<compile_context>
chip_gen: v5e
topology: v5e:2x2
jax: 0.10.0
libtpu: 0.0.40
codegen_flags: <defaults>
</compile_context>

<pallas_src>
import functools

import jax
import jax.numpy as jnp
from jax.experimental import pallas as pl
from jax.experimental.pallas import tpu as pltpu


# ----------------------------- Pallas kernels --------------------------------

def _make_conv_kernel(has_affine, act):
    """out = act((W^T @ X^T) * scale + shift); W^T (N,K) bf16, X^T (K,R) bf16."""
    def kernel(*refs):
        if has_affine:
            w_ref, x_ref, s_ref, sh_ref, o_ref = refs
        else:
            w_ref, x_ref, o_ref = refs
        y = jnp.dot(w_ref[...], x_ref[...], preferred_element_type=jnp.float32)
        if has_affine:
            y = y * s_ref[...] + sh_ref[...]          # folded BN / bias (per-channel)
        if act == "relu":
            y = jnp.maximum(y, 0.0)
        elif act == "tanh":
            y = jnp.tanh(y)
        o_ref[...] = y.astype(o_ref.dtype)
    return kernel


def _make_resblock_kernel(has_post):
    """Whole ResBlock in one body (two MXU matmuls, no HBM round-trip of `t`)."""
    def kernel(p_ref, w3_ref, s3_ref, sh3_ref, w1_ref, b1_ref, x_ref, *rest):
        if has_post:
            ps_ref, psh_ref, o_ref = rest
        else:
            (o_ref,) = rest
        # relu(im2col(x)) == im2col(relu(x)) (zero padding is relu-invariant)
        p = jnp.maximum(p_ref[...], 0.0).astype(jnp.bfloat16)
        t = jnp.dot(w3_ref[...], p, preferred_element_type=jnp.float32)
        t = jnp.maximum(t * s3_ref[...] + sh3_ref[...], 0.0)     # BN(+bias) fold + ReLU
        y = jnp.dot(w1_ref[...], t.astype(jnp.bfloat16),
                    preferred_element_type=jnp.float32)
        y = y + b1_ref[...] + x_ref[...].astype(jnp.float32)     # 1x1 bias + residual
        if has_post:
            y = y * ps_ref[...] + psh_ref[...]                   # trailing standalone BN
        o_ref[...] = y.astype(o_ref.dtype)
    return kernel


def _fc_kernel(x_ref, w_ref, b_ref, o_ref):
    y = jnp.dot(x_ref[...], w_ref[...], preferred_element_type=jnp.float32)
    o_ref[...] = (y + b_ref[...]).astype(o_ref.dtype)


_VMEM_LIMIT = 32 * 1024 * 1024


def _lane_tile(rows):
    """Row (lane-axis) tile: stay lane-dense (>=128) and split the work >=2 ways when
    there are enough rows so both v7x TensorCores get a block (no-op on v5e/v6e)."""
    if rows <= 256:
        return rows
    half = -(-rows // 2)
    half = -(-half // 128) * 128
    return int(max(256, min(512, half)))


def conv_gemm_t(wT, patches, scale=None, shift=None, *, act="none",
                out_dtype=jnp.bfloat16):
    """out (N,R) = act((wT (N,K) @ patches (K,R)) * scale + shift), lane-dense store."""
    N, K = wT.shape
    R = patches.shape[1]
    tn = _lane_tile(R)
    grid = (pl.cdiv(R, tn),)
    has_affine = scale is not None
    kernel = _make_conv_kernel(has_affine, act)

    resident = lambda shp: pl.BlockSpec(shp, lambda i: (0, 0))   # VMEM-resident operand
    col = lambda rows_dim: pl.BlockSpec((rows_dim, tn), lambda i: (0, i))

    in_specs = [resident((N, K)), col(K)]
    args = [wT, patches]
    if has_affine:
        in_specs += [resident((N, 1)), resident((N, 1))]
        args += [scale, shift]

    return pl.pallas_call(
        kernel,
        out_shape=jax.ShapeDtypeStruct((N, R), out_dtype),
        grid=grid,
        in_specs=in_specs,
        out_specs=col(N),
        compiler_params=pltpu.CompilerParams(
            dimension_semantics=("parallel",),
            vmem_limit_bytes=_VMEM_LIMIT),
    )(*args)


def fc_gemm(x, w, b):
    """y (Bp, N) = x (Bp, K) @ w (K, N) + b; N=2048 is already lane-dense."""
    Bp, K = x.shape
    N = w.shape[1]
    full = lambda shp: pl.BlockSpec(shp, lambda i: (0, 0))
    return pl.pallas_call(
        _fc_kernel,
        out_shape=jax.ShapeDtypeStruct((Bp, N), jnp.float32),
        grid=(1,),
        in_specs=[full((Bp, K)), full((K, N)), full((1, N))],
        out_specs=full((Bp, N)),
        compiler_params=pltpu.CompilerParams(
            dimension_semantics=("arbitrary",),
            vmem_limit_bytes=_VMEM_LIMIT),
    )(x, w, b)


# -------------------------- wrapper layout helpers ---------------------------

def _im2col_t(x_cbhw, k, stride, pad):
    """(C,B,H,W) -> transposed patch matrix (k*k*C, B*Ho*Wo). Pure layout plumbing."""
    C, B, H, W = x_cbhw.shape
    x = jnp.pad(x_cbhw, ((0, 0), (0, 0), (pad, pad), (pad, pad)))
    Ho = (H + 2 * pad - k) // stride + 1
    Wo = (W + 2 * pad - k) // stride + 1
    cols = []
    for dy in range(k):
        for dx in range(k):
            sl = jax.lax.slice(
                x, (0, 0, dy, dx),
                (C, B, dy + (Ho - 1) * stride + 1, dx + (Wo - 1) * stride + 1),
                (1, 1, stride, stride))                      # (C, B, Ho, Wo)
            cols.append(sl)
    p = jnp.stack(cols, axis=0)                              # (k*k, C, B, Ho, Wo)
    return p.reshape(k * k * C, B * Ho * Wo), (Ho, Wo)


def _bn_fold_col(bn, conv_bias=None, eps=1e-5):
    """Fold BN (inference) + optional preceding conv bias into per-channel scale/shift,
    as (C,1) columns for the transposed (channel-major) GEMM layout."""
    s = bn["g"] / jnp.sqrt(bn["v"] + eps)
    sh = bn["b"] - bn["m"] * s
    if conv_bias is not None:
        sh = sh + conv_bias * s
    return s.reshape(-1, 1).astype(jnp.float32), sh.reshape(-1, 1).astype(jnp.float32)


def resblock_t(x_cbhw, rp, post_bn=None):
    """x + Conv1x1(ReLU(BN(Conv3x3(ReLU(x))))), optional trailing BN, one pallas_call."""
    C, B, H, W = x_cbhw.shape
    R = B * H * W
    patches, _ = _im2col_t(x_cbhw, 3, 1, 1)                  # (9C, R) bf16
    x_flat = x_cbhw.reshape(C, R)
    s3, sh3 = _bn_fold_col(rp["bn"], conv_bias=rp["b3"])
    has_post = post_bn is not None
    kernel = _make_resblock_kernel(has_post)

    tn = _lane_tile(R)
    grid = (pl.cdiv(R, tn),)
    resident = lambda shp: pl.BlockSpec(shp, lambda i: (0, 0))
    col = lambda rows_dim: pl.BlockSpec((rows_dim, tn), lambda i: (0, i))

    in_specs = [col(9 * C), resident((C, 9 * C)), resident((C, 1)), resident((C, 1)),
                resident((C, C)), resident((C, 1)), col(C)]
    args = [patches, rp["w3T"], s3, sh3, rp["w1T"], rp["b1"].reshape(C, 1), x_flat]
    if has_post:
        ps, psh = _bn_fold_col(post_bn)
        in_specs += [resident((C, 1)), resident((C, 1))]
        args += [ps, psh]

    return pl.pallas_call(
        kernel,
        out_shape=jax.ShapeDtypeStruct((C, R), jnp.bfloat16),
        grid=grid,
        in_specs=in_specs,
        out_specs=col(C),
        compiler_params=pltpu.CompilerParams(
            dimension_semantics=("parallel",),
            vmem_limit_bytes=_VMEM_LIMIT),
    )(*args)


def conv_transpose_phase(x_cbhw, wT_ph, scale, shift, *, cout, act,
                         out_dtype=jnp.bfloat16):
    """ConvTranspose2d(k=4,s=2,p=1) via 4-phase sub-pixel decomposition:
    one k=3 im2col on the undilated input, one matmul against the phase-packed
    (4*Cout, 9*Cin) weight, then interleave the 2x2 output phases (layout only)."""
    C, B, H, W = x_cbhw.shape
    patches, _ = _im2col_t(x_cbhw, 3, 1, 1)                  # (9C, B*H*W)
    y = conv_gemm_t(wT_ph, patches, scale, shift, act=act, out_dtype=out_dtype)
    y = y.reshape(2, 2, cout, B, H, W)                       # (a, c, co, b, h, w)
    y = jnp.transpose(y, (2, 3, 4, 0, 5, 1))                 # (co, b, h, a, w, c)
    return y.reshape(cout, B, 2 * H, 2 * W)


# ------------------------------- parameters ----------------------------------

def _conv_wT(key, cout, cin, k):
    """Conv2d weight -> transposed matmul matrix (cout, k*k*cin), col = (ky,kx,ci)."""
    bound = float(cin * k * k) ** -0.5
    w = jax.random.uniform(key, (cout, cin, k, k), jnp.float32, -bound, bound)
    return jnp.transpose(w, (0, 2, 3, 1)).reshape(cout, k * k * cin)


def _convT_phase_wT(key, cin, cout, k=4):
    """ConvTranspose2d(k=4,s=2,p=1) weight -> phase-packed (4*cout, 9*cin) matrix.
    Output phase (a,c) at low-res position (m,n) reads padded input window
    xp[m+a+di, n+c+dj] with kernel tap (ky,kx) = (3-a-2*di, 3-c-2*dj)."""
    bound = float(cout * k * k) ** -0.5
    w = jax.random.uniform(key, (cin, cout, k, k), jnp.float32, -bound, bound)
    wt = jnp.zeros((4, cout, 3, 3, cin), jnp.float32)
    for a in range(2):
        for c in range(2):
            ph = a * 2 + c
            for di in range(2):
                for dj in range(2):
                    ry, rx = a + di, c + dj
                    ky, kx = 3 - a - 2 * di, 3 - c - 2 * dj
                    wt = wt.at[ph, :, ry, rx, :].set(jnp.transpose(w[:, :, ky, kx]))
    return wt.reshape(4 * cout, 9 * cin)


def _bn(c):
    return dict(g=jnp.ones((c,), jnp.float32), b=jnp.zeros((c,), jnp.float32),
                m=jnp.zeros((c,), jnp.float32), v=jnp.ones((c,), jnp.float32))


def _resblock_params(keys, c):
    k3, kb3, k1, kb1 = keys
    b3 = float(c * 9) ** -0.5
    b1 = float(c) ** -0.5
    return dict(
        w3T=_conv_wT(k3, c, c, 3).astype(jnp.bfloat16),
        b3=jax.random.uniform(kb3, (c,), jnp.float32, -b3, b3),
        bn=_bn(c),
        w1T=_conv_wT(k1, c, c, 1).astype(jnp.bfloat16),
        b1=jax.random.uniform(kb1, (c,), jnp.float32, -b1, b1),
    )


def init_params(key, d=16, f=8):
    keys = iter(jax.random.split(key, 32))
    nxt = lambda: next(keys)
    n = d * f * f
    bound = float(n) ** -0.5
    p = {}
    p["w_e1T"], p["bn_e1"] = _conv_wT(nxt(), d // 2, 3, 4).astype(jnp.bfloat16), _bn(d // 2)
    p["w_e2T"], p["bn_e2"] = _conv_wT(nxt(), d, d // 2, 4).astype(jnp.bfloat16), _bn(d)
    p["rb_e3"] = _resblock_params([nxt() for _ in range(4)], d)
    p["bn_e4"] = _bn(d)
    p["rb_e5"] = _resblock_params([nxt() for _ in range(4)], d)
    # fc11 / fc12 pre-concatenated once at init (no per-forward 8 MiB concat)
    w11 = jax.random.uniform(nxt(), (n, n), jnp.float32, -bound, bound)
    w12 = jax.random.uniform(nxt(), (n, n), jnp.float32, -bound, bound)
    p["w_fc"] = jnp.concatenate([w11, w12], axis=1).astype(jnp.bfloat16)      # (n, 2n)
    b11 = jax.random.uniform(nxt(), (n,), jnp.float32, -bound, bound)
    b12 = jax.random.uniform(nxt(), (n,), jnp.float32, -bound, bound)
    p["b_fc"] = jnp.concatenate([b11, b12]).reshape(1, 2 * n)
    p["rb_d1"] = _resblock_params([nxt() for _ in range(4)], d)
    p["bn_d2"] = _bn(d)
    p["rb_d3"] = _resblock_params([nxt() for _ in range(4)], d)
    p["bn_d4"] = _bn(d)
    p["wt_d5T"], p["bn_d6"] = _convT_phase_wT(nxt(), d, d // 2, 4).astype(jnp.bfloat16), _bn(d // 2)
    p["wt_d7T"] = _convT_phase_wT(nxt(), d // 2, 3, 4).astype(jnp.bfloat16)
    return p


# --------------------------------- forward -----------------------------------

def cvae_forward(x_nchw, p, d=16, f=8):
    B = x_nchw.shape[0]
    n = d * f * f

    # NCHW -> channel-major CBHW; activations flow channel-major so conv outputs
    # store lane-dense and the NCHW flatten / final output are plain reshapes.
    x = jnp.transpose(x_nchw.astype(jnp.bfloat16), (1, 0, 2, 3))      # (3, B, 32, 32)

    # ---- encoder: Conv+BN+ReLU, Conv+BN+ReLU, ResBlock(+BN), ResBlock
    patches, (Ho, Wo) = _im2col_t(x, 4, 2, 1)                          # (48, B*256)
    s, sh = _bn_fold_col(p["bn_e1"])
    h = conv_gemm_t(p["w_e1T"], patches, s, sh, act="relu").reshape(d // 2, B, Ho, Wo)

    patches, (Ho, Wo) = _im2col_t(h, 4, 2, 1)                          # (128, B*64)
    s, sh = _bn_fold_col(p["bn_e2"])
    h = conv_gemm_t(p["w_e2T"], patches, s, sh, act="relu").reshape(d, B, Ho, Wo)

    h = resblock_t(h, p["rb_e3"], post_bn=p["bn_e4"]).reshape(d, B, Ho, Wo)
    h = resblock_t(h, p["rb_e5"], post_bn=None)                        # (d, B*f*f)

    # flatten exactly like h1.view(-1, d*f*f) on NCHW
    h1 = jnp.transpose(h.reshape(d, B, f * f), (1, 0, 2)).reshape(B, n)

    # ---- fc11 / fc12 in one lane-dense GEMM; rows padded to a full sublane (8)
    Bp = max(8, -(-B // 8) * 8)
    h1p = jnp.zeros((Bp, n), jnp.bfloat16).at[:B].set(h1.astype(jnp.bfloat16))
    mulv = fc_gemm(h1p, p["w_fc"], p["b_fc"])                          # (Bp, 2n) f32
    mu, logvar = mulv[:B, :n], mulv[:B, n:]

    z = mu  # TODO(synk): eval-mode reparameterize only

    # ---- decoder: ResBlock(+BN), ResBlock(+BN), ConvT+BN+ReLU, ConvT, tanh
    hd = jnp.transpose(z.reshape(B, d, f, f), (1, 0, 2, 3)).astype(jnp.bfloat16)
    hd = resblock_t(hd, p["rb_d1"], post_bn=p["bn_d2"]).reshape(d, B, f, f)
    hd = resblock_t(hd, p["rb_d3"], post_bn=p["bn_d4"]).reshape(d, B, f, f)

    s, sh = _bn_fold_col(p["bn_d6"])
    hd = conv_transpose_phase(hd, p["wt_d5T"], jnp.tile(s, (4, 1)), jnp.tile(sh, (4, 1)),
                              cout=d // 2, act="relu")                 # (d/2, B, 16, 16)
    out = conv_transpose_phase(hd, p["wt_d7T"], None, None,
                               cout=3, act="tanh", out_dtype=jnp.float32)  # (3, B, 32, 32)

    recon = jnp.transpose(out, (1, 0, 2, 3))                           # NCHW (B, 3, 32, 32)
    return recon, mu, logvar


# ----------------------------------- main -------------------------------------

if __name__ == "__main__":
    key = jax.random.PRNGKey(0)
    k_x, k_p = jax.random.split(key)

    d, f = 16, 8                                  # f=8 is fixed by the module -> 32x32 input
    params = init_params(k_p, d=d, f=f)
    x = jax.random.uniform(k_x, (2, 3, 32, 32), jnp.float32)

    fwd = jax.jit(functools.partial(cvae_forward, p=params, d=d, f=f))
    recon, mu, logvar = fwd(x)
    jax.block_until_ready((recon, mu, logvar))

    assert recon.shape == (2, 3, 32, 32)
    assert mu.shape == (2, d * f * f)
    assert logvar.shape == (2, d * f * f)
    assert bool(jnp.all(jnp.isfinite(recon)))
    assert bool(jnp.all(jnp.isfinite(mu))) and bool(jnp.all(jnp.isfinite(logvar)))
    assert bool(jnp.all(jnp.abs(recon) <= 1.0))   # tanh output range
    print("KERNEL_OK")
</pallas_src>

<mosaic_0001>
module attributes {stable_mosaic.version = 11 : i64} {
  func.func @kernel(%arg0: i32, %arg1: memref<8x48xbf16, #tpu.memory_space<vmem>>, %arg2: memref<48x256xbf16, #tpu.memory_space<vmem>>, %arg3: memref<8x1xf32, #tpu.memory_space<vmem>>, %arg4: memref<8x1xf32, #tpu.memory_space<vmem>>, %arg5: memref<8x256xbf16, #tpu.memory_space<vmem>>) attributes {dimension_semantics = [#tpu.dimension_semantics<parallel>], iteration_bounds = array<i64: 2>, scalar_prefetch = 0 : i64, scratch_operands = 0 : i64, tpu.core_type = #tpu.core_type<tc>, window_params = [{pipeline_mode = #tpu.pipeline_mode<synchronous>, transform_indices = @transform_0, window_bounds = array<i64: 8, 48>}, {transform_indices = @transform_1, window_bounds = array<i64: 48, 256>}, {pipeline_mode = #tpu.pipeline_mode<synchronous>, transform_indices = @transform_2, window_bounds = array<i64: 8, 1>}, {pipeline_mode = #tpu.pipeline_mode<synchronous>, transform_indices = @transform_3, window_bounds = array<i64: 8, 1>}, {transform_indices = @transform_4, window_bounds = array<i64: 8, 256>}]} {
    %c0 = arith.constant 0 : index
    %c0_0 = arith.constant 0 : index
    %0 = vector.load %arg1[%c0, %c0_0] : memref<8x48xbf16, #tpu.memory_space<vmem>>, vector<8x48xbf16>
    %c0_1 = arith.constant 0 : index
    %c0_2 = arith.constant 0 : index
    %1 = vector.load %arg2[%c0_1, %c0_2] : memref<48x256xbf16, #tpu.memory_space<vmem>>, vector<48x256xbf16>
    %cst = arith.constant dense<0.000000e+00> : vector<8x256xf32>
    %2 = tpu.matmul %0, %1, %cst {dimension_numbers = #tpu.dot_dimension_numbers<[1], [0], [0], [1], [0, 0, 1, 1], [], []>} : vector<8x48xbf16>, vector<48x256xbf16>, vector<8x256xf32> -> vector<8x256xf32>
    %c0_3 = arith.constant 0 : index
    %c0_4 = arith.constant 0 : index
    %3 = vector.load %arg3[%c0_3, %c0_4] : memref<8x1xf32, #tpu.memory_space<vmem>>, vector<8x1xf32>
    %4 = vector.broadcast %3 : vector<8x1xf32> to vector<8x256xf32>
    %5 = arith.mulf %2, %4 : vector<8x256xf32>
    %c0_5 = arith.constant 0 : index
    %c0_6 = arith.constant 0 : index
    %6 = vector.load %arg4[%c0_5, %c0_6] : memref<8x1xf32, #tpu.memory_space<vmem>>, vector<8x1xf32>
    %7 = vector.broadcast %6 : vector<8x1xf32> to vector<8x256xf32>
    %8 = arith.addf %5, %7 : vector<8x256xf32>
    %cst_7 = arith.constant 0.000000e+00 : f32
    %9 = vector.broadcast %cst_7 : f32 to vector<8x256xf32>
    %10 = arith.maximumf %8, %9 : vector<8x256xf32>
    %11 = arith.truncf %10 : vector<8x256xf32> to vector<8x256xbf16>
    %c0_8 = arith.constant 0 : index
    %c0_9 = arith.constant 0 : index
    %12 = vector.load %arg5[%c0_8, %c0_9] : memref<8x256xbf16, #tpu.memory_space<vmem>>, vector<8x256xbf16>
    tpu.vector_store %arg5[%c0_8, %c0_9], %11 {strides = array<i32>} : memref<8x256xbf16, #tpu.memory_space<vmem>>, vector<8x256xbf16>,
    return
  }
  func.func @transform_0(%arg0: i32) -> (i32, i32) {
    %c0_i32 = arith.constant 0 : i32
    %c0_i32_0 = arith.constant 0 : i32
    %c0_i32_1 = arith.constant 0 : i32
    return %c0_i32, %c0_i32_0 : i32, i32
  }
  func.func @transform_1(%arg0: i32) -> (i32, i32) {
    %c0_i32 = arith.constant 0 : i32
    %c0_i32_0 = arith.constant 0 : i32
    return %c0_i32, %arg0 : i32, i32
  }
  func.func @transform_2(%arg0: i32) -> (i32, i32) {
    %c0_i32 = arith.constant 0 : i32
    %c0_i32_0 = arith.constant 0 : i32
    %c0_i32_1 = arith.constant 0 : i32
    return %c0_i32, %c0_i32_0 : i32, i32
  }
  func.func @transform_3(%arg0: i32) -> (i32, i32) {
    %c0_i32 = arith.constant 0 : i32
    %c0_i32_0 = arith.constant 0 : i32
    %c0_i32_1 = arith.constant 0 : i32
    return %c0_i32, %c0_i32_0 : i32, i32
  }
  func.func @transform_4(%arg0: i32) -> (i32, i32) {
    %c0_i32 = arith.constant 0 : i32
    %c0_i32_0 = arith.constant 0 : i32
    return %c0_i32, %arg0 : i32, i32
  }
}

module attributes {stable_mosaic.version = 11 : i64} {
  func.func @kernel(%arg0: i32, %arg1: memref<16x128xbf16, #tpu.memory_space<vmem>>, %arg2: memref<128x128xbf16, #tpu.memory_space<vmem>>, %arg3: memref<16x1xf32, #tpu.memory_space<vmem>>, %arg4: memref<16x1xf32, #tpu.memory_space<vmem>>, %arg5: memref<16x128xbf16, #tpu.memory_space<vmem>>) attributes {dimension_semantics = [#tpu.dimension_semantics<parallel>], iteration_bounds = array<i64: 1>, scalar_prefetch = 0 : i64, scratch_operands = 0 : i64, tpu.core_type = #tpu.core_type<tc>, window_params = [{pipeline_mode = #tpu.pipeline_mode<synchronous>, transform_indices = @transform_0, window_bounds = array<i64: 16, 128>}, {transform_indices = @transform_1, window_bounds = array<i64: 128, 128>}, {pipeline_mode = #tpu.pipeline_mode<synchronous>, transform_indices = @transform_2, window_bounds = array<i64: 16, 1>}, {pipeline_mode = #tpu.pipeline_mode<synchronous>, transform_indices = @transform_3, window_bounds = array<i64: 16, 1>}, {transform_indices = @transform_4, window_bounds = array<i64: 16, 128>}]} {
    %c0 = arith.constant 0 : index
    %c0_0 = arith.constant 0 : index
    %0 = vector.load %arg1[%c0, %c0_0] : memref<16x128xbf16, #tpu.memory_space<vmem>>, vector<16x128xbf16>
    %c0_1 = arith.constant 0 : index
    %c0_2 = arith.constant 0 : index
    %1 = vector.load %arg2[%c0_1, %c0_2] : memref<128x128xbf16, #tpu.memory_space<vmem>>, vector<128x128xbf16>
    %cst = arith.constant dense<0.000000e+00> : vector<16x128xf32>
    %2 = tpu.matmul %0, %1, %cst {dimension_numbers = #tpu.dot_dimension_numbers<[1], [0], [0], [1], [0, 0, 1, 1], [], []>} : vector<16x128xbf16>, vector<128x128xbf16>, vector<16x128xf32> -> vector<16x128xf32>
    %c0_3 = arith.constant 0 : index
    %c0_4 = arith.constant 0 : index
    %3 = vector.load %arg3[%c0_3, %c0_4] : memref<16x1xf32, #tpu.memory_space<vmem>>, vector<16x1xf32>
    %4 = vector.broadcast %3 : vector<16x1xf32> to vector<16x128xf32>
    %5 = arith.mulf %2, %4 : vector<16x128xf32>
    %c0_5 = arith.constant 0 : index
    %c0_6 = arith.constant 0 : index
    %6 = vector.load %arg4[%c0_5, %c0_6] : memref<16x1xf32, #tpu.memory_space<vmem>>, vector<16x1xf32>
    %7 = vector.broadcast %6 : vector<16x1xf32> to vector<16x128xf32>
    %8 = arith.addf %5, %7 : vector<16x128xf32>
    %cst_7 = arith.constant 0.000000e+00 : f32
    %9 = vector.broadcast %cst_7 : f32 to vector<16x128xf32>
    %10 = arith.maximumf %8, %9 : vector<16x128xf32>
    %11 = arith.truncf %10 : vector<16x128xf32> to vector<16x128xbf16>
    %c0_8 = arith.constant 0 : index
    %c0_9 = arith.constant 0 : index
    %12 = vector.load %arg5[%c0_8, %c0_9] : memref<16x128xbf16, #tpu.memory_space<vmem>>, vector<16x128xbf16>
    tpu.vector_store %arg5[%c0_8, %c0_9], %11 {strides = array<i32>} : memref<16x128xbf16, #tpu.memory_space<vmem>>, vector<16x128xbf16>,
    return
  }
  func.func @transform_0(%arg0: i32) -> (i32, i32) {
    %c0_i32 = arith.constant 0 : i32
    %c0_i32_0 = arith.constant 0 : i32
    %c0_i32_1 = arith.constant 0 : i32
    return %c0_i32, %c0_i32_0 : i32, i32
  }
  func.func @transform_1(%arg0: i32) -> (i32, i32) {
    %c0_i32 = arith.constant 0 : i32
    %c0_i32_0 = arith.constant 0 : i32
    return %c0_i32, %arg0 : i32, i32
  }
  func.func @transform_2(%arg0: i32) -> (i32, i32) {
    %c0_i32 = arith.constant 0 : i32
    %c0_i32_0 = arith.constant 0 : i32
    %c0_i32_1 = arith.constant 0 : i32
    return %c0_i32, %c0_i32_0 : i32, i32
  }
  func.func @transform_3(%arg0: i32) -> (i32, i32) {
    %c0_i32 = arith.constant 0 : i32
    %c0_i32_0 = arith.constant 0 : i32
    %c0_i32_1 = arith.constant 0 : i32
    return %c0_i32, %c0_i32_0 : i32, i32
  }
  func.func @transform_4(%arg0: i32) -> (i32, i32) {
    %c0_i32 = arith.constant 0 : i32
    %c0_i32_0 = arith.constant 0 : i32
    return %c0_i32, %arg0 : i32, i32
  }
}

module attributes {stable_mosaic.version = 11 : i64} {
  func.func @kernel(%arg0: i32, %arg1: memref<144x128xbf16, #tpu.memory_space<vmem>>, %arg2: memref<16x144xbf16, #tpu.memory_space<vmem>>, %arg3: memref<16x1xf32, #tpu.memory_space<vmem>>, %arg4: memref<16x1xf32, #tpu.memory_space<vmem>>, %arg5: memref<16x16xbf16, #tpu.memory_space<vmem>>, %arg6: memref<16x1xf32, #tpu.memory_space<vmem>>, %arg7: memref<16x128xbf16, #tpu.memory_space<vmem>>, %arg8: memref<16x1xf32, #tpu.memory_space<vmem>>, %arg9: memref<16x1xf32, #tpu.memory_space<vmem>>, %arg10: memref<16x128xbf16, #tpu.memory_space<vmem>>) attributes {dimension_semantics = [#tpu.dimension_semantics<parallel>], iteration_bounds = array<i64: 1>, scalar_prefetch = 0 : i64, scratch_operands = 0 : i64, tpu.core_type = #tpu.core_type<tc>, window_params = [{transform_indices = @transform_0, window_bounds = array<i64: 144, 128>}, {pipeline_mode = #tpu.pipeline_mode<synchronous>, transform_indices = @transform_1, window_bounds = array<i64: 16, 144>}, {pipeline_mode = #tpu.pipeline_mode<synchronous>, transform_indices = @transform_2, window_bounds = array<i64: 16, 1>}, {pipeline_mode = #tpu.pipeline_mode<synchronous>, transform_indices = @transform_3, window_bounds = array<i64: 16, 1>}, {pipeline_mode = #tpu.pipeline_mode<synchronous>, transform_indices = @transform_4, window_bounds = array<i64: 16, 16>}, {pipeline_mode = #tpu.pipeline_mode<synchronous>, transform_indices = @transform_5, window_bounds = array<i64: 16, 1>}, {transform_indices = @transform_6, window_bounds = array<i64: 16, 128>}, {pipeline_mode = #tpu.pipeline_mode<synchronous>, transform_indices = @transform_7, window_bounds = array<i64: 16, 1>}, {pipeline_mode = #tpu.pipeline_mode<synchronous>, transform_indices = @transform_8, window_bounds = array<i64: 16, 1>}, {transform_indices = @transform_9, window_bounds = array<i64: 16, 128>}]} {
    %c0 = arith.constant 0 : index
    %c0_0 = arith.constant 0 : index
    %0 = vector.load %arg1[%c0, %c0_0] : memref<144x128xbf16, #tpu.memory_space<vmem>>, vector<144x128xbf16>
    %cst = arith.constant 0.000000e+00 : bf16
    %1 = vector.broadcast %cst : bf16 to vector<144x128xbf16>
    %2 = arith.maximumf %0, %1 : vector<144x128xbf16>
    %c0_1 = arith.constant 0 : index
    %c0_2 = arith.constant 0 : index
    %3 = vector.load %arg2[%c0_1, %c0_2] : memref<16x144xbf16, #tpu.memory_space<vmem>>, vector<16x144xbf16>
    %cst_3 = arith.constant dense<0.000000e+00> : vector<16x128xf32>
    %4 = tpu.matmul %3, %2, %cst_3 {dimension_numbers = #tpu.dot_dimension_numbers<[1], [0], [0], [1], [0, 0, 1, 1], [], []>} : vector<16x144xbf16>, vector<144x128xbf16>, vector<16x128xf32> -> vector<16x128xf32>
    %c0_4 = arith.constant 0 : index
    %c0_5 = arith.constant 0 : index
    %5 = vector.load %arg3[%c0_4, %c0_5] : memref<16x1xf32, #tpu.memory_space<vmem>>, vector<16x1xf32>
    %6 = vector.broadcast %5 : vector<16x1xf32> to vector<16x128xf32>
    %7 = arith.mulf %4, %6 : vector<16x128xf32>
    %c0_6 = arith.constant 0 : index
    %c0_7 = arith.constant 0 : index
    %8 = vector.load %arg4[%c0_6, %c0_7] : memref<16x1xf32, #tpu.memory_space<vmem>>, vector<16x1xf32>
    %9 = vector.broadcast %8 : vector<16x1xf32> to vector<16x128xf32>
    %10 = arith.addf %7, %9 : vector<16x128xf32>
    %cst_8 = arith.constant 0.000000e+00 : f32
    %11 = vector.broadcast %cst_8 : f32 to vector<16x128xf32>
    %12 = arith.maximumf %10, %11 : vector<16x128xf32>
    %c0_9 = arith.constant 0 : index
    %c0_10 = arith.constant 0 : index
    %13 = vector.load %arg5[%c0_9, %c0_10] : memref<16x16xbf16, #tpu.memory_space<vmem>>, vector<16x16xbf16>
    %14 = arith.truncf %12 : vector<16x128xf32> to vector<16x128xbf16>
    %cst_11 = arith.constant dense<0.000000e+00> : vector<16x128xf32>
    %15 = tpu.matmul %13, %14, %cst_11 {dimension_numbers = #tpu.dot_dimension_numbers<[1], [0], [0], [1], [0, 0, 1, 1], [], []>} : vector<16x16xbf16>, vector<16x128xbf16>, vector<16x128xf32> -> vector<16x128xf32>
    %c0_12 = arith.constant 0 : index
    %c0_13 = arith.constant 0 : index
    %16 = vector.load %arg6[%c0_12, %c0_13] : memref<16x1xf32, #tpu.memory_space<vmem>>, vector<16x1xf32>
    %17 = vector.broadcast %16 : vector<16x1xf32> to vector<16x128xf32>
    %18 = arith.addf %15, %17 : vector<16x128xf32>
    %c0_14 = arith.constant 0 : index
    %c0_15 = arith.constant 0 : index
    %19 = vector.load %arg7[%c0_14, %c0_15] : memref<16x128xbf16, #tpu.memory_space<vmem>>, vector<16x128xbf16>
    %20 = arith.extf %19 : vector<16x128xbf16> to vector<16x128xf32>
    %21 = arith.addf %18, %20 : vector<16x128xf32>
    %c0_16 = arith.constant 0 : index
    %c0_17 = arith.constant 0 : index
    %22 = vector.load %arg8[%c0_16, %c0_17] : memref<16x1xf32, #tpu.memory_space<vmem>>, vector<16x1xf32>
    %23 = vector.broadcast %22 : vector<16x1xf32> to vector<16x128xf32>
    %24 = arith.mulf %21, %23 : vector<16x128xf32>
    %c0_18 = arith.constant 0 : index
    %c0_19 = arith.constant 0 : index
    %25 = vector.load %arg9[%c0_18, %c0_19] : memref<16x1xf32, #tpu.memory_space<vmem>>, vector<16x1xf32>
    %26 = vector.broadcast %25 : vector<16x1xf32> to vector<16x128xf32>
    %27 = arith.addf %24, %26 : vector<16x128xf32>
    %28 = arith.truncf %27 : vector<16x128xf32> to vector<16x128xbf16>
    %c0_20 = arith.constant 0 : index
    %c0_21 = arith.constant 0 : index
    %29 = vector.load %arg10[%c0_20, %c0_21] : memref<16x128xbf16, #tpu.memory_space<vmem>>, vector<16x128xbf16>
    tpu.vector_store %arg10[%c0_20, %c0_21], %28 {strides = array<i32>} : memref<16x128xbf16, #tpu.memory_space<vmem>>, vector<16x128xbf16>,
    return
  }
  func.func @transform_0(%arg0: i32) -> (i32, i32) {
    %c0_i32 = arith.constant 0 : i32
    %c0_i32_0 = arith.constant 0 : i32
    return %c0_i32, %arg0 : i32, i32
  }
  func.func @transform_1(%arg0: i32) -> (i32, i32) {
    %c0_i32 = arith.constant 0 : i32
    %c0_i32_0 = arith.constant 0 : i32
    %c0_i32_1 = arith.constant 0 : i32
    return %c0_i32, %c0_i32_0 : i32, i32
  }
  func.func @transform_2(%arg0: i32) -> (i32, i32) {
    %c0_i32 = arith.constant 0 : i32
    %c0_i32_0 = arith.constant 0 : i32
    %c0_i32_1 = arith.constant 0 : i32
    return %c0_i32, %c0_i32_0 : i32, i32
  }
  func.func @transform_3(%arg0: i32) -> (i32, i32) {
    %c0_i32 = arith.constant 0 : i32
    %c0_i32_0 = arith.constant 0 : i32
    %c0_i32_1 = arith.constant 0 : i32
    return %c0_i32, %c0_i32_0 : i32, i32
  }
  func.func @transform_4(%arg0: i32) -> (i32, i32) {
    %c0_i32 = arith.constant 0 : i32
    %c0_i32_0 = arith.constant 0 : i32
    %c0_i32_1 = arith.constant 0 : i32
    return %c0_i32, %c0_i32_0 : i32, i32
  }
  func.func @transform_5(%arg0: i32) -> (i32, i32) {
    %c0_i32 = arith.constant 0 : i32
    %c0_i32_0 = arith.constant 0 : i32
    %c0_i32_1 = arith.constant 0 : i32
    return %c0_i32, %c0_i32_0 : i32, i32
  }
  func.func @transform_6(%arg0: i32) -> (i32, i32) {
    %c0_i32 = arith.constant 0 : i32
    %c0_i32_0 = arith.constant 0 : i32
    return %c0_i32, %arg0 : i32, i32
  }
  func.func @transform_7(%arg0: i32) -> (i32, i32) {
    %c0_i32 = arith.constant 0 : i32
    %c0_i32_0 = arith.constant 0 : i32
    %c0_i32_1 = arith.constant 0 : i32
    return %c0_i32, %c0_i32_0 : i32, i32
  }
  func.func @transform_8(%arg0: i32) -> (i32, i32) {
    %c0_i32 = arith.constant 0 : i32
    %c0_i32_0 = arith.constant 0 : i32
    %c0_i32_1 = arith.constant 0 : i32
    return %c0_i32, %c0_i32_0 : i32, i32
  }
  func.func @transform_9(%arg0: i32) -> (i32, i32) {
    %c0_i32 = arith.constant 0 : i32
    %c0_i32_0 = arith.constant 0 : i32
    return %c0_i32, %arg0 : i32, i32
  }
}

module attributes {stable_mosaic.version = 11 : i64} {
  func.func @kernel(%arg0: i32, %arg1: memref<144x128xbf16, #tpu.memory_space<vmem>>, %arg2: memref<16x144xbf16, #tpu.memory_space<vmem>>, %arg3: memref<16x1xf32, #tpu.memory_space<vmem>>, %arg4: memref<16x1xf32, #tpu.memory_space<vmem>>, %arg5: memref<16x16xbf16, #tpu.memory_space<vmem>>, %arg6: memref<16x1xf32, #tpu.memory_space<vmem>>, %arg7: memref<16x128xbf16, #tpu.memory_space<vmem>>, %arg8: memref<16x128xbf16, #tpu.memory_space<vmem>>) attributes {dimension_semantics = [#tpu.dimension_semantics<parallel>], iteration_bounds = array<i64: 1>, scalar_prefetch = 0 : i64, scratch_operands = 0 : i64, tpu.core_type = #tpu.core_type<tc>, window_params = [{transform_indices = @transform_0, window_bounds = array<i64: 144, 128>}, {pipeline_mode = #tpu.pipeline_mode<synchronous>, transform_indices = @transform_1, window_bounds = array<i64: 16, 144>}, {pipeline_mode = #tpu.pipeline_mode<synchronous>, transform_indices = @transform_2, window_bounds = array<i64: 16, 1>}, {pipeline_mode = #tpu.pipeline_mode<synchronous>, transform_indices = @transform_3, window_bounds = array<i64: 16, 1>}, {pipeline_mode = #tpu.pipeline_mode<synchronous>, transform_indices = @transform_4, window_bounds = array<i64: 16, 16>}, {pipeline_mode = #tpu.pipeline_mode<synchronous>, transform_indices = @transform_5, window_bounds = array<i64: 16, 1>}, {transform_indices = @transform_6, window_bounds = array<i64: 16, 128>}, {transform_indices = @transform_7, window_bounds = array<i64: 16, 128>}]} {
    %c0 = arith.constant 0 : index
    %c0_0 = arith.constant 0 : index
    %0 = vector.load %arg1[%c0, %c0_0] : memref<144x128xbf16, #tpu.memory_space<vmem>>, vector<144x128xbf16>
    %cst = arith.constant 0.000000e+00 : bf16
    %1 = vector.broadcast %cst : bf16 to vector<144x128xbf16>
    %2 = arith.maximumf %0, %1 : vector<144x128xbf16>
    %c0_1 = arith.constant 0 : index
    %c0_2 = arith.constant 0 : index
    %3 = vector.load %arg2[%c0_1, %c0_2] : memref<16x144xbf16, #tpu.memory_space<vmem>>, vector<16x144xbf16>
    %cst_3 = arith.constant dense<0.000000e+00> : vector<16x128xf32>
    %4 = tpu.matmul %3, %2, %cst_3 {dimension_numbers = #tpu.dot_dimension_numbers<[1], [0], [0], [1], [0, 0, 1, 1], [], []>} : vector<16x144xbf16>, vector<144x128xbf16>, vector<16x128xf32> -> vector<16x128xf32>
    %c0_4 = arith.constant 0 : index
    %c0_5 = arith.constant 0 : index
    %5 = vector.load %arg3[%c0_4, %c0_5] : memref<16x1xf32, #tpu.memory_space<vmem>>, vector<16x1xf32>
    %6 = vector.broadcast %5 : vector<16x1xf32> to vector<16x128xf32>
    %7 = arith.mulf %4, %6 : vector<16x128xf32>
    %c0_6 = arith.constant 0 : index
    %c0_7 = arith.constant 0 : index
    %8 = vector.load %arg4[%c0_6, %c0_7] : memref<16x1xf32, #tpu.memory_space<vmem>>, vector<16x1xf32>
    %9 = vector.broadcast %8 : vector<16x1xf32> to vector<16x128xf32>
    %10 = arith.addf %7, %9 : vector<16x128xf32>
    %cst_8 = arith.constant 0.000000e+00 : f32
    %11 = vector.broadcast %cst_8 : f32 to vector<16x128xf32>
    %12 = arith.maximumf %10, %11 : vector<16x128xf32>
    %c0_9 = arith.constant 0 : index
    %c0_10 = arith.constant 0 : index
    %13 = vector.load %arg5[%c0_9, %c0_10] : memref<16x16xbf16, #tpu.memory_space<vmem>>, vector<16x16xbf16>
    %14 = arith.truncf %12 : vector<16x128xf32> to vector<16x128xbf16>
    %cst_11 = arith.constant dense<0.000000e+00> : vector<16x128xf32>
    %15 = tpu.matmul %13, %14, %cst_11 {dimension_numbers = #tpu.dot_dimension_numbers<[1], [0], [0], [1], [0, 0, 1, 1], [], []>} : vector<16x16xbf16>, vector<16x128xbf16>, vector<16x128xf32> -> vector<16x128xf32>
    %c0_12 = arith.constant 0 : index
    %c0_13 = arith.constant 0 : index
    %16 = vector.load %arg6[%c0_12, %c0_13] : memref<16x1xf32, #tpu.memory_space<vmem>>, vector<16x1xf32>
    %17 = vector.broadcast %16 : vector<16x1xf32> to vector<16x128xf32>
    %18 = arith.addf %15, %17 : vector<16x128xf32>
    %c0_14 = arith.constant 0 : index
    %c0_15 = arith.constant 0 : index
    %19 = vector.load %arg7[%c0_14, %c0_15] : memref<16x128xbf16, #tpu.memory_space<vmem>>, vector<16x128xbf16>
    %20 = arith.extf %19 : vector<16x128xbf16> to vector<16x128xf32>
    %21 = arith.addf %18, %20 : vector<16x128xf32>
    %22 = arith.truncf %21 : vector<16x128xf32> to vector<16x128xbf16>
    %c0_16 = arith.constant 0 : index
    %c0_17 = arith.constant 0 : index
    %23 = vector.load %arg8[%c0_16, %c0_17] : memref<16x128xbf16, #tpu.memory_space<vmem>>, vector<16x128xbf16>
    tpu.vector_store %arg8[%c0_16, %c0_17], %22 {strides = array<i32>} : memref<16x128xbf16, #tpu.memory_space<vmem>>, vector<16x128xbf16>,
    return
  }
  func.func @transform_0(%arg0: i32) -> (i32, i32) {
    %c0_i32 = arith.constant 0 : i32
    %c0_i32_0 = arith.constant 0 : i32
    return %c0_i32, %arg0 : i32, i32
  }
  func.func @transform_1(%arg0: i32) -> (i32, i32) {
    %c0_i32 = arith.constant 0 : i32
    %c0_i32_0 = arith.constant 0 : i32
    %c0_i32_1 = arith.constant 0 : i32
    return %c0_i32, %c0_i32_0 : i32, i32
  }
  func.func @transform_2(%arg0: i32) -> (i32, i32) {
    %c0_i32 = arith.constant 0 : i32
    %c0_i32_0 = arith.constant 0 : i32
    %c0_i32_1 = arith.constant 0 : i32
    return %c0_i32, %c0_i32_0 : i32, i32
  }
  func.func @transform_3(%arg0: i32) -> (i32, i32) {
    %c0_i32 = arith.constant 0 : i32
    %c0_i32_0 = arith.constant 0 : i32
    %c0_i32_1 = arith.constant 0 : i32
    return %c0_i32, %c0_i32_0 : i32, i32
  }
  func.func @transform_4(%arg0: i32) -> (i32, i32) {
    %c0_i32 = arith.constant 0 : i32
    %c0_i32_0 = arith.constant 0 : i32
    %c0_i32_1 = arith.constant 0 : i32
    return %c0_i32, %c0_i32_0 : i32, i32
  }
  func.func @transform_5(%arg0: i32) -> (i32, i32) {
    %c0_i32 = arith.constant 0 : i32
    %c0_i32_0 = arith.constant 0 : i32
    %c0_i32_1 = arith.constant 0 : i32
    return %c0_i32, %c0_i32_0 : i32, i32
  }
  func.func @transform_6(%arg0: i32) -> (i32, i32) {
    %c0_i32 = arith.constant 0 : i32
    %c0_i32_0 = arith.constant 0 : i32
    return %c0_i32, %arg0 : i32, i32
  }
  func.func @transform_7(%arg0: i32) -> (i32, i32) {
    %c0_i32 = arith.constant 0 : i32
    %c0_i32_0 = arith.constant 0 : i32
    return %c0_i32, %arg0 : i32, i32
  }
}

module attributes {stable_mosaic.version = 11 : i64} {
  func.func @_fc_kernel(%arg0: i32, %arg1: memref<8x1024xbf16, #tpu.memory_space<vmem>>, %arg2: memref<1024x2048xbf16, #tpu.memory_space<vmem>>, %arg3: memref<1x2048xf32, #tpu.memory_space<vmem>>, %arg4: memref<8x2048xf32, #tpu.memory_space<vmem>>) attributes {dimension_semantics = [#tpu.dimension_semantics<arbitrary>], iteration_bounds = array<i64: 1>, scalar_prefetch = 0 : i64, scratch_operands = 0 : i64, tpu.core_type = #tpu.core_type<tc>, window_params = [{pipeline_mode = #tpu.pipeline_mode<synchronous>, transform_indices = @transform_0, window_bounds = array<i64: 8, 1024>}, {pipeline_mode = #tpu.pipeline_mode<synchronous>, transform_indices = @transform_1, window_bounds = array<i64: 1024, 2048>}, {pipeline_mode = #tpu.pipeline_mode<synchronous>, transform_indices = @transform_2, window_bounds = array<i64: 1, 2048>}, {pipeline_mode = #tpu.pipeline_mode<synchronous>, transform_indices = @transform_3, window_bounds = array<i64: 8, 2048>}]} {
    %c0 = arith.constant 0 : index
    %c0_0 = arith.constant 0 : index
    %0 = vector.load %arg1[%c0, %c0_0] : memref<8x1024xbf16, #tpu.memory_space<vmem>>, vector<8x1024xbf16>
    %c0_1 = arith.constant 0 : index
    %c0_2 = arith.constant 0 : index
    %1 = vector.load %arg2[%c0_1, %c0_2] : memref<1024x2048xbf16, #tpu.memory_space<vmem>>, vector<1024x2048xbf16>
    %cst = arith.constant dense<0.000000e+00> : vector<8x2048xf32>
    %2 = tpu.matmul %0, %1, %cst {dimension_numbers = #tpu.dot_dimension_numbers<[1], [0], [0], [1], [0, 0, 1, 1], [], []>} : vector<8x1024xbf16>, vector<1024x2048xbf16>, vector<8x2048xf32> -> vector<8x2048xf32>
    %c0_3 = arith.constant 0 : index
    %c0_4 = arith.constant 0 : index
    %3 = vector.load %arg3[%c0_3, %c0_4] : memref<1x2048xf32, #tpu.memory_space<vmem>>, vector<1x2048xf32>
    %4 = vector.broadcast %3 : vector<1x2048xf32> to vector<8x2048xf32>
    %5 = arith.addf %2, %4 : vector<8x2048xf32>
    %c0_5 = arith.constant 0 : index
    %c0_6 = arith.constant 0 : index
    %6 = vector.load %arg4[%c0_5, %c0_6] : memref<8x2048xf32, #tpu.memory_space<vmem>>, vector<8x2048xf32>
    tpu.vector_store %arg4[%c0_5, %c0_6], %5 {strides = array<i32>} : memref<8x2048xf32, #tpu.memory_space<vmem>>, vector<8x2048xf32>,
    return
  }
  func.func @transform_0(%arg0: i32) -> (i32, i32) {
    %c0_i32 = arith.constant 0 : i32
    %c0_i32_0 = arith.constant 0 : i32
    %c0_i32_1 = arith.constant 0 : i32
    return %c0_i32, %c0_i32_0 : i32, i32
  }
  func.func @transform_1(%arg0: i32) -> (i32, i32) {
    %c0_i32 = arith.constant 0 : i32
    %c0_i32_0 = arith.constant 0 : i32
    %c0_i32_1 = arith.constant 0 : i32
    return %c0_i32, %c0_i32_0 : i32, i32
  }
  func.func @transform_2(%arg0: i32) -> (i32, i32) {
    %c0_i32 = arith.constant 0 : i32
    %c0_i32_0 = arith.constant 0 : i32
    %c0_i32_1 = arith.constant 0 : i32
    return %c0_i32, %c0_i32_0 : i32, i32
  }
  func.func @transform_3(%arg0: i32) -> (i32, i32) {
    %c0_i32 = arith.constant 0 : i32
    %c0_i32_0 = arith.constant 0 : i32
    %c0_i32_1 = arith.constant 0 : i32
    return %c0_i32, %c0_i32_0 : i32, i32
  }
}

module attributes {stable_mosaic.version = 11 : i64} {
  func.func @kernel(%arg0: i32, %arg1: memref<32x144xbf16, #tpu.memory_space<vmem>>, %arg2: memref<144x128xbf16, #tpu.memory_space<vmem>>, %arg3: memref<32x1xf32, #tpu.memory_space<vmem>>, %arg4: memref<32x1xf32, #tpu.memory_space<vmem>>, %arg5: memref<32x128xbf16, #tpu.memory_space<vmem>>) attributes {dimension_semantics = [#tpu.dimension_semantics<parallel>], iteration_bounds = array<i64: 1>, scalar_prefetch = 0 : i64, scratch_operands = 0 : i64, tpu.core_type = #tpu.core_type<tc>, window_params = [{pipeline_mode = #tpu.pipeline_mode<synchronous>, transform_indices = @transform_0, window_bounds = array<i64: 32, 144>}, {transform_indices = @transform_1, window_bounds = array<i64: 144, 128>}, {pipeline_mode = #tpu.pipeline_mode<synchronous>, transform_indices = @transform_2, window_bounds = array<i64: 32, 1>}, {pipeline_mode = #tpu.pipeline_mode<synchronous>, transform_indices = @transform_3, window_bounds = array<i64: 32, 1>}, {transform_indices = @transform_4, window_bounds = array<i64: 32, 128>}]} {
    %c0 = arith.constant 0 : index
    %c0_0 = arith.constant 0 : index
    %0 = vector.load %arg1[%c0, %c0_0] : memref<32x144xbf16, #tpu.memory_space<vmem>>, vector<32x144xbf16>
    %c0_1 = arith.constant 0 : index
    %c0_2 = arith.constant 0 : index
    %1 = vector.load %arg2[%c0_1, %c0_2] : memref<144x128xbf16, #tpu.memory_space<vmem>>, vector<144x128xbf16>
    %cst = arith.constant dense<0.000000e+00> : vector<32x128xf32>
    %2 = tpu.matmul %0, %1, %cst {dimension_numbers = #tpu.dot_dimension_numbers<[1], [0], [0], [1], [0, 0, 1, 1], [], []>} : vector<32x144xbf16>, vector<144x128xbf16>, vector<32x128xf32> -> vector<32x128xf32>
    %c0_3 = arith.constant 0 : index
    %c0_4 = arith.constant 0 : index
    %3 = vector.load %arg3[%c0_3, %c0_4] : memref<32x1xf32, #tpu.memory_space<vmem>>, vector<32x1xf32>
    %4 = vector.broadcast %3 : vector<32x1xf32> to vector<32x128xf32>
    %5 = arith.mulf %2, %4 : vector<32x128xf32>
    %c0_5 = arith.constant 0 : index
    %c0_6 = arith.constant 0 : index
    %6 = vector.load %arg4[%c0_5, %c0_6] : memref<32x1xf32, #tpu.memory_space<vmem>>, vector<32x1xf32>
    %7 = vector.broadcast %6 : vector<32x1xf32> to vector<32x128xf32>
    %8 = arith.addf %5, %7 : vector<32x128xf32>
    %cst_7 = arith.constant 0.000000e+00 : f32
    %9 = vector.broadcast %cst_7 : f32 to vector<32x128xf32>
    %10 = arith.maximumf %8, %9 : vector<32x128xf32>
    %11 = arith.truncf %10 : vector<32x128xf32> to vector<32x128xbf16>
    %c0_8 = arith.constant 0 : index
    %c0_9 = arith.constant 0 : index
    %12 = vector.load %arg5[%c0_8, %c0_9] : memref<32x128xbf16, #tpu.memory_space<vmem>>, vector<32x128xbf16>
    tpu.vector_store %arg5[%c0_8, %c0_9], %11 {strides = array<i32>} : memref<32x128xbf16, #tpu.memory_space<vmem>>, vector<32x128xbf16>,
    return
  }
  func.func @transform_0(%arg0: i32) -> (i32, i32) {
    %c0_i32 = arith.constant 0 : i32
    %c0_i32_0 = arith.constant 0 : i32
    %c0_i32_1 = arith.constant 0 : i32
    return %c0_i32, %c0_i32_0 : i32, i32
  }
  func.func @transform_1(%arg0: i32) -> (i32, i32) {
    %c0_i32 = arith.constant 0 : i32
    %c0_i32_0 = arith.constant 0 : i32
    return %c0_i32, %arg0 : i32, i32
  }
  func.func @transform_2(%arg0: i32) -> (i32, i32) {
    %c0_i32 = arith.constant 0 : i32
    %c0_i32_0 = arith.constant 0 : i32
    %c0_i32_1 = arith.constant 0 : i32
    return %c0_i32, %c0_i32_0 : i32, i32
  }
  func.func @transform_3(%arg0: i32) -> (i32, i32) {
    %c0_i32 = arith.constant 0 : i32
    %c0_i32_0 = arith.constant 0 : i32
    %c0_i32_1 = arith.constant 0 : i32
    return %c0_i32, %c0_i32_0 : i32, i32
  }
  func.func @transform_4(%arg0: i32) -> (i32, i32) {
    %c0_i32 = arith.constant 0 : i32
    %c0_i32_0 = arith.constant 0 : i32
    return %c0_i32, %arg0 : i32, i32
  }
}

module attributes {stable_mosaic.version = 11 : i64} {
  func.func @kernel(%arg0: i32, %arg1: memref<12x72xbf16, #tpu.memory_space<vmem>>, %arg2: memref<72x256xbf16, #tpu.memory_space<vmem>>, %arg3: memref<12x256xf32, #tpu.memory_space<vmem>>) attributes {dimension_semantics = [#tpu.dimension_semantics<parallel>], iteration_bounds = array<i64: 2>, scalar_prefetch = 0 : i64, scratch_operands = 0 : i64, tpu.core_type = #tpu.core_type<tc>, window_params = [{pipeline_mode = #tpu.pipeline_mode<synchronous>, transform_indices = @transform_0, window_bounds = array<i64: 12, 72>}, {transform_indices = @transform_1, window_bounds = array<i64: 72, 256>}, {transform_indices = @transform_2, window_bounds = array<i64: 12, 256>}]} {
    %c0 = arith.constant 0 : index
    %c0_0 = arith.constant 0 : index
    %0 = vector.load %arg1[%c0, %c0_0] : memref<12x72xbf16, #tpu.memory_space<vmem>>, vector<12x72xbf16>
    %c0_1 = arith.constant 0 : index
    %c0_2 = arith.constant 0 : index
    %1 = vector.load %arg2[%c0_1, %c0_2] : memref<72x256xbf16, #tpu.memory_space<vmem>>, vector<72x256xbf16>
    %cst = arith.constant dense<0.000000e+00> : vector<12x256xf32>
    %2 = tpu.matmul %0, %1, %cst {dimension_numbers = #tpu.dot_dimension_numbers<[1], [0], [0], [1], [0, 0, 1, 1], [], []>} : vector<12x72xbf16>, vector<72x256xbf16>, vector<12x256xf32> -> vector<12x256xf32>
    %3 = math.tanh %2 : vector<12x256xf32>
    %c0_3 = arith.constant 0 : index
    %c0_4 = arith.constant 0 : index
    %4 = vector.load %arg3[%c0_3, %c0_4] : memref<12x256xf32, #tpu.memory_space<vmem>>, vector<12x256xf32>
    tpu.vector_store %arg3[%c0_3, %c0_4], %3 {strides = array<i32>} : memref<12x256xf32, #tpu.memory_space<vmem>>, vector<12x256xf32>,
    return
  }
  func.func @transform_0(%arg0: i32) -> (i32, i32) {
    %c0_i32 = arith.constant 0 : i32
    %c0_i32_0 = arith.constant 0 : i32
    %c0_i32_1 = arith.constant 0 : i32
    return %c0_i32, %c0_i32_0 : i32, i32
  }
  func.func @transform_1(%arg0: i32) -> (i32, i32) {
    %c0_i32 = arith.constant 0 : i32
    %c0_i32_0 = arith.constant 0 : i32
    return %c0_i32, %arg0 : i32, i32
  }
  func.func @transform_2(%arg0: i32) -> (i32, i32) {
    %c0_i32 = arith.constant 0 : i32
    %c0_i32_0 = arith.constant 0 : i32
    return %c0_i32, %arg0 : i32, i32
  }
}

</mosaic_0001>

<bundles_post_ra>
// kernel: cvae_forward.9
= control target key start
LH: loop header
LB: loop body
LE: loop exit
PB: predicated region body
PF: predicated region fallthrough
CT: control target
= control target key end

     0   :  { %s528_s15 = smov 0   ;;  %s530_s16 = smov 0   ;;  %s589_s0 = inlined_call_operand.vmem [shape: bf16[8,48], index: 0, kind: input, shape index: {}]   ;;  %s590_s1 = inlined_call_operand.vmem [shape: bf16[48,512], index: 1, kind: input, shape index: {}]   ;;  %s591_s2 = inlined_call_operand.vmem [shape: f32[8,1], index: 2, kind: input, shape index: {}]   ;;  %s592_s3 = inlined_call_operand.vmem [shape: f32[8,1], index: 3, kind: input, shape index: {}]   ;;  %s593_s4 = inlined_call_operand.vmem [shape: bf16[8,512], index: 4, kind: output, shape index: {}]  }
   0x1   :  { %s532_s17 = smov 0  }
   0x2 LB: > { %s406_s18 = sadd.s32 4294967295, %s500_s17   ;;  %s545_s19 = sadd.s32 1, %s500_s17   ;;  %s500_s17 = sphi %s532_s17, %s596_s17   ;;  %s496_s16 = sphi %s530_s16, %s595_s16   ;;  %s492_s15 = sphi %s528_s15, %s594_s15  }
   0x3   : > { %s39_s20 = ssub.s32 %s500_s17, %s545_s19  ;;  %s42_s21 = sadd.s32 1, %s496_s16 }
   0x4   : > { %p40_p0 = scmp.eq.s32.totalorder %s39_s20, 0  ;;  %p49_p1 = scmp.ne.s32.totalorder %s496_s16, %s492_s15 }
   0x5   : > { %p50_p2 = scmp.eq.s32.totalorder %s500_s17, 0  ;;  %p409_p4 = scmp.ge.s32.totalorder %s500_s17, 2 }
   0x6   : > { %s554_s22 = scalar_select %p40_p0, %s496_s16, %s42_s21  }
   0x7   : > { %p51_p3 = por %p50_p2, %p49_p1  ;;  %152 = sbr.rel (%p409_p4) target bundleno = 22 (0x16), region = 28 }
   0xc   : > { %155 = sbr.rel (!%p51_p3) target bundleno = 22 (0x16), region = 32  ;;  %s157_s23 = sand.u32 (%p51_p3), 1, %s496_s16  }
   0xd   : > { %s443_s24 = sshll.u32 (%p51_p3), %s500_s17, 3  ;;  %s450_s25 = smul.u32 (%p51_p3), 48, %s157_s23 }
   0xe   : > { %s162_s28 = scalar_lea.vmem (%p51_p3), %s590_s1, %s443_s24 }
   0xf   : > { %v201_v0 = vld [vmem:[%s162_s28] sm:$0xff] (%p51_p3)  ;;  %v203_v1 = vld [vmem:[%s162_s28 + $0x10] sm:$0xff] (%p51_p3)  ;;  %s159_s29 = scalar_lea.vmem (%p51_p3), [#allocation2], %s450_s25 }
  0x10   : > { %v205_v2 = vld [vmem:[%s162_s28 + $0x20] sm:$0xff] (%p51_p3)  ;;  %202 = vst [vmem:[%s159_s29] sm:$0xff] (%p51_p3), %v201_v0  ;;  %v207_v3 = vld [vmem:[%s162_s28 + $0x30] sm:$0xff] (%p51_p3) }
  0x11   : > { %204 = vst [vmem:[%s159_s29 + $0x8] sm:$0xff] %v203_v1  ;;  %v209_v4 = vld [vmem:[%s162_s28 + $0x40] sm:$0xff]  ;;  %v211_v5 = vld [vmem:[%s162_s28 + $0x50] sm:$0xff] }
  0x12   : > { %206 = vst [vmem:[%s159_s29 + $0x10] sm:$0xff] %v205_v2 }
  0x13   : > { %208 = vst [vmem:[%s159_s29 + $0x18] sm:$0xff] %v207_v3 }
  0x14   : > { %210 = vst [vmem:[%s159_s29 + $0x20] sm:$0xff] %v209_v4 }
  0x15   : > { %212 = vst [vmem:[%s159_s29 + $0x28] sm:$0xff] %v211_v5 }
  0x16 PF: > { %p412_p5 = scmp.ge.s32.totalorder %s500_s17, 1  ;;  %p217_p6 = scmp.lt.s32.totalorder %s500_s17, 3 }
  0x18   : > { %p218_p7 = pnand %p412_p5, %p217_p6 }
  0x19   : > { %s224_s30 = sand.u32 (!%p218_p7), 1, %s492_s15   ;;  %s413_s13 = sshll.u32 (!%p218_p7), %s406_s18, 1 }
  0x1a   : > { %221 = sbr.rel (%p218_p7) target bundleno = 181 (0xb5), region = 70  ;;  %p251_p8 = scmp.lt.s32.totalorder (!%p218_p7), %s413_s13, 3 }
  0x1b   : > { %s451_s7 = smul.u32 (!%p218_p7), 48, %s224_s30 }
  0x1d   : > { %s226_s8 = scalar_lea.vmem (!%p218_p7), [#allocation2], %s451_s7 }
  0x1f   : > { %v324_v6 = vld [vmem:[%s591_s2] sm:$0xff]  ;;  %v502_v7 = vmov 0   ;;  %v449_v9 = vld [vmem:[%s226_s8 + $0x24] sm:$0xf0]  ;;  %v435_v12 = vld [vmem:[%s226_s8 + $0x28] sm:$0xf0] }
  0x20   : > { %477 = vset.pattern.permute.xlu0 %v502_v7  ;;  %v433_v8 = vld [vmem:[%s226_s8 + $0x20] sm:$0xf]  ;;  %v448_v10 = vld [vmem:[%s226_s8 + $0x24] sm:$0xf]  ;;  %v425_v13 = vld [vmem:[%s226_s8 + $0x10] sm:$0xf] }
  0x21   : > { %327 = vperm.xlu0 %477, %v324_v6   ;;  %v434_v11 = vor.u32 %v449_v9, %v433_v8  ;;  %v447_v14 = vld [vmem:[%s226_s8 + $0x14] sm:$0xf0]  ;;  %v438_v15 = vor.u32 %v448_v10, %v435_v12  ;;  %v446_v16 = vld [vmem:[%s226_s8 + $0x14] sm:$0xf]  ;;  %v427_v17 = vld [vmem:[%s226_s8 + $0x18] sm:$0xf0] }
  0x22   : > { %v426_v18 = vor.u32 %v447_v14, %v425_v13  ;;  %v332_v19 = vld [vmem:[%s592_s3] sm:$0xff]  ;;  %v430_v20 = vor.u32 %v446_v16, %v427_v17  ;;  %v445_v22 = vld [vmem:[%s226_s8 + $0x4] sm:$0xf0]  ;;  %v419_v24 = vld [vmem:[%s226_s8 + $0x8] sm:$0xf0]  ;;  %vm294_vm0 = vcmask 392192  }
  0x23   : > { %303 = vmatpush.bf16.msra.mxu0 %v434_v11  ;;  %316 = vmatpush.bf16.msra.mxu1 %v438_v15  ;;  %v417_v21 = vld [vmem:[%s226_s8] sm:$0xf]  ;;  %v444_v23 = vld [vmem:[%s226_s8 + $0x4] sm:$0xf]  ;;  %s598_s13 = smov (!%p251_p8, %s413_s13), 3 }
  0x24   : > { %v418_v25 = vor.u32 %v445_v22, %v417_v21  ;;  %v422_v26 = vor.u32 %v444_v23, %v419_v24  ;;  %v257_v27 = vld [vmem:[%s589_s0] sm:$0xf]  ;;  %s414_s14 = sshll.u32 %s598_s13, 2 }
  0x25   : > { %s254_s21 = scalar_lea.vmem %s593_s4, %s414_s14 }
  0x27   : > { %304 = vmatpush.bf16.msra.mxu0 %v426_v18  ;;  %317 = vmatpush.bf16.msra.mxu1 %v430_v20 }
  0x29   : > { %335 = vperm.xlu0 %477, %v332_v19  }
  0x2b   : > { %305 = vmatpush.bf16.msra.mxu0 %v418_v25  ;;  %318 = vmatpush.bf16.msra.mxu1 %v422_v26 }
  0x2e   : > { %439 = vmatmul.msk.bf16.vlgmr.msra.gmra.mxu0 %vm294_vm0, %v257_v27  ;;  %440 = vmatmul.msk.bf16.vlgmr.msra.gmra.mxu1 %vm294_vm0, %v257_v27 }
  0x93   : > { %v328_v28 = vpop.permute.xlu0 %327 }
  0x9b   : > { %v336_v32 = vpop.permute.xlu0 %335 }
  0xab   : > { %v307_v29 = vpop.f32.mrf.mxu0  ;;  %v320_v31 = vpop.f32.mrf.mxu1 }
  0xac   : > { %v330_v30 = vmul.f32 %v328_v28, %v307_v29  ;;  %v331_v33 = vmul.f32 %v328_v28, %v320_v31 }
  0xae   : > { %v338_v34 = vadd.f32 %v336_v32, %v330_v30  ;;  %v339_v35 = vadd.f32 %v336_v32, %v331_v33 }
  0xb0   : > { %v340_v36 = vmax.f32 %v338_v34, 0.0  ;;  %v341_v37 = vmax.f32 %v339_v35, 0.0 }
  0xb2   : > { %v342_v38 = vpack.c.bf16 %v341_v37, %v340_v36 }
  0xb3   : > { %v309_v39 = vpop.f32.mrf.mxu0  ;;  %v322_v40 = vpop.f32.mrf.mxu1 }
  0xb4   : > { %343 = vst [vmem:[%s254_s21] sm:$0xff] %v342_v38 }
  0xb5 PF: > { %p11_p9 = scmp.ge.s32.totalorder %s545_s19, 4   ;;  %s594_s15 = smov %s496_s16 }
  0xb6   : > { %s595_s16 = smov %s554_s22  ;;  %s596_s17 = smov %s545_s19 }
  0xb7   :  { %13 = sbr.rel (!%p11_p9) target bundleno = 2 (0x2), region = 109 }

// kernel: cvae_forward.10
= control target key start
LH: loop header
LB: loop body
LE: loop exit
PB: predicated region body
PF: predicated region fallthrough
CT: control target
= control target key end

     0   :  { %v194_v2 = vmov 0   ;;  %s262_s1 = inlined_call_operand.vmem [shape: bf16[128,128], index: 1, kind: input, shape index: {}]   ;;  %s263_s2 = inlined_call_operand.vmem [shape: f32[16,1], index: 2, kind: input, shape index: {}]   ;;  %s264_s3 = inlined_call_operand.vmem [shape: f32[16,1], index: 3, kind: input, shape index: {}]   ;;  %s265_s0 = inlined_call_operand.vmem [shape: bf16[16,128], index: 0, kind: input, shape index: {}]   ;;  %s266_s4 = inlined_call_operand.vmem [shape: bf16[16,128], index: 4, kind: output, shape index: {}]  }
   0x1   :  { %v185_v0 = vld [vmem:[%s262_s1 + $0x38] sm:$0xff]  ;;  %v184_v1 = vld [vmem:[%s262_s1 + $0x30] sm:$0xff]  ;;  %192 = vset.pattern.permute.xlu0 %v194_v2  ;;  %v103_v3 = vld [vmem:[%s263_s2] sm:$0xff]  ;;  %193 = vset.pattern.permute.xlu1 %v194_v2 }
   0x2   :  { %89 = vmatpush.bf16.msra.mxu0 %v185_v0  ;;  %v117_v4 = vld [vmem:[%s264_s3] sm:$0xff]  ;;  %107 = vperm.xlu0 %192, %v103_v3   ;;  %v183_v5 = vld [vmem:[%s262_s1 + $0x28] sm:$0xff]  ;;  %v181_v9 = vld [vmem:[%s262_s1 + $0x18] sm:$0xff] }
   0x3   :  { %121 = vperm.xlu1 %193, %v117_v4   ;;  %v104_v6 = vld [vmem:[%s263_s2 + $0x8] sm:$0xff]  ;;  %v182_v8 = vld [vmem:[%s262_s1 + $0x20] sm:$0xff]  ;;  %v180_v10 = vld [vmem:[%s262_s1 + $0x10] sm:$0xff] }
   0x4   :  { %v118_v7 = vld [vmem:[%s264_s3 + $0x8] sm:$0xff]  ;;  %v178_v12 = vld [vmem:[%s262_s1] sm:$0xff] }
   0x5   :  { %v179_v11 = vld [vmem:[%s262_s1 + $0x8] sm:$0xff]  ;;  %v177_v13 = vld [vmem:[%s265_s0] sm:$0xff] }
   0x6   :  { %90 = vmatpush.bf16.msra.mxu0 %v184_v1 }
   0xa   :  { %91 = vmatpush.bf16.msra.mxu0 %v183_v5  ;;  %112 = vperm.xlu0 %192, %v104_v6  }
   0xb   :  { %126 = vperm.xlu1 %193, %v118_v7  }
   0xe   :  { %92 = vmatpush.bf16.msra.mxu0 %v182_v8 }
  0x12   :  { %93 = vmatpush.bf16.msra.mxu0 %v181_v9 }
  0x16   :  { %94 = vmatpush.bf16.msra.mxu0 %v180_v10 }
  0x1a   :  { %95 = vmatpush.bf16.msra.mxu0 %v179_v11 }
  0x1e   :  { %96 = vmatpush.bf16.msra.mxu0 %v178_v12 }
  0x21   :  { %97 = vmatmul.bf16.vlgmr.msra.gmra.mxu0 %v177_v13 }
  0x74   :  { %v108_v14 = vpop.permute.xlu0 %107 }
  0x75   :  { %v122_v15 = vpop.permute.xlu1 %121 }
  0x7c   :  { %v113_v18 = vpop.permute.xlu0 %112 }
  0x7d   :  { %v127_v22 = vpop.permute.xlu1 %126 }
  0x9e   :  { %v98_v16 = vpop.f32.mrf.mxu0 }
  0x9f   :  { %v115_v17 = vmul.f32 %v108_v14, %v98_v16 }
  0xa1   :  { %v129_v20 = vadd.f32 %v122_v15, %v115_v17 }
  0xa3   :  { %v131_v24 = vmax.f32 %v129_v20, 0.0 }
  0xa6   :  { %v100_v19 = vpop.f32.mrf.mxu0 }
  0xa7   :  { %v116_v21 = vmul.f32 %v113_v18, %v100_v19 }
  0xa9   :  { %v130_v23 = vadd.f32 %v127_v22, %v116_v21 }
  0xab   :  { %v132_v25 = vmax.f32 %v130_v23, 0.0 }
  0xad   :  { %v189_v26 = vpack.c.bf16 %v132_v25, %v131_v24 }
  0xaf   :  { %190 = vst [vmem:[%s266_s4] sm:$0xff] %v189_v26  }

// kernel: cvae_forward.11
= control target key start
LH: loop header
LB: loop body
LE: loop exit
PB: predicated region body
PF: predicated region fallthrough
CT: control target
= control target key end

     0   :  { %v322_v3 = vmov 0   ;;  %vm107_vm0 = vcmask 130048   ;;  %s453_s0 = inlined_call_operand.vmem [shape: bf16[144,128], index: 0, kind: input, shape index: {}]   ;;  %s454_s2 = inlined_call_operand.vmem [shape: f32[16,1], index: 2, kind: input, shape index: {}, may-alias: {2,7}]   ;;  %s455_s3 = inlined_call_operand.vmem [shape: f32[16,1], index: 3, kind: input, shape index: {}]   ;;  %s456_s1 = inlined_call_operand.vmem [shape: bf16[16,144], index: 1, kind: input, shape index: {}]   ;;  %s457_s7 = inlined_call_operand.vmem [shape: f32[16,1], index: 7, kind: input, shape index: {}, may-alias: {2,7}]   ;;  %s458_s8 = inlined_call_operand.vmem [shape: f32[16,1], index: 8, kind: input, shape index: {}]   ;;  %s459_s5 = inlined_call_operand.vmem [shape: f32[16,1], index: 5, kind: input, shape index: {}]   ;;  %s460_s4 = inlined_call_operand.vmem [shape: bf16[16,16], index: 4, kind: input, shape index: {}]   ;;  %s461_s6 = inlined_call_operand.vmem [shape: bf16[16,128], index: 6, kind: input, shape index: {}]   ;;  %s462_s9 = inlined_call_operand.vmem [shape: bf16[16,128], index: 9, kind: output, shape index: {}]  }
   0x1   :  { %v316_v0 = vld [vmem:[%s453_s0 + $0x38] sm:$0xff]   ;;  %v315_v1 = vld [vmem:[%s453_s0 + $0x30] sm:$0xff]   ;;  %v314_v2 = vld [vmem:[%s453_s0 + $0x28] sm:$0xff]   ;;  %319 = vset.pattern.permute.xlu0 %v322_v3  ;;  %320 = vset.pattern.permute.xlu1 %v322_v3 }
   0x2   :  { %v295_v4 = vunpack.c.l.bf16 %v316_v0  ;;  %v296_v5 = vunpack.c.h.bf16 %v316_v0  ;;  %v291_v6 = vunpack.c.l.bf16 %v315_v1  ;;  %v292_v7 = vunpack.c.h.bf16 %v315_v1  ;;  %v139_v8 = vld [vmem:[%s454_s2] sm:$0xff]  ;;  %321 = vset.pattern.permute.xlu2 %v322_v3  ;;  %v140_v26 = vld [vmem:[%s454_s2 + $0x8] sm:$0xff]  ;;  %v312_v27 = vld [vmem:[%s453_s0 + $0x18] sm:$0xff]  }
   0x3   :  { %v287_v9 = vunpack.c.l.bf16 %v314_v2  ;;  %v288_v10 = vunpack.c.h.bf16 %v314_v2  ;;  %143 = vperm.xlu0 %319, %v139_v8   ;;  %v313_v15 = vld [vmem:[%s453_s0 + $0x20] sm:$0xff]   ;;  %v252_v31 = vld [vmem:[%s456_s1 + $0x8] sm:$0xf0]  ;;  %v279_v35 = vunpack.c.l.bf16 %v312_v27  ;;  %v280_v36 = vunpack.c.h.bf16 %v312_v27  ;;  %v311_v37 = vld [vmem:[%s453_s0 + $0x10] sm:$0xff]  }
   0x4   :  { %v83_v11 = vmax.f32 %v295_v4, 0.0  ;;  %v84_v12 = vmax.f32 %v296_v5, 0.0  ;;  %v81_v13 = vmax.f32 %v291_v6, 0.0  ;;  %v82_v14 = vmax.f32 %v292_v7, 0.0  ;;  %v317_v16 = vld [vmem:[%s453_s0 + $0x40] sm:$0xff]   ;;  %v154_v39 = vld [vmem:[%s455_s3 + $0x8] sm:$0xff] }
   0x5   :  { %v153_v18 = vld [vmem:[%s455_s3] sm:$0xff]  ;;  %v79_v19 = vmax.f32 %v287_v9, 0.0  ;;  %v283_v20 = vunpack.c.l.bf16 %v313_v15  ;;  %v284_v21 = vunpack.c.h.bf16 %v313_v15  ;;  %v80_v23 = vmax.f32 %v288_v10, 0.0  ;;  %v310_v47 = vld [vmem:[%s453_s0 + $0x8] sm:$0xff]  }
   0x6   :  { %v94_v17 = vpack.c.bf16 %v84_v12, %v83_v11  ;;  %157 = vperm.xlu1 %320, %v153_v18   ;;  %v93_v22 = vpack.c.bf16 %v82_v14, %v81_v13  ;;  %v299_v24 = vunpack.c.l.bf16 %v317_v16  ;;  %v300_v25 = vunpack.c.h.bf16 %v317_v16  ;;  %v262_v30 = vld [vmem:[%s456_s1 + $0x4] sm:$0xf]  ;;  %v213_v53 = vld [vmem:[%s457_s7 + $0x8] sm:$0xff]  ;;  %v250_v1 = vld [vmem:[%s456_s1] sm:$0xf] }
   0x7   :  { %v77_v32 = vmax.f32 %v283_v20, 0.0  ;;  %v78_v33 = vmax.f32 %v284_v21, 0.0  ;;  %v92_v34 = vpack.c.bf16 %v80_v23, %v79_v19  ;;  %v255_v40 = vor.u32 %v262_v30, %v252_v31  ;;  %v212_v46 = vld [vmem:[%s457_s7] sm:$0xff]  ;;  %v227_v60 = vld [vmem:[%s458_s8 + $0x8] sm:$0xff] }
   0x8   :  { %111 = vmatpush.bf16.msra.mxu0 %v94_v17  ;;  %v85_v28 = vmax.f32 %v299_v24, 0.0  ;;  %v86_v29 = vmax.f32 %v300_v25, 0.0  ;;  %v275_v41 = vunpack.c.l.bf16 %v311_v37  ;;  %v276_v42 = vunpack.c.h.bf16 %v311_v37  ;;  %v266_v54 = vld [vmem:[%s453_s0] sm:$0xff]   ;;  %v263_v2 = vld [vmem:[%s456_s1 + $0x4] sm:$0xf0] }
   0x9   :  { %v91_v43 = vpack.c.bf16 %v78_v33, %v77_v32  ;;  %v75_v44 = vmax.f32 %v279_v35, 0.0  ;;  %v76_v45 = vmax.f32 %v280_v36, 0.0  ;;  %v271_v51 = vunpack.c.l.bf16 %v310_v47  ;;  %v172_v4 = vld [vmem:[%s459_s5] sm:$0xff]  ;;  %v173_v5 = vld [vmem:[%s459_s5 + $0x8] sm:$0xff] }
   0xa   :  { %v95_v38 = vpack.c.bf16 %v86_v29, %v85_v28  ;;  %v73_v48 = vmax.f32 %v275_v41, 0.0  ;;  %v74_v49 = vmax.f32 %v276_v42, 0.0  ;;  %v272_v52 = vunpack.c.h.bf16 %v310_v47  ;;  %176 = vperm.xlu2 %321, %v172_v4   ;;  %v226_v11 = vld [vmem:[%s458_s8] sm:$0xff] }
   0xb   :  { %148 = vperm.xlu0 %319, %v140_v26   ;;  %v90_v50 = vpack.c.bf16 %v76_v45, %v75_v44  ;;  %v71_v56 = vmax.f32 %v271_v51, 0.0  ;;  %v267_v58 = vunpack.c.l.bf16 %v266_v54  ;;  %v268_v59 = vunpack.c.h.bf16 %v266_v54  ;;  %v264_v24 = vld [vmem:[%s460_s4] sm:$0xff] }
   0xc   :  { %112 = vmatpush.bf16.msra.mxu0 %v93_v22  ;;  %132 = vmatpush.bf16.msra.mxu1 %v95_v38  ;;  %v89_v55 = vpack.c.bf16 %v74_v49, %v73_v48  ;;  %v72_v57 = vmax.f32 %v272_v52, 0.0  ;;  %v251_v3 = vor.u32 %v263_v2, %v250_v1  ;;  %v302_v27 = vld [vmem:[%s461_s6] sm:$0xff]  }
   0xd   :  { %v69_v62 = vmax.f32 %v267_v58, 0.0  ;;  %v70_v63 = vmax.f32 %v268_v59, 0.0  ;;  %v303_v29 = vunpack.c.l.bf16 %v302_v27  ;;  %v304_v33 = vunpack.c.h.bf16 %v302_v27 }
   0xe   :  { %162 = vperm.xlu1 %320, %v154_v39   ;;  %v88_v61 = vpack.c.bf16 %v72_v57, %v71_v56 }
   0xf   :  { %256 = vmatmul.msk.bf16.vlgmr.msra.gmra.mxu1 %vm107_vm0, %v255_v40  ;;  %v87_v0 = vpack.c.bf16 %v70_v63, %v69_v62 }
  0x10   :  { %113 = vmatpush.bf16.msra.mxu0 %v92_v34 }
  0x12   :  { %181 = vperm.xlu2 %321, %v173_v5  }
  0x13   :  { %216 = vperm.xlu0 %319, %v212_v46  }
  0x14   :  { %114 = vmatpush.bf16.msra.mxu0 %v91_v43 }
  0x16   :  { %221 = vperm.xlu1 %320, %v213_v53  }
  0x18   :  { %115 = vmatpush.bf16.msra.mxu0 %v90_v50 }
  0x1a   :  { %230 = vperm.xlu2 %321, %v226_v11  }
  0x1b   :  { %235 = vperm.xlu0 %319, %v227_v60  }
  0x1c   :  { %116 = vmatpush.bf16.msra.mxu0 %v89_v55 }
  0x20   :  { %117 = vmatpush.bf16.msra.mxu0 %v88_v61 }
  0x24   :  { %118 = vmatpush.bf16.msra.mxu0 %v87_v0 }
  0x27   :  { %119 = vmatmul.bf16.vlgmr.msra.gmra.mxu0 %v251_v3 }
  0x64   :  { %v177_v25 = vpop.permute.xlu2 %176 }
  0x6c   :  { %v182_v31 = vpop.permute.xlu2 %181 }
  0x74   :  { %v231_v41 = vpop.permute.xlu2 %230 }
  0x75   :  { %v144_v7 = vpop.permute.xlu0 %143 }
  0x78   :  { %v158_v9 = vpop.permute.xlu1 %157 }
  0x7d   :  { %v149_v16 = vpop.permute.xlu0 %148 }
  0x80   :  { %v163_v19 = vpop.permute.xlu1 %162 }
  0x85   :  { %v217_v30 = vpop.permute.xlu0 %216 }
  0x88   :  { %v222_v38 = vpop.permute.xlu1 %221 }
  0x8c   :  { %v134_v6 = vpop.f32.mrf.mxu1 }
  0x8d   :  { %v236_v40 = vpop.permute.xlu0 %235 }
  0x94   :  { %v136_v13 = vpop.f32.mrf.mxu1 }
  0xa4   :  { %v120_v8 = vpop.f32.mrf.mxu0 }
  0xa5   :  { %v135_v10 = vadd.f32 %v134_v6, %v120_v8 }
  0xa7   :  { %v151_v12 = vmul.f32 %v144_v7, %v135_v10 }
  0xa9   :  { %v165_v18 = vadd.f32 %v158_v9, %v151_v12 }
  0xab   :  { %v167_v21 = vmax.f32 %v165_v18, 0.0 }
  0xac   :  { %v122_v14 = vpop.f32.mrf.mxu0 }
  0xad   :  { %v137_v15 = vadd.f32 %v136_v13, %v122_v14 }
  0xaf   :  { %v152_v17 = vmul.f32 %v149_v16, %v137_v15 }
  0xb1   :  { %v166_v20 = vadd.f32 %v163_v19, %v152_v17 }
  0xb3   :  { %v168_v22 = vmax.f32 %v166_v20, 0.0 }
  0xb5   :  { %v171_v23 = vpack.c.bf16 %v168_v22, %v167_v21 }
  0xb7   :  { %199 = vmatpush.bf16.msra.mxu2 %v171_v23 }
  0xba   :  { %261 = vmatmul.msk.bf16.vlgmr.msra.gmra.mxu2 %vm107_vm0, %v264_v24 }
 0x13d   :  { %v201_v26 = vpop.f32.mrf.mxu2 }
 0x13e   :  { %v202_v28 = vadd.f32 %v201_v26, %v177_v25 }
 0x140   :  { %v210_v32 = vadd.f32 %v303_v29, %v202_v28 }
 0x142   :  { %v224_v36 = vmul.f32 %v217_v30, %v210_v32 }
 0x144   :  { %v238_v42 = vadd.f32 %v231_v41, %v224_v36 }
 0x145   :  { %v203_v34 = vpop.f32.mrf.mxu2 }
 0x146   :  { %v204_v35 = vadd.f32 %v203_v34, %v182_v31 }
 0x148   :  { %v211_v37 = vadd.f32 %v304_v33, %v204_v35 }
 0x14a   :  { %v225_v39 = vmul.f32 %v222_v38, %v211_v37 }
 0x14c   :  { %v239_v43 = vadd.f32 %v236_v40, %v225_v39 }
 0x14e   :  { %v308_v44 = vpack.c.bf16 %v239_v43, %v238_v42 }
 0x150   :  { %309 = vst [vmem:[%s462_s9] sm:$0xff] %v308_v44  }

// kernel: cvae_forward.12
= control target key start
LH: loop header
LB: loop body
LE: loop exit
PB: predicated region body
PF: predicated region fallthrough
CT: control target
= control target key end

     0   :  { %v288_v38 = vmov 0   ;;  %vm101_vm0 = vcmask 130048   ;;  %s397_s0 = inlined_call_operand.vmem [shape: bf16[144,128], index: 0, kind: input, shape index: {}]   ;;  %s398_s1 = inlined_call_operand.vmem [shape: bf16[16,144], index: 1, kind: input, shape index: {}]   ;;  %s399_s2 = inlined_call_operand.vmem [shape: f32[16,1], index: 2, kind: input, shape index: {}]   ;;  %s400_s3 = inlined_call_operand.vmem [shape: f32[16,1], index: 3, kind: input, shape index: {}]   ;;  %s401_s5 = inlined_call_operand.vmem [shape: f32[16,1], index: 5, kind: input, shape index: {}]   ;;  %s402_s4 = inlined_call_operand.vmem [shape: bf16[16,16], index: 4, kind: input, shape index: {}]   ;;  %s403_s6 = inlined_call_operand.vmem [shape: bf16[16,128], index: 6, kind: input, shape index: {}]   ;;  %s404_s7 = inlined_call_operand.vmem [shape: bf16[16,128], index: 7, kind: output, shape index: {}]  }
   0x1   :  { %v282_v0 = vld [vmem:[%s397_s0 + $0x38] sm:$0xff]   ;;  %v281_v1 = vld [vmem:[%s397_s0 + $0x30] sm:$0xff]   ;;  %v280_v2 = vld [vmem:[%s397_s0 + $0x28] sm:$0xff]   ;;  %285 = vset.pattern.permute.xlu0 %v288_v38  ;;  %286 = vset.pattern.permute.xlu1 %v288_v38 }
   0x2   :  { %v261_v3 = vunpack.c.l.bf16 %v282_v0  ;;  %v262_v4 = vunpack.c.h.bf16 %v282_v0  ;;  %v257_v5 = vunpack.c.l.bf16 %v281_v1  ;;  %v258_v6 = vunpack.c.h.bf16 %v281_v1  ;;  %v279_v13 = vld [vmem:[%s397_s0 + $0x20] sm:$0xff]   ;;  %v278_v21 = vld [vmem:[%s397_s0 + $0x18] sm:$0xff]   ;;  %v218_v27 = vld [vmem:[%s398_s1 + $0x8] sm:$0xf0]  ;;  %287 = vset.pattern.permute.xlu2 %v288_v38 }
   0x3   :  { %v253_v7 = vunpack.c.l.bf16 %v280_v2  ;;  %v254_v8 = vunpack.c.h.bf16 %v280_v2  ;;  %v283_v14 = vld [vmem:[%s397_s0 + $0x40] sm:$0xff]   ;;  %v249_v17 = vunpack.c.l.bf16 %v279_v13  ;;  %v250_v18 = vunpack.c.h.bf16 %v279_v13  ;;  %v277_v34 = vld [vmem:[%s397_s0 + $0x10] sm:$0xff]   ;;  %v276_v44 = vld [vmem:[%s397_s0 + $0x8] sm:$0xff]  }
   0x4   :  { %v77_v9 = vmax.f32 %v261_v3, 0.0  ;;  %v78_v10 = vmax.f32 %v262_v4, 0.0  ;;  %v75_v11 = vmax.f32 %v257_v5, 0.0  ;;  %v76_v12 = vmax.f32 %v258_v6, 0.0  ;;  %v228_v26 = vld [vmem:[%s398_s1 + $0x4] sm:$0xf] }
   0x5   :  { %v73_v16 = vmax.f32 %v253_v7, 0.0  ;;  %v74_v20 = vmax.f32 %v254_v8, 0.0  ;;  %v265_v22 = vunpack.c.l.bf16 %v283_v14  ;;  %v266_v23 = vunpack.c.h.bf16 %v283_v14  ;;  %v133_v31 = vld [vmem:[%s399_s2] sm:$0xff]  ;;  %v134_v47 = vld [vmem:[%s399_s2 + $0x8] sm:$0xff] }
   0x6   :  { %v88_v15 = vpack.c.bf16 %v78_v10, %v77_v9  ;;  %v87_v19 = vpack.c.bf16 %v76_v12, %v75_v11  ;;  %v71_v28 = vmax.f32 %v249_v17, 0.0  ;;  %v72_v29 = vmax.f32 %v250_v18, 0.0  ;;  %v147_v36 = vld [vmem:[%s400_s3] sm:$0xff]  ;;  %137 = vperm.xlu0 %285, %v133_v31   ;;  %v148_v51 = vld [vmem:[%s400_s3 + $0x8] sm:$0xff] }
   0x7   :  { %v79_v24 = vmax.f32 %v265_v22, 0.0  ;;  %v80_v25 = vmax.f32 %v266_v23, 0.0  ;;  %v245_v30 = vunpack.c.l.bf16 %v278_v21  ;;  %v86_v32 = vpack.c.bf16 %v74_v20, %v73_v16  ;;  %151 = vperm.xlu1 %286, %v147_v36   ;;  %v232_v52 = vld [vmem:[%s397_s0] sm:$0xff]   ;;  %v229_v63 = vld [vmem:[%s398_s1 + $0x4] sm:$0xf0] }
   0x8   :  { %105 = vmatpush.bf16.msra.mxu0 %v88_v15  ;;  %v246_v33 = vunpack.c.h.bf16 %v278_v21  ;;  %v221_v37 = vor.u32 %v228_v26, %v218_v27  ;;  %v241_v39 = vunpack.c.l.bf16 %v277_v34  ;;  %v242_v40 = vunpack.c.h.bf16 %v277_v34  ;;  %v216_v62 = vld [vmem:[%s398_s1] sm:$0xf]  ;;  %v167_v2 = vld [vmem:[%s401_s5 + $0x8] sm:$0xff] }
   0x9   :  { %v89_v35 = vpack.c.bf16 %v80_v25, %v79_v24  ;;  %v85_v41 = vpack.c.bf16 %v72_v29, %v71_v28  ;;  %v69_v42 = vmax.f32 %v245_v30, 0.0  ;;  %v237_v49 = vunpack.c.l.bf16 %v276_v44  ;;  %v166_v1 = vld [vmem:[%s401_s5] sm:$0xff] }
   0xa   :  { %v70_v43 = vmax.f32 %v246_v33, 0.0  ;;  %v67_v45 = vmax.f32 %v241_v39, 0.0  ;;  %v68_v46 = vmax.f32 %v242_v40, 0.0  ;;  %v238_v50 = vunpack.c.h.bf16 %v276_v44  ;;  %170 = vperm.xlu2 %287, %v166_v1   ;;  %v230_v20 = vld [vmem:[%s402_s4] sm:$0xff] }
   0xb   :  { %126 = vmatpush.bf16.msra.mxu1 %v89_v35  ;;  %v65_v54 = vmax.f32 %v237_v49, 0.0  ;;  %v233_v56 = vunpack.c.l.bf16 %v232_v52  ;;  %v234_v57 = vunpack.c.h.bf16 %v232_v52  ;;  %v217_v0 = vor.u32 %v229_v63, %v216_v62  ;;  %v268_v23 = vld [vmem:[%s403_s6] sm:$0xff]  }
   0xc   :  { %106 = vmatpush.bf16.msra.mxu0 %v87_v19  ;;  %v84_v48 = vpack.c.bf16 %v70_v43, %v69_v42  ;;  %v83_v53 = vpack.c.bf16 %v68_v46, %v67_v45  ;;  %v66_v55 = vmax.f32 %v238_v50, 0.0  ;;  %v269_v25 = vunpack.c.l.bf16 %v268_v23 }
   0xd   :  { %v63_v59 = vmax.f32 %v233_v56, 0.0  ;;  %v64_v60 = vmax.f32 %v234_v57, 0.0  ;;  %v270_v26 = vunpack.c.h.bf16 %v268_v23 }
   0xe   :  { %222 = vmatmul.msk.bf16.vlgmr.msra.gmra.mxu1 %vm101_vm0, %v221_v37  ;;  %142 = vperm.xlu0 %285, %v134_v47   ;;  %v82_v58 = vpack.c.bf16 %v66_v55, %v65_v54 }
   0xf   :  { %156 = vperm.xlu1 %286, %v148_v51   ;;  %v81_v61 = vpack.c.bf16 %v64_v60, %v63_v59 }
  0x10   :  { %107 = vmatpush.bf16.msra.mxu0 %v86_v32 }
  0x12   :  { %175 = vperm.xlu2 %287, %v167_v2  }
  0x14   :  { %108 = vmatpush.bf16.msra.mxu0 %v85_v41 }
  0x18   :  { %109 = vmatpush.bf16.msra.mxu0 %v84_v48 }
  0x1c   :  { %110 = vmatpush.bf16.msra.mxu0 %v83_v53 }
  0x20   :  { %111 = vmatpush.bf16.msra.mxu0 %v82_v58 }
  0x24   :  { %112 = vmatpush.bf16.msra.mxu0 %v81_v61 }
  0x27   :  { %113 = vmatmul.bf16.vlgmr.msra.gmra.mxu0 %v217_v0 }
  0x64   :  { %v171_v21 = vpop.permute.xlu2 %170 }
  0x6c   :  { %v176_v27 = vpop.permute.xlu2 %175 }
  0x78   :  { %v138_v4 = vpop.permute.xlu0 %137 }
  0x79   :  { %v152_v6 = vpop.permute.xlu1 %151 }
  0x80   :  { %v143_v12 = vpop.permute.xlu0 %142 }
  0x81   :  { %v157_v15 = vpop.permute.xlu1 %156 }
  0x8b   :  { %v128_v3 = vpop.f32.mrf.mxu1 }
  0x93   :  { %v130_v9 = vpop.f32.mrf.mxu1 }
  0xa4   :  { %v114_v5 = vpop.f32.mrf.mxu0 }
  0xa5   :  { %v129_v7 = vadd.f32 %v128_v3, %v114_v5 }
  0xa7   :  { %v145_v8 = vmul.f32 %v138_v4, %v129_v7 }
  0xa9   :  { %v159_v14 = vadd.f32 %v152_v6, %v145_v8 }
  0xab   :  { %v161_v17 = vmax.f32 %v159_v14, 0.0 }
  0xac   :  { %v116_v10 = vpop.f32.mrf.mxu0 }
  0xad   :  { %v131_v11 = vadd.f32 %v130_v9, %v116_v10 }
  0xaf   :  { %v146_v13 = vmul.f32 %v143_v12, %v131_v11 }
  0xb1   :  { %v160_v16 = vadd.f32 %v157_v15, %v146_v13 }
  0xb3   :  { %v162_v18 = vmax.f32 %v160_v16, 0.0 }
  0xb5   :  { %v165_v19 = vpack.c.bf16 %v162_v18, %v161_v17 }
  0xb7   :  { %193 = vmatpush.bf16.msra.mxu2 %v165_v19 }
  0xba   :  { %227 = vmatmul.msk.bf16.vlgmr.msra.gmra.mxu2 %vm101_vm0, %v230_v20 }
 0x13d   :  { %v195_v22 = vpop.f32.mrf.mxu2 }
 0x13e   :  { %v196_v24 = vadd.f32 %v195_v22, %v171_v21 }
 0x140   :  { %v204_v30 = vadd.f32 %v269_v25, %v196_v24 }
 0x145   :  { %v197_v28 = vpop.f32.mrf.mxu2 }
 0x146   :  { %v198_v29 = vadd.f32 %v197_v28, %v176_v27 }
 0x148   :  { %v205_v31 = vadd.f32 %v270_v26, %v198_v29 }
 0x14a   :  { %v274_v32 = vpack.c.bf16 %v205_v31, %v204_v30 }
 0x14c   :  { %275 = vst [vmem:[%s404_s7] sm:$0xff] %v274_v32  }

// kernel: tile.2
= control target key start
LH: loop header
LB: loop body
LE: loop exit
PB: predicated region body
PF: predicated region fallthrough
CT: control target
= control target key end

     0   :  { %s38_s0 = inlined_call_operand.<no memory space> [shape: f32[], index: 0, kind: input, shape index: {}]   ;;  %s39_s1 = inlined_call_operand.vmem [shape: f32[32,1], index: 1, kind: output, shape index: {}]  }
   0x1   :  { %v2_v0 = vstv %s38_s0 }
   0x2   :  { %3 = vst [vmem:[%s39_s1] sm:$0xff] %v2_v0 }
   0x3   :  { %10 = vst [vmem:[%s39_s1 + $0x8] sm:$0xff] %v2_v0 }
   0x4   :  { %11 = vst [vmem:[%s39_s1 + $0x10] sm:$0xff] %v2_v0 }
   0x5   :  { %12 = vst [vmem:[%s39_s1 + $0x18] sm:$0xff] %v2_v0 }

// kernel: cvae_forward.16
= control target key start
LH: loop header
LB: loop body
LE: loop exit
PB: predicated region body
PF: predicated region fallthrough
CT: control target
= control target key end

     0   :  { %v319_v1 = vmov 0   ;;  %vm112_vm0 = vcmask 130048   ;;  %s428_s1 = inlined_call_operand.vmem [shape: bf16[144,128], index: 1, kind: input, shape index: {}]   ;;  %s429_s0 = inlined_call_operand.vmem [shape: bf16[32,144], index: 0, kind: input, shape index: {}]   ;;  %s430_s2 = inlined_call_operand.vmem [shape: f32[32,1], index: 2, kind: input, shape index: {}]   ;;  %s431_s3 = inlined_call_operand.vmem [shape: f32[32,1], index: 3, kind: input, shape index: {}]   ;;  %s432_s4 = inlined_call_operand.vmem [shape: bf16[32,128], index: 4, kind: output, shape index: {}]  }
   0x1   :  { %v294_v0 = vld [vmem:[%s428_s1 + $0x38] sm:$0xff]  ;;  %317 = vset.pattern.permute.xlu1 %v319_v1  ;;  %316 = vset.pattern.permute.xlu0 %v319_v1  ;;  %v295_v2 = vld [vmem:[%s428_s1 + $0x40] sm:$0xff]  ;;  %v293_v4 = vld [vmem:[%s428_s1 + $0x30] sm:$0xff] }
   0x2   :  { %v283_v3 = vld [vmem:[%s429_s0 + $0x4] sm:$0xf]  ;;  %318 = vset.pattern.permute.xlu2 %v319_v1  ;;  %119 = vmatpush.bf16.msra.mxu0 %v294_v0  ;;  %v233_v5 = vld [vmem:[%s429_s0 + $0x8] sm:$0xf0]  ;;  %v159_v7 = vld [vmem:[%s430_s2 + $0x10] sm:$0xff] }
   0x3   :  { %307 = vmatpush.bf16.msra.mxu2 %v294_v0  ;;  %145 = vmatpush.bf16.msra.mxu1 %v295_v2  ;;  %v236_v6 = vor.u32 %v283_v3, %v233_v5  ;;  %v157_v8 = vld [vmem:[%s430_s2] sm:$0xff]  ;;  %v292_v9 = vld [vmem:[%s428_s1 + $0x28] sm:$0xff]  ;;  %v160_v11 = vld [vmem:[%s430_s2 + $0x18] sm:$0xff] }
   0x4   :  { %173 = vperm.xlu1 %317, %v159_v7   ;;  %163 = vperm.xlu0 %316, %v157_v8   ;;  %v185_v10 = vld [vmem:[%s431_s3] sm:$0xff]  ;;  %v158_v12 = vld [vmem:[%s430_s2 + $0x8] sm:$0xff]  ;;  %v290_v15 = vld [vmem:[%s428_s1 + $0x18] sm:$0xff] }
   0x5   :  { %191 = vperm.xlu2 %318, %v185_v10   ;;  %v291_v13 = vld [vmem:[%s428_s1 + $0x20] sm:$0xff]  ;;  %v186_v14 = vld [vmem:[%s431_s3 + $0x8] sm:$0xff]  ;;  %v285_v16 = vld [vmem:[%s429_s0 + $0x14] sm:$0xf] }
   0x6   :  { %120 = vmatpush.bf16.msra.mxu0 %v293_v4  ;;  %281 = vmatmul.msk.bf16.vlgmr.msra.gmra.mxu1 %vm112_vm0, %v236_v6  ;;  %v241_v17 = vld [vmem:[%s429_s0 + $0x18] sm:$0xf0]  ;;  %v187_v19 = vld [vmem:[%s431_s3 + $0x10] sm:$0xff]  ;;  %v288_v22 = vld [vmem:[%s428_s1 + $0x8] sm:$0xff] }
   0x7   :  { %308 = vmatpush.bf16.msra.mxu2 %v293_v4  ;;  %v188_v18 = vld [vmem:[%s431_s3 + $0x18] sm:$0xff]  ;;  %v289_v20 = vld [vmem:[%s428_s1 + $0x10] sm:$0xff]  ;;  %v244_v21 = vor.u32 %v285_v16, %v241_v17  ;;  %v287_v23 = vld [vmem:[%s428_s1] sm:$0xff] }
   0x8   :  { %v231_v24 = vld [vmem:[%s429_s0] sm:$0xf]  ;;  %v284_v25 = vld [vmem:[%s429_s0 + $0x4] sm:$0xf0]  ;;  %v239_v26 = vld [vmem:[%s429_s0 + $0x10] sm:$0xf] }
   0x9   :  { %v286_v27 = vld [vmem:[%s429_s0 + $0x14] sm:$0xf0]  ;;  %v232_v28 = vor.u32 %v284_v25, %v231_v24 }
   0xa   :  { %121 = vmatpush.bf16.msra.mxu0 %v292_v9  ;;  %v240_v29 = vor.u32 %v286_v27, %v239_v26 }
   0xb   :  { %309 = vmatpush.bf16.msra.mxu2 %v292_v9 }
   0xc   :  { %178 = vperm.xlu1 %317, %v160_v11   ;;  %168 = vperm.xlu0 %316, %v158_v12  }
   0xd   :  { %196 = vperm.xlu2 %318, %v186_v14  }
   0xe   :  { %122 = vmatpush.bf16.msra.mxu0 %v291_v13 }
   0xf   :  { %310 = vmatpush.bf16.msra.mxu2 %v291_v13 }
  0x12   :  { %123 = vmatpush.bf16.msra.mxu0 %v290_v15 }
  0x13   :  { %311 = vmatpush.bf16.msra.mxu2 %v290_v15 }
  0x14   :  { %206 = vperm.xlu1 %317, %v188_v18   ;;  %201 = vperm.xlu0 %316, %v187_v19  }
  0x16   :  { %124 = vmatpush.bf16.msra.mxu0 %v289_v20  ;;  %282 = vmatmul.msk.bf16.gmra.mxu1 %vm112_vm0, %v244_v21 }
  0x17   :  { %312 = vmatpush.bf16.msra.mxu2 %v289_v20 }
  0x1a   :  { %125 = vmatpush.bf16.msra.mxu0 %v288_v22 }
  0x1b   :  { %313 = vmatpush.bf16.msra.mxu2 %v288_v22 }
  0x1e   :  { %126 = vmatpush.bf16.msra.mxu0 %v287_v23 }
  0x1f   :  { %314 = vmatpush.bf16.msra.mxu2 %v287_v23 }
  0x21   :  { %127 = vmatmul.bf16.vlgmr.msra.gmra.mxu0 %v232_v28 }
  0x22   :  { %132 = vmatmul.bf16.vlgmr.msra.gmra.mxu2 %v240_v29 }
  0x5f   :  { %v192_v35 = vpop.permute.xlu2 %191 }
  0x67   :  { %v197_v47 = vpop.permute.xlu2 %196 }
  0x76   :  { %v164_v32 = vpop.permute.xlu0 %163  ;;  %v174_v33 = vpop.permute.xlu1 %173 }
  0x7e   :  { %v169_v38 = vpop.permute.xlu0 %168  ;;  %v179_v41 = vpop.permute.xlu1 %178 }
  0x83   :  { %v147_v30 = vpop.f32.mrf.mxu1 }
  0x86   :  { %v202_v55 = vpop.permute.xlu0 %201  ;;  %v207_v59 = vpop.permute.xlu1 %206 }
  0x8b   :  { %v149_v31 = vpop.f32.mrf.mxu1 }
  0x93   :  { %v152_v37 = vpop.f32.mrf.mxu1 }
  0x9b   :  { %v154_v50 = vpop.f32.mrf.mxu1 }
  0x9e   :  { %v128_v34 = vpop.f32.mrf.mxu0 }
  0x9f   :  { %v148_v36 = vadd.f32 %v147_v30, %v128_v34 }
  0xa1   :  { %v181_v40 = vmul.f32 %v164_v32, %v148_v36 }
  0xa3   :  { %v209_v45 = vadd.f32 %v192_v35, %v181_v40 }
  0xa5   :  { %v133_v39 = vpop.f32.mrf.mxu2  ;;  %v213_v52 = vmax.f32 %v209_v45, 0.0 }
  0xa6   :  { %v130_v42 = vpop.f32.mrf.mxu0  ;;  %v153_v43 = vadd.f32 %v152_v37, %v133_v39 }
  0xa7   :  { %v150_v44 = vadd.f32 %v149_v31, %v130_v42 }
  0xa8   :  { %v183_v48 = vmul.f32 %v174_v33, %v153_v43 }
  0xa9   :  { %v182_v46 = vmul.f32 %v169_v38, %v150_v44 }
  0xaa   :  { %v211_v56 = vadd.f32 %v202_v55, %v183_v48 }
  0xab   :  { %v210_v49 = vadd.f32 %v197_v47, %v182_v46 }
  0xac   :  { %v215_v61 = vmax.f32 %v211_v56, 0.0 }
  0xad   :  { %v135_v51 = vpop.f32.mrf.mxu2  ;;  %v214_v53 = vmax.f32 %v210_v49, 0.0 }
  0xae   :  { %v155_v54 = vadd.f32 %v154_v50, %v135_v51 }
  0xaf   :  { %v299_v57 = vpack.c.bf16 %v214_v53, %v213_v52 }
  0xb0   :  { %v184_v58 = vmul.f32 %v179_v41, %v155_v54 }
  0xb1   :  { %300 = vst [vmem:[%s432_s4] sm:$0xff] %v299_v57  }
  0xb2   :  { %v212_v60 = vadd.f32 %v207_v59, %v184_v58 }
  0xb4   :  { %v216_v62 = vmax.f32 %v212_v60, 0.0 }
  0xb6   :  { %v304_v63 = vpack.c.bf16 %v216_v62, %v215_v61 }
  0xb8   :  { %306 = vst [vmem:[%s432_s4 + $0x8] sm:$0xff] %v304_v63  }

// kernel: cvae_forward.17
= control target key start
LH: loop header
LB: loop body
LE: loop exit
PB: predicated region body
PF: predicated region fallthrough
CT: control target
= control target key end

     0   :  { %s541_s9 = smov 0   ;;  %s543_s10 = smov 0   ;;  %s630_s0 = inlined_call_operand.vmem [shape: bf16[12,72], index: 0, kind: input, shape index: {}]   ;;  %s631_s1 = inlined_call_operand.vmem [shape: bf16[72,512], index: 1, kind: input, shape index: {}]   ;;  %s632_s2 = inlined_call_operand.vmem [shape: f32[12,512], index: 2, kind: output, shape index: {}]  }
   0x1   :  { %s545_s11 = smov 0  }
   0x2 LB: > { %s406_s12 = sadd.s32 4294967295, %s524_s11   ;;  %s558_s13 = sadd.s32 1, %s524_s11   ;;  %s524_s11 = sphi %s545_s11, %s636_s11   ;;  %s520_s10 = sphi %s543_s10, %s635_s10   ;;  %s516_s9 = sphi %s541_s9, %s634_s9  }
   0x3   : > { %s37_s14 = ssub.s32 %s524_s11, %s558_s13  ;;  %s40_s15 = sadd.s32 1, %s520_s10 }
   0x4   : > { %p38_p0 = scmp.eq.s32.totalorder %s37_s14, 0  ;;  %p47_p1 = scmp.ne.s32.totalorder %s520_s10, %s516_s9 }
   0x5   : > { %p48_p2 = scmp.eq.s32.totalorder %s524_s11, 0  ;;  %p77_p3 = scmp.eq.s32.totalorder %s406_s12, 1 }
   0x6   : > { %s569_s16 = scalar_select %p38_p0, %s520_s10, %s40_s15  }
   0x7   : > { %p49_p4 = por %p48_p2, %p47_p1  ;;  %p571_p5 = por %p77_p3, %p47_p1 }
   0x8   : > { %p409_p6 = scmp.ge.s32.totalorder %s524_s11, 2 }
   0xa   : > { %102 = sbr.rel (%p409_p6) target bundleno = 28 (0x1c), region = 20 }
   0xf   : > { %105 = sbr.rel (!%p49_p4) target bundleno = 28 (0x1c), region = 24  ;;  %s107_s18 = sand.u32 (%p49_p4), 1, %s520_s10  }
  0x10   : > { %s457_s19 = sshll.u32 (%p49_p4), %s524_s11, 3  ;;  %s468_s20 = smul.u32 (%p49_p4), 72, %s107_s18 }
  0x11   : > { %s112_s23 = scalar_lea.vmem (%p49_p4), %s631_s1, %s457_s19 }
  0x12   : > { %v157_v0 = vld [vmem:[%s112_s23] sm:$0xff] (%p49_p4)  ;;  %v159_v1 = vld [vmem:[%s112_s23 + $0x10] sm:$0xff] (%p49_p4)  ;;  %s109_s24 = scalar_lea.vmem (%p49_p4), [#allocation2], %s468_s20 }
  0x13   : > { %v161_v2 = vld [vmem:[%s112_s23 + $0x20] sm:$0xff] (%p49_p4)  ;;  %158 = vst [vmem:[%s109_s24] sm:$0xff] (%p49_p4), %v157_v0  ;;  %v163_v3 = vld [vmem:[%s112_s23 + $0x30] sm:$0xff] (%p49_p4) }
  0x14   : > { %160 = vst [vmem:[%s109_s24 + $0x8] sm:$0xff] %v159_v1  ;;  %v165_v4 = vld [vmem:[%s112_s23 + $0x40] sm:$0xff]  ;;  %v167_v5 = vld [vmem:[%s112_s23 + $0x50] sm:$0xff] }
  0x15   : > { %162 = vst [vmem:[%s109_s24 + $0x10] sm:$0xff] %v161_v2  ;;  %v169_v6 = vld [vmem:[%s112_s23 + $0x60] sm:$0xff]  ;;  %v171_v7 = vld [vmem:[%s112_s23 + $0x70] sm:$0xff] }
  0x16   : > { %164 = vst [vmem:[%s109_s24 + $0x18] sm:$0xff] %v163_v3  ;;  %v173_v8 = vld [vmem:[%s112_s23 + $0x80] sm:$0xff] }
  0x17   : > { %166 = vst [vmem:[%s109_s24 + $0x20] sm:$0xff] %v165_v4 }
  0x18   : > { %168 = vst [vmem:[%s109_s24 + $0x28] sm:$0xff] %v167_v5 }
  0x19   : > { %170 = vst [vmem:[%s109_s24 + $0x30] sm:$0xff] %v169_v6 }
  0x1a   : > { %172 = vst [vmem:[%s109_s24 + $0x38] sm:$0xff] %v171_v7 }
  0x1b   : > { %174 = vst [vmem:[%s109_s24 + $0x40] sm:$0xff] %v173_v8 }
  0x1c PF: > { %p412_p7 = scmp.ge.s32.totalorder %s524_s11, 1  ;;  %p179_p8 = scmp.lt.s32.totalorder %s524_s11, 3 }
  0x1e   : > { %p180_p9 = pnand %p412_p7, %p179_p8 }
  0x1f   : > { %s186_s25 = sand.u32 (!%p180_p9), 1, %s516_s9  }
  0x20   : > { %183 = sbr.rel (%p180_p9) target bundleno = 213 (0xd5), region = 62  ;;  %s413_s4 = sshll.u32 (!%p180_p9), %s186_s25, 5 }
  0x21   : > { %s469_s26 = smul.u32 (!%p180_p9), 72, %s186_s25  ;;  %s205_s5 = scalar_lea.vmem (!%p180_p9), [#allocation3], %s413_s4 }
  0x23   : > { %s586_s27 = scalar_lea.vmem (!%p180_p9), [#allocation2], %s469_s26 }
  0x25   : > { %v219_v9 = vld [vmem:[%s586_s27 + $0x40] sm:$0xff]  ;;  %vm274_vm0 = vcmask 1043456   ;;  %v444_v12 = vld [vmem:[%s586_s27 + $0x30] sm:$0xf]  ;;  %v466_v15 = vld [vmem:[%s586_s27 + $0x34] sm:$0xf0] }
  0x26   : > { %v250_v10 = vunpack.c.l.b16 %v219_v9  ;;  %v251_v11 = vunpack.c.h.b16 %v219_v9  ;;  %v465_v16 = vld [vmem:[%s586_s27 + $0x34] sm:$0xf]  ;;  %v446_v17 = vld [vmem:[%s586_s27 + $0x38] sm:$0xf0]  ;;  %v445_v20 = vor.u32 %v466_v15, %v444_v12  ;;  %v436_v22 = vld [vmem:[%s586_s27 + $0x20] sm:$0xf] }
  0x27   : > { %v449_v21 = vor.u32 %v465_v16, %v446_v17  ;;  %v464_v23 = vld [vmem:[%s586_s27 + $0x24] sm:$0xf0]  ;;  %v463_v24 = vld [vmem:[%s586_s27 + $0x24] sm:$0xf]  ;;  %v438_v25 = vld [vmem:[%s586_s27 + $0x28] sm:$0xf0] }
  0x28   : > { %v260_v13 = vpack.c.b16 %v250_v10, %v250_v10  ;;  %v261_v14 = vpack.c.b16 %v251_v11, %v251_v11  ;;  %v437_v26 = vor.u32 %v464_v23, %v436_v22  ;;  %v441_v27 = vor.u32 %v463_v24, %v438_v25  ;;  %v428_v28 = vld [vmem:[%s586_s27 + $0x10] sm:$0xf]  ;;  %v462_v29 = vld [vmem:[%s586_s27 + $0x14] sm:$0xf0]  ;;  %v461_v30 = vld [vmem:[%s586_s27 + $0x14] sm:$0xf] }
  0x29   : > { %v430_v31 = vld [vmem:[%s586_s27 + $0x18] sm:$0xf0]  ;;  %v429_v32 = vor.u32 %v462_v29, %v428_v28  ;;  %v420_v34 = vld [vmem:[%s586_s27] sm:$0xf]  ;;  %v460_v35 = vld [vmem:[%s586_s27 + $0x4] sm:$0xf0] }
  0x2a   : > { %v276_v18 = vsel %vm274_vm0, %v260_v13, 0  ;;  %v279_v19 = vsel %vm274_vm0, %v261_v14, 0  ;;  %v433_v33 = vor.u32 %v461_v30, %v430_v31  ;;  %v459_v36 = vld [vmem:[%s586_s27 + $0x4] sm:$0xf]  ;;  %v422_v37 = vld [vmem:[%s586_s27 + $0x8] sm:$0xf0]  ;;  %v421_v38 = vor.u32 %v460_v35, %v420_v34 }
  0x2b   : > { %284 = vmatpush.bf16.msra.mxu0 %v276_v18  ;;  %298 = vmatpush.bf16.msra.mxu1 %v279_v19  ;;  %v425_v39 = vor.u32 %v459_v36, %v422_v37  ;;  %v416_v40 = vld [vmem:[%s630_s0] sm:$0xf]  ;;  %v458_v41 = vld [vmem:[%s630_s0] sm:$0x30]  ;;  %vm270_vm1 = vcmask 588800   ;;  %s467_s6 = sshll.u32 (%p571_p5), %s406_s12, 4 }
  0x2c   : > { %v417_v42 = vor.u32 %v458_v41, %v416_v40  ;;  %s326_s9 = scalar_lea.vmem (%p571_p5), %s632_s2, %s467_s6 }
  0x2f   : > { %285 = vmatpush.bf16.msra.mxu0 %v445_v20  ;;  %299 = vmatpush.bf16.msra.mxu1 %v449_v21 }
  0x33   : > { %286 = vmatpush.bf16.msra.mxu0 %v437_v26  ;;  %300 = vmatpush.bf16.msra.mxu1 %v441_v27 }
  0x37   : > { %287 = vmatpush.bf16.msra.mxu0 %v429_v32  ;;  %301 = vmatpush.bf16.msra.mxu1 %v433_v33 }
  0x3b   : > { %288 = vmatpush.bf16.msra.mxu0 %v421_v38  ;;  %302 = vmatpush.bf16.msra.mxu1 %v425_v39 }
  0x3e   : > { %450 = vmatmul.msk.bf16.vlgmr.msra.gmra.mxu0 %vm270_vm1, %v417_v42  ;;  %451 = vmatmul.msk.bf16.vlgmr.msra.gmra.mxu1 %vm270_vm1, %v417_v42 }
  0xbb   : > { %v290_v43 = vpop.f32.mrf.mxu0  ;;  %v304_v44 = vpop.f32.mrf.mxu1 }
  0xbc   : > { %494 = vtanh.f32 %v290_v43 }
  0xbd   : > { %496 = vtanh.f32 %v304_v44 }
  0xc2   : > { %v495_v45 = vpop.eup %494 }
  0xc3   : > { %v497_v46 = vpop.eup %496  ;;  %313 = vst [vmem:[%s205_s5] sm:$0xff] %v495_v45  ;;  %v292_v47 = vpop.f32.mrf.mxu0 }
  0xc4   : > { %v306_v48 = vpop.f32.mrf.mxu1  ;;  %314 = vst [vmem:[%s205_s5 + $0x8] sm:$0xff] %v497_v46  ;;  %498 = vtanh.f32 %v292_v47 }
  0xc5   : > { %500 = vtanh.f32 %v306_v48 }
  0xc8   : > { %323 = sbr.rel (!%p571_p5) target bundleno = 213 (0xd5), region = 70 }
  0xca   : > { %v499_v49 = vpop.eup %498  ;;  %v339_v51 = vld [vmem:[%s205_s5] sm:$0xff] (%p571_p5) }
  0xcb   : > { %v501_v50 = vpop.eup %500  ;;  %315 = vst [vmem:[%s205_s5 + $0x10] sm:$0xf] %v499_v49  ;;  %v341_v52 = vld [vmem:[%s205_s5 + $0x8] sm:$0xff] (%p571_p5) }
  0xcc   : > { %316 = vst [vmem:[%s205_s5 + $0x18] sm:$0xf] %v501_v50 }
  0xcd   : > { %340 = vst [vmem:[%s326_s9] sm:$0xff] %v339_v51 }
  0xce   : > { %342 = vst [vmem:[%s326_s9 + $0x8] sm:$0xff] %v341_v52 }
  0xd2   : > { %v343_v53 = vld [vmem:[%s205_s5 + $0x10] sm:$0xff] }
  0xd3   : > { %v345_v54 = vld [vmem:[%s205_s5 + $0x18] sm:$0xff]  ;;  %344 = vst [vmem:[%s326_s9 + $0x20] sm:$0xff] %v343_v53 }
  0xd4   : > { %346 = vst [vmem:[%s326_s9 + $0x28] sm:$0xff] %v345_v54 }
  0xd5 PF: > { %p9_p10 = scmp.ge.s32.totalorder %s558_s13, 4   ;;  %s634_s9 = smov %s520_s10 }
  0xd6   : > { %s635_s10 = smov %s569_s16  ;;  %s636_s11 = smov %s558_s13 }
  0xd7   :  { %11 = sbr.rel (!%p9_p10) target bundleno = 2 (0x2), region = 124 }

// kernel: cvae_forward.13
= control target key start
LH: loop header
LB: loop body
LE: loop exit
PB: predicated region body
PF: predicated region fallthrough
CT: control target
= control target key end

     0   :  { %s19610_s1 = inlined_call_operand.vmem [shape: bf16[1024,2048], index: 1, kind: input, shape index: {}]   ;;  %s19611_s0 = inlined_call_operand.vmem [shape: bf16[8,1024], index: 0, kind: input, shape index: {}]   ;;  %s19612_s2 = inlined_call_operand.vmem [shape: f32[1,2048], index: 2, kind: input, shape index: {}]   ;;  %s19613_s3 = inlined_call_operand.vmem [shape: f32[8,2048], index: 3, kind: output, shape index: {}]  }
   0x1   :  { %v8360_v0 = vld [vmem:[%s19610_s1 + $0x380] sm:$0xf] }
   0x2   :  { %v12126_v1 = vld [vmem:[%s19610_s1 + $0x3bc] sm:$0xf0] }
   0x3   :  { %v8872_v2 = vld [vmem:[%s19610_s1 + $0x780] sm:$0xf]  ;;  %v8361_v3 = vor.u32 %v12126_v1, %v8360_v0 }
   0x4   :  { %v12254_v4 = vld [vmem:[%s19610_s1 + $0x7bc] sm:$0xf0] }
   0x5   :  { %v9384_v5 = vld [vmem:[%s19610_s1 + $0xb80] sm:$0xf]  ;;  %v8873_v7 = vor.u32 %v12254_v4, %v8872_v2  ;;  %6226 = vmatpush.bf16.msra.mxu0 %v8361_v3 }
   0x6   :  { %v12382_v6 = vld [vmem:[%s19610_s1 + $0xbbc] sm:$0xf0] }
   0x7   :  { %v9385_v8 = vor.u32 %v12382_v6, %v9384_v5  ;;  %v9896_v9 = vld [vmem:[%s19610_s1 + $0xf80] sm:$0xf]  ;;  %6239 = vmatpush.bf16.msra.mxu1 %v8873_v7 }
   0x8   :  { %v12510_v10 = vld [vmem:[%s19610_s1 + $0xfbc] sm:$0xf0] }
   0x9   :  { %v8296_v11 = vld [vmem:[%s19610_s1 + $0x300] sm:$0xf]  ;;  %v9897_v12 = vor.u32 %v12510_v10, %v9896_v9  ;;  %6252 = vmatpush.bf16.msra.mxu2 %v9385_v8 }
   0xa   :  { %v12110_v13 = vld [vmem:[%s19610_s1 + $0x33c] sm:$0xf0] }
   0xb   :  { %v8808_v14 = vld [vmem:[%s19610_s1 + $0x700] sm:$0xf]  ;;  %v8297_v16 = vor.u32 %v12110_v13, %v8296_v11  ;;  %6265 = vmatpush.bf16.msra.mxu3 %v9897_v12 }
   0xc   :  { %v12238_v15 = vld [vmem:[%s19610_s1 + $0x73c] sm:$0xf0] }
   0xd   :  { %v8809_v17 = vor.u32 %v12238_v15, %v8808_v14  ;;  %v9320_v18 = vld [vmem:[%s19610_s1 + $0xb00] sm:$0xf]  ;;  %6227 = vmatpush.bf16.msra.mxu0 %v8297_v16 }
   0xe   :  { %v12366_v19 = vld [vmem:[%s19610_s1 + $0xb3c] sm:$0xf0] }
   0xf   :  { %v9832_v20 = vld [vmem:[%s19610_s1 + $0xf00] sm:$0xf]  ;;  %v9321_v21 = vor.u32 %v12366_v19, %v9320_v18  ;;  %6240 = vmatpush.bf16.msra.mxu1 %v8809_v17 }
  0x10   :  { %v12494_v22 = vld [vmem:[%s19610_s1 + $0xf3c] sm:$0xf0] }
  0x11   :  { %v8232_v23 = vld [vmem:[%s19610_s1 + $0x280] sm:$0xf]  ;;  %v9833_v25 = vor.u32 %v12494_v22, %v9832_v20  ;;  %6253 = vmatpush.bf16.msra.mxu2 %v9321_v21 }
  0x12   :  { %v12094_v24 = vld [vmem:[%s19610_s1 + $0x2bc] sm:$0xf0] }
  0x13   :  { %v8744_v26 = vld [vmem:[%s19610_s1 + $0x680] sm:$0xf]  ;;  %v8233_v29 = vor.u32 %v12094_v24, %v8232_v23  ;;  %6266 = vmatpush.bf16.msra.mxu3 %v9833_v25 }
  0x14   :  { %v12222_v27 = vld [vmem:[%s19610_s1 + $0x6bc] sm:$0xf0] }
  0x15   :  { %v9256_v28 = vld [vmem:[%s19610_s1 + $0xa80] sm:$0xf]  ;;  %v8745_v33 = vor.u32 %v12222_v27, %v8744_v26  ;;  %6228 = vmatpush.bf16.msra.mxu0 %v8233_v29 }
  0x16   :  { %v12350_v30 = vld [vmem:[%s19610_s1 + $0xabc] sm:$0xf0] }
  0x17   :  { %v9768_v31 = vld [vmem:[%s19610_s1 + $0xe80] sm:$0xf]  ;;  %v9257_v34 = vor.u32 %v12350_v30, %v9256_v28  ;;  %6241 = vmatpush.bf16.msra.mxu1 %v8745_v33 }
  0x18   :  { %v12478_v32 = vld [vmem:[%s19610_s1 + $0xebc] sm:$0xf0] }
  0x19   :  { %v8168_v35 = vld [vmem:[%s19610_s1 + $0x200] sm:$0xf]  ;;  %v9769_v38 = vor.u32 %v12478_v32, %v9768_v31  ;;  %6254 = vmatpush.bf16.msra.mxu2 %v9257_v34 }
  0x1a   :  { %v12078_v36 = vld [vmem:[%s19610_s1 + $0x23c] sm:$0xf0] }
  0x1b   :  { %v8680_v37 = vld [vmem:[%s19610_s1 + $0x600] sm:$0xf]  ;;  %v8169_v44 = vor.u32 %v12078_v36, %v8168_v35  ;;  %6267 = vmatpush.bf16.msra.mxu3 %v9769_v38 }
  0x1c   :  { %v12206_v39 = vld [vmem:[%s19610_s1 + $0x63c] sm:$0xf0] }
  0x1d   :  { %v9192_v40 = vld [vmem:[%s19610_s1 + $0xa00] sm:$0xf]  ;;  %v8681_v45 = vor.u32 %v12206_v39, %v8680_v37  ;;  %6229 = vmatpush.bf16.msra.mxu0 %v8169_v44 }
  0x1e   :  { %v12334_v41 = vld [vmem:[%s19610_s1 + $0xa3c] sm:$0xf0] }
  0x1f   :  { %v9704_v42 = vld [vmem:[%s19610_s1 + $0xe00] sm:$0xf]  ;;  %v9193_v46 = vor.u32 %v12334_v41, %v9192_v40  ;;  %6242 = vmatpush.bf16.msra.mxu1 %v8681_v45 }
  0x20   :  { %v12462_v43 = vld [vmem:[%s19610_s1 + $0xe3c] sm:$0xf0] }
  0x21   :  { %v8104_v47 = vld [vmem:[%s19610_s1 + $0x180] sm:$0xf]  ;;  %v9705_v50 = vor.u32 %v12462_v43, %v9704_v42  ;;  %6255 = vmatpush.bf16.msra.mxu2 %v9193_v46 }
  0x22   :  { %v12062_v48 = vld [vmem:[%s19610_s1 + $0x1bc] sm:$0xf0] }
  0x23   :  { %v8616_v49 = vld [vmem:[%s19610_s1 + $0x580] sm:$0xf]  ;;  %v8105_v56 = vor.u32 %v12062_v48, %v8104_v47  ;;  %6268 = vmatpush.bf16.msra.mxu3 %v9705_v50 }
  0x24   :  { %v12190_v51 = vld [vmem:[%s19610_s1 + $0x5bc] sm:$0xf0] }
  0x25   :  { %v9128_v52 = vld [vmem:[%s19610_s1 + $0x980] sm:$0xf]  ;;  %v8617_v57 = vor.u32 %v12190_v51, %v8616_v49  ;;  %6230 = vmatpush.bf16.msra.mxu0 %v8105_v56 }
  0x26   :  { %v12318_v53 = vld [vmem:[%s19610_s1 + $0x9bc] sm:$0xf0] }
  0x27   :  { %v9640_v54 = vld [vmem:[%s19610_s1 + $0xd80] sm:$0xf]  ;;  %v9129_v58 = vor.u32 %v12318_v53, %v9128_v52  ;;  %6243 = vmatpush.bf16.msra.mxu1 %v8617_v57 }
  0x28   :  { %v12446_v55 = vld [vmem:[%s19610_s1 + $0xdbc] sm:$0xf0] }
  0x29   :  { %v8040_v59 = vld [vmem:[%s19610_s1 + $0x100] sm:$0xf]  ;;  %v9641_v62 = vor.u32 %v12446_v55, %v9640_v54  ;;  %6256 = vmatpush.bf16.msra.mxu2 %v9129_v58  ;;  %v15_v58 = vld [vmem:[%s19611_s0 + $0x8] sm:$0xff] }
  0x2a   :  { %v12046_v60 = vld [vmem:[%s19610_s1 + $0x13c] sm:$0xf0] }
  0x2b   :  { %v8552_v61 = vld [vmem:[%s19610_s1 + $0x500] sm:$0xf]  ;;  %v8041_v4 = vor.u32 %v12046_v60, %v8040_v59  ;;  %6269 = vmatpush.bf16.msra.mxu3 %v9641_v62 }
  0x2c   :  { %v12174_v63 = vld [vmem:[%s19610_s1 + $0x53c] sm:$0xf0] }
  0x2d   :  { %v9064_v0 = vld [vmem:[%s19610_s1 + $0x900] sm:$0xf]  ;;  %v8553_v5 = vor.u32 %v12174_v63, %v8552_v61  ;;  %6231 = vmatpush.bf16.msra.mxu0 %v8041_v4  ;;  %v1084_v63 = vunpack.c.l.b16 %v15_v58 }
  0x2e   :  { %v12302_v1 = vld [vmem:[%s19610_s1 + $0x93c] sm:$0xf0] }
  0x2f   :  { %v9576_v2 = vld [vmem:[%s19610_s1 + $0xd00] sm:$0xf]  ;;  %v9065_v6 = vor.u32 %v12302_v1, %v9064_v0  ;;  %6244 = vmatpush.bf16.msra.mxu1 %v8553_v5  ;;  %v1085_v0 = vunpack.c.h.b16 %v15_v58  ;;  %v13322_v4 = vpack.c.b16 %v1084_v63, %v1084_v63 }
  0x30   :  { %v12430_v3 = vld [vmem:[%s19610_s1 + $0xd3c] sm:$0xf0] }
  0x31   :  { %v7976_v7 = vld [vmem:[%s19610_s1 + $0x80] sm:$0xf]  ;;  %v9577_v10 = vor.u32 %v12430_v3, %v9576_v2  ;;  %6257 = vmatpush.bf16.msra.mxu2 %v9065_v6  ;;  %v13327_v6 = vpack.c.b16 %v1085_v0, %v1085_v0 }
  0x32   :  { %v12030_v8 = vld [vmem:[%s19610_s1 + $0xbc] sm:$0xf0] }
  0x33   :  { %v8488_v9 = vld [vmem:[%s19610_s1 + $0x480] sm:$0xf]  ;;  %v7977_v16 = vor.u32 %v12030_v8, %v7976_v7  ;;  %6270 = vmatpush.bf16.msra.mxu3 %v9577_v10 }
  0x34   :  { %v12158_v11 = vld [vmem:[%s19610_s1 + $0x4bc] sm:$0xf0] }
  0x35   :  { %v9000_v12 = vld [vmem:[%s19610_s1 + $0x880] sm:$0xf]  ;;  %v8489_v19 = vor.u32 %v12158_v11, %v8488_v9  ;;  %6232 = vmatpush.bf16.msra.mxu0 %v7977_v16 }
  0x36   :  { %v12286_v13 = vld [vmem:[%s19610_s1 + $0x8bc] sm:$0xf0] }
  0x37   :  { %v9512_v14 = vld [vmem:[%s19610_s1 + $0xc80] sm:$0xf]  ;;  %v9001_v20 = vor.u32 %v12286_v13, %v9000_v12  ;;  %6245 = vmatpush.bf16.msra.mxu1 %v8489_v19 }
  0x38   :  { %v12414_v15 = vld [vmem:[%s19610_s1 + $0xcbc] sm:$0xf0] }
  0x39   :  { %v7912_v17 = vld [vmem:[%s19610_s1] sm:$0xf]  ;;  %v9513_v24 = vor.u32 %v12414_v15, %v9512_v14  ;;  %6258 = vmatpush.bf16.msra.mxu2 %v9001_v20 }
  0x3a   :  { %v12014_v18 = vld [vmem:[%s19610_s1 + $0x3c] sm:$0xf0] }
  0x3b   :  { %v8424_v21 = vld [vmem:[%s19610_s1 + $0x400] sm:$0xf]  ;;  %v7913_v31 = vor.u32 %v12014_v18, %v7912_v17  ;;  %6271 = vmatpush.bf16.msra.mxu3 %v9513_v24 }
  0x3c   :  { %v12142_v22 = vld [vmem:[%s19610_s1 + $0x43c] sm:$0xf0] }
  0x3d   :  { %v8936_v23 = vld [vmem:[%s19610_s1 + $0x800] sm:$0xf]  ;;  %v8425_v35 = vor.u32 %v12142_v22, %v8424_v21  ;;  %6233 = vmatpush.bf16.msra.mxu0 %v7913_v31 }
  0x3e   :  { %v12270_v25 = vld [vmem:[%s19610_s1 + $0x83c] sm:$0xf0] }
  0x3f   :  { %v9448_v26 = vld [vmem:[%s19610_s1 + $0xc00] sm:$0xf]  ;;  %v8937_v36 = vor.u32 %v12270_v25, %v8936_v23  ;;  %6246 = vmatpush.bf16.msra.mxu1 %v8425_v35 }
  0x40   :  { %v12398_v27 = vld [vmem:[%s19610_s1 + $0xc3c] sm:$0xf0] }
  0x41   :  { %v10408_v28 = vld [vmem:[%s19610_s1 + $0x1380] sm:$0xf]  ;;  %v9449_v39 = vor.u32 %v12398_v27, %v9448_v26  ;;  %6259 = vmatpush.bf16.msra.mxu2 %v8937_v36 }
  0x42   :  { %v12638_v29 = vld [vmem:[%s19610_s1 + $0x13bc] sm:$0xf0] }
  0x43   :  { %v10920_v30 = vld [vmem:[%s19610_s1 + $0x1780] sm:$0xf]  ;;  %v10409_v40 = vor.u32 %v12638_v29, %v10408_v28  ;;  %6272 = vmatpush.bf16.msra.mxu3 %v9449_v39 }
  0x44   :  { %v12766_v32 = vld [vmem:[%s19610_s1 + $0x17bc] sm:$0xf0]  ;;  %6260 = vmatmul.bf16.vlgmr.msra.gmra.mxu2 %v13322_v4 }
  0x45   :  { %v11432_v33 = vld [vmem:[%s19610_s1 + $0x1b80] sm:$0xf]  ;;  %v10921_v41 = vor.u32 %v12766_v32, %v10920_v30  ;;  %6278 = vmatpush.bf16.msrb.mxu0 %v10409_v40 }
  0x46   :  { %v12894_v34 = vld [vmem:[%s19610_s1 + $0x1bbc] sm:$0xf0]  ;;  %6273 = vmatmul.bf16.vlgmr.msra.gmra.mxu3 %v13327_v6 }
  0x47   :  { %v11944_v37 = vld [vmem:[%s19610_s1 + $0x1f80] sm:$0xf]  ;;  %v11433_v42 = vor.u32 %v12894_v34, %v11432_v33  ;;  %6291 = vmatpush.bf16.msrb.mxu1 %v10921_v41 }
  0x48   :  { %v13022_v38 = vld [vmem:[%s19610_s1 + $0x1fbc] sm:$0xf0] }
  0x49   :  { %v10344_v43 = vld [vmem:[%s19610_s1 + $0x1300] sm:$0xf]  ;;  %v11945_v46 = vor.u32 %v13022_v38, %v11944_v37  ;;  %6304 = vmatpush.bf16.msrb.mxu2 %v11433_v42 }
  0x4a   :  { %v12622_v44 = vld [vmem:[%s19610_s1 + $0x133c] sm:$0xf0] }
  0x4b   :  { %v10856_v45 = vld [vmem:[%s19610_s1 + $0x1700] sm:$0xf]  ;;  %v10345_v52 = vor.u32 %v12622_v44, %v10344_v43  ;;  %6317 = vmatpush.bf16.msrb.mxu3 %v11945_v46 }
  0x4c   :  { %v12750_v47 = vld [vmem:[%s19610_s1 + $0x173c] sm:$0xf0] }
  0x4d   :  { %v11368_v48 = vld [vmem:[%s19610_s1 + $0x1b00] sm:$0xf]  ;;  %v10857_v54 = vor.u32 %v12750_v47, %v10856_v45  ;;  %6279 = vmatpush.bf16.msrb.mxu0 %v10345_v52 }
  0x4e   :  { %v12878_v49 = vld [vmem:[%s19610_s1 + $0x1b3c] sm:$0xf0] }
  0x4f   :  { %v11880_v50 = vld [vmem:[%s19610_s1 + $0x1f00] sm:$0xf]  ;;  %v11369_v55 = vor.u32 %v12878_v49, %v11368_v48  ;;  %6292 = vmatpush.bf16.msrb.mxu1 %v10857_v54 }
  0x50   :  { %v13006_v51 = vld [vmem:[%s19610_s1 + $0x1f3c] sm:$0xf0] }
  0x51   :  { %v10280_v53 = vld [vmem:[%s19610_s1 + $0x1280] sm:$0xf]  ;;  %v11881_v59 = vor.u32 %v13006_v51, %v11880_v50  ;;  %6305 = vmatpush.bf16.msrb.mxu2 %v11369_v55 }
  0x52   :  { %v12606_v56 = vld [vmem:[%s19610_s1 + $0x12bc] sm:$0xf0] }
  0x53   :  { %v10792_v57 = vld [vmem:[%s19610_s1 + $0x1680] sm:$0xf]  ;;  %v10281_v3 = vor.u32 %v12606_v56, %v10280_v53  ;;  %6318 = vmatpush.bf16.msrb.mxu3 %v11881_v59 }
  0x54   :  { %v12734_v60 = vld [vmem:[%s19610_s1 + $0x16bc] sm:$0xf0] }
  0x55   :  { %v11304_v61 = vld [vmem:[%s19610_s1 + $0x1a80] sm:$0xf]  ;;  %v10793_v7 = vor.u32 %v12734_v60, %v10792_v57  ;;  %6280 = vmatpush.bf16.msrb.mxu0 %v10281_v3  ;;  %v17_v3 = vld [vmem:[%s19611_s0 + $0x18] sm:$0xff] }
  0x56   :  { %v12862_v62 = vld [vmem:[%s19610_s1 + $0x1abc] sm:$0xf0] }
  0x57   :  { %v11816_v1 = vld [vmem:[%s19610_s1 + $0x1e80] sm:$0xf]  ;;  %v11305_v8 = vor.u32 %v12862_v62, %v11304_v61  ;;  %6293 = vmatpush.bf16.msrb.mxu1 %v10793_v7 }
  0x58   :  { %v12990_v2 = vld [vmem:[%s19610_s1 + $0x1ebc] sm:$0xf0] }
  0x59   :  { %v14_v5 = vld [vmem:[%s19611_s0] sm:$0xff]  ;;  %v11817_v14 = vor.u32 %v12990_v2, %v11816_v1  ;;  %6306 = vmatpush.bf16.msrb.mxu2 %v11305_v8 }
  0x5a   :  { %v10216_v9 = vld [vmem:[%s19610_s1 + $0x1200] sm:$0xf]  ;;  %v1082_v12 = vunpack.c.l.b16 %v14_v5  ;;  %v1083_v13 = vunpack.c.h.b16 %v14_v5 }
  0x5b   :  { %v12590_v10 = vld [vmem:[%s19610_s1 + $0x123c] sm:$0xf0]  ;;  %6319 = vmatpush.bf16.msrb.mxu3 %v11817_v14  ;;  %v8874_v14 = vld [vmem:[%s19610_s1 + $0x7c0] sm:$0xf0] }
  0x5c   :  { %v10728_v11 = vld [vmem:[%s19610_s1 + $0x1600] sm:$0xf]  ;;  %v13354_v20 = vpack.c.b16 %v1082_v12, %v1082_v12  ;;  %v13357_v21 = vpack.c.b16 %v1083_v13, %v1083_v13  ;;  %v10217_v22 = vor.u32 %v12590_v10, %v10216_v9  ;;  %v16_v9 = vld [vmem:[%s19611_s0 + $0x10] sm:$0xff]  ;;  %v12118_v10 = vld [vmem:[%s19610_s1 + $0x384] sm:$0xf] }
  0x5d   :  { %v12718_v15 = vld [vmem:[%s19610_s1 + $0x163c] sm:$0xf0]  ;;  %v12246_v12 = vld [vmem:[%s19610_s1 + $0x784] sm:$0xf] }
  0x5e   :  { %v11240_v16 = vld [vmem:[%s19610_s1 + $0x1a00] sm:$0xf]  ;;  %v10729_v23 = vor.u32 %v12718_v15, %v10728_v11  ;;  %6234 = vmatmul.bf16.vlgmr.msra.gmra.mxu0 %v13354_v20  ;;  %6247 = vmatmul.bf16.vlgmr.msra.gmra.mxu1 %v13357_v21  ;;  %v8362_v11 = vld [vmem:[%s19610_s1 + $0x3c0] sm:$0xf0] }
  0x5f   :  { %v12846_v17 = vld [vmem:[%s19610_s1 + $0x1a3c] sm:$0xf0]  ;;  %6281 = vmatpush.bf16.msrb.mxu0 %v10217_v22  ;;  %v12374_v15 = vld [vmem:[%s19610_s1 + $0xb84] sm:$0xf] }
  0x60   :  { %v11752_v18 = vld [vmem:[%s19610_s1 + $0x1e00] sm:$0xf]  ;;  %v11241_v24 = vor.u32 %v12846_v17, %v11240_v16  ;;  %6294 = vmatpush.bf16.msrb.mxu1 %v10729_v23  ;;  %v9386_v16 = vld [vmem:[%s19610_s1 + $0xbc0] sm:$0xf0]  ;;  %v1088_v17 = vunpack.c.l.b16 %v17_v3 }
  0x61   :  { %v12974_v19 = vld [vmem:[%s19610_s1 + $0x1e3c] sm:$0xf0]  ;;  %v12502_v22 = vld [vmem:[%s19610_s1 + $0xf84] sm:$0xf] }
  0x62   :  { %v10152_v25 = vld [vmem:[%s19610_s1 + $0x1180] sm:$0xf]  ;;  %v11753_v28 = vor.u32 %v12974_v19, %v11752_v18  ;;  %6307 = vmatpush.bf16.msrb.mxu2 %v11241_v24  ;;  %v9898_v23 = vld [vmem:[%s19610_s1 + $0xfc0] sm:$0xf0]  ;;  %v1086_v24 = vunpack.c.l.b16 %v16_v9 }
  0x63   :  { %v12574_v26 = vld [vmem:[%s19610_s1 + $0x11bc] sm:$0xf0] }
  0x64   :  { %v10664_v27 = vld [vmem:[%s19610_s1 + $0x1580] sm:$0xf]  ;;  %v10153_v34 = vor.u32 %v12574_v26, %v10152_v25  ;;  %6320 = vmatpush.bf16.msrb.mxu3 %v11753_v28  ;;  %v1089_v25 = vunpack.c.h.b16 %v17_v3  ;;  %v1087_v28 = vunpack.c.h.b16 %v16_v9  ;;  %v9706_v3 = vld [vmem:[%s19610_s1 + $0xe40] sm:$0xf0] }
  0x65   :  { %v12702_v29 = vld [vmem:[%s19610_s1 + $0x15bc] sm:$0xf0]  ;;  %v12054_v9 = vld [vmem:[%s19610_s1 + $0x184] sm:$0xf] }
  0x66   :  { %v11176_v30 = vld [vmem:[%s19610_s1 + $0x1980] sm:$0xf]  ;;  %v10665_v35 = vor.u32 %v12702_v29, %v10664_v27  ;;  %6282 = vmatpush.bf16.msrb.mxu0 %v10153_v34  ;;  %v8365_v27 = vor.u32 %v12118_v10, %v8362_v11  ;;  %v8877_v29 = vor.u32 %v12246_v12, %v8874_v14  ;;  %v9901_v34 = vor.u32 %v12502_v22, %v9898_v23  ;;  %v8106_v10 = vld [vmem:[%s19610_s1 + $0x1c0] sm:$0xf0] }
  0x67   :  { %v12830_v31 = vld [vmem:[%s19610_s1 + $0x19bc] sm:$0xf0]  ;;  %v12182_v11 = vld [vmem:[%s19610_s1 + $0x584] sm:$0xf] }
  0x68   :  { %v11688_v32 = vld [vmem:[%s19610_s1 + $0x1d80] sm:$0xf]  ;;  %v11177_v36 = vor.u32 %v12830_v31, %v11176_v30  ;;  %6295 = vmatpush.bf16.msrb.mxu1 %v10665_v35  ;;  %v9389_v30 = vor.u32 %v12374_v15, %v9386_v16  ;;  %v12102_v31 = vld [vmem:[%s19610_s1 + $0x304] sm:$0xf] }
  0x69   :  { %v12958_v33 = vld [vmem:[%s19610_s1 + $0x1dbc] sm:$0xf0]  ;;  %v8810_v35 = vld [vmem:[%s19610_s1 + $0x740] sm:$0xf0] }
  0x6a   :  { %v10088_v37 = vld [vmem:[%s19610_s1 + $0x1100] sm:$0xf]  ;;  %v11689_v40 = vor.u32 %v12958_v33, %v11688_v32  ;;  %6308 = vmatpush.bf16.msrb.mxu2 %v11177_v36  ;;  %v8298_v32 = vld [vmem:[%s19610_s1 + $0x340] sm:$0xf0] }
  0x6b   :  { %v12558_v38 = vld [vmem:[%s19610_s1 + $0x113c] sm:$0xf0]  ;;  %v12230_v33 = vld [vmem:[%s19610_s1 + $0x704] sm:$0xf] }
  0x6c   :  { %v10600_v39 = vld [vmem:[%s19610_s1 + $0x1500] sm:$0xf]  ;;  %v10089_v46 = vor.u32 %v12558_v38, %v10088_v37  ;;  %6321 = vmatpush.bf16.msrb.mxu3 %v11689_v40  ;;  %v12358_v36 = vld [vmem:[%s19610_s1 + $0xb04] sm:$0xf]  ;;  %v13505_v38 = vpack.c.b16 %v1088_v17, %v1088_v17 }
  0x6d   :  { %v12686_v41 = vld [vmem:[%s19610_s1 + $0x153c] sm:$0xf0]  ;;  %v9322_v37 = vld [vmem:[%s19610_s1 + $0xb40] sm:$0xf0] }
  0x6e   :  { %v11112_v42 = vld [vmem:[%s19610_s1 + $0x1900] sm:$0xf]  ;;  %v10601_v47 = vor.u32 %v12686_v41, %v10600_v39  ;;  %6283 = vmatpush.bf16.msrb.mxu0 %v10089_v46  ;;  %v12486_v39 = vld [vmem:[%s19610_s1 + $0xf04] sm:$0xf]  ;;  %v13513_v41 = vpack.c.b16 %v1086_v24, %v1086_v24  ;;  %v9325_v46 = vor.u32 %v12358_v36, %v9322_v37 }
  0x6f   :  { %v12814_v43 = vld [vmem:[%s19610_s1 + $0x193c] sm:$0xf0]  ;;  %v9834_v40 = vld [vmem:[%s19610_s1 + $0xf40] sm:$0xf0] }
  0x70   :  { %v11624_v44 = vld [vmem:[%s19610_s1 + $0x1d00] sm:$0xf]  ;;  %v11113_v48 = vor.u32 %v12814_v43, %v11112_v42  ;;  %6296 = vmatpush.bf16.msrb.mxu1 %v10601_v47  ;;  %v13515_v42 = vpack.c.b16 %v1089_v25, %v1089_v25  ;;  %v8301_v43 = vor.u32 %v12102_v31, %v8298_v32  ;;  %v12086_v47 = vld [vmem:[%s19610_s1 + $0x284] sm:$0xf] }
  0x71   :  { %v12942_v45 = vld [vmem:[%s19610_s1 + $0x1d3c] sm:$0xf0]  ;;  %v12310_v14 = vld [vmem:[%s19610_s1 + $0x984] sm:$0xf] }
  0x72   :  { %v10024_v49 = vld [vmem:[%s19610_s1 + $0x1080] sm:$0xf]  ;;  %v11625_v52 = vor.u32 %v12942_v45, %v11624_v44  ;;  %6309 = vmatpush.bf16.msrb.mxu2 %v11113_v48  ;;  %v13517_v44 = vpack.c.b16 %v1087_v28, %v1087_v28  ;;  %v8813_v45 = vor.u32 %v12230_v33, %v8810_v35  ;;  %v8234_v48 = vld [vmem:[%s19610_s1 + $0x2c0] sm:$0xf0] }
  0x73   :  { %v12542_v50 = vld [vmem:[%s19610_s1 + $0x10bc] sm:$0xf0]  ;;  %v9130_v15 = vld [vmem:[%s19610_s1 + $0x9c0] sm:$0xf0] }
  0x74   :  { %v10536_v51 = vld [vmem:[%s19610_s1 + $0x1480] sm:$0xf]  ;;  %v10025_v59 = vor.u32 %v12542_v50, %v10024_v49  ;;  %6322 = vmatpush.bf16.msrb.mxu3 %v11625_v52  ;;  %v12214_v49 = vld [vmem:[%s19610_s1 + $0x684] sm:$0xf]  ;;  %v9837_v50 = vor.u32 %v12486_v39, %v9834_v40  ;;  %v9133_v22 = vor.u32 %v12310_v14, %v9130_v15 }
  0x75   :  { %v12670_v53 = vld [vmem:[%s19610_s1 + $0x14bc] sm:$0xf0]  ;;  %v12342_v52 = vld [vmem:[%s19610_s1 + $0xa84] sm:$0xf] }
  0x76   :  { %v11048_v54 = vld [vmem:[%s19610_s1 + $0x1880] sm:$0xf]  ;;  %v10537_v63 = vor.u32 %v12670_v53, %v10536_v51  ;;  %6284 = vmatpush.bf16.msrb.mxu0 %v10025_v59  ;;  %v8746_v51 = vld [vmem:[%s19610_s1 + $0x6c0] sm:$0xf0] }
  0x77   :  { %v12798_v55 = vld [vmem:[%s19610_s1 + $0x18bc] sm:$0xf0]  ;;  %v9258_v53 = vld [vmem:[%s19610_s1 + $0xac0] sm:$0xf0] }
  0x78   :  { %v11560_v56 = vld [vmem:[%s19610_s1 + $0x1c80] sm:$0xf]  ;;  %v11049_v0 = vor.u32 %v12798_v55, %v11048_v54  ;;  %6297 = vmatpush.bf16.msrb.mxu1 %v10537_v63  ;;  %v12470_v54 = vld [vmem:[%s19610_s1 + $0xe84] sm:$0xf] }
  0x79   :  { %v12926_v57 = vld [vmem:[%s19610_s1 + $0x1cbc] sm:$0xf0]  ;;  %v9770_v55 = vld [vmem:[%s19610_s1 + $0xec0] sm:$0xf0] }
  0x7a   :  { %v9960_v58 = vld [vmem:[%s19610_s1 + $0x1000] sm:$0xf]  ;;  %v11561_v5 = vor.u32 %v12926_v57, %v11560_v56  ;;  %6310 = vmatpush.bf16.msrb.mxu2 %v11049_v0  ;;  %v8237_v56 = vor.u32 %v12086_v47, %v8234_v48  ;;  %v8749_v57 = vor.u32 %v12214_v49, %v8746_v51  ;;  %v12070_v59 = vld [vmem:[%s19610_s1 + $0x204] sm:$0xf] }
  0x7b   :  { %v12526_v60 = vld [vmem:[%s19610_s1 + $0x103c] sm:$0xf0]  ;;  %v8682_v63 = vld [vmem:[%s19610_s1 + $0x640] sm:$0xf0] }
  0x7c   :  { %v10472_v61 = vld [vmem:[%s19610_s1 + $0x1400] sm:$0xf]  ;;  %v9961_v13 = vor.u32 %v12526_v60, %v9960_v58  ;;  %6323 = vmatpush.bf16.msrb.mxu3 %v11561_v5  ;;  %v9261_v58 = vor.u32 %v12342_v52, %v9258_v53  ;;  %v8170_v60 = vld [vmem:[%s19610_s1 + $0x240] sm:$0xf0] }
  0x7d   :  { %v12654_v62 = vld [vmem:[%s19610_s1 + $0x143c] sm:$0xf0]  ;;  %v12326_v0 = vld [vmem:[%s19610_s1 + $0xa04] sm:$0xf]  ;;  %v8173_v5 = vor.u32 %v12070_v59, %v8170_v60 }
  0x7e   :  { %v10984_v1 = vld [vmem:[%s19610_s1 + $0x1800] sm:$0xf]  ;;  %v10473_v18 = vor.u32 %v12654_v62, %v10472_v61  ;;  %6285 = vmatpush.bf16.msrb.mxu0 %v9961_v13  ;;  %v12198_v61 = vld [vmem:[%s19610_s1 + $0x604] sm:$0xf]  ;;  %v9773_v62 = vor.u32 %v12470_v54, %v9770_v55 }
  0x7f   :  { %v12782_v2 = vld [vmem:[%s19610_s1 + $0x183c] sm:$0xf0]  ;;  %v8618_v13 = vld [vmem:[%s19610_s1 + $0x5c0] sm:$0xf0] }
  0x80   :  { %v11496_v7 = vld [vmem:[%s19610_s1 + $0x1c00] sm:$0xf]  ;;  %v10985_v19 = vor.u32 %v12782_v2, %v10984_v1  ;;  %6298 = vmatpush.bf16.msrb.mxu1 %v10473_v18  ;;  %v9194_v1 = vld [vmem:[%s19610_s1 + $0xa40] sm:$0xf0]  ;;  %v8109_v18 = vor.u32 %v12054_v9, %v8106_v10 }
  0x81   :  { %v12910_v8 = vld [vmem:[%s19610_s1 + $0x1c3c] sm:$0xf0]  ;;  %6286 = vmatmul.bf16.vlgmr.msrb.gmra.mxu0 %v13513_v41  ;;  %v12454_v2 = vld [vmem:[%s19610_s1 + $0xe04] sm:$0xf] }
  0x82   :  { %v11497_v26 = vor.u32 %v12910_v8, %v11496_v7  ;;  %6311 = vmatpush.bf16.msrb.mxu2 %v10985_v19  ;;  %6330 = vmatpush.bf16.msra.mxu0 %v8365_v27  ;;  %v8685_v7 = vor.u32 %v12198_v61, %v8682_v63  ;;  %v9197_v8 = vor.u32 %v12326_v0, %v9194_v1  ;;  %v12438_v16 = vld [vmem:[%s19610_s1 + $0xd84] sm:$0xf] }
  0x83   :  { %6299 = vmatmul.bf16.vlgmr.msrb.gmra.mxu1 %v13517_v44  ;;  %v9709_v12 = vor.u32 %v12454_v2, %v9706_v3  ;;  %v9642_v17 = vld [vmem:[%s19610_s1 + $0xdc0] sm:$0xf0]  ;;  %v8621_v19 = vor.u32 %v12182_v11, %v8618_v13 }
  0x84   :  { %6324 = vmatpush.bf16.msrb.mxu3 %v11497_v26  ;;  %6343 = vmatpush.bf16.msra.mxu1 %v8877_v29  ;;  %v12038_v23 = vld [vmem:[%s19610_s1 + $0x104] sm:$0xf]  ;;  %v9645_v26 = vor.u32 %v12438_v16, %v9642_v17 }
  0x85   :  { %6312 = vmatmul.bf16.vlgmr.msrb.gmra.mxu2 %v13505_v38  ;;  %v8042_v24 = vld [vmem:[%s19610_s1 + $0x140] sm:$0xf0] }
  0x86   :  { %6356 = vmatpush.bf16.msra.mxu2 %v9389_v30  ;;  %6331 = vmatpush.bf16.msra.mxu0 %v8301_v43  ;;  %v12166_v25 = vld [vmem:[%s19610_s1 + $0x504] sm:$0xf]  ;;  %v8045_v32 = vor.u32 %v12038_v23, %v8042_v24 }
  0x87   :  { %6325 = vmatmul.bf16.vlgmr.msrb.gmra.mxu3 %v13515_v42  ;;  %v8554_v27 = vld [vmem:[%s19610_s1 + $0x540] sm:$0xf0] }
  0x88   :  { %6369 = vmatpush.bf16.msra.mxu3 %v9901_v34  ;;  %6344 = vmatpush.bf16.msra.mxu1 %v8813_v45  ;;  %v12294_v28 = vld [vmem:[%s19610_s1 + $0x904] sm:$0xf]  ;;  %v8557_v33 = vor.u32 %v12166_v25, %v8554_v27 }
  0x89   :  { %v9066_v29 = vld [vmem:[%s19610_s1 + $0x940] sm:$0xf0] }
  0x8a   :  { %6357 = vmatpush.bf16.msra.mxu2 %v9325_v46  ;;  %6332 = vmatpush.bf16.msra.mxu0 %v8237_v56  ;;  %v12422_v30 = vld [vmem:[%s19610_s1 + $0xd04] sm:$0xf]  ;;  %v9069_v34 = vor.u32 %v12294_v28, %v9066_v29 }
  0x8b   :  { %v9578_v31 = vld [vmem:[%s19610_s1 + $0xd40] sm:$0xf0] }
  0x8c   :  { %6370 = vmatpush.bf16.msra.mxu3 %v9837_v50  ;;  %6345 = vmatpush.bf16.msra.mxu1 %v8749_v57  ;;  %v12022_v35 = vld [vmem:[%s19610_s1 + $0x84] sm:$0xf]  ;;  %v9581_v39 = vor.u32 %v12422_v30, %v9578_v31 }
  0x8d   :  { %v7978_v36 = vld [vmem:[%s19610_s1 + $0xc0] sm:$0xf0] }
  0x8e   :  { %6358 = vmatpush.bf16.msra.mxu2 %v9261_v58  ;;  %6333 = vmatpush.bf16.msra.mxu0 %v8173_v5  ;;  %v12150_v37 = vld [vmem:[%s19610_s1 + $0x484] sm:$0xf]  ;;  %v7981_v48 = vor.u32 %v12022_v35, %v7978_v36 }
  0x8f   :  { %v8490_v40 = vld [vmem:[%s19610_s1 + $0x4c0] sm:$0xf0] }
  0x90   :  { %6371 = vmatpush.bf16.msra.mxu3 %v9773_v62  ;;  %6346 = vmatpush.bf16.msra.mxu1 %v8685_v7  ;;  %v12278_v43 = vld [vmem:[%s19610_s1 + $0x884] sm:$0xf]  ;;  %v8493_v51 = vor.u32 %v12150_v37, %v8490_v40 }
  0x91   :  { %v9002_v45 = vld [vmem:[%s19610_s1 + $0x8c0] sm:$0xf0] }
  0x92   :  { %6359 = vmatpush.bf16.msra.mxu2 %v9197_v8  ;;  %6334 = vmatpush.bf16.msra.mxu0 %v8109_v18  ;;  %v12406_v46 = vld [vmem:[%s19610_s1 + $0xc84] sm:$0xf]  ;;  %v9005_v52 = vor.u32 %v12278_v43, %v9002_v45 }
  0x93   :  { %v9514_v47 = vld [vmem:[%s19610_s1 + $0xcc0] sm:$0xf0] }
  0x94   :  { %6372 = vmatpush.bf16.msra.mxu3 %v9709_v12  ;;  %6347 = vmatpush.bf16.msra.mxu1 %v8621_v19  ;;  %v12006_v49 = vld [vmem:[%s19610_s1 + $0x4] sm:$0xf]  ;;  %v9517_v56 = vor.u32 %v12406_v46, %v9514_v47 }
  0x95   :  { %v7914_v50 = vld [vmem:[%s19610_s1 + $0x40] sm:$0xf0] }
  0x96   :  { %6360 = vmatpush.bf16.msra.mxu2 %v9133_v22  ;;  %6335 = vmatpush.bf16.msra.mxu0 %v8045_v32  ;;  %v12134_v53 = vld [vmem:[%s19610_s1 + $0x404] sm:$0xf]  ;;  %v7917_v63 = vor.u32 %v12006_v49, %v7914_v50 }
  0x97   :  { %v8426_v54 = vld [vmem:[%s19610_s1 + $0x440] sm:$0xf0] }
  0x98   :  { %6373 = vmatpush.bf16.msra.mxu3 %v9645_v26  ;;  %6348 = vmatpush.bf16.msra.mxu1 %v8557_v33  ;;  %v12262_v55 = vld [vmem:[%s19610_s1 + $0x804] sm:$0xf]  ;;  %v8429_v3 = vor.u32 %v12134_v53, %v8426_v54 }
  0x99   :  { %v8938_v57 = vld [vmem:[%s19610_s1 + $0x840] sm:$0xf0] }
  0x9a   :  { %6361 = vmatpush.bf16.msra.mxu2 %v9069_v34  ;;  %v12390_v58 = vld [vmem:[%s19610_s1 + $0xc04] sm:$0xf]  ;;  %6336 = vmatpush.bf16.msra.mxu0 %v7981_v48  ;;  %v8941_v5 = vor.u32 %v12262_v55, %v8938_v57 }
  0x9b   :  { %v9450_v59 = vld [vmem:[%s19610_s1 + $0xc40] sm:$0xf0] }
  0x9c   :  { %6374 = vmatpush.bf16.msra.mxu3 %v9581_v39  ;;  %v12630_v60 = vld [vmem:[%s19610_s1 + $0x1384] sm:$0xf]  ;;  %6349 = vmatpush.bf16.msra.mxu1 %v8493_v51  ;;  %v9453_v9 = vor.u32 %v12390_v58, %v9450_v59 }
  0x9d   :  { %v10410_v61 = vld [vmem:[%s19610_s1 + $0x13c0] sm:$0xf0] }
  0x9e   :  { %v12758_v62 = vld [vmem:[%s19610_s1 + $0x1784] sm:$0xf]  ;;  %6362 = vmatpush.bf16.msra.mxu2 %v9005_v52  ;;  %v10413_v10 = vor.u32 %v12630_v60, %v10410_v61  ;;  %6337 = vmatpush.bf16.msra.mxu0 %v7917_v63 }
  0x9f   :  { %v10922_v0 = vld [vmem:[%s19610_s1 + $0x17c0] sm:$0xf0] }
  0xa0   :  { %v12886_v1 = vld [vmem:[%s19610_s1 + $0x1b84] sm:$0xf]  ;;  %6375 = vmatpush.bf16.msra.mxu3 %v9517_v56  ;;  %v10925_v11 = vor.u32 %v12758_v62, %v10922_v0  ;;  %6350 = vmatpush.bf16.msra.mxu1 %v8429_v3 }
  0xa1   :  { %v11434_v2 = vld [vmem:[%s19610_s1 + $0x1bc0] sm:$0xf0]  ;;  %6338 = vmatmul.bf16.vlgmr.msra.gmra.mxu0 %v13354_v20 }
  0xa2   :  { %v13014_v7 = vld [vmem:[%s19610_s1 + $0x1f84] sm:$0xf]  ;;  %v11437_v12 = vor.u32 %v12886_v1, %v11434_v2  ;;  %6363 = vmatpush.bf16.msra.mxu2 %v8941_v5  ;;  %6382 = vmatpush.bf16.msrb.mxu0 %v10413_v10 }
  0xa3   :  { %v11946_v8 = vld [vmem:[%s19610_s1 + $0x1fc0] sm:$0xf0]  ;;  %6351 = vmatmul.bf16.vlgmr.msra.gmra.mxu1 %v13357_v21 }
  0xa4   :  { %v12614_v13 = vld [vmem:[%s19610_s1 + $0x1304] sm:$0xf]  ;;  %v11949_v16 = vor.u32 %v13014_v7, %v11946_v8  ;;  %6376 = vmatpush.bf16.msra.mxu3 %v9453_v9  ;;  %6395 = vmatpush.bf16.msrb.mxu1 %v10925_v11 }
  0xa5   :  { %v10346_v14 = vld [vmem:[%s19610_s1 + $0x1340] sm:$0xf0]  ;;  %6364 = vmatmul.bf16.vlgmr.msra.gmra.mxu2 %v13322_v4 }
  0xa6   :  { %v12742_v15 = vld [vmem:[%s19610_s1 + $0x1704] sm:$0xf]  ;;  %v10349_v24 = vor.u32 %v12614_v13, %v10346_v14  ;;  %6408 = vmatpush.bf16.msrb.mxu2 %v11437_v12 }
  0xa7   :  { %v10858_v17 = vld [vmem:[%s19610_s1 + $0x1740] sm:$0xf0]  ;;  %6377 = vmatmul.bf16.vlgmr.msra.gmra.mxu3 %v13327_v6 }
  0xa8   :  { %v12870_v18 = vld [vmem:[%s19610_s1 + $0x1b04] sm:$0xf]  ;;  %v10861_v25 = vor.u32 %v12742_v15, %v10858_v17  ;;  %6421 = vmatpush.bf16.msrb.mxu3 %v11949_v16  ;;  %6383 = vmatpush.bf16.msrb.mxu0 %v10349_v24 }
  0xa9   :  { %v11370_v19 = vld [vmem:[%s19610_s1 + $0x1b40] sm:$0xf0] }
  0xaa   :  { %v12998_v22 = vld [vmem:[%s19610_s1 + $0x1f04] sm:$0xf]  ;;  %v11373_v26 = vor.u32 %v12870_v18, %v11370_v19  ;;  %6396 = vmatpush.bf16.msrb.mxu1 %v10861_v25 }
  0xab   :  { %v11882_v23 = vld [vmem:[%s19610_s1 + $0x1f40] sm:$0xf0] }
  0xac   :  { %v12598_v27 = vld [vmem:[%s19610_s1 + $0x1284] sm:$0xf]  ;;  %v11885_v30 = vor.u32 %v12998_v22, %v11882_v23  ;;  %6409 = vmatpush.bf16.msrb.mxu2 %v11373_v26 }
  0xad   :  { %v10282_v28 = vld [vmem:[%s19610_s1 + $0x12c0] sm:$0xf0] }
  0xae   :  { %v12726_v29 = vld [vmem:[%s19610_s1 + $0x1684] sm:$0xf]  ;;  %v10285_v36 = vor.u32 %v12598_v27, %v10282_v28  ;;  %6422 = vmatpush.bf16.msrb.mxu3 %v11885_v30 }
  0xaf   :  { %v10794_v31 = vld [vmem:[%s19610_s1 + $0x16c0] sm:$0xf0] }
  0xb0   :  { %v12854_v32 = vld [vmem:[%s19610_s1 + $0x1a84] sm:$0xf]  ;;  %v10797_v37 = vor.u32 %v12726_v29, %v10794_v31  ;;  %6384 = vmatpush.bf16.msrb.mxu0 %v10285_v36 }
  0xb1   :  { %v11306_v33 = vld [vmem:[%s19610_s1 + $0x1ac0] sm:$0xf0] }
  0xb2   :  { %v12982_v34 = vld [vmem:[%s19610_s1 + $0x1e84] sm:$0xf]  ;;  %v11309_v39 = vor.u32 %v12854_v32, %v11306_v33  ;;  %6397 = vmatpush.bf16.msrb.mxu1 %v10797_v37 }
  0xb3   :  { %v11818_v35 = vld [vmem:[%s19610_s1 + $0x1ec0] sm:$0xf0] }
  0xb4   :  { %v12582_v40 = vld [vmem:[%s19610_s1 + $0x1204] sm:$0xf]  ;;  %v11821_v46 = vor.u32 %v12982_v34, %v11818_v35  ;;  %6410 = vmatpush.bf16.msrb.mxu2 %v11309_v39 }
  0xb5   :  { %v10218_v43 = vld [vmem:[%s19610_s1 + $0x1240] sm:$0xf0] }
  0xb6   :  { %v12710_v45 = vld [vmem:[%s19610_s1 + $0x1604] sm:$0xf]  ;;  %v10221_v52 = vor.u32 %v12582_v40, %v10218_v43  ;;  %6423 = vmatpush.bf16.msrb.mxu3 %v11821_v46  ;;  %v8368_v43 = vld [vmem:[%s19610_s1 + $0x388] sm:$0xf] }
  0xb7   :  { %v10730_v47 = vld [vmem:[%s19610_s1 + $0x1640] sm:$0xf0]  ;;  %v8880_v46 = vld [vmem:[%s19610_s1 + $0x788] sm:$0xf] }
  0xb8   :  { %v12838_v48 = vld [vmem:[%s19610_s1 + $0x1a04] sm:$0xf]  ;;  %v10733_v53 = vor.u32 %v12710_v45, %v10730_v47  ;;  %6385 = vmatpush.bf16.msrb.mxu0 %v10221_v52  ;;  %v12127_v45 = vld [vmem:[%s19610_s1 + $0x3c4] sm:$0xf0] }
  0xb9   :  { %v11242_v49 = vld [vmem:[%s19610_s1 + $0x1a40] sm:$0xf0] }
  0xba   :  { %v12966_v50 = vld [vmem:[%s19610_s1 + $0x1e04] sm:$0xf]  ;;  %v11245_v54 = vor.u32 %v12838_v48, %v11242_v49  ;;  %6398 = vmatpush.bf16.msrb.mxu1 %v10733_v53  ;;  %v12255_v48 = vld [vmem:[%s19610_s1 + $0x7c4] sm:$0xf0] }
  0xbb   :  { %v11754_v51 = vld [vmem:[%s19610_s1 + $0x1e40] sm:$0xf0]  ;;  %v9392_v49 = vld [vmem:[%s19610_s1 + $0xb88] sm:$0xf] }
  0xbc   :  { %v12566_v55 = vld [vmem:[%s19610_s1 + $0x1184] sm:$0xf]  ;;  %v11757_v58 = vor.u32 %v12966_v50, %v11754_v51  ;;  %6411 = vmatpush.bf16.msrb.mxu2 %v11245_v54  ;;  %v12383_v50 = vld [vmem:[%s19610_s1 + $0xbc4] sm:$0xf0] }
  0xbd   :  { %v10154_v56 = vld [vmem:[%s19610_s1 + $0x11c0] sm:$0xf0]  ;;  %v9904_v53 = vld [vmem:[%s19610_s1 + $0xf88] sm:$0xf] }
  0xbe   :  { %v12694_v57 = vld [vmem:[%s19610_s1 + $0x1584] sm:$0xf]  ;;  %v10157_v0 = vor.u32 %v12566_v55, %v10154_v56  ;;  %6424 = vmatpush.bf16.msrb.mxu3 %v11757_v58  ;;  %v12511_v54 = vld [vmem:[%s19610_s1 + $0xfc4] sm:$0xf0]  ;;  %v8369_v56 = vor.u32 %v12127_v45, %v8368_v43  ;;  %v9393_v58 = vor.u32 %v12383_v50, %v9392_v49 }
  0xbf   :  { %v10666_v59 = vld [vmem:[%s19610_s1 + $0x15c0] sm:$0xf0]  ;;  %v9136_v43 = vld [vmem:[%s19610_s1 + $0x988] sm:$0xf] }
  0xc0   :  { %v12822_v60 = vld [vmem:[%s19610_s1 + $0x1984] sm:$0xf]  ;;  %v10669_v1 = vor.u32 %v12694_v57, %v10666_v59  ;;  %6386 = vmatpush.bf16.msrb.mxu0 %v10157_v0  ;;  %v8881_v57 = vor.u32 %v12255_v48, %v8880_v46  ;;  %v8304_v59 = vld [vmem:[%s19610_s1 + $0x308] sm:$0xf] }
  0xc1   :  { %v11178_v61 = vld [vmem:[%s19610_s1 + $0x19c0] sm:$0xf0]  ;;  %v9328_v0 = vld [vmem:[%s19610_s1 + $0xb08] sm:$0xf] }
  0xc2   :  { %v12950_v62 = vld [vmem:[%s19610_s1 + $0x1d84] sm:$0xf]  ;;  %v11181_v2 = vor.u32 %v12822_v60, %v11178_v61  ;;  %6399 = vmatpush.bf16.msrb.mxu1 %v10669_v1  ;;  %v12111_v60 = vld [vmem:[%s19610_s1 + $0x344] sm:$0xf0] }
  0xc3   :  { %v11690_v63 = vld [vmem:[%s19610_s1 + $0x1dc0] sm:$0xf0]  ;;  %v8816_v61 = vld [vmem:[%s19610_s1 + $0x708] sm:$0xf] }
  0xc4   :  { %v12550_v3 = vld [vmem:[%s19610_s1 + $0x1104] sm:$0xf]  ;;  %v11693_v8 = vor.u32 %v12950_v62, %v11690_v63  ;;  %6412 = vmatpush.bf16.msrb.mxu2 %v11181_v2  ;;  %v9905_v62 = vor.u32 %v12511_v54, %v9904_v53  ;;  %v12239_v63 = vld [vmem:[%s19610_s1 + $0x744] sm:$0xf0] }
  0xc5   :  { %v10090_v5 = vld [vmem:[%s19610_s1 + $0x1140] sm:$0xf0]  ;;  %v12367_v1 = vld [vmem:[%s19610_s1 + $0xb44] sm:$0xf0] }
  0xc6   :  { %v12678_v7 = vld [vmem:[%s19610_s1 + $0x1504] sm:$0xf]  ;;  %v10093_v14 = vor.u32 %v12550_v3, %v10090_v5  ;;  %6425 = vmatpush.bf16.msrb.mxu3 %v11693_v8  ;;  %v9840_v2 = vld [vmem:[%s19610_s1 + $0xf08] sm:$0xf]  ;;  %v8305_v5 = vor.u32 %v12111_v60, %v8304_v59  ;;  %v9329_v8 = vor.u32 %v12367_v1, %v9328_v0 }
  0xc7   :  { %v10602_v9 = vld [vmem:[%s19610_s1 + $0x1540] sm:$0xf0]  ;;  %v12495_v3 = vld [vmem:[%s19610_s1 + $0xf44] sm:$0xf0] }
  0xc8   :  { %v12806_v10 = vld [vmem:[%s19610_s1 + $0x1904] sm:$0xf]  ;;  %v10605_v15 = vor.u32 %v12678_v7, %v10602_v9  ;;  %6387 = vmatpush.bf16.msrb.mxu0 %v10093_v14  ;;  %v8817_v7 = vor.u32 %v12239_v63, %v8816_v61  ;;  %v8240_v9 = vld [vmem:[%s19610_s1 + $0x288] sm:$0xf] }
  0xc9   :  { %v11114_v11 = vld [vmem:[%s19610_s1 + $0x1940] sm:$0xf0]  ;;  %v9264_v14 = vld [vmem:[%s19610_s1 + $0xa88] sm:$0xf] }
  0xca   :  { %v12934_v12 = vld [vmem:[%s19610_s1 + $0x1d04] sm:$0xf]  ;;  %v11117_v16 = vor.u32 %v12806_v10, %v11114_v11  ;;  %6400 = vmatpush.bf16.msrb.mxu1 %v10605_v15  ;;  %v12095_v10 = vld [vmem:[%s19610_s1 + $0x2c4] sm:$0xf0] }
  0xcb   :  { %v11626_v13 = vld [vmem:[%s19610_s1 + $0x1d40] sm:$0xf0]  ;;  %v8752_v11 = vld [vmem:[%s19610_s1 + $0x688] sm:$0xf] }
  0xcc   :  { %v12534_v17 = vld [vmem:[%s19610_s1 + $0x1084] sm:$0xf]  ;;  %v11629_v22 = vor.u32 %v12934_v12, %v11626_v13  ;;  %6413 = vmatpush.bf16.msrb.mxu2 %v11117_v16  ;;  %v9841_v12 = vor.u32 %v12495_v3, %v9840_v2  ;;  %v12223_v13 = vld [vmem:[%s19610_s1 + $0x6c4] sm:$0xf0] }
  0xcd   :  { %v10026_v18 = vld [vmem:[%s19610_s1 + $0x10c0] sm:$0xf0]  ;;  %v12351_v15 = vld [vmem:[%s19610_s1 + $0xac4] sm:$0xf0] }
  0xce   :  { %v12662_v19 = vld [vmem:[%s19610_s1 + $0x1484] sm:$0xf]  ;;  %v10029_v28 = vor.u32 %v12534_v17, %v10026_v18  ;;  %6426 = vmatpush.bf16.msrb.mxu3 %v11629_v22  ;;  %v9776_v16 = vld [vmem:[%s19610_s1 + $0xe88] sm:$0xf]  ;;  %v8241_v18 = vor.u32 %v12095_v10, %v8240_v9  ;;  %v9265_v22 = vor.u32 %v12351_v15, %v9264_v14 }
  0xcf   :  { %v10538_v23 = vld [vmem:[%s19610_s1 + $0x14c0] sm:$0xf0]  ;;  %v12479_v17 = vld [vmem:[%s19610_s1 + $0xec4] sm:$0xf0] }
  0xd0   :  { %v12790_v24 = vld [vmem:[%s19610_s1 + $0x1884] sm:$0xf]  ;;  %v10541_v31 = vor.u32 %v12662_v19, %v10538_v23  ;;  %6388 = vmatpush.bf16.msrb.mxu0 %v10029_v28  ;;  %v8753_v19 = vor.u32 %v12223_v13, %v8752_v11  ;;  %v8176_v23 = vld [vmem:[%s19610_s1 + $0x208] sm:$0xf] }
  0xd1   :  { %v11050_v25 = vld [vmem:[%s19610_s1 + $0x18c0] sm:$0xf0]  ;;  %v9200_v28 = vld [vmem:[%s19610_s1 + $0xa08] sm:$0xf] }
  0xd2   :  { %v12918_v26 = vld [vmem:[%s19610_s1 + $0x1c84] sm:$0xf]  ;;  %v11053_v32 = vor.u32 %v12790_v24, %v11050_v25  ;;  %6401 = vmatpush.bf16.msrb.mxu1 %v10541_v31  ;;  %v12079_v24 = vld [vmem:[%s19610_s1 + $0x244] sm:$0xf0] }
  0xd3   :  { %v11562_v27 = vld [vmem:[%s19610_s1 + $0x1cc0] sm:$0xf0]  ;;  %v8688_v25 = vld [vmem:[%s19610_s1 + $0x608] sm:$0xf] }
  0xd4   :  { %v12518_v29 = vld [vmem:[%s19610_s1 + $0x1004] sm:$0xf]  ;;  %v11565_v36 = vor.u32 %v12918_v26, %v11562_v27  ;;  %6414 = vmatpush.bf16.msrb.mxu2 %v11053_v32  ;;  %v9777_v26 = vor.u32 %v12479_v17, %v9776_v16  ;;  %v12207_v27 = vld [vmem:[%s19610_s1 + $0x644] sm:$0xf0]  ;;  %v8177_v32 = vor.u32 %v12079_v24, %v8176_v23 }
  0xd5   :  { %v9962_v30 = vld [vmem:[%s19610_s1 + $0x1040] sm:$0xf0]  ;;  %v12463_v31 = vld [vmem:[%s19610_s1 + $0xe44] sm:$0xf0] }
  0xd6   :  { %v12646_v33 = vld [vmem:[%s19610_s1 + $0x1404] sm:$0xf]  ;;  %v9965_v47 = vor.u32 %v12518_v29, %v9962_v30  ;;  %6427 = vmatpush.bf16.msrb.mxu3 %v11565_v36  ;;  %v12335_v29 = vld [vmem:[%s19610_s1 + $0xa44] sm:$0xf0] }
  0xd7   :  { %v10474_v34 = vld [vmem:[%s19610_s1 + $0x1440] sm:$0xf0]  ;;  %v9712_v30 = vld [vmem:[%s19610_s1 + $0xe08] sm:$0xf] }
  0xd8   :  { %v12774_v35 = vld [vmem:[%s19610_s1 + $0x1804] sm:$0xf]  ;;  %v10477_v51 = vor.u32 %v12646_v33, %v10474_v34  ;;  %6389 = vmatpush.bf16.msrb.mxu0 %v9965_v47  ;;  %v8689_v33 = vor.u32 %v12207_v27, %v8688_v25  ;;  %v9201_v34 = vor.u32 %v12335_v29, %v9200_v28  ;;  %v12063_v36 = vld [vmem:[%s19610_s1 + $0x1c4] sm:$0xf0] }
  0xd9   :  { %v10986_v37 = vld [vmem:[%s19610_s1 + $0x1840] sm:$0xf0]  ;;  %v12319_v45 = vld [vmem:[%s19610_s1 + $0x9c4] sm:$0xf0] }
  0xda   :  { %v12902_v39 = vld [vmem:[%s19610_s1 + $0x1c04] sm:$0xf]  ;;  %v10989_v52 = vor.u32 %v12774_v35, %v10986_v37  ;;  %6402 = vmatpush.bf16.msrb.mxu1 %v10477_v51  ;;  %v8112_v35 = vld [vmem:[%s19610_s1 + $0x188] sm:$0xf]  ;;  %v9137_v50 = vor.u32 %v12319_v45, %v9136_v43 }
  0xdb   :  { %v11498_v40 = vld [vmem:[%s19610_s1 + $0x1c40] sm:$0xf0]  ;;  %6390 = vmatmul.bf16.vlgmr.msrb.gmra.mxu0 %v13513_v41  ;;  %v8624_v37 = vld [vmem:[%s19610_s1 + $0x588] sm:$0xf]  ;;  %v8113_v48 = vor.u32 %v12063_v36, %v8112_v35 }
  0xdc   :  { %v11501_v55 = vor.u32 %v12902_v39, %v11498_v40  ;;  %6415 = vmatpush.bf16.msrb.mxu2 %v10989_v52  ;;  %6434 = vmatpush.bf16.msra.mxu0 %v8369_v56  ;;  %v9713_v39 = vor.u32 %v12463_v31, %v9712_v30  ;;  %v12191_v40 = vld [vmem:[%s19610_s1 + $0x5c4] sm:$0xf0] }
  0xdd   :  { %6403 = vmatmul.bf16.vlgmr.msrb.gmra.mxu1 %v13517_v44  ;;  %v9648_v46 = vld [vmem:[%s19610_s1 + $0xd88] sm:$0xf]  ;;  %v8625_v49 = vor.u32 %v12191_v40, %v8624_v37 }
  0xde   :  { %6428 = vmatpush.bf16.msrb.mxu3 %v11501_v55  ;;  %6447 = vmatpush.bf16.msra.mxu1 %v8881_v57  ;;  %v12447_v47 = vld [vmem:[%s19610_s1 + $0xdc4] sm:$0xf0] }
  0xdf   :  { %6416 = vmatmul.bf16.vlgmr.msrb.gmra.mxu2 %v13505_v38  ;;  %v8048_v51 = vld [vmem:[%s19610_s1 + $0x108] sm:$0xf]  ;;  %v9649_v54 = vor.u32 %v12447_v47, %v9648_v46 }
  0xe0   :  { %6460 = vmatpush.bf16.msra.mxu2 %v9393_v58  ;;  %6435 = vmatpush.bf16.msra.mxu0 %v8305_v5  ;;  %v12047_v52 = vld [vmem:[%s19610_s1 + $0x144] sm:$0xf0] }
  0xe1   :  { %6429 = vmatmul.bf16.vlgmr.msrb.gmra.mxu3 %v13515_v42  ;;  %v8560_v53 = vld [vmem:[%s19610_s1 + $0x508] sm:$0xf]  ;;  %v8049_v60 = vor.u32 %v12047_v52, %v8048_v51 }
  0xe2   :  { %6473 = vmatpush.bf16.msra.mxu3 %v9905_v62  ;;  %6448 = vmatpush.bf16.msra.mxu1 %v8817_v7  ;;  %v12175_v55 = vld [vmem:[%s19610_s1 + $0x544] sm:$0xf0] }
  0xe3   :  { %v9072_v56 = vld [vmem:[%s19610_s1 + $0x908] sm:$0xf]  ;;  %v8561_v61 = vor.u32 %v12175_v55, %v8560_v53 }
  0xe4   :  { %6461 = vmatpush.bf16.msra.mxu2 %v9329_v8  ;;  %6436 = vmatpush.bf16.msra.mxu0 %v8241_v18  ;;  %v12303_v57 = vld [vmem:[%s19610_s1 + $0x944] sm:$0xf0] }
  0xe5   :  { %v9584_v58 = vld [vmem:[%s19610_s1 + $0xd08] sm:$0xf]  ;;  %v9073_v62 = vor.u32 %v12303_v57, %v9072_v56 }
  0xe6   :  { %6474 = vmatpush.bf16.msra.mxu3 %v9841_v12  ;;  %6449 = vmatpush.bf16.msra.mxu1 %v8753_v19  ;;  %v12431_v59 = vld [vmem:[%s19610_s1 + $0xd44] sm:$0xf0] }
  0xe7   :  { %v7984_v63 = vld [vmem:[%s19610_s1 + $0x88] sm:$0xf]  ;;  %v9585_v2 = vor.u32 %v12431_v59, %v9584_v58 }
  0xe8   :  { %6462 = vmatpush.bf16.msra.mxu2 %v9265_v22  ;;  %6437 = vmatpush.bf16.msra.mxu0 %v8177_v32  ;;  %v12031_v0 = vld [vmem:[%s19610_s1 + $0xc4] sm:$0xf0] }
  0xe9   :  { %v8496_v1 = vld [vmem:[%s19610_s1 + $0x488] sm:$0xf]  ;;  %v7985_v10 = vor.u32 %v12031_v0, %v7984_v63 }
  0xea   :  { %6475 = vmatpush.bf16.msra.mxu3 %v9777_v26  ;;  %6450 = vmatpush.bf16.msra.mxu1 %v8689_v33  ;;  %v12159_v3 = vld [vmem:[%s19610_s1 + $0x4c4] sm:$0xf0] }
  0xeb   :  { %v9008_v5 = vld [vmem:[%s19610_s1 + $0x888] sm:$0xf]  ;;  %v8497_v13 = vor.u32 %v12159_v3, %v8496_v1 }
  0xec   :  { %6463 = vmatpush.bf16.msra.mxu2 %v9201_v34  ;;  %6438 = vmatpush.bf16.msra.mxu0 %v8113_v48  ;;  %v12287_v7 = vld [vmem:[%s19610_s1 + $0x8c4] sm:$0xf0] }
  0xed   :  { %v9520_v8 = vld [vmem:[%s19610_s1 + $0xc88] sm:$0xf]  ;;  %v9009_v14 = vor.u32 %v12287_v7, %v9008_v5 }
  0xee   :  { %6476 = vmatpush.bf16.msra.mxu3 %v9713_v39  ;;  %6451 = vmatpush.bf16.msra.mxu1 %v8625_v49  ;;  %v12415_v9 = vld [vmem:[%s19610_s1 + $0xcc4] sm:$0xf0] }
  0xef   :  { %v7920_v11 = vld [vmem:[%s19610_s1 + $0x8] sm:$0xf]  ;;  %v9521_v18 = vor.u32 %v12415_v9, %v9520_v8 }
  0xf0   :  { %6464 = vmatpush.bf16.msra.mxu2 %v9137_v50  ;;  %6439 = vmatpush.bf16.msra.mxu0 %v8049_v60  ;;  %v12015_v12 = vld [vmem:[%s19610_s1 + $0x44] sm:$0xf0] }
  0xf1   :  { %v8432_v15 = vld [vmem:[%s19610_s1 + $0x408] sm:$0xf]  ;;  %v7921_v27 = vor.u32 %v12015_v12, %v7920_v11 }
  0xf2   :  { %6477 = vmatpush.bf16.msra.mxu3 %v9649_v54  ;;  %6452 = vmatpush.bf16.msra.mxu1 %v8561_v61  ;;  %v12143_v16 = vld [vmem:[%s19610_s1 + $0x444] sm:$0xf0] }
  0xf3   :  { %v8944_v17 = vld [vmem:[%s19610_s1 + $0x808] sm:$0xf]  ;;  %v8433_v31 = vor.u32 %v12143_v16, %v8432_v15 }
  0xf4   :  { %6465 = vmatpush.bf16.msra.mxu2 %v9073_v62  ;;  %v12271_v19 = vld [vmem:[%s19610_s1 + $0x844] sm:$0xf0]  ;;  %6440 = vmatpush.bf16.msra.mxu0 %v7985_v10 }
  0xf5   :  { %v9456_v22 = vld [vmem:[%s19610_s1 + $0xc08] sm:$0xf]  ;;  %v8945_v32 = vor.u32 %v12271_v19, %v8944_v17 }
  0xf6   :  { %6478 = vmatpush.bf16.msra.mxu3 %v9585_v2  ;;  %v12399_v23 = vld [vmem:[%s19610_s1 + $0xc44] sm:$0xf0]  ;;  %6453 = vmatpush.bf16.msra.mxu1 %v8497_v13 }
  0xf7   :  { %v10416_v24 = vld [vmem:[%s19610_s1 + $0x1388] sm:$0xf]  ;;  %v9457_v35 = vor.u32 %v12399_v23, %v9456_v22 }
  0xf8   :  { %v12639_v25 = vld [vmem:[%s19610_s1 + $0x13c4] sm:$0xf0]  ;;  %6466 = vmatpush.bf16.msra.mxu2 %v9009_v14  ;;  %6441 = vmatpush.bf16.msra.mxu0 %v7921_v27 }
  0xf9   :  { %v10928_v26 = vld [vmem:[%s19610_s1 + $0x1788] sm:$0xf]  ;;  %v10417_v36 = vor.u32 %v12639_v25, %v10416_v24 }
  0xfa   :  { %v12767_v28 = vld [vmem:[%s19610_s1 + $0x17c4] sm:$0xf0]  ;;  %6479 = vmatpush.bf16.msra.mxu3 %v9521_v18  ;;  %6454 = vmatpush.bf16.msra.mxu1 %v8433_v31 }
  0xfb   :  { %v11440_v29 = vld [vmem:[%s19610_s1 + $0x1b88] sm:$0xf]  ;;  %v10929_v37 = vor.u32 %v12767_v28, %v10928_v26  ;;  %6442 = vmatmul.bf16.vlgmr.msra.gmra.mxu0 %v13354_v20 }
  0xfc   :  { %v12895_v30 = vld [vmem:[%s19610_s1 + $0x1bc4] sm:$0xf0]  ;;  %6467 = vmatpush.bf16.msra.mxu2 %v8945_v32  ;;  %6486 = vmatpush.bf16.msrb.mxu0 %v10417_v36 }
  0xfd   :  { %v11952_v33 = vld [vmem:[%s19610_s1 + $0x1f88] sm:$0xf]  ;;  %v11441_v39 = vor.u32 %v12895_v30, %v11440_v29  ;;  %6455 = vmatmul.bf16.vlgmr.msra.gmra.mxu1 %v13357_v21 }
  0xfe   :  { %v13023_v34 = vld [vmem:[%s19610_s1 + $0x1fc4] sm:$0xf0]  ;;  %6480 = vmatpush.bf16.msra.mxu3 %v9457_v35  ;;  %6499 = vmatpush.bf16.msrb.mxu1 %v10929_v37 }
  0xff   :  { %v10352_v40 = vld [vmem:[%s19610_s1 + $0x1308] sm:$0xf]  ;;  %v11953_v46 = vor.u32 %v13023_v34, %v11952_v33  ;;  %6468 = vmatmul.bf16.vlgmr.msra.gmra.mxu2 %v13322_v4 }
 0x100   :  { %v12623_v43 = vld [vmem:[%s19610_s1 + $0x1344] sm:$0xf0]  ;;  %6512 = vmatpush.bf16.msrb.mxu2 %v11441_v39 }
 0x101   :  { %v10864_v45 = vld [vmem:[%s19610_s1 + $0x1708] sm:$0xf]  ;;  %v10353_v52 = vor.u32 %v12623_v43, %v10352_v40  ;;  %6481 = vmatmul.bf16.vlgmr.msra.gmra.mxu3 %v13327_v6  ;;  %v6235_v43 = vpop.f32.mrf.mxu0 }
 0x102   :  { %v12751_v47 = vld [vmem:[%s19610_s1 + $0x1744] sm:$0xf0]  ;;  %6525 = vmatpush.bf16.msrb.mxu3 %v11953_v46  ;;  %v14210_v46 = vld [vmem:[%s19612_s2] sm:$0xff] }
 0x103   :  { %v11376_v48 = vld [vmem:[%s19610_s1 + $0x1b08] sm:$0xf]  ;;  %v10865_v53 = vor.u32 %v12751_v47, %v10864_v45  ;;  %6487 = vmatpush.bf16.msrb.mxu0 %v10353_v52  ;;  %v6248_v47 = vpop.f32.mrf.mxu1 }
 0x104   :  { %v12879_v49 = vld [vmem:[%s19610_s1 + $0x1b44] sm:$0xf0] }
 0x105   :  { %v11888_v50 = vld [vmem:[%s19610_s1 + $0x1f08] sm:$0xf]  ;;  %v11377_v54 = vor.u32 %v12879_v49, %v11376_v48  ;;  %6500 = vmatpush.bf16.msrb.mxu1 %v10865_v53  ;;  %v14221_v53 = vpop.f32.mrf.mxu2 }
 0x106   :  { %v13007_v51 = vld [vmem:[%s19610_s1 + $0x1f44] sm:$0xf0] }
 0x107   :  { %v10288_v55 = vld [vmem:[%s19610_s1 + $0x1288] sm:$0xf]  ;;  %v11889_v58 = vor.u32 %v13007_v51, %v11888_v50  ;;  %6513 = vmatpush.bf16.msrb.mxu2 %v11377_v54 }
 0x108   :  { %v12607_v56 = vld [vmem:[%s19610_s1 + $0x12c4] sm:$0xf0] }
 0x109   :  { %v10800_v57 = vld [vmem:[%s19610_s1 + $0x1688] sm:$0xf]  ;;  %v10289_v0 = vor.u32 %v12607_v56, %v10288_v55  ;;  %6526 = vmatpush.bf16.msrb.mxu3 %v11889_v58  ;;  %v14232_v58 = vpop.f32.mrf.mxu3 }
 0x10a   :  { %v12735_v59 = vld [vmem:[%s19610_s1 + $0x16c4] sm:$0xf0] }
 0x10b   :  { %v11312_v60 = vld [vmem:[%s19610_s1 + $0x1a88] sm:$0xf]  ;;  %v10801_v1 = vor.u32 %v12735_v59, %v10800_v57  ;;  %6488 = vmatpush.bf16.msrb.mxu0 %v10289_v0 }
 0x10c   :  { %v12863_v61 = vld [vmem:[%s19610_s1 + $0x1ac4] sm:$0xf0] }
 0x10d   :  { %v11824_v62 = vld [vmem:[%s19610_s1 + $0x1e88] sm:$0xf]  ;;  %v11313_v2 = vor.u32 %v12863_v61, %v11312_v60  ;;  %6501 = vmatpush.bf16.msrb.mxu1 %v10801_v1  ;;  %v1046_v61 = vperm.slane %v14210_v46, 0 }
 0x10e   :  { %v12991_v63 = vld [vmem:[%s19610_s1 + $0x1ec4] sm:$0xf0] }
 0x10f   :  { %v10224_v3 = vld [vmem:[%s19610_s1 + $0x1208] sm:$0xf]  ;;  %v11825_v8 = vor.u32 %v12991_v63, %v11824_v62  ;;  %6514 = vmatpush.bf16.msrb.mxu2 %v11313_v2 }
 0x110   :  { %v12591_v5 = vld [vmem:[%s19610_s1 + $0x1244] sm:$0xf0] }
 0x111   :  { %v10736_v7 = vld [vmem:[%s19610_s1 + $0x1608] sm:$0xf]  ;;  %v10225_v14 = vor.u32 %v12591_v5, %v10224_v3  ;;  %6527 = vmatpush.bf16.msrb.mxu3 %v11825_v8 }
 0x112   :  { %v12719_v9 = vld [vmem:[%s19610_s1 + $0x1644] sm:$0xf0] }
 0x113   :  { %v11248_v10 = vld [vmem:[%s19610_s1 + $0x1a08] sm:$0xf]  ;;  %v10737_v15 = vor.u32 %v12719_v9, %v10736_v7  ;;  %6489 = vmatpush.bf16.msrb.mxu0 %v10225_v14  ;;  %v12247_v14 = vld [vmem:[%s19610_s1 + $0x78c] sm:$0xf] }
 0x114   :  { %v12847_v11 = vld [vmem:[%s19610_s1 + $0x1a44] sm:$0xf0] }
 0x115   :  { %v11760_v12 = vld [vmem:[%s19610_s1 + $0x1e08] sm:$0xf]  ;;  %v11249_v16 = vor.u32 %v12847_v11, %v11248_v10  ;;  %6502 = vmatpush.bf16.msrb.mxu1 %v10737_v15  ;;  %v6236_v15 = vadd.f32 %v6235_v43, %v1046_v61  ;;  %v12359_v43 = vld [vmem:[%s19610_s1 + $0xb0c] sm:$0xf] }
 0x116   :  { %v12975_v13 = vld [vmem:[%s19610_s1 + $0x1e44] sm:$0xf0]  ;;  %v12471_v61 = vld [vmem:[%s19610_s1 + $0xe8c] sm:$0xf] }
 0x117   :  { %v10160_v17 = vld [vmem:[%s19610_s1 + $0x1188] sm:$0xf]  ;;  %v11761_v22 = vor.u32 %v12975_v13, %v11760_v12  ;;  %6515 = vmatpush.bf16.msrb.mxu2 %v11249_v16  ;;  %v12119_v12 = vld [vmem:[%s19610_s1 + $0x38c] sm:$0xf]  ;;  %v6237_v16 = vpop.f32.mrf.mxu0 }
 0x118   :  { %v12575_v18 = vld [vmem:[%s19610_s1 + $0x11c4] sm:$0xf0]  ;;  %v8370_v13 = vld [vmem:[%s19610_s1 + $0x3c8] sm:$0xf0] }
 0x119   :  { %v10672_v19 = vld [vmem:[%s19610_s1 + $0x1588] sm:$0xf]  ;;  %v10161_v28 = vor.u32 %v12575_v18, %v10160_v17  ;;  %6528 = vmatpush.bf16.msrb.mxu3 %v11761_v22  ;;  %v8882_v18 = vld [vmem:[%s19610_s1 + $0x7c8] sm:$0xf0] }
 0x11a   :  { %v12703_v23 = vld [vmem:[%s19610_s1 + $0x15c4] sm:$0xf0]  ;;  %v9394_v22 = vld [vmem:[%s19610_s1 + $0xbc8] sm:$0xf0] }
 0x11b   :  { %v11184_v24 = vld [vmem:[%s19610_s1 + $0x1988] sm:$0xf]  ;;  %v10673_v29 = vor.u32 %v12703_v23, %v10672_v19  ;;  %6490 = vmatpush.bf16.msrb.mxu0 %v10161_v28  ;;  %v12375_v19 = vld [vmem:[%s19610_s1 + $0xb8c] sm:$0xf]  ;;  %v6250_v23 = vpop.f32.mrf.mxu1  ;;  %v6263_v28 = vpop.f32.mrf.mxu2 }
 0x11c   :  { %v12831_v25 = vld [vmem:[%s19610_s1 + $0x19c4] sm:$0xf0]  ;;  %v12439_v28 = vld [vmem:[%s19610_s1 + $0xd8c] sm:$0xf] }
 0x11d   :  { %v11696_v26 = vld [vmem:[%s19610_s1 + $0x1d88] sm:$0xf]  ;;  %v11185_v30 = vor.u32 %v12831_v25, %v11184_v24  ;;  %6503 = vmatpush.bf16.msrb.mxu1 %v10673_v29 }
 0x11e   :  { %v12959_v27 = vld [vmem:[%s19610_s1 + $0x1dc4] sm:$0xf0] }
 0x11f   :  { %v10096_v31 = vld [vmem:[%s19610_s1 + $0x1108] sm:$0xf]  ;;  %v11697_v34 = vor.u32 %v12959_v27, %v11696_v26  ;;  %6516 = vmatpush.bf16.msrb.mxu2 %v11185_v30  ;;  %v12503_v26 = vld [vmem:[%s19610_s1 + $0xf8c] sm:$0xf]  ;;  %v8373_v30 = vor.u32 %v12119_v12, %v8370_v13 }
 0x120   :  { %v12559_v32 = vld [vmem:[%s19610_s1 + $0x1144] sm:$0xf0]  ;;  %v9906_v27 = vld [vmem:[%s19610_s1 + $0xfc8] sm:$0xf0] }
 0x121   :  { %v10608_v33 = vld [vmem:[%s19610_s1 + $0x1508] sm:$0xf]  ;;  %v10097_v45 = vor.u32 %v12559_v32, %v10096_v31  ;;  %6529 = vmatpush.bf16.msrb.mxu3 %v11697_v34  ;;  %v6276_v31 = vpop.f32.mrf.mxu3  ;;  %v8885_v32 = vor.u32 %v12247_v14, %v8882_v18  ;;  %v6249_v34 = vadd.f32 %v6248_v47, %v6236_v15  ;;  %v12487_v47 = vld [vmem:[%s19610_s1 + $0xf0c] sm:$0xf]  ;;  %v6287_v14 = vpop.f32.mrf.mxu0 }
 0x122   :  { %v12687_v35 = vld [vmem:[%s19610_s1 + $0x1544] sm:$0xf0]  ;;  %v9714_v12 = vld [vmem:[%s19610_s1 + $0xe48] sm:$0xf0] }
 0x123   :  { %v11120_v36 = vld [vmem:[%s19610_s1 + $0x1908] sm:$0xf]  ;;  %v10609_v48 = vor.u32 %v12687_v35, %v10608_v33  ;;  %6491 = vmatpush.bf16.msrb.mxu0 %v10097_v45  ;;  %v9397_v33 = vor.u32 %v12375_v19, %v9394_v22  ;;  %v12103_v35 = vld [vmem:[%s19610_s1 + $0x30c] sm:$0xf]  ;;  %v6300_v23 = vpop.f32.mrf.mxu1 }
 0x124   :  { %v12815_v37 = vld [vmem:[%s19610_s1 + $0x1944] sm:$0xf0]  ;;  %v9330_v45 = vld [vmem:[%s19610_s1 + $0xb48] sm:$0xf0] }
 0x125   :  { %v11632_v39 = vld [vmem:[%s19610_s1 + $0x1d08] sm:$0xf]  ;;  %v11121_v49 = vor.u32 %v12815_v37, %v11120_v36  ;;  %6504 = vmatpush.bf16.msrb.mxu1 %v10609_v48  ;;  %v8306_v36 = vld [vmem:[%s19610_s1 + $0x348] sm:$0xf0] }
 0x126   :  { %v12943_v40 = vld [vmem:[%s19610_s1 + $0x1d44] sm:$0xf0]  ;;  %v12231_v37 = vld [vmem:[%s19610_s1 + $0x70c] sm:$0xf] }
 0x127   :  { %v10032_v50 = vld [vmem:[%s19610_s1 + $0x1088] sm:$0xf]  ;;  %v11633_v54 = vor.u32 %v12943_v40, %v11632_v39  ;;  %6517 = vmatpush.bf16.msrb.mxu2 %v11121_v49  ;;  %v9909_v39 = vor.u32 %v12503_v26, %v9906_v27  ;;  %v8818_v40 = vld [vmem:[%s19610_s1 + $0x748] sm:$0xf0]  ;;  %v8309_v49 = vor.u32 %v12103_v35, %v8306_v36 }
 0x128   :  { %v12543_v51 = vld [vmem:[%s19610_s1 + $0x10c4] sm:$0xf0]  ;;  %v9842_v48 = vld [vmem:[%s19610_s1 + $0xf48] sm:$0xf0] }
 0x129   :  { %v10544_v52 = vld [vmem:[%s19610_s1 + $0x1488] sm:$0xf]  ;;  %v10033_v62 = vor.u32 %v12543_v51, %v10032_v50  ;;  %6530 = vmatpush.bf16.msrb.mxu3 %v11633_v54  ;;  %v8821_v50 = vor.u32 %v12231_v37, %v8818_v40  ;;  %v9333_v51 = vor.u32 %v12359_v43, %v9330_v45  ;;  %v12087_v54 = vld [vmem:[%s19610_s1 + $0x28c] sm:$0xf]  ;;  %v6313_v37 = vpop.f32.mrf.mxu2 }
 0x12a   :  { %v12671_v55 = vld [vmem:[%s19610_s1 + $0x14c4] sm:$0xf0]  ;;  %v8114_v18 = vld [vmem:[%s19610_s1 + $0x1c8] sm:$0xf0] }
 0x12b   :  { %v11056_v56 = vld [vmem:[%s19610_s1 + $0x1888] sm:$0xf]  ;;  %v10545_v1 = vor.u32 %v12671_v55, %v10544_v52  ;;  %6492 = vmatpush.bf16.msrb.mxu0 %v10033_v62  ;;  %v6262_v52 = vadd.f32 %v14221_v53, %v6249_v34  ;;  %v8242_v55 = vld [vmem:[%s19610_s1 + $0x2c8] sm:$0xf0] }
 0x12c   :  { %v12799_v57 = vld [vmem:[%s19610_s1 + $0x18c4] sm:$0xf0]  ;;  %v8754_v53 = vld [vmem:[%s19610_s1 + $0x6c8] sm:$0xf0] }
 0x12d   :  { %v11568_v59 = vld [vmem:[%s19610_s1 + $0x1c88] sm:$0xf]  ;;  %v11057_v2 = vor.u32 %v12799_v57, %v11056_v56  ;;  %6505 = vmatpush.bf16.msrb.mxu1 %v10545_v1  ;;  %v12215_v56 = vld [vmem:[%s19610_s1 + $0x68c] sm:$0xf]  ;;  %v9845_v57 = vor.u32 %v12487_v47, %v9842_v48  ;;  %v6326_v48 = vpop.f32.mrf.mxu3 }
 0x12e   :  { %v12927_v60 = vld [vmem:[%s19610_s1 + $0x1cc4] sm:$0xf0]  ;;  %v9778_v62 = vld [vmem:[%s19610_s1 + $0xec8] sm:$0xf0]  ;;  %v8757_v1 = vor.u32 %v12215_v56, %v8754_v53 }
 0x12f   :  { %v9968_v63 = vld [vmem:[%s19610_s1 + $0x1008] sm:$0xf]  ;;  %v11569_v8 = vor.u32 %v12927_v60, %v11568_v59  ;;  %6518 = vmatpush.bf16.msrb.mxu2 %v11057_v2  ;;  %v12343_v59 = vld [vmem:[%s19610_s1 + $0xa8c] sm:$0xf] }
 0x130   :  { %v12527_v0 = vld [vmem:[%s19610_s1 + $0x1044] sm:$0xf0]  ;;  %v9266_v60 = vld [vmem:[%s19610_s1 + $0xac8] sm:$0xf0] }
 0x131   :  { %v10480_v3 = vld [vmem:[%s19610_s1 + $0x1408] sm:$0xf]  ;;  %v9969_v17 = vor.u32 %v12527_v0, %v9968_v63  ;;  %6531 = vmatpush.bf16.msrb.mxu3 %v11569_v8  ;;  %v8245_v63 = vor.u32 %v12087_v54, %v8242_v55  ;;  %v6275_v0 = vadd.f32 %v14232_v58, %v6262_v52  ;;  %v9269_v2 = vor.u32 %v12343_v59, %v9266_v60  ;;  %v8690_v58 = vld [vmem:[%s19610_s1 + $0x648] sm:$0xf0]  ;;  %v6289_v54 = vpop.f32.mrf.mxu0  ;;  %v6302_v60 = vpop.f32.mrf.mxu1 }
 0x132   :  { %v12655_v5 = vld [vmem:[%s19610_s1 + $0x1444] sm:$0xf0]  ;;  %v9781_v8 = vor.u32 %v12471_v61, %v9778_v62  ;;  %v12183_v19 = vld [vmem:[%s19610_s1 + $0x58c] sm:$0xf] }
 0x133   :  { %v10992_v7 = vld [vmem:[%s19610_s1 + $0x1808] sm:$0xf]  ;;  %v10481_v24 = vor.u32 %v12655_v5, %v10480_v3  ;;  %6493 = vmatpush.bf16.msrb.mxu0 %v9969_v17  ;;  %v12071_v3 = vld [vmem:[%s19610_s1 + $0x20c] sm:$0xf]  ;;  %v6288_v22 = vadd.f32 %v6287_v14, %v6275_v0 }
 0x134   :  { %v12783_v9 = vld [vmem:[%s19610_s1 + $0x1844] sm:$0xf0]  ;;  %v8178_v5 = vld [vmem:[%s19610_s1 + $0x248] sm:$0xf0] }
 0x135   :  { %v11504_v10 = vld [vmem:[%s19610_s1 + $0x1c08] sm:$0xf]  ;;  %v10993_v25 = vor.u32 %v12783_v9, %v10992_v7  ;;  %6506 = vmatpush.bf16.msrb.mxu1 %v10481_v24  ;;  %v12199_v7 = vld [vmem:[%s19610_s1 + $0x60c] sm:$0xf]  ;;  %v8181_v13 = vor.u32 %v12071_v3, %v8178_v5 }
 0x136   :  { %v12911_v11 = vld [vmem:[%s19610_s1 + $0x1c44] sm:$0xf0]  ;;  %6494 = vmatmul.bf16.vlgmr.msrb.gmra.mxu0 %v13513_v41  ;;  %v12327_v9 = vld [vmem:[%s19610_s1 + $0xa0c] sm:$0xf]  ;;  %v8693_v15 = vor.u32 %v12199_v7, %v8690_v58 }
 0x137   :  { %v11505_v29 = vor.u32 %v12911_v11, %v11504_v10  ;;  %6519 = vmatpush.bf16.msrb.mxu2 %v10993_v25  ;;  %6538 = vmatpush.bf16.msra.mxu0 %v8373_v30  ;;  %v9202_v10 = vld [vmem:[%s19610_s1 + $0xa48] sm:$0xf0]  ;;  %v6301_v30 = vadd.f32 %v6300_v23, %v6288_v22 }
 0x138   :  { %6507 = vmatmul.bf16.vlgmr.msrb.gmra.mxu1 %v13517_v44  ;;  %v12455_v11 = vld [vmem:[%s19610_s1 + $0xe0c] sm:$0xf]  ;;  %v9205_v16 = vor.u32 %v12327_v9, %v9202_v10 }
 0x139   :  { %6532 = vmatpush.bf16.msrb.mxu3 %v11505_v29  ;;  %6551 = vmatpush.bf16.msra.mxu1 %v8885_v32  ;;  %v12055_v17 = vld [vmem:[%s19610_s1 + $0x18c] sm:$0xf]  ;;  %v9717_v24 = vor.u32 %v12455_v11, %v9714_v12  ;;  %v6314_v47 = vadd.f32 %v6313_v37, %v6301_v30  ;;  %v6315_v12 = vpop.f32.mrf.mxu2 }
 0x13a   :  { %6520 = vmatmul.bf16.vlgmr.msrb.gmra.mxu2 %v13505_v38  ;;  %v8626_v25 = vld [vmem:[%s19610_s1 + $0x5c8] sm:$0xf0]  ;;  %v8117_v31 = vor.u32 %v12055_v17, %v8114_v18  ;;  %v6328_v17 = vpop.f32.mrf.mxu3  ;;  %v14566_v12 = vpop.f32.mrf.mxu0 }
 0x13b   :  { %6564 = vmatpush.bf16.msra.mxu2 %v9397_v33  ;;  %6539 = vmatpush.bf16.msra.mxu0 %v8309_v49  ;;  %v12311_v26 = vld [vmem:[%s19610_s1 + $0x98c] sm:$0xf]  ;;  %v8629_v32 = vor.u32 %v12183_v19, %v8626_v25  ;;  %v6327_v52 = vadd.f32 %v6326_v48, %v6314_v47 }
 0x13c   :  { %6533 = vmatmul.bf16.vlgmr.msrb.gmra.mxu3 %v13515_v42  ;;  %v9138_v27 = vld [vmem:[%s19610_s1 + $0x9c8] sm:$0xf0] }
 0x13d   :  { %6577 = vmatpush.bf16.msra.mxu3 %v9909_v39  ;;  %6552 = vmatpush.bf16.msra.mxu1 %v8821_v50  ;;  %v9650_v29 = vld [vmem:[%s19610_s1 + $0xdc8] sm:$0xf0]  ;;  %v9141_v33 = vor.u32 %v12311_v26, %v9138_v27  ;;  %7890 = vst [vmem:[%s19613_s3] sm:$0xff] %v6327_v52 }
 0x13e   :  { %v12039_v34 = vld [vmem:[%s19610_s1 + $0x10c] sm:$0xf]  ;;  %v9653_v39 = vor.u32 %v12439_v28, %v9650_v29 }
 0x13f   :  { %6565 = vmatpush.bf16.msra.mxu2 %v9333_v51  ;;  %6540 = vmatpush.bf16.msra.mxu0 %v8245_v63  ;;  %v8050_v35 = vld [vmem:[%s19610_s1 + $0x148] sm:$0xf0] }
 0x140   :  { %v12167_v36 = vld [vmem:[%s19610_s1 + $0x50c] sm:$0xf]  ;;  %v8053_v51 = vor.u32 %v12039_v34, %v8050_v35 }
 0x141   :  { %6578 = vmatpush.bf16.msra.mxu3 %v9845_v57  ;;  %6553 = vmatpush.bf16.msra.mxu1 %v8757_v1  ;;  %v8562_v40 = vld [vmem:[%s19610_s1 + $0x548] sm:$0xf0] }
 0x142   :  { %v12295_v43 = vld [vmem:[%s19610_s1 + $0x90c] sm:$0xf]  ;;  %v8565_v55 = vor.u32 %v12167_v36, %v8562_v40 }
 0x143   :  { %6566 = vmatpush.bf16.msra.mxu2 %v9269_v2  ;;  %6541 = vmatpush.bf16.msra.mxu0 %v8181_v13  ;;  %v9074_v45 = vld [vmem:[%s19610_s1 + $0x948] sm:$0xf0] }
 0x144   :  { %v12423_v49 = vld [vmem:[%s19610_s1 + $0xd0c] sm:$0xf]  ;;  %v9077_v56 = vor.u32 %v12295_v43, %v9074_v45 }
 0x145   :  { %6579 = vmatpush.bf16.msra.mxu3 %v9781_v8  ;;  %6554 = vmatpush.bf16.msra.mxu1 %v8693_v15  ;;  %v9586_v50 = vld [vmem:[%s19610_s1 + $0xd48] sm:$0xf0] }
 0x146   :  { %v12023_v57 = vld [vmem:[%s19610_s1 + $0x8c] sm:$0xf]  ;;  %v9589_v61 = vor.u32 %v12423_v49, %v9586_v50 }
 0x147   :  { %6567 = vmatpush.bf16.msra.mxu2 %v9205_v16  ;;  %6542 = vmatpush.bf16.msra.mxu0 %v8117_v31  ;;  %v7986_v53 = vld [vmem:[%s19610_s1 + $0xc8] sm:$0xf0] }
 0x148   :  { %v12151_v59 = vld [vmem:[%s19610_s1 + $0x48c] sm:$0xf]  ;;  %v7989_v3 = vor.u32 %v12023_v57, %v7986_v53 }
 0x149   :  { %6580 = vmatpush.bf16.msra.mxu3 %v9717_v24  ;;  %6555 = vmatpush.bf16.msra.mxu1 %v8629_v32  ;;  %v8498_v62 = vld [vmem:[%s19610_s1 + $0x4c8] sm:$0xf0] }
 0x14a   :  { %v12279_v63 = vld [vmem:[%s19610_s1 + $0x88c] sm:$0xf]  ;;  %v8501_v8 = vor.u32 %v12151_v59, %v8498_v62 }
 0x14b   :  { %6568 = vmatpush.bf16.msra.mxu2 %v9141_v33  ;;  %v9010_v0 = vld [vmem:[%s19610_s1 + $0x8c8] sm:$0xf0]  ;;  %6543 = vmatpush.bf16.msra.mxu0 %v8053_v51 }
 0x14c   :  { %v12407_v1 = vld [vmem:[%s19610_s1 + $0xc8c] sm:$0xf]  ;;  %v9013_v58 = vor.u32 %v12279_v63, %v9010_v0 }
 0x14d   :  { %6581 = vmatpush.bf16.msra.mxu3 %v9653_v39  ;;  %v9522_v2 = vld [vmem:[%s19610_s1 + $0xcc8] sm:$0xf0]  ;;  %6556 = vmatpush.bf16.msra.mxu1 %v8565_v55 }
 0x14e   :  { %v12007_v5 = vld [vmem:[%s19610_s1 + $0xc] sm:$0xf]  ;;  %v9525_v13 = vor.u32 %v12407_v1, %v9522_v2 }
 0x14f   :  { %v7922_v7 = vld [vmem:[%s19610_s1 + $0x48] sm:$0xf0]  ;;  %6569 = vmatpush.bf16.msra.mxu2 %v9077_v56  ;;  %6544 = vmatpush.bf16.msra.mxu0 %v7989_v3 }
 0x150   :  { %v12135_v9 = vld [vmem:[%s19610_s1 + $0x40c] sm:$0xf]  ;;  %v7925_v23 = vor.u32 %v12007_v5, %v7922_v7 }
 0x151   :  { %v8434_v10 = vld [vmem:[%s19610_s1 + $0x448] sm:$0xf0]  ;;  %6582 = vmatpush.bf16.msra.mxu3 %v9589_v61  ;;  %6557 = vmatpush.bf16.msra.mxu1 %v8501_v8 }
 0x152   :  { %v12263_v11 = vld [vmem:[%s19610_s1 + $0x80c] sm:$0xf]  ;;  %v8437_v27 = vor.u32 %v12135_v9, %v8434_v10 }
 0x153   :  { %v8946_v14 = vld [vmem:[%s19610_s1 + $0x848] sm:$0xf0]  ;;  %6570 = vmatpush.bf16.msra.mxu2 %v9013_v58  ;;  %6545 = vmatpush.bf16.msra.mxu0 %v7925_v23 }
 0x154   :  { %v12391_v15 = vld [vmem:[%s19610_s1 + $0xc0c] sm:$0xf]  ;;  %v8949_v28 = vor.u32 %v12263_v11, %v8946_v14 }
 0x155   :  { %v9458_v16 = vld [vmem:[%s19610_s1 + $0xc48] sm:$0xf0]  ;;  %6583 = vmatpush.bf16.msra.mxu3 %v9525_v13  ;;  %6558 = vmatpush.bf16.msra.mxu1 %v8437_v27 }
 0x156   :  { %v12631_v18 = vld [vmem:[%s19610_s1 + $0x138c] sm:$0xf]  ;;  %v9461_v31 = vor.u32 %v12391_v15, %v9458_v16  ;;  %6546 = vmatmul.bf16.vlgmr.msra.gmra.mxu0 %v13354_v20 }
 0x157   :  { %v10418_v19 = vld [vmem:[%s19610_s1 + $0x13c8] sm:$0xf0]  ;;  %6571 = vmatpush.bf16.msra.mxu2 %v8949_v28 }
 0x158   :  { %v12759_v22 = vld [vmem:[%s19610_s1 + $0x178c] sm:$0xf]  ;;  %v10421_v32 = vor.u32 %v12631_v18, %v10418_v19  ;;  %6559 = vmatmul.bf16.vlgmr.msra.gmra.mxu1 %v13357_v21  ;;  %v14577_v18 = vpop.f32.mrf.mxu1 }
 0x159   :  { %v10930_v24 = vld [vmem:[%s19610_s1 + $0x17c8] sm:$0xf0]  ;;  %6584 = vmatpush.bf16.msra.mxu3 %v9461_v31 }
 0x15a   :  { %v12887_v25 = vld [vmem:[%s19610_s1 + $0x1b8c] sm:$0xf]  ;;  %v10933_v33 = vor.u32 %v12759_v22, %v10930_v24  ;;  %6590 = vmatpush.bf16.msrb.mxu0 %v10421_v32  ;;  %6572 = vmatmul.bf16.vlgmr.msra.gmra.mxu2 %v13322_v4 }
 0x15b   :  { %v11442_v26 = vld [vmem:[%s19610_s1 + $0x1bc8] sm:$0xf0] }
 0x15c   :  { %v13015_v29 = vld [vmem:[%s19610_s1 + $0x1f8c] sm:$0xf]  ;;  %v11445_v34 = vor.u32 %v12887_v25, %v11442_v26  ;;  %6603 = vmatpush.bf16.msrb.mxu1 %v10933_v33  ;;  %6585 = vmatmul.bf16.vlgmr.msra.gmra.mxu3 %v13327_v6  ;;  %v14603_v33 = vpop.f32.mrf.mxu2 }
 0x15d   :  { %v11954_v30 = vld [vmem:[%s19610_s1 + $0x1fc8] sm:$0xf0] }
 0x15e   :  { %v12615_v35 = vld [vmem:[%s19610_s1 + $0x130c] sm:$0xf]  ;;  %v11957_v39 = vor.u32 %v13015_v29, %v11954_v30  ;;  %6616 = vmatpush.bf16.msrb.mxu2 %v11445_v34 }
 0x15f   :  { %v10354_v36 = vld [vmem:[%s19610_s1 + $0x1348] sm:$0xf0] }
 0x160   :  { %v12743_v37 = vld [vmem:[%s19610_s1 + $0x170c] sm:$0xf]  ;;  %v10357_v49 = vor.u32 %v12615_v35, %v10354_v36  ;;  %6629 = vmatpush.bf16.msrb.mxu3 %v11957_v39  ;;  %v14614_v39 = vpop.f32.mrf.mxu3 }
 0x161   :  { %v10866_v40 = vld [vmem:[%s19610_s1 + $0x1748] sm:$0xf0] }
 0x162   :  { %v12871_v43 = vld [vmem:[%s19610_s1 + $0x1b0c] sm:$0xf]  ;;  %v10869_v50 = vor.u32 %v12743_v37, %v10866_v40  ;;  %6591 = vmatpush.bf16.msrb.mxu0 %v10357_v49 }
 0x163   :  { %v11378_v45 = vld [vmem:[%s19610_s1 + $0x1b48] sm:$0xf0] }
 0x164   :  { %v12999_v47 = vld [vmem:[%s19610_s1 + $0x1f0c] sm:$0xf]  ;;  %v11381_v51 = vor.u32 %v12871_v43, %v11378_v45  ;;  %6604 = vmatpush.bf16.msrb.mxu1 %v10869_v50 }
 0x165   :  { %v11890_v48 = vld [vmem:[%s19610_s1 + $0x1f48] sm:$0xf0] }
 0x166   :  { %v12599_v52 = vld [vmem:[%s19610_s1 + $0x128c] sm:$0xf]  ;;  %v11893_v56 = vor.u32 %v12999_v47, %v11890_v48  ;;  %6617 = vmatpush.bf16.msrb.mxu2 %v11381_v51  ;;  %v6341_v47 = vpop.f32.mrf.mxu0 }
 0x167   :  { %v10290_v54 = vld [vmem:[%s19610_s1 + $0x12c8] sm:$0xf0] }
 0x168   :  { %v12727_v55 = vld [vmem:[%s19610_s1 + $0x168c] sm:$0xf]  ;;  %v10293_v62 = vor.u32 %v12599_v52, %v10290_v54  ;;  %6630 = vmatpush.bf16.msrb.mxu3 %v11893_v56  ;;  %v6354_v54 = vpop.f32.mrf.mxu1 }
 0x169   :  { %v10802_v57 = vld [vmem:[%s19610_s1 + $0x16c8] sm:$0xf0]  ;;  %v8760_v54 = vld [vmem:[%s19610_s1 + $0x690] sm:$0xf] }
 0x16a   :  { %v12855_v53 = vld [vmem:[%s19610_s1 + $0x1a8c] sm:$0xf]  ;;  %v10805_v63 = vor.u32 %v12727_v55, %v10802_v57  ;;  %6592 = vmatpush.bf16.msrb.mxu0 %v10293_v62 }
 0x16b   :  { %v11314_v59 = vld [vmem:[%s19610_s1 + $0x1ac8] sm:$0xf0] }
 0x16c   :  { %v12983_v60 = vld [vmem:[%s19610_s1 + $0x1e8c] sm:$0xf]  ;;  %v11317_v0 = vor.u32 %v12855_v53, %v11314_v59  ;;  %6605 = vmatpush.bf16.msrb.mxu1 %v10805_v63 }
 0x16d   :  { %v11826_v61 = vld [vmem:[%s19610_s1 + $0x1ec8] sm:$0xf0] }
 0x16e   :  { %v12583_v1 = vld [vmem:[%s19610_s1 + $0x120c] sm:$0xf]  ;;  %v11829_v5 = vor.u32 %v12983_v60, %v11826_v61  ;;  %6618 = vmatpush.bf16.msrb.mxu2 %v11317_v0  ;;  %v1047_v61 = vperm.slane %v14210_v46, 1 }
 0x16f   :  { %v10226_v2 = vld [vmem:[%s19610_s1 + $0x1248] sm:$0xf0] }
 0x170   :  { %v12711_v3 = vld [vmem:[%s19610_s1 + $0x160c] sm:$0xf]  ;;  %v10229_v11 = vor.u32 %v12583_v1, %v10226_v2  ;;  %6631 = vmatpush.bf16.msrb.mxu3 %v11829_v5 }
 0x171   :  { %v10738_v7 = vld [vmem:[%s19610_s1 + $0x1648] sm:$0xf0] }
 0x172   :  { %v12839_v8 = vld [vmem:[%s19610_s1 + $0x1a0c] sm:$0xf]  ;;  %v10741_v13 = vor.u32 %v12711_v3, %v10738_v7  ;;  %6593 = vmatpush.bf16.msrb.mxu0 %v10229_v11  ;;  %v6367_v7 = vpop.f32.mrf.mxu2  ;;  %v6380_v11 = vpop.f32.mrf.mxu3 }
 0x173   :  { %v11250_v58 = vld [vmem:[%s19610_s1 + $0x1a48] sm:$0xf0]  ;;  %v9720_v7 = vld [vmem:[%s19610_s1 + $0xe10] sm:$0xf] }
 0x174   :  { %v12967_v9 = vld [vmem:[%s19610_s1 + $0x1e0c] sm:$0xf]  ;;  %v11253_v14 = vor.u32 %v12839_v8, %v11250_v58  ;;  %6606 = vmatpush.bf16.msrb.mxu1 %v10741_v13  ;;  %v8376_v13 = vld [vmem:[%s19610_s1 + $0x390] sm:$0xf] }
 0x175   :  { %v11762_v10 = vld [vmem:[%s19610_s1 + $0x1e48] sm:$0xf0] }
 0x176   :  { %v12567_v15 = vld [vmem:[%s19610_s1 + $0x118c] sm:$0xf]  ;;  %v11765_v19 = vor.u32 %v12967_v9, %v11762_v10  ;;  %6619 = vmatpush.bf16.msrb.mxu2 %v11253_v14  ;;  %v12128_v14 = vld [vmem:[%s19610_s1 + $0x3cc] sm:$0xf0] }
 0x177   :  { %v10162_v16 = vld [vmem:[%s19610_s1 + $0x11c8] sm:$0xf0] }
 0x178   :  { %v12695_v17 = vld [vmem:[%s19610_s1 + $0x158c] sm:$0xf]  ;;  %v10165_v27 = vor.u32 %v12567_v15, %v10162_v16  ;;  %6632 = vmatpush.bf16.msrb.mxu3 %v11765_v19  ;;  %v8888_v15 = vld [vmem:[%s19610_s1 + $0x790] sm:$0xf]  ;;  %v6340_v16 = vadd.f32 %v14566_v12, %v1047_v61 }
 0x179   :  { %v10674_v22 = vld [vmem:[%s19610_s1 + $0x15c8] sm:$0xf0]  ;;  %v12256_v19 = vld [vmem:[%s19610_s1 + $0x7cc] sm:$0xf0] }
 0x17a   :  { %v12823_v23 = vld [vmem:[%s19610_s1 + $0x198c] sm:$0xf]  ;;  %v10677_v28 = vor.u32 %v12695_v17, %v10674_v22  ;;  %6594 = vmatpush.bf16.msrb.mxu0 %v10165_v27  ;;  %v9400_v22 = vld [vmem:[%s19610_s1 + $0xb90] sm:$0xf] }
 0x17b   :  { %v11186_v24 = vld [vmem:[%s19610_s1 + $0x19c8] sm:$0xf0]  ;;  %v9912_v12 = vld [vmem:[%s19610_s1 + $0xf90] sm:$0xf] }
 0x17c   :  { %v12951_v25 = vld [vmem:[%s19610_s1 + $0x1d8c] sm:$0xf]  ;;  %v11189_v29 = vor.u32 %v12823_v23, %v11186_v24  ;;  %6607 = vmatpush.bf16.msrb.mxu1 %v10677_v28  ;;  %v12384_v23 = vld [vmem:[%s19610_s1 + $0xbcc] sm:$0xf0]  ;;  %v8377_v28 = vor.u32 %v12128_v14, %v8376_v13 }
 0x17d   :  { %v11698_v26 = vld [vmem:[%s19610_s1 + $0x1dc8] sm:$0xf0]  ;;  %v8120_v13 = vld [vmem:[%s19610_s1 + $0x190] sm:$0xf] }
 0x17e   :  { %v12551_v30 = vld [vmem:[%s19610_s1 + $0x110c] sm:$0xf]  ;;  %v11701_v34 = vor.u32 %v12951_v25, %v11698_v26  ;;  %6620 = vmatpush.bf16.msrb.mxu2 %v11189_v29  ;;  %v12512_v26 = vld [vmem:[%s19610_s1 + $0xfcc] sm:$0xf0]  ;;  %v8889_v29 = vor.u32 %v12256_v19, %v8888_v15 }
 0x17f   :  { %v10098_v31 = vld [vmem:[%s19610_s1 + $0x1148] sm:$0xf0]  ;;  %v12064_v14 = vld [vmem:[%s19610_s1 + $0x1cc] sm:$0xf0] }
 0x180   :  { %v12679_v32 = vld [vmem:[%s19610_s1 + $0x150c] sm:$0xf]  ;;  %v10101_v45 = vor.u32 %v12551_v30, %v10098_v31  ;;  %6633 = vmatpush.bf16.msrb.mxu3 %v11701_v34  ;;  %v9401_v30 = vor.u32 %v12384_v23, %v9400_v22  ;;  %v6353_v31 = vadd.f32 %v14577_v18, %v6340_v16  ;;  %v12112_v34 = vld [vmem:[%s19610_s1 + $0x34c] sm:$0xf0] }
 0x181   :  { %v10610_v35 = vld [vmem:[%s19610_s1 + $0x1548] sm:$0xf0]  ;;  %v9336_v18 = vld [vmem:[%s19610_s1 + $0xb10] sm:$0xf] }
 0x182   :  { %v12807_v36 = vld [vmem:[%s19610_s1 + $0x190c] sm:$0xf]  ;;  %v10613_v48 = vor.u32 %v12679_v32, %v10610_v35  ;;  %6595 = vmatpush.bf16.msrb.mxu0 %v10101_v45  ;;  %v8312_v32 = vld [vmem:[%s19610_s1 + $0x310] sm:$0xf] }
 0x183   :  { %v11122_v37 = vld [vmem:[%s19610_s1 + $0x1948] sm:$0xf0]  ;;  %v8824_v35 = vld [vmem:[%s19610_s1 + $0x710] sm:$0xf]  ;;  %v8313_v47 = vor.u32 %v12112_v34, %v8312_v32  ;;  %v6417_v34 = vpop.f32.mrf.mxu2 }
 0x184   :  { %v12935_v40 = vld [vmem:[%s19610_s1 + $0x1d0c] sm:$0xf]  ;;  %v11125_v49 = vor.u32 %v12807_v36, %v11122_v37  ;;  %6608 = vmatpush.bf16.msrb.mxu1 %v10613_v48  ;;  %v9913_v36 = vor.u32 %v12512_v26, %v9912_v12  ;;  %v12240_v37 = vld [vmem:[%s19610_s1 + $0x74c] sm:$0xf0] }
 0x185   :  { %v11634_v43 = vld [vmem:[%s19610_s1 + $0x1d48] sm:$0xf0]  ;;  %v12496_v45 = vld [vmem:[%s19610_s1 + $0xf4c] sm:$0xf0]  ;;  %v8825_v48 = vor.u32 %v12240_v37, %v8824_v35 }
 0x186   :  { %v12535_v50 = vld [vmem:[%s19610_s1 + $0x108c] sm:$0xf]  ;;  %v11637_v55 = vor.u32 %v12935_v40, %v11634_v43  ;;  %6621 = vmatpush.bf16.msrb.mxu2 %v11125_v49  ;;  %v12368_v40 = vld [vmem:[%s19610_s1 + $0xb4c] sm:$0xf0] }
 0x187   :  { %v10034_v51 = vld [vmem:[%s19610_s1 + $0x10c8] sm:$0xf0]  ;;  %v9848_v43 = vld [vmem:[%s19610_s1 + $0xf10] sm:$0xf]  ;;  %v9337_v49 = vor.u32 %v12368_v40, %v9336_v18 }
 0x188   :  { %v12663_v52 = vld [vmem:[%s19610_s1 + $0x148c] sm:$0xf]  ;;  %v10037_v62 = vor.u32 %v12535_v50, %v10034_v51  ;;  %6634 = vmatpush.bf16.msrb.mxu3 %v11637_v55  ;;  %v6366_v50 = vadd.f32 %v14603_v33, %v6353_v31  ;;  %v8248_v51 = vld [vmem:[%s19610_s1 + $0x290] sm:$0xf]  ;;  %v9849_v55 = vor.u32 %v12496_v45, %v9848_v43  ;;  %v6430_v43 = vpop.f32.mrf.mxu3 }
 0x189   :  { %v10546_v56 = vld [vmem:[%s19610_s1 + $0x14c8] sm:$0xf0]  ;;  %v12224_v33 = vld [vmem:[%s19610_s1 + $0x6cc] sm:$0xf0] }
 0x18a   :  { %v12791_v57 = vld [vmem:[%s19610_s1 + $0x188c] sm:$0xf]  ;;  %v10549_v1 = vor.u32 %v12663_v52, %v10546_v56  ;;  %6596 = vmatpush.bf16.msrb.mxu0 %v10037_v62  ;;  %v12096_v52 = vld [vmem:[%s19610_s1 + $0x2cc] sm:$0xf0]  ;;  %v6379_v61 = vadd.f32 %v14614_v39, %v6366_v50  ;;  %v8761_v62 = vor.u32 %v12224_v33, %v8760_v54 }
 0x18b   :  { %v11058_v53 = vld [vmem:[%s19610_s1 + $0x18c8] sm:$0xf0]  ;;  %v9272_v56 = vld [vmem:[%s19610_s1 + $0xa90] sm:$0xf] }
 0x18c   :  { %v12919_v59 = vld [vmem:[%s19610_s1 + $0x1c8c] sm:$0xf]  ;;  %v11061_v2 = vor.u32 %v12791_v57, %v11058_v53  ;;  %6609 = vmatpush.bf16.msrb.mxu1 %v10549_v1  ;;  %v12352_v57 = vld [vmem:[%s19610_s1 + $0xacc] sm:$0xf0] }
 0x18d   :  { %v11570_v60 = vld [vmem:[%s19610_s1 + $0x1cc8] sm:$0xf0]  ;;  %v9784_v53 = vld [vmem:[%s19610_s1 + $0xe90] sm:$0xf] }
 0x18e   :  { %v12519_v63 = vld [vmem:[%s19610_s1 + $0x100c] sm:$0xf]  ;;  %v11573_v8 = vor.u32 %v12919_v59, %v11570_v60  ;;  %6622 = vmatpush.bf16.msrb.mxu2 %v11061_v2  ;;  %v12480_v59 = vld [vmem:[%s19610_s1 + $0xecc] sm:$0xf0]  ;;  %v8249_v60 = vor.u32 %v12096_v52, %v8248_v51 }
 0x18f   :  { %v9970_v0 = vld [vmem:[%s19610_s1 + $0x1048] sm:$0xf0]  ;;  %v12080_v1 = vld [vmem:[%s19610_s1 + $0x24c] sm:$0xf0] }
 0x190   :  { %v12647_v3 = vld [vmem:[%s19610_s1 + $0x140c] sm:$0xf]  ;;  %v9973_v17 = vor.u32 %v12519_v63, %v9970_v0  ;;  %6635 = vmatpush.bf16.msrb.mxu3 %v11573_v8  ;;  %v9273_v63 = vor.u32 %v12352_v57, %v9272_v56  ;;  %v8184_v0 = vld [vmem:[%s19610_s1 + $0x210] sm:$0xf] }
 0x191   :  { %v10482_v46 = vld [vmem:[%s19610_s1 + $0x1448] sm:$0xf0]  ;;  %v8696_v2 = vld [vmem:[%s19610_s1 + $0x610] sm:$0xf] }
 0x192   :  { %v12775_v5 = vld [vmem:[%s19610_s1 + $0x180c] sm:$0xf]  ;;  %v10485_v24 = vor.u32 %v12647_v3, %v10482_v46  ;;  %6597 = vmatpush.bf16.msrb.mxu0 %v9973_v17  ;;  %v9785_v3 = vor.u32 %v12480_v59, %v9784_v53  ;;  %v12208_v39 = vld [vmem:[%s19610_s1 + $0x64c] sm:$0xf0]  ;;  %v6404_v17 = vpop.f32.mrf.mxu1 }
 0x193   :  { %v10994_v58 = vld [vmem:[%s19610_s1 + $0x1848] sm:$0xf0]  ;;  %v9208_v46 = vld [vmem:[%s19610_s1 + $0xa10] sm:$0xf] }
 0x194   :  { %v12903_v9 = vld [vmem:[%s19610_s1 + $0x1c0c] sm:$0xf]  ;;  %v10997_v25 = vor.u32 %v12775_v5, %v10994_v58  ;;  %6610 = vmatpush.bf16.msrb.mxu1 %v10485_v24  ;;  %v12336_v5 = vld [vmem:[%s19610_s1 + $0xa4c] sm:$0xf0]  ;;  %v8185_v58 = vor.u32 %v12080_v1, %v8184_v0 }
 0x195   :  { %v11506_v10 = vld [vmem:[%s19610_s1 + $0x1c48] sm:$0xf0]  ;;  %6598 = vmatmul.bf16.vlgmr.msrb.gmra.mxu0 %v13513_v41  ;;  %v12464_v8 = vld [vmem:[%s19610_s1 + $0xe4c] sm:$0xf0]  ;;  %v9209_v11 = vor.u32 %v12336_v5, %v9208_v46 }
 0x196   :  { %v11509_v27 = vor.u32 %v12903_v9, %v11506_v10  ;;  %6623 = vmatpush.bf16.msrb.mxu2 %v10997_v25  ;;  %6642 = vmatpush.bf16.msra.mxu0 %v8377_v28  ;;  %v6391_v9 = vpop.f32.mrf.mxu0  ;;  %v8697_v10 = vor.u32 %v12208_v39, %v8696_v2  ;;  %v8632_v15 = vld [vmem:[%s19610_s1 + $0x590] sm:$0xf]  ;;  %v9721_v19 = vor.u32 %v12464_v8, %v9720_v7  ;;  %v6419_v7 = vpop.f32.mrf.mxu2 }
 0x197   :  { %6611 = vmatmul.bf16.vlgmr.msrb.gmra.mxu1 %v13517_v44  ;;  %v6392_v16 = vadd.f32 %v6391_v9, %v6379_v61  ;;  %v12192_v22 = vld [vmem:[%s19610_s1 + $0x5cc] sm:$0xf0] }
 0x198   :  { %6636 = vmatpush.bf16.msrb.mxu3 %v11509_v27  ;;  %6655 = vmatpush.bf16.msra.mxu1 %v8889_v29  ;;  %v9144_v23 = vld [vmem:[%s19610_s1 + $0x990] sm:$0xf]  ;;  %v8121_v27 = vor.u32 %v12064_v14, %v8120_v13  ;;  %v8633_v28 = vor.u32 %v12192_v22, %v8632_v15 }
 0x199   :  { %6624 = vmatmul.bf16.vlgmr.msrb.gmra.mxu2 %v13505_v38  ;;  %v12320_v24 = vld [vmem:[%s19610_s1 + $0x9cc] sm:$0xf0]  ;;  %v6405_v26 = vadd.f32 %v6404_v17, %v6392_v16 }
 0x19a   :  { %6668 = vmatpush.bf16.msra.mxu2 %v9401_v30  ;;  %6643 = vmatpush.bf16.msra.mxu0 %v8313_v47  ;;  %v9656_v25 = vld [vmem:[%s19610_s1 + $0xd90] sm:$0xf]  ;;  %v9145_v29 = vor.u32 %v12320_v24, %v9144_v23  ;;  %v6406_v57 = vpop.f32.mrf.mxu1 }
 0x19b   :  { %6637 = vmatmul.bf16.vlgmr.msrb.gmra.mxu3 %v13515_v42  ;;  %v12448_v12 = vld [vmem:[%s19610_s1 + $0xdcc] sm:$0xf0]  ;;  %v6418_v40 = vadd.f32 %v6417_v34, %v6405_v26 }
 0x19c   :  { %6681 = vmatpush.bf16.msra.mxu3 %v9913_v36  ;;  %6656 = vmatpush.bf16.msra.mxu1 %v8825_v48  ;;  %v8056_v30 = vld [vmem:[%s19610_s1 + $0x110] sm:$0xf]  ;;  %v9657_v35 = vor.u32 %v12448_v12, %v9656_v25 }
 0x19d   :  { %v12048_v31 = vld [vmem:[%s19610_s1 + $0x14c] sm:$0xf0] }
 0x19e   :  { %6669 = vmatpush.bf16.msra.mxu2 %v9337_v49  ;;  %6644 = vmatpush.bf16.msra.mxu0 %v8249_v60  ;;  %v8568_v32 = vld [vmem:[%s19610_s1 + $0x510] sm:$0xf]  ;;  %v8057_v48 = vor.u32 %v12048_v31, %v8056_v30  ;;  %v6431_v49 = vadd.f32 %v6430_v43, %v6418_v40  ;;  %v6393_v51 = vpop.f32.mrf.mxu0 }
 0x19f   :  { %v12176_v36 = vld [vmem:[%s19610_s1 + $0x54c] sm:$0xf0] }
 0x1a0   :  { %6682 = vmatpush.bf16.msra.mxu3 %v9849_v55  ;;  %6657 = vmatpush.bf16.msra.mxu1 %v8761_v62  ;;  %v9080_v37 = vld [vmem:[%s19610_s1 + $0x910] sm:$0xf]  ;;  %v8569_v52 = vor.u32 %v12176_v36, %v8568_v32  ;;  %7891 = vst [vmem:[%s19613_s3 + $0x8] sm:$0xff] %v6431_v49 }
 0x1a1   :  { %v12304_v18 = vld [vmem:[%s19610_s1 + $0x94c] sm:$0xf0] }
 0x1a2   :  { %6670 = vmatpush.bf16.msra.mxu2 %v9273_v63  ;;  %6645 = vmatpush.bf16.msra.mxu0 %v8185_v58  ;;  %v9592_v45 = vld [vmem:[%s19610_s1 + $0xd10] sm:$0xf]  ;;  %v9081_v54 = vor.u32 %v12304_v18, %v9080_v37 }
 0x1a3   :  { %v12432_v47 = vld [vmem:[%s19610_s1 + $0xd4c] sm:$0xf0] }
 0x1a4   :  { %6683 = vmatpush.bf16.msra.mxu3 %v9785_v3  ;;  %6658 = vmatpush.bf16.msra.mxu1 %v8697_v10  ;;  %v7992_v50 = vld [vmem:[%s19610_s1 + $0x90] sm:$0xf]  ;;  %v9593_v53 = vor.u32 %v12432_v47, %v9592_v45 }
 0x1a5   :  { %v12032_v55 = vld [vmem:[%s19610_s1 + $0xcc] sm:$0xf0] }
 0x1a6   :  { %6671 = vmatpush.bf16.msra.mxu2 %v9209_v11  ;;  %6646 = vmatpush.bf16.msra.mxu0 %v8121_v27  ;;  %v8504_v33 = vld [vmem:[%s19610_s1 + $0x490] sm:$0xf]  ;;  %v7993_v63 = vor.u32 %v12032_v55, %v7992_v50  ;;  %v6432_v11 = vpop.f32.mrf.mxu3 }
 0x1a7   :  { %v12160_v56 = vld [vmem:[%s19610_s1 + $0x4cc] sm:$0xf0]  ;;  %v14985_v11 = vpop.f32.mrf.mxu1 }
 0x1a8   :  { %6684 = vmatpush.bf16.msra.mxu3 %v9721_v19  ;;  %6659 = vmatpush.bf16.msra.mxu1 %v8633_v28  ;;  %v9016_v59 = vld [vmem:[%s19610_s1 + $0x890] sm:$0xf]  ;;  %v8505_v2 = vor.u32 %v12160_v56, %v8504_v33 }
 0x1a9   :  { %v12288_v60 = vld [vmem:[%s19610_s1 + $0x8cc] sm:$0xf0] }
 0x1aa   :  { %6672 = vmatpush.bf16.msra.mxu2 %v9145_v29  ;;  %v9528_v61 = vld [vmem:[%s19610_s1 + $0xc90] sm:$0xf]  ;;  %6647 = vmatpush.bf16.msra.mxu0 %v8057_v48  ;;  %v9017_v3 = vor.u32 %v12288_v60, %v9016_v59 }
 0x1ab   :  { %v12416_v62 = vld [vmem:[%s19610_s1 + $0xccc] sm:$0xf0] }
 0x1ac   :  { %6685 = vmatpush.bf16.msra.mxu3 %v9657_v35  ;;  %v7928_v0 = vld [vmem:[%s19610_s1 + $0x10] sm:$0xf]  ;;  %6660 = vmatpush.bf16.msra.mxu1 %v8569_v52  ;;  %v9529_v8 = vor.u32 %v12416_v62, %v9528_v61 }
 0x1ad   :  { %v12016_v1 = vld [vmem:[%s19610_s1 + $0x4c] sm:$0xf0] }
 0x1ae   :  { %6673 = vmatpush.bf16.msra.mxu2 %v9081_v54  ;;  %v8440_v39 = vld [vmem:[%s19610_s1 + $0x410] sm:$0xf]  ;;  %6648 = vmatpush.bf16.msra.mxu0 %v7993_v63  ;;  %v7929_v16 = vor.u32 %v12016_v1, %v7928_v0 }
 0x1af   :  { %v12144_v46 = vld [vmem:[%s19610_s1 + $0x44c] sm:$0xf0] }
 0x1b0   :  { %v8952_v5 = vld [vmem:[%s19610_s1 + $0x810] sm:$0xf]  ;;  %6686 = vmatpush.bf16.msra.mxu3 %v9593_v53  ;;  %6661 = vmatpush.bf16.msra.mxu1 %v8505_v2  ;;  %v8441_v23 = vor.u32 %v12144_v46, %v8440_v39 }
 0x1b1   :  { %v12272_v58 = vld [vmem:[%s19610_s1 + $0x84c] sm:$0xf0] }
 0x1b2   :  { %v9464_v9 = vld [vmem:[%s19610_s1 + $0xc10] sm:$0xf]  ;;  %6674 = vmatpush.bf16.msra.mxu2 %v9017_v3  ;;  %v8953_v24 = vor.u32 %v12272_v58, %v8952_v5  ;;  %6649 = vmatpush.bf16.msra.mxu0 %v7929_v16  ;;  %v14974_v5 = vpop.f32.mrf.mxu0 }
 0x1b3   :  { %v12400_v10 = vld [vmem:[%s19610_s1 + $0xc4c] sm:$0xf0] }
 0x1b4   :  { %v10424_v13 = vld [vmem:[%s19610_s1 + $0x1390] sm:$0xf]  ;;  %6687 = vmatpush.bf16.msra.mxu3 %v9529_v8  ;;  %v9465_v26 = vor.u32 %v12400_v10, %v9464_v9  ;;  %6662 = vmatpush.bf16.msra.mxu1 %v8441_v23 }
 0x1b5   :  { %v12640_v14 = vld [vmem:[%s19610_s1 + $0x13cc] sm:$0xf0]  ;;  %6650 = vmatmul.bf16.vlgmr.msra.gmra.mxu0 %v13354_v20 }
 0x1b6   :  { %v10936_v15 = vld [vmem:[%s19610_s1 + $0x1790] sm:$0xf]  ;;  %v10425_v27 = vor.u32 %v12640_v14, %v10424_v13  ;;  %6675 = vmatpush.bf16.msra.mxu2 %v8953_v24 }
 0x1b7   :  { %v12768_v17 = vld [vmem:[%s19610_s1 + $0x17cc] sm:$0xf0]  ;;  %6663 = vmatmul.bf16.vlgmr.msra.gmra.mxu1 %v13357_v21 }
 0x1b8   :  { %v11448_v19 = vld [vmem:[%s19610_s1 + $0x1b90] sm:$0xf]  ;;  %v10937_v28 = vor.u32 %v12768_v17, %v10936_v15  ;;  %6688 = vmatpush.bf16.msra.mxu3 %v9465_v26  ;;  %6694 = vmatpush.bf16.msrb.mxu0 %v10425_v27  ;;  %v15011_v27 = vpop.f32.mrf.mxu2 }
 0x1b9   :  { %v12896_v22 = vld [vmem:[%s19610_s1 + $0x1bcc] sm:$0xf0]  ;;  %6676 = vmatmul.bf16.vlgmr.msra.gmra.mxu2 %v13322_v4 }
 0x1ba   :  { %v11960_v25 = vld [vmem:[%s19610_s1 + $0x1f90] sm:$0xf]  ;;  %v11449_v29 = vor.u32 %v12896_v22, %v11448_v19  ;;  %6707 = vmatpush.bf16.msrb.mxu1 %v10937_v28 }
 0x1bb   :  { %v13024_v12 = vld [vmem:[%s19610_s1 + $0x1fcc] sm:$0xf0]  ;;  %6689 = vmatmul.bf16.vlgmr.msra.gmra.mxu3 %v13327_v6 }
 0x1bc   :  { %v10360_v30 = vld [vmem:[%s19610_s1 + $0x1310] sm:$0xf]  ;;  %v11961_v34 = vor.u32 %v13024_v12, %v11960_v25  ;;  %6720 = vmatpush.bf16.msrb.mxu2 %v11449_v29 }
 0x1bd   :  { %v12624_v31 = vld [vmem:[%s19610_s1 + $0x134c] sm:$0xf0] }
 0x1be   :  { %v10872_v32 = vld [vmem:[%s19610_s1 + $0x1710] sm:$0xf]  ;;  %v10361_v43 = vor.u32 %v12624_v31, %v10360_v30  ;;  %6733 = vmatpush.bf16.msrb.mxu3 %v11961_v34 }
 0x1bf   :  { %v12752_v35 = vld [vmem:[%s19610_s1 + $0x174c] sm:$0xf0] }
 0x1c0   :  { %v11384_v36 = vld [vmem:[%s19610_s1 + $0x1b10] sm:$0xf]  ;;  %v10873_v45 = vor.u32 %v12752_v35, %v10872_v32  ;;  %6695 = vmatpush.bf16.msrb.mxu0 %v10361_v43  ;;  %v15022_v32 = vpop.f32.mrf.mxu3 }
 0x1c1   :  { %v12880_v37 = vld [vmem:[%s19610_s1 + $0x1b4c] sm:$0xf0] }
 0x1c2   :  { %v11896_v18 = vld [vmem:[%s19610_s1 + $0x1f10] sm:$0xf]  ;;  %v11385_v47 = vor.u32 %v12880_v37, %v11384_v36  ;;  %6708 = vmatpush.bf16.msrb.mxu1 %v10873_v45  ;;  %v6445_v37 = vpop.f32.mrf.mxu0 }
 0x1c3   :  { %v13008_v40 = vld [vmem:[%s19610_s1 + $0x1f4c] sm:$0xf0]  ;;  %v9850_v37 = vld [vmem:[%s19610_s1 + $0xf50] sm:$0xf0] }
 0x1c4   :  { %v10296_v48 = vld [vmem:[%s19610_s1 + $0x1290] sm:$0xf]  ;;  %v11897_v51 = vor.u32 %v13008_v40, %v11896_v18  ;;  %6721 = vmatpush.bf16.msrb.mxu2 %v11385_v47 }
 0x1c5   :  { %v12608_v49 = vld [vmem:[%s19610_s1 + $0x12cc] sm:$0xf0] }
 0x1c6   :  { %v10808_v50 = vld [vmem:[%s19610_s1 + $0x1690] sm:$0xf]  ;;  %v10297_v57 = vor.u32 %v12608_v49, %v10296_v48  ;;  %6734 = vmatpush.bf16.msrb.mxu3 %v11897_v51  ;;  %v6458_v48 = vpop.f32.mrf.mxu1 }
 0x1c7   :  { %v12736_v52 = vld [vmem:[%s19610_s1 + $0x16cc] sm:$0xf0]  ;;  %v8250_v48 = vld [vmem:[%s19610_s1 + $0x2d0] sm:$0xf0] }
 0x1c8   :  { %v11320_v54 = vld [vmem:[%s19610_s1 + $0x1a90] sm:$0xf]  ;;  %v10809_v53 = vor.u32 %v12736_v52, %v10808_v50  ;;  %6696 = vmatpush.bf16.msrb.mxu0 %v10297_v57 }
 0x1c9   :  { %v12864_v55 = vld [vmem:[%s19610_s1 + $0x1acc] sm:$0xf0] }
 0x1ca   :  { %v11832_v33 = vld [vmem:[%s19610_s1 + $0x1e90] sm:$0xf]  ;;  %v11321_v59 = vor.u32 %v12864_v55, %v11320_v54  ;;  %6709 = vmatpush.bf16.msrb.mxu1 %v10809_v53 }
 0x1cb   :  { %v12992_v56 = vld [vmem:[%s19610_s1 + $0x1ecc] sm:$0xf0] }
 0x1cc   :  { %v10232_v60 = vld [vmem:[%s19610_s1 + $0x1210] sm:$0xf]  ;;  %v11833_v63 = vor.u32 %v12992_v56, %v11832_v33  ;;  %6722 = vmatpush.bf16.msrb.mxu2 %v11321_v59  ;;  %v15057_v33 = vld [vmem:[%s19612_s2] sm:$0xff] }
 0x1cd   :  { %v12592_v61 = vld [vmem:[%s19610_s1 + $0x124c] sm:$0xf0]  ;;  %v1048_v56 = vperm.slane %v15057_v33, 2 }
 0x1ce   :  { %v10744_v62 = vld [vmem:[%s19610_s1 + $0x1610] sm:$0xf]  ;;  %v10233_v46 = vor.u32 %v12592_v61, %v10232_v60  ;;  %6735 = vmatpush.bf16.msrb.mxu3 %v11833_v63 }
 0x1cf   :  { %v12720_v0 = vld [vmem:[%s19610_s1 + $0x164c] sm:$0xf0] }
 0x1d0   :  { %v11256_v1 = vld [vmem:[%s19610_s1 + $0x1a10] sm:$0xf]  ;;  %v10745_v7 = vor.u32 %v12720_v0, %v10744_v62  ;;  %6697 = vmatpush.bf16.msrb.mxu0 %v10233_v46 }
 0x1d1   :  { %v12848_v2 = vld [vmem:[%s19610_s1 + $0x1a4c] sm:$0xf0] }
 0x1d2   :  { %v11768_v3 = vld [vmem:[%s19610_s1 + $0x1e10] sm:$0xf]  ;;  %v11257_v8 = vor.u32 %v12848_v2, %v11256_v1  ;;  %6710 = vmatpush.bf16.msrb.mxu1 %v10745_v7  ;;  %v6471_v1 = vpop.f32.mrf.mxu2  ;;  %v6484_v7 = vpop.f32.mrf.mxu3 }
 0x1d3   :  { %v12976_v39 = vld [vmem:[%s19610_s1 + $0x1e4c] sm:$0xf0]  ;;  %v9210_v1 = vld [vmem:[%s19610_s1 + $0xa50] sm:$0xf0] }
 0x1d4   :  { %v10168_v58 = vld [vmem:[%s19610_s1 + $0x1190] sm:$0xf]  ;;  %v11769_v13 = vor.u32 %v12976_v39, %v11768_v3  ;;  %6723 = vmatpush.bf16.msrb.mxu2 %v11257_v8  ;;  %v12120_v8 = vld [vmem:[%s19610_s1 + $0x394] sm:$0xf] }
 0x1d5   :  { %v12576_v9 = vld [vmem:[%s19610_s1 + $0x11cc] sm:$0xf0] }
 0x1d6   :  { %v10680_v10 = vld [vmem:[%s19610_s1 + $0x1590] sm:$0xf]  ;;  %v10169_v22 = vor.u32 %v12576_v9, %v10168_v58  ;;  %6736 = vmatpush.bf16.msrb.mxu3 %v11769_v13  ;;  %v8378_v58 = vld [vmem:[%s19610_s1 + $0x3d0] sm:$0xf0] }
 0x1d7   :  { %v12704_v14 = vld [vmem:[%s19610_s1 + $0x15cc] sm:$0xf0]  ;;  %v12248_v9 = vld [vmem:[%s19610_s1 + $0x794] sm:$0xf] }
 0x1d8   :  { %v11192_v15 = vld [vmem:[%s19610_s1 + $0x1990] sm:$0xf]  ;;  %v10681_v23 = vor.u32 %v12704_v14, %v10680_v10  ;;  %6698 = vmatpush.bf16.msrb.mxu0 %v10169_v22  ;;  %v6444_v10 = vadd.f32 %v14974_v5, %v1048_v56  ;;  %v8890_v14 = vld [vmem:[%s19610_s1 + $0x7d0] sm:$0xf0] }
 0x1d9   :  { %v12832_v16 = vld [vmem:[%s19610_s1 + $0x19cc] sm:$0xf0]  ;;  %v12504_v5 = vld [vmem:[%s19610_s1 + $0xf94] sm:$0xf] }
 0x1da   :  { %v11704_v17 = vld [vmem:[%s19610_s1 + $0x1d90] sm:$0xf]  ;;  %v11193_v24 = vor.u32 %v12832_v16, %v11192_v15  ;;  %6711 = vmatpush.bf16.msrb.mxu1 %v10681_v23  ;;  %v12376_v15 = vld [vmem:[%s19610_s1 + $0xb94] sm:$0xf] }
 0x1db   :  { %v12960_v19 = vld [vmem:[%s19610_s1 + $0x1dcc] sm:$0xf0]  ;;  %v9402_v16 = vld [vmem:[%s19610_s1 + $0xbd0] sm:$0xf0] }
 0x1dc   :  { %v10104_v25 = vld [vmem:[%s19610_s1 + $0x1110] sm:$0xf]  ;;  %v11705_v28 = vor.u32 %v12960_v19, %v11704_v17  ;;  %6724 = vmatpush.bf16.msrb.mxu2 %v11193_v24  ;;  %v9914_v22 = vld [vmem:[%s19610_s1 + $0xfd0] sm:$0xf0]  ;;  %v8381_v24 = vor.u32 %v12120_v8, %v8378_v58 }
 0x1dd   :  { %v12560_v12 = vld [vmem:[%s19610_s1 + $0x114c] sm:$0xf0]  ;;  %v12056_v58 = vld [vmem:[%s19610_s1 + $0x194] sm:$0xf] }
 0x1de   :  { %v10616_v26 = vld [vmem:[%s19610_s1 + $0x1510] sm:$0xf]  ;;  %v10105_v36 = vor.u32 %v12560_v12, %v10104_v25  ;;  %6737 = vmatpush.bf16.msrb.mxu3 %v11705_v28  ;;  %v8893_v25 = vor.u32 %v12248_v9, %v8890_v14  ;;  %v9405_v12 = vor.u32 %v12376_v15, %v9402_v16  ;;  %v12104_v28 = vld [vmem:[%s19610_s1 + $0x314] sm:$0xf]  ;;  %v6508_v14 = vpop.f32.mrf.mxu1 }
 0x1df   :  { %v12688_v29 = vld [vmem:[%s19610_s1 + $0x154c] sm:$0xf0]  ;;  %v8122_v9 = vld [vmem:[%s19610_s1 + $0x1d0] sm:$0xf0] }
 0x1e0   :  { %v11128_v30 = vld [vmem:[%s19610_s1 + $0x1910] sm:$0xf]  ;;  %v10617_v18 = vor.u32 %v12688_v29, %v10616_v26  ;;  %6699 = vmatpush.bf16.msrb.mxu0 %v10105_v36  ;;  %v6457_v26 = vadd.f32 %v14985_v11, %v6444_v10  ;;  %v8314_v29 = vld [vmem:[%s19610_s1 + $0x350] sm:$0xf0] }
 0x1e1   :  { %v12816_v31 = vld [vmem:[%s19610_s1 + $0x194c] sm:$0xf0]  ;;  %v12360_v11 = vld [vmem:[%s19610_s1 + $0xb14] sm:$0xf] }
 0x1e2   :  { %v11640_v34 = vld [vmem:[%s19610_s1 + $0x1d10] sm:$0xf]  ;;  %v11129_v40 = vor.u32 %v12816_v31, %v11128_v30  ;;  %6712 = vmatpush.bf16.msrb.mxu1 %v10617_v18  ;;  %v12232_v30 = vld [vmem:[%s19610_s1 + $0x714] sm:$0xf]  ;;  %v9917_v31 = vor.u32 %v12504_v5, %v9914_v22  ;;  %v8317_v18 = vor.u32 %v12104_v28, %v8314_v29 }
 0x1e3   :  { %v12944_v35 = vld [vmem:[%s19610_s1 + $0x1d4c] sm:$0xf0]  ;;  %v12488_v36 = vld [vmem:[%s19610_s1 + $0xf14] sm:$0xf] }
 0x1e4   :  { %v10040_v43 = vld [vmem:[%s19610_s1 + $0x1090] sm:$0xf]  ;;  %v11641_v49 = vor.u32 %v12944_v35, %v11640_v34  ;;  %6725 = vmatpush.bf16.msrb.mxu2 %v11129_v40  ;;  %v8826_v34 = vld [vmem:[%s19610_s1 + $0x750] sm:$0xf0] }
 0x1e5   :  { %v12544_v45 = vld [vmem:[%s19610_s1 + $0x10cc] sm:$0xf0]  ;;  %v9338_v35 = vld [vmem:[%s19610_s1 + $0xb50] sm:$0xf0]  ;;  %v8829_v40 = vor.u32 %v12232_v30, %v8826_v34  ;;  %v6521_v30 = vpop.f32.mrf.mxu2 }
 0x1e6   :  { %v10552_v47 = vld [vmem:[%s19610_s1 + $0x1490] sm:$0xf]  ;;  %v10041_v57 = vor.u32 %v12544_v45, %v10040_v43  ;;  %6738 = vmatpush.bf16.msrb.mxu3 %v11641_v49  ;;  %v9341_v43 = vor.u32 %v12360_v11, %v9338_v35  ;;  %v6470_v45 = vadd.f32 %v15011_v27, %v6457_v26  ;;  %v12216_v49 = vld [vmem:[%s19610_s1 + $0x694] sm:$0xf] }
 0x1e7   :  { %v12672_v50 = vld [vmem:[%s19610_s1 + $0x14cc] sm:$0xf0]  ;;  %v8762_v27 = vld [vmem:[%s19610_s1 + $0x6d0] sm:$0xf0] }
 0x1e8   :  { %v11064_v51 = vld [vmem:[%s19610_s1 + $0x1890] sm:$0xf]  ;;  %v10553_v60 = vor.u32 %v12672_v50, %v10552_v47  ;;  %6700 = vmatpush.bf16.msrb.mxu0 %v10041_v57  ;;  %v12088_v47 = vld [vmem:[%s19610_s1 + $0x294] sm:$0xf]  ;;  %v9853_v50 = vor.u32 %v12488_v36, %v9850_v37  ;;  %v6483_v57 = vadd.f32 %v15022_v32, %v6470_v45  ;;  %v6534_v37 = vpop.f32.mrf.mxu3 }
 0x1e9   :  { %v12800_v52 = vld [vmem:[%s19610_s1 + $0x18cc] sm:$0xf0]  ;;  %v8253_v56 = vor.u32 %v12088_v47, %v8250_v48  ;;  %v8698_v32 = vld [vmem:[%s19610_s1 + $0x650] sm:$0xf0] }
 0x1ea   :  { %v11576_v54 = vld [vmem:[%s19610_s1 + $0x1c90] sm:$0xf]  ;;  %v11065_v61 = vor.u32 %v12800_v52, %v11064_v51  ;;  %6713 = vmatpush.bf16.msrb.mxu1 %v10553_v60  ;;  %v12344_v51 = vld [vmem:[%s19610_s1 + $0xa94] sm:$0xf] }
 0x1eb   :  { %v12928_v55 = vld [vmem:[%s19610_s1 + $0x1ccc] sm:$0xf0]  ;;  %v9274_v52 = vld [vmem:[%s19610_s1 + $0xad0] sm:$0xf0] }
 0x1ec   :  { %v9976_v53 = vld [vmem:[%s19610_s1 + $0x1010] sm:$0xf]  ;;  %v11577_v2 = vor.u32 %v12928_v55, %v11576_v54  ;;  %6726 = vmatpush.bf16.msrb.mxu2 %v11065_v61  ;;  %v12472_v54 = vld [vmem:[%s19610_s1 + $0xe94] sm:$0xf] }
 0x1ed   :  { %v12528_v59 = vld [vmem:[%s19610_s1 + $0x104c] sm:$0xf0]  ;;  %v9786_v55 = vld [vmem:[%s19610_s1 + $0xed0] sm:$0xf0] }
 0x1ee   :  { %v10488_v62 = vld [vmem:[%s19610_s1 + $0x1410] sm:$0xf]  ;;  %v9977_v13 = vor.u32 %v12528_v59, %v9976_v53  ;;  %6739 = vmatpush.bf16.msrb.mxu3 %v11577_v2  ;;  %v8765_v53 = vor.u32 %v12216_v49, %v8762_v27  ;;  %v9277_v59 = vor.u32 %v12344_v51, %v9274_v52  ;;  %v12072_v60 = vld [vmem:[%s19610_s1 + $0x214] sm:$0xf] }
 0x1ef   :  { %v12656_v63 = vld [vmem:[%s19610_s1 + $0x144c] sm:$0xf0]  ;;  %v8186_v61 = vld [vmem:[%s19610_s1 + $0x250] sm:$0xf0] }
 0x1f0   :  { %v11000_v0 = vld [vmem:[%s19610_s1 + $0x1810] sm:$0xf]  ;;  %v10489_v17 = vor.u32 %v12656_v63, %v10488_v62  ;;  %6701 = vmatpush.bf16.msrb.mxu0 %v9977_v13  ;;  %v12200_v62 = vld [vmem:[%s19610_s1 + $0x614] sm:$0xf]  ;;  %v9789_v63 = vor.u32 %v12472_v54, %v9786_v55  ;;  %v6510_v54 = vpop.f32.mrf.mxu1 }
 0x1f1   :  { %v12784_v3 = vld [vmem:[%s19610_s1 + $0x184c] sm:$0xf0]  ;;  %v12456_v2 = vld [vmem:[%s19610_s1 + $0xe14] sm:$0xf]  ;;  %v8701_v7 = vor.u32 %v12200_v62, %v8698_v32 }
 0x1f2   :  { %v11512_v39 = vld [vmem:[%s19610_s1 + $0x1c10] sm:$0xf]  ;;  %v11001_v19 = vor.u32 %v12784_v3, %v11000_v0  ;;  %6714 = vmatpush.bf16.msrb.mxu1 %v10489_v17  ;;  %v12328_v0 = vld [vmem:[%s19610_s1 + $0xa14] sm:$0xf] }
 0x1f3   :  { %v12912_v46 = vld [vmem:[%s19610_s1 + $0x1c4c] sm:$0xf0]  ;;  %6702 = vmatmul.bf16.vlgmr.msrb.gmra.mxu0 %v13513_v41  ;;  %v9722_v3 = vld [vmem:[%s19610_s1 + $0xe50] sm:$0xf0]  ;;  %v9213_v8 = vor.u32 %v12328_v0, %v9210_v1 }
 0x1f4   :  { %v11513_v23 = vor.u32 %v12912_v46, %v11512_v39  ;;  %6727 = vmatpush.bf16.msrb.mxu2 %v11001_v19  ;;  %6746 = vmatpush.bf16.msra.mxu0 %v8381_v24  ;;  %v8189_v39 = vor.u32 %v12072_v60, %v8186_v61  ;;  %v6495_v46 = vpop.f32.mrf.mxu0  ;;  %v12184_v10 = vld [vmem:[%s19610_s1 + $0x594] sm:$0xf]  ;;  %v9725_v15 = vor.u32 %v12456_v2, %v9722_v3  ;;  %v6523_v3 = vpop.f32.mrf.mxu2 }
 0x1f5   :  { %6715 = vmatmul.bf16.vlgmr.msrb.gmra.mxu1 %v13517_v44  ;;  %v6496_v13 = vadd.f32 %v6495_v46, %v6483_v57  ;;  %v8634_v16 = vld [vmem:[%s19610_s1 + $0x5d0] sm:$0xf0]  ;;  %v8125_v24 = vor.u32 %v12056_v58, %v8122_v9  ;;  %v6536_v58 = vpop.f32.mrf.mxu3 }
 0x1f6   :  { %6740 = vmatpush.bf16.msrb.mxu3 %v11513_v23  ;;  %6759 = vmatpush.bf16.msra.mxu1 %v8893_v25  ;;  %v12312_v17 = vld [vmem:[%s19610_s1 + $0x994] sm:$0xf]  ;;  %v8637_v25 = vor.u32 %v12184_v10, %v8634_v16 }
 0x1f7   :  { %6728 = vmatmul.bf16.vlgmr.msrb.gmra.mxu2 %v13505_v38  ;;  %v9146_v19 = vld [vmem:[%s19610_s1 + $0x9d0] sm:$0xf0]  ;;  %v6509_v23 = vadd.f32 %v6508_v14, %v6496_v13 }
 0x1f8   :  { %6772 = vmatpush.bf16.msra.mxu2 %v9405_v12  ;;  %6747 = vmatpush.bf16.msra.mxu0 %v8317_v18  ;;  %v12440_v5 = vld [vmem:[%s19610_s1 + $0xd94] sm:$0xf]  ;;  %v9149_v12 = vor.u32 %v12312_v17, %v9146_v19 }
 0x1f9   :  { %6741 = vmatmul.bf16.vlgmr.msrb.gmra.mxu3 %v13515_v42  ;;  %v9658_v22 = vld [vmem:[%s19610_s1 + $0xdd0] sm:$0xf0]  ;;  %v6522_v36 = vadd.f32 %v6521_v30, %v6509_v23 }
 0x1fa   :  { %6785 = vmatpush.bf16.msra.mxu3 %v9917_v31  ;;  %6760 = vmatpush.bf16.msra.mxu1 %v8829_v40  ;;  %v12040_v26 = vld [vmem:[%s19610_s1 + $0x114] sm:$0xf]  ;;  %v9661_v31 = vor.u32 %v12440_v5, %v9658_v22 }
 0x1fb   :  { %v8058_v28 = vld [vmem:[%s19610_s1 + $0x150] sm:$0xf0]  ;;  %v6535_v45 = vadd.f32 %v6534_v37, %v6522_v36 }
 0x1fc   :  { %6773 = vmatpush.bf16.msra.mxu2 %v9341_v43  ;;  %6748 = vmatpush.bf16.msra.mxu0 %v8253_v56  ;;  %v12168_v29 = vld [vmem:[%s19610_s1 + $0x514] sm:$0xf]  ;;  %v8061_v43 = vor.u32 %v12040_v26, %v8058_v28  ;;  %v6497_v48 = vpop.f32.mrf.mxu0 }
 0x1fd   :  { %v8570_v34 = vld [vmem:[%s19610_s1 + $0x550] sm:$0xf0]  ;;  %7892 = vst [vmem:[%s19613_s3 + $0x10] sm:$0xff] %v6535_v45 }
 0x1fe   :  { %6786 = vmatpush.bf16.msra.mxu3 %v9853_v50  ;;  %6761 = vmatpush.bf16.msra.mxu1 %v8765_v53  ;;  %v12296_v11 = vld [vmem:[%s19610_s1 + $0x914] sm:$0xf]  ;;  %v8573_v49 = vor.u32 %v12168_v29, %v8570_v34 }
 0x1ff   :  { %v9082_v35 = vld [vmem:[%s19610_s1 + $0x950] sm:$0xf0] }
 0x200   :  { %6774 = vmatpush.bf16.msra.mxu2 %v9277_v59  ;;  %6749 = vmatpush.bf16.msra.mxu0 %v8189_v39  ;;  %v12424_v18 = vld [vmem:[%s19610_s1 + $0xd14] sm:$0xf]  ;;  %v9085_v50 = vor.u32 %v12296_v11, %v9082_v35 }
 0x201   :  { %v9594_v40 = vld [vmem:[%s19610_s1 + $0xd50] sm:$0xf0] }
 0x202   :  { %6787 = vmatpush.bf16.msra.mxu3 %v9789_v63  ;;  %6762 = vmatpush.bf16.msra.mxu1 %v8701_v7  ;;  %v12024_v47 = vld [vmem:[%s19610_s1 + $0x94] sm:$0xf]  ;;  %v9597_v55 = vor.u32 %v12424_v18, %v9594_v40 }
 0x203   :  { %v7994_v27 = vld [vmem:[%s19610_s1 + $0xd0] sm:$0xf0] }
 0x204   :  { %6775 = vmatpush.bf16.msra.mxu2 %v9213_v8  ;;  %6750 = vmatpush.bf16.msra.mxu0 %v8125_v24  ;;  %v12152_v51 = vld [vmem:[%s19610_s1 + $0x494] sm:$0xf]  ;;  %v7997_v60 = vor.u32 %v12024_v47, %v7994_v27  ;;  %v15387_v3 = vpop.f32.mrf.mxu0 }
 0x205   :  { %v8506_v52 = vld [vmem:[%s19610_s1 + $0x4d0] sm:$0xf0] }
 0x206   :  { %6788 = vmatpush.bf16.msra.mxu3 %v9725_v15  ;;  %6763 = vmatpush.bf16.msra.mxu1 %v8637_v25  ;;  %v12280_v56 = vld [vmem:[%s19610_s1 + $0x894] sm:$0xf]  ;;  %v8509_v63 = vor.u32 %v12152_v51, %v8506_v52 }
 0x207   :  { %v9018_v57 = vld [vmem:[%s19610_s1 + $0x8d0] sm:$0xf0] }
 0x208   :  { %6776 = vmatpush.bf16.msra.mxu2 %v9149_v12  ;;  %v12408_v53 = vld [vmem:[%s19610_s1 + $0xc94] sm:$0xf]  ;;  %6751 = vmatpush.bf16.msra.mxu0 %v8061_v43  ;;  %v9021_v32 = vor.u32 %v12280_v56, %v9018_v57 }
 0x209   :  { %v9530_v59 = vld [vmem:[%s19610_s1 + $0xcd0] sm:$0xf0] }
 0x20a   :  { %6789 = vmatpush.bf16.msra.mxu3 %v9661_v31  ;;  %v12008_v61 = vld [vmem:[%s19610_s1 + $0x14] sm:$0xf]  ;;  %6764 = vmatpush.bf16.msra.mxu1 %v8573_v49  ;;  %v9533_v39 = vor.u32 %v12408_v53, %v9530_v59 }
 0x20b   :  { %v7930_v62 = vld [vmem:[%s19610_s1 + $0x50] sm:$0xf0] }
 0x20c   :  { %6777 = vmatpush.bf16.msra.mxu2 %v9085_v50  ;;  %v12136_v0 = vld [vmem:[%s19610_s1 + $0x414] sm:$0xf]  ;;  %6752 = vmatpush.bf16.msra.mxu0 %v7997_v60  ;;  %v7933_v14 = vor.u32 %v12008_v61, %v7930_v62 }
 0x20d   :  { %v8442_v1 = vld [vmem:[%s19610_s1 + $0x450] sm:$0xf0] }
 0x20e   :  { %v12264_v2 = vld [vmem:[%s19610_s1 + $0x814] sm:$0xf]  ;;  %6790 = vmatpush.bf16.msra.mxu3 %v9597_v55  ;;  %6765 = vmatpush.bf16.msra.mxu1 %v8509_v63  ;;  %v8445_v19 = vor.u32 %v12136_v0, %v8442_v1 }
 0x20f   :  { %v8954_v46 = vld [vmem:[%s19610_s1 + $0x850] sm:$0xf0] }
 0x210   :  { %v12392_v7 = vld [vmem:[%s19610_s1 + $0xc14] sm:$0xf]  ;;  %6778 = vmatpush.bf16.msra.mxu2 %v9021_v32  ;;  %v8957_v5 = vor.u32 %v12264_v2, %v8954_v46  ;;  %6753 = vmatpush.bf16.msra.mxu0 %v7933_v14 }
 0x211   :  { %v9466_v8 = vld [vmem:[%s19610_s1 + $0xc50] sm:$0xf0] }
 0x212   :  { %v12632_v9 = vld [vmem:[%s19610_s1 + $0x1394] sm:$0xf]  ;;  %6791 = vmatpush.bf16.msra.mxu3 %v9533_v39  ;;  %v9469_v24 = vor.u32 %v12392_v7, %v9466_v8  ;;  %6766 = vmatpush.bf16.msra.mxu1 %v8445_v19 }
 0x213   :  { %v10426_v10 = vld [vmem:[%s19610_s1 + $0x13d0] sm:$0xf0]  ;;  %6754 = vmatmul.bf16.vlgmr.msra.gmra.mxu0 %v13354_v20 }
 0x214   :  { %v12760_v13 = vld [vmem:[%s19610_s1 + $0x1794] sm:$0xf]  ;;  %v10429_v25 = vor.u32 %v12632_v9, %v10426_v10  ;;  %6779 = vmatpush.bf16.msra.mxu2 %v8957_v5  ;;  %v15398_v9 = vpop.f32.mrf.mxu1 }
 0x215   :  { %v10938_v15 = vld [vmem:[%s19610_s1 + $0x17d0] sm:$0xf0]  ;;  %6767 = vmatmul.bf16.vlgmr.msra.gmra.mxu1 %v13357_v21 }
 0x216   :  { %v12888_v16 = vld [vmem:[%s19610_s1 + $0x1b94] sm:$0xf]  ;;  %v10941_v12 = vor.u32 %v12760_v13, %v10938_v15  ;;  %6792 = vmatpush.bf16.msra.mxu3 %v9469_v24  ;;  %6798 = vmatpush.bf16.msrb.mxu0 %v10429_v25 }
 0x217   :  { %v11450_v17 = vld [vmem:[%s19610_s1 + $0x1bd0] sm:$0xf0]  ;;  %6780 = vmatmul.bf16.vlgmr.msra.gmra.mxu2 %v13322_v4 }
 0x218   :  { %v13016_v22 = vld [vmem:[%s19610_s1 + $0x1f94] sm:$0xf]  ;;  %v11453_v26 = vor.u32 %v12888_v16, %v11450_v17  ;;  %6811 = vmatpush.bf16.msrb.mxu1 %v10941_v12  ;;  %v15424_v12 = vpop.f32.mrf.mxu2 }
 0x219   :  { %v11962_v23 = vld [vmem:[%s19610_s1 + $0x1fd0] sm:$0xf0]  ;;  %6793 = vmatmul.bf16.vlgmr.msra.gmra.mxu3 %v13327_v6 }
 0x21a   :  { %v12616_v28 = vld [vmem:[%s19610_s1 + $0x1314] sm:$0xf]  ;;  %v11965_v31 = vor.u32 %v13016_v22, %v11962_v23  ;;  %6824 = vmatpush.bf16.msrb.mxu2 %v11453_v26 }
 0x21b   :  { %v10362_v29 = vld [vmem:[%s19610_s1 + $0x1350] sm:$0xf0] }
 0x21c   :  { %v12744_v30 = vld [vmem:[%s19610_s1 + $0x1714] sm:$0xf]  ;;  %v10365_v18 = vor.u32 %v12616_v28, %v10362_v29  ;;  %6837 = vmatpush.bf16.msrb.mxu3 %v11965_v31  ;;  %v15435_v31 = vpop.f32.mrf.mxu3 }
 0x21d   :  { %v10874_v34 = vld [vmem:[%s19610_s1 + $0x1750] sm:$0xf0] }
 0x21e   :  { %v12872_v11 = vld [vmem:[%s19610_s1 + $0x1b14] sm:$0xf]  ;;  %v10877_v40 = vor.u32 %v12744_v30, %v10874_v34  ;;  %6799 = vmatpush.bf16.msrb.mxu0 %v10365_v18 }
 0x21f   :  { %v11386_v35 = vld [vmem:[%s19610_s1 + $0x1b50] sm:$0xf0] }
 0x220   :  { %v13000_v36 = vld [vmem:[%s19610_s1 + $0x1f14] sm:$0xf]  ;;  %v11389_v43 = vor.u32 %v12872_v11, %v11386_v35  ;;  %6812 = vmatpush.bf16.msrb.mxu1 %v10877_v40 }
 0x221   :  { %v11898_v37 = vld [vmem:[%s19610_s1 + $0x1f50] sm:$0xf0] }
 0x222   :  { %v12600_v45 = vld [vmem:[%s19610_s1 + $0x1294] sm:$0xf]  ;;  %v11901_v49 = vor.u32 %v13000_v36, %v11898_v37  ;;  %6825 = vmatpush.bf16.msrb.mxu2 %v11389_v43  ;;  %v6549_v36 = vpop.f32.mrf.mxu0 }
 0x223   :  { %v10298_v47 = vld [vmem:[%s19610_s1 + $0x12d0] sm:$0xf0] }
 0x224   :  { %v12728_v48 = vld [vmem:[%s19610_s1 + $0x1694] sm:$0xf]  ;;  %v10301_v55 = vor.u32 %v12600_v45, %v10298_v47  ;;  %6838 = vmatpush.bf16.msrb.mxu3 %v11901_v49  ;;  %v6562_v47 = vpop.f32.mrf.mxu1 }
 0x225   :  { %v10810_v50 = vld [vmem:[%s19610_s1 + $0x16d0] sm:$0xf0]  ;;  %v8768_v47 = vld [vmem:[%s19610_s1 + $0x698] sm:$0xf] }
 0x226   :  { %v12856_v27 = vld [vmem:[%s19610_s1 + $0x1a94] sm:$0xf]  ;;  %v10813_v56 = vor.u32 %v12728_v48, %v10810_v50  ;;  %6800 = vmatpush.bf16.msrb.mxu0 %v10301_v55 }
 0x227   :  { %v11322_v51 = vld [vmem:[%s19610_s1 + $0x1ad0] sm:$0xf0] }
 0x228   :  { %v12984_v52 = vld [vmem:[%s19610_s1 + $0x1e94] sm:$0xf]  ;;  %v11325_v57 = vor.u32 %v12856_v27, %v11322_v51  ;;  %6813 = vmatpush.bf16.msrb.mxu1 %v10813_v56 }
 0x229   :  { %v11834_v54 = vld [vmem:[%s19610_s1 + $0x1ed0] sm:$0xf0] }
 0x22a   :  { %v12584_v53 = vld [vmem:[%s19610_s1 + $0x1214] sm:$0xf]  ;;  %v11837_v61 = vor.u32 %v12984_v52, %v11834_v54  ;;  %6826 = vmatpush.bf16.msrb.mxu2 %v11325_v57  ;;  %v1049_v54 = vperm.slane %v15057_v33, 3 }
 0x22b   :  { %v10234_v59 = vld [vmem:[%s19610_s1 + $0x1250] sm:$0xf0] }
 0x22c   :  { %v12712_v60 = vld [vmem:[%s19610_s1 + $0x1614] sm:$0xf]  ;;  %v10237_v2 = vor.u32 %v12584_v53, %v10234_v59  ;;  %6839 = vmatpush.bf16.msrb.mxu3 %v11837_v61 }
 0x22d   :  { %v10746_v62 = vld [vmem:[%s19610_s1 + $0x1650] sm:$0xf0] }
 0x22e   :  { %v12840_v63 = vld [vmem:[%s19610_s1 + $0x1a14] sm:$0xf]  ;;  %v10749_v39 = vor.u32 %v12712_v60, %v10746_v62  ;;  %6801 = vmatpush.bf16.msrb.mxu0 %v10237_v2  ;;  %v6575_v62 = vpop.f32.mrf.mxu2  ;;  %v6588_v2 = vpop.f32.mrf.mxu3 }
 0x22f   :  { %v11258_v32 = vld [vmem:[%s19610_s1 + $0x1a50] sm:$0xf0]  ;;  %v9728_v62 = vld [vmem:[%s19610_s1 + $0xe18] sm:$0xf] }
 0x230   :  { %v12968_v0 = vld [vmem:[%s19610_s1 + $0x1e14] sm:$0xf]  ;;  %v11261_v46 = vor.u32 %v12840_v63, %v11258_v32  ;;  %6814 = vmatpush.bf16.msrb.mxu1 %v10749_v39  ;;  %v8384_v39 = vld [vmem:[%s19610_s1 + $0x398] sm:$0xf] }
 0x231   :  { %v11770_v1 = vld [vmem:[%s19610_s1 + $0x1e50] sm:$0xf0] }
 0x232   :  { %v12568_v7 = vld [vmem:[%s19610_s1 + $0x1194] sm:$0xf]  ;;  %v11773_v10 = vor.u32 %v12968_v0, %v11770_v1  ;;  %6827 = vmatpush.bf16.msrb.mxu2 %v11261_v46  ;;  %v12129_v46 = vld [vmem:[%s19610_s1 + $0x3d4] sm:$0xf0] }
 0x233   :  { %v10170_v8 = vld [vmem:[%s19610_s1 + $0x11d0] sm:$0xf0] }
 0x234   :  { %v12696_v58 = vld [vmem:[%s19610_s1 + $0x1594] sm:$0xf]  ;;  %v10173_v19 = vor.u32 %v12568_v7, %v10170_v8  ;;  %6840 = vmatpush.bf16.msrb.mxu3 %v11773_v10  ;;  %v8896_v7 = vld [vmem:[%s19610_s1 + $0x798] sm:$0xf]  ;;  %v6548_v8 = vadd.f32 %v15387_v3, %v1049_v54 }
 0x235   :  { %v10682_v13 = vld [vmem:[%s19610_s1 + $0x15d0] sm:$0xf0]  ;;  %v12257_v10 = vld [vmem:[%s19610_s1 + $0x7d4] sm:$0xf0] }
 0x236   :  { %v12824_v14 = vld [vmem:[%s19610_s1 + $0x1994] sm:$0xf]  ;;  %v10685_v5 = vor.u32 %v12696_v58, %v10682_v13  ;;  %6802 = vmatpush.bf16.msrb.mxu0 %v10173_v19  ;;  %v9408_v13 = vld [vmem:[%s19610_s1 + $0xb98] sm:$0xf] }
 0x237   :  { %v11194_v15 = vld [vmem:[%s19610_s1 + $0x19d0] sm:$0xf0]  ;;  %v9920_v3 = vld [vmem:[%s19610_s1 + $0xf98] sm:$0xf] }
 0x238   :  { %v12952_v16 = vld [vmem:[%s19610_s1 + $0x1d94] sm:$0xf]  ;;  %v11197_v22 = vor.u32 %v12824_v14, %v11194_v15  ;;  %6815 = vmatpush.bf16.msrb.mxu1 %v10685_v5  ;;  %v12385_v14 = vld [vmem:[%s19610_s1 + $0xbd4] sm:$0xf0]  ;;  %v8385_v5 = vor.u32 %v12129_v46, %v8384_v39 }
 0x239   :  { %v11706_v17 = vld [vmem:[%s19610_s1 + $0x1dd0] sm:$0xf0]  ;;  %v8128_v39 = vld [vmem:[%s19610_s1 + $0x198] sm:$0xf] }
 0x23a   :  { %v12552_v23 = vld [vmem:[%s19610_s1 + $0x1114] sm:$0xf]  ;;  %v11709_v26 = vor.u32 %v12952_v16, %v11706_v17  ;;  %6828 = vmatpush.bf16.msrb.mxu2 %v11197_v22  ;;  %v12513_v17 = vld [vmem:[%s19610_s1 + $0xfd4] sm:$0xf0]  ;;  %v8897_v22 = vor.u32 %v12257_v10, %v8896_v7 }
 0x23b   :  { %v10106_v24 = vld [vmem:[%s19610_s1 + $0x1150] sm:$0xf0]  ;;  %v12065_v46 = vld [vmem:[%s19610_s1 + $0x1d4] sm:$0xf0] }
 0x23c   :  { %v12680_v25 = vld [vmem:[%s19610_s1 + $0x1514] sm:$0xf]  ;;  %v10109_v35 = vor.u32 %v12552_v23, %v10106_v24  ;;  %6841 = vmatpush.bf16.msrb.mxu3 %v11709_v26  ;;  %v9409_v23 = vor.u32 %v12385_v14, %v9408_v13  ;;  %v6561_v24 = vadd.f32 %v15398_v9, %v6548_v8  ;;  %v12113_v26 = vld [vmem:[%s19610_s1 + $0x354] sm:$0xf0] }
 0x23d   :  { %v10618_v28 = vld [vmem:[%s19610_s1 + $0x1550] sm:$0xf0]  ;;  %v9344_v9 = vld [vmem:[%s19610_s1 + $0xb18] sm:$0xf] }
 0x23e   :  { %v12808_v29 = vld [vmem:[%s19610_s1 + $0x1914] sm:$0xf]  ;;  %v10621_v37 = vor.u32 %v12680_v25, %v10618_v28  ;;  %6803 = vmatpush.bf16.msrb.mxu0 %v10109_v35  ;;  %v8320_v25 = vld [vmem:[%s19610_s1 + $0x318] sm:$0xf] }
 0x23f   :  { %v11130_v30 = vld [vmem:[%s19610_s1 + $0x1950] sm:$0xf0]  ;;  %v8832_v28 = vld [vmem:[%s19610_s1 + $0x718] sm:$0xf]  ;;  %v8321_v36 = vor.u32 %v12113_v26, %v8320_v25  ;;  %v6625_v26 = vpop.f32.mrf.mxu2 }
 0x240   :  { %v12936_v34 = vld [vmem:[%s19610_s1 + $0x1d14] sm:$0xf]  ;;  %v11133_v18 = vor.u32 %v12808_v29, %v11130_v30  ;;  %6816 = vmatpush.bf16.msrb.mxu1 %v10621_v37  ;;  %v9921_v29 = vor.u32 %v12513_v17, %v9920_v3  ;;  %v12241_v30 = vld [vmem:[%s19610_s1 + $0x754] sm:$0xf0] }
 0x241   :  { %v11642_v11 = vld [vmem:[%s19610_s1 + $0x1d50] sm:$0xf0]  ;;  %v12497_v35 = vld [vmem:[%s19610_s1 + $0xf54] sm:$0xf0]  ;;  %v8833_v37 = vor.u32 %v12241_v30, %v8832_v28 }
 0x242   :  { %v12536_v40 = vld [vmem:[%s19610_s1 + $0x1094] sm:$0xf]  ;;  %v11645_v48 = vor.u32 %v12936_v34, %v11642_v11  ;;  %6829 = vmatpush.bf16.msrb.mxu2 %v11133_v18  ;;  %v12369_v34 = vld [vmem:[%s19610_s1 + $0xb54] sm:$0xf0] }
 0x243   :  { %v10042_v43 = vld [vmem:[%s19610_s1 + $0x10d0] sm:$0xf0]  ;;  %v9856_v11 = vld [vmem:[%s19610_s1 + $0xf18] sm:$0xf]  ;;  %v9345_v18 = vor.u32 %v12369_v34, %v9344_v9 }
 0x244   :  { %v12664_v45 = vld [vmem:[%s19610_s1 + $0x1494] sm:$0xf]  ;;  %v10045_v55 = vor.u32 %v12536_v40, %v10042_v43  ;;  %6842 = vmatpush.bf16.msrb.mxu3 %v11645_v48  ;;  %v6574_v40 = vadd.f32 %v15424_v12, %v6561_v24  ;;  %v8256_v43 = vld [vmem:[%s19610_s1 + $0x298] sm:$0xf]  ;;  %v9857_v48 = vor.u32 %v12497_v35, %v9856_v11  ;;  %v6638_v11 = vpop.f32.mrf.mxu3 }
 0x245   :  { %v10554_v49 = vld [vmem:[%s19610_s1 + $0x14d0] sm:$0xf0]  ;;  %v12225_v12 = vld [vmem:[%s19610_s1 + $0x6d4] sm:$0xf0] }
 0x246   :  { %v12792_v50 = vld [vmem:[%s19610_s1 + $0x1894] sm:$0xf]  ;;  %v10557_v53 = vor.u32 %v12664_v45, %v10554_v49  ;;  %6804 = vmatpush.bf16.msrb.mxu0 %v10045_v55  ;;  %v12097_v45 = vld [vmem:[%s19610_s1 + $0x2d4] sm:$0xf0]  ;;  %v6587_v54 = vadd.f32 %v15435_v31, %v6574_v40  ;;  %v8769_v55 = vor.u32 %v12225_v12, %v8768_v47 }
 0x247   :  { %v11066_v27 = vld [vmem:[%s19610_s1 + $0x18d0] sm:$0xf0]  ;;  %v9280_v49 = vld [vmem:[%s19610_s1 + $0xa98] sm:$0xf] }
 0x248   :  { %v12920_v51 = vld [vmem:[%s19610_s1 + $0x1c94] sm:$0xf]  ;;  %v11069_v59 = vor.u32 %v12792_v50, %v11066_v27  ;;  %6817 = vmatpush.bf16.msrb.mxu1 %v10557_v53  ;;  %v12353_v50 = vld [vmem:[%s19610_s1 + $0xad4] sm:$0xf0] }
 0x249   :  { %v11578_v52 = vld [vmem:[%s19610_s1 + $0x1cd0] sm:$0xf0]  ;;  %v9792_v27 = vld [vmem:[%s19610_s1 + $0xe98] sm:$0xf] }
 0x24a   :  { %v12520_v56 = vld [vmem:[%s19610_s1 + $0x1014] sm:$0xf]  ;;  %v11581_v63 = vor.u32 %v12920_v51, %v11578_v52  ;;  %6830 = vmatpush.bf16.msrb.mxu2 %v11069_v59  ;;  %v12481_v51 = vld [vmem:[%s19610_s1 + $0xed4] sm:$0xf0]  ;;  %v8257_v52 = vor.u32 %v12097_v45, %v8256_v43 }
 0x24b   :  { %v9978_v57 = vld [vmem:[%s19610_s1 + $0x1050] sm:$0xf0]  ;;  %v12081_v53 = vld [vmem:[%s19610_s1 + $0x254] sm:$0xf0] }
 0x24c   :  { %v12648_v60 = vld [vmem:[%s19610_s1 + $0x1414] sm:$0xf]  ;;  %v9981_v58 = vor.u32 %v12520_v56, %v9978_v57  ;;  %6843 = vmatpush.bf16.msrb.mxu3 %v11581_v63  ;;  %v9281_v56 = vor.u32 %v12353_v50, %v9280_v49  ;;  %v8192_v57 = vld [vmem:[%s19610_s1 + $0x218] sm:$0xf] }
 0x24d   :  { %v10490_v33 = vld [vmem:[%s19610_s1 + $0x1450] sm:$0xf0]  ;;  %v8704_v59 = vld [vmem:[%s19610_s1 + $0x618] sm:$0xf] }
 0x24e   :  { %v12776_v61 = vld [vmem:[%s19610_s1 + $0x1814] sm:$0xf]  ;;  %v10493_v15 = vor.u32 %v12648_v60, %v10490_v33  ;;  %6805 = vmatpush.bf16.msrb.mxu0 %v9981_v58  ;;  %v9793_v60 = vor.u32 %v12481_v51, %v9792_v27  ;;  %v12209_v31 = vld [vmem:[%s19610_s1 + $0x654] sm:$0xf0]  ;;  %v6612_v58 = vpop.f32.mrf.mxu1 }
 0x24f   :  { %v11002_v32 = vld [vmem:[%s19610_s1 + $0x1850] sm:$0xf0]  ;;  %v9216_v33 = vld [vmem:[%s19610_s1 + $0xa18] sm:$0xf] }
 0x250   :  { %v12904_v0 = vld [vmem:[%s19610_s1 + $0x1c14] sm:$0xf]  ;;  %v11005_v16 = vor.u32 %v12776_v61, %v11002_v32  ;;  %6818 = vmatpush.bf16.msrb.mxu1 %v10493_v15  ;;  %v12337_v61 = vld [vmem:[%s19610_s1 + $0xa54] sm:$0xf0]  ;;  %v8193_v32 = vor.u32 %v12081_v53, %v8192_v57 }
 0x251   :  { %v11514_v1 = vld [vmem:[%s19610_s1 + $0x1c50] sm:$0xf0]  ;;  %6806 = vmatmul.bf16.vlgmr.msrb.gmra.mxu0 %v13513_v41  ;;  %v12465_v63 = vld [vmem:[%s19610_s1 + $0xe54] sm:$0xf0]  ;;  %v9217_v2 = vor.u32 %v12337_v61, %v9216_v33 }
 0x252   :  { %v11517_v19 = vor.u32 %v12904_v0, %v11514_v1  ;;  %6831 = vmatpush.bf16.msrb.mxu2 %v11005_v16  ;;  %6850 = vmatpush.bf16.msra.mxu0 %v8385_v5  ;;  %v6599_v0 = vpop.f32.mrf.mxu0  ;;  %v8705_v1 = vor.u32 %v12209_v31, %v8704_v59  ;;  %v8640_v7 = vld [vmem:[%s19610_s1 + $0x598] sm:$0xf]  ;;  %v9729_v10 = vor.u32 %v12465_v63, %v9728_v62  ;;  %v6627_v62 = vpop.f32.mrf.mxu2 }
 0x253   :  { %6819 = vmatmul.bf16.vlgmr.msrb.gmra.mxu1 %v13517_v44  ;;  %v6600_v8 = vadd.f32 %v6599_v0, %v6587_v54  ;;  %v12193_v13 = vld [vmem:[%s19610_s1 + $0x5d4] sm:$0xf0] }
 0x254   :  { %6844 = vmatpush.bf16.msrb.mxu3 %v11517_v19  ;;  %6863 = vmatpush.bf16.msra.mxu1 %v8897_v22  ;;  %v9152_v14 = vld [vmem:[%s19610_s1 + $0x998] sm:$0xf]  ;;  %v8129_v19 = vor.u32 %v12065_v46, %v8128_v39  ;;  %v8641_v5 = vor.u32 %v12193_v13, %v8640_v7 }
 0x255   :  { %6832 = vmatmul.bf16.vlgmr.msrb.gmra.mxu2 %v13505_v38  ;;  %v12321_v15 = vld [vmem:[%s19610_s1 + $0x9d4] sm:$0xf0]  ;;  %v6613_v17 = vadd.f32 %v6612_v58, %v6600_v8 }
 0x256   :  { %6876 = vmatpush.bf16.msra.mxu2 %v9409_v23  ;;  %6851 = vmatpush.bf16.msra.mxu0 %v8321_v36  ;;  %v9664_v16 = vld [vmem:[%s19610_s1 + $0xd98] sm:$0xf]  ;;  %v9153_v22 = vor.u32 %v12321_v15, %v9152_v14  ;;  %v6614_v50 = vpop.f32.mrf.mxu1 }
 0x257   :  { %6845 = vmatmul.bf16.vlgmr.msrb.gmra.mxu3 %v13515_v42  ;;  %v12449_v3 = vld [vmem:[%s19610_s1 + $0xdd4] sm:$0xf0]  ;;  %v6626_v34 = vadd.f32 %v6625_v26, %v6613_v17 }
 0x258   :  { %6889 = vmatpush.bf16.msra.mxu3 %v9921_v29  ;;  %6864 = vmatpush.bf16.msra.mxu1 %v8833_v37  ;;  %v8064_v23 = vld [vmem:[%s19610_s1 + $0x118] sm:$0xf]  ;;  %v9665_v28 = vor.u32 %v12449_v3, %v9664_v16 }
 0x259   :  { %v12049_v24 = vld [vmem:[%s19610_s1 + $0x154] sm:$0xf0] }
 0x25a   :  { %6877 = vmatpush.bf16.msra.mxu2 %v9345_v18  ;;  %6852 = vmatpush.bf16.msra.mxu0 %v8257_v52  ;;  %v8576_v25 = vld [vmem:[%s19610_s1 + $0x518] sm:$0xf]  ;;  %v8065_v37 = vor.u32 %v12049_v24, %v8064_v23  ;;  %v6639_v18 = vadd.f32 %v6638_v11, %v6626_v34  ;;  %v6601_v43 = vpop.f32.mrf.mxu0 }
 0x25b   :  { %v12177_v29 = vld [vmem:[%s19610_s1 + $0x554] sm:$0xf0] }
 0x25c   :  { %6890 = vmatpush.bf16.msra.mxu3 %v9857_v48  ;;  %6865 = vmatpush.bf16.msra.mxu1 %v8769_v55  ;;  %v9088_v30 = vld [vmem:[%s19610_s1 + $0x918] sm:$0xf]  ;;  %v8577_v45 = vor.u32 %v12177_v29, %v8576_v25  ;;  %7893 = vst [vmem:[%s19613_s3 + $0x18] sm:$0xff] %v6639_v18 }
 0x25d   :  { %v12305_v9 = vld [vmem:[%s19610_s1 + $0x954] sm:$0xf0] }
 0x25e   :  { %6878 = vmatpush.bf16.msra.mxu2 %v9281_v56  ;;  %6853 = vmatpush.bf16.msra.mxu0 %v8193_v32  ;;  %v9600_v35 = vld [vmem:[%s19610_s1 + $0xd18] sm:$0xf]  ;;  %v9089_v47 = vor.u32 %v12305_v9, %v9088_v30 }
 0x25f   :  { %v12433_v36 = vld [vmem:[%s19610_s1 + $0xd54] sm:$0xf0] }
 0x260   :  { %6891 = vmatpush.bf16.msra.mxu3 %v9793_v60  ;;  %6866 = vmatpush.bf16.msra.mxu1 %v8705_v1  ;;  %v8000_v40 = vld [vmem:[%s19610_s1 + $0x98] sm:$0xf]  ;;  %v9601_v27 = vor.u32 %v12433_v36, %v9600_v35 }
 0x261   :  { %v12033_v48 = vld [vmem:[%s19610_s1 + $0xd4] sm:$0xf0] }
 0x262   :  { %6879 = vmatpush.bf16.msra.mxu2 %v9217_v2  ;;  %6854 = vmatpush.bf16.msra.mxu0 %v8129_v19  ;;  %v8512_v12 = vld [vmem:[%s19610_s1 + $0x498] sm:$0xf]  ;;  %v8001_v56 = vor.u32 %v12033_v48, %v8000_v40  ;;  %v6640_v2 = vpop.f32.mrf.mxu3 }
 0x263   :  { %v12161_v49 = vld [vmem:[%s19610_s1 + $0x4d4] sm:$0xf0]  ;;  %v15806_v2 = vpop.f32.mrf.mxu1 }
 0x264   :  { %6892 = vmatpush.bf16.msra.mxu3 %v9729_v10  ;;  %6867 = vmatpush.bf16.msra.mxu1 %v8641_v5  ;;  %v9024_v51 = vld [vmem:[%s19610_s1 + $0x898] sm:$0xf]  ;;  %v8513_v59 = vor.u32 %v12161_v49, %v8512_v12 }
 0x265   :  { %v12289_v52 = vld [vmem:[%s19610_s1 + $0x8d4] sm:$0xf0] }
 0x266   :  { %6880 = vmatpush.bf16.msra.mxu2 %v9153_v22  ;;  %v9536_v54 = vld [vmem:[%s19610_s1 + $0xc98] sm:$0xf]  ;;  %6855 = vmatpush.bf16.msra.mxu0 %v8065_v37  ;;  %v9025_v60 = vor.u32 %v12289_v52, %v9024_v51 }
 0x267   :  { %v12417_v55 = vld [vmem:[%s19610_s1 + $0xcd4] sm:$0xf0] }
 0x268   :  { %6893 = vmatpush.bf16.msra.mxu3 %v9665_v28  ;;  %v7936_v57 = vld [vmem:[%s19610_s1 + $0x18] sm:$0xf]  ;;  %6868 = vmatpush.bf16.msra.mxu1 %v8577_v45  ;;  %v9537_v63 = vor.u32 %v12417_v55, %v9536_v54 }
 0x269   :  { %v12017_v53 = vld [vmem:[%s19610_s1 + $0x54] sm:$0xf0] }
 0x26a   :  { %6881 = vmatpush.bf16.msra.mxu2 %v9089_v47  ;;  %v8448_v31 = vld [vmem:[%s19610_s1 + $0x418] sm:$0xf]  ;;  %6856 = vmatpush.bf16.msra.mxu0 %v8001_v56  ;;  %v7937_v8 = vor.u32 %v12017_v53, %v7936_v57 }
 0x26b   :  { %v12145_v33 = vld [vmem:[%s19610_s1 + $0x454] sm:$0xf0] }
 0x26c   :  { %v8960_v61 = vld [vmem:[%s19610_s1 + $0x818] sm:$0xf]  ;;  %6894 = vmatpush.bf16.msra.mxu3 %v9601_v27  ;;  %6869 = vmatpush.bf16.msra.mxu1 %v8513_v59  ;;  %v8449_v14 = vor.u32 %v12145_v33, %v8448_v31 }
 0x26d   :  { %v12273_v32 = vld [vmem:[%s19610_s1 + $0x854] sm:$0xf0] }
 0x26e   :  { %v9472_v0 = vld [vmem:[%s19610_s1 + $0xc18] sm:$0xf]  ;;  %6882 = vmatpush.bf16.msra.mxu2 %v9025_v60  ;;  %v8961_v15 = vor.u32 %v12273_v32, %v8960_v61  ;;  %6857 = vmatpush.bf16.msra.mxu0 %v7937_v8  ;;  %v15795_v61 = vpop.f32.mrf.mxu0 }
 0x26f   :  { %v12401_v1 = vld [vmem:[%s19610_s1 + $0xc54] sm:$0xf0] }
 0x270   :  { %v10432_v39 = vld [vmem:[%s19610_s1 + $0x1398] sm:$0xf]  ;;  %6895 = vmatpush.bf16.msra.mxu3 %v9537_v63  ;;  %v9473_v17 = vor.u32 %v12401_v1, %v9472_v0  ;;  %6870 = vmatpush.bf16.msra.mxu1 %v8449_v14 }
 0x271   :  { %v12641_v46 = vld [vmem:[%s19610_s1 + $0x13d4] sm:$0xf0]  ;;  %6858 = vmatmul.bf16.vlgmr.msra.gmra.mxu0 %v13354_v20 }
 0x272   :  { %v10944_v7 = vld [vmem:[%s19610_s1 + $0x1798] sm:$0xf]  ;;  %v10433_v19 = vor.u32 %v12641_v46, %v10432_v39  ;;  %6883 = vmatpush.bf16.msra.mxu2 %v8961_v15 }
 0x273   :  { %v12769_v58 = vld [vmem:[%s19610_s1 + $0x17d4] sm:$0xf0]  ;;  %6871 = vmatmul.bf16.vlgmr.msra.gmra.mxu1 %v13357_v21 }
 0x274   :  { %v11456_v10 = vld [vmem:[%s19610_s1 + $0x1b98] sm:$0xf]  ;;  %v10945_v5 = vor.u32 %v12769_v58, %v10944_v7  ;;  %6896 = vmatpush.bf16.msra.mxu3 %v9473_v17  ;;  %6902 = vmatpush.bf16.msrb.mxu0 %v10433_v19  ;;  %v15832_v19 = vpop.f32.mrf.mxu2 }
 0x275   :  { %v12897_v13 = vld [vmem:[%s19610_s1 + $0x1bd4] sm:$0xf0]  ;;  %6884 = vmatmul.bf16.vlgmr.msra.gmra.mxu2 %v13322_v4 }
 0x276   :  { %v11968_v16 = vld [vmem:[%s19610_s1 + $0x1f98] sm:$0xf]  ;;  %v11457_v22 = vor.u32 %v12897_v13, %v11456_v10  ;;  %6915 = vmatpush.bf16.msrb.mxu1 %v10945_v5 }
 0x277   :  { %v13025_v3 = vld [vmem:[%s19610_s1 + $0x1fd4] sm:$0xf0]  ;;  %6897 = vmatmul.bf16.vlgmr.msra.gmra.mxu3 %v13327_v6 }
 0x278   :  { %v10368_v23 = vld [vmem:[%s19610_s1 + $0x1318] sm:$0xf]  ;;  %v11969_v26 = vor.u32 %v13025_v3, %v11968_v16  ;;  %6928 = vmatpush.bf16.msrb.mxu2 %v11457_v22 }
 0x279   :  { %v12625_v24 = vld [vmem:[%s19610_s1 + $0x1354] sm:$0xf0] }
 0x27a   :  { %v10880_v25 = vld [vmem:[%s19610_s1 + $0x1718] sm:$0xf]  ;;  %v10369_v11 = vor.u32 %v12625_v24, %v10368_v23  ;;  %6941 = vmatpush.bf16.msrb.mxu3 %v11969_v26 }
 0x27b   :  { %v12753_v28 = vld [vmem:[%s19610_s1 + $0x1754] sm:$0xf0] }
 0x27c   :  { %v11392_v29 = vld [vmem:[%s19610_s1 + $0x1b18] sm:$0xf]  ;;  %v10881_v35 = vor.u32 %v12753_v28, %v10880_v25  ;;  %6903 = vmatpush.bf16.msrb.mxu0 %v10369_v11  ;;  %v15843_v25 = vpop.f32.mrf.mxu3 }
 0x27d   :  { %v12881_v30 = vld [vmem:[%s19610_s1 + $0x1b54] sm:$0xf0] }
 0x27e   :  { %v11904_v9 = vld [vmem:[%s19610_s1 + $0x1f18] sm:$0xf]  ;;  %v11393_v36 = vor.u32 %v12881_v30, %v11392_v29  ;;  %6916 = vmatpush.bf16.msrb.mxu1 %v10881_v35  ;;  %v6653_v30 = vpop.f32.mrf.mxu0 }
 0x27f   :  { %v13009_v34 = vld [vmem:[%s19610_s1 + $0x1f54] sm:$0xf0]  ;;  %v9858_v30 = vld [vmem:[%s19610_s1 + $0xf58] sm:$0xf0] }
 0x280   :  { %v10304_v37 = vld [vmem:[%s19610_s1 + $0x1298] sm:$0xf]  ;;  %v11905_v43 = vor.u32 %v13009_v34, %v11904_v9  ;;  %6929 = vmatpush.bf16.msrb.mxu2 %v11393_v36 }
 0x281   :  { %v12609_v18 = vld [vmem:[%s19610_s1 + $0x12d4] sm:$0xf0] }
 0x282   :  { %v10816_v40 = vld [vmem:[%s19610_s1 + $0x1698] sm:$0xf]  ;;  %v10305_v50 = vor.u32 %v12609_v18, %v10304_v37  ;;  %6942 = vmatpush.bf16.msrb.mxu3 %v11905_v43  ;;  %v6666_v37 = vpop.f32.mrf.mxu1 }
 0x283   :  { %v12737_v45 = vld [vmem:[%s19610_s1 + $0x16d4] sm:$0xf0]  ;;  %v8258_v37 = vld [vmem:[%s19610_s1 + $0x2d8] sm:$0xf0] }
 0x284   :  { %v11328_v47 = vld [vmem:[%s19610_s1 + $0x1a98] sm:$0xf]  ;;  %v10817_v27 = vor.u32 %v12737_v45, %v10816_v40  ;;  %6904 = vmatpush.bf16.msrb.mxu0 %v10305_v50 }
 0x285   :  { %v12865_v48 = vld [vmem:[%s19610_s1 + $0x1ad4] sm:$0xf0] }
 0x286   :  { %v11840_v12 = vld [vmem:[%s19610_s1 + $0x1e98] sm:$0xf]  ;;  %v11329_v51 = vor.u32 %v12865_v48, %v11328_v47  ;;  %6917 = vmatpush.bf16.msrb.mxu1 %v10817_v27 }
 0x287   :  { %v12993_v49 = vld [vmem:[%s19610_s1 + $0x1ed4] sm:$0xf0] }
 0x288   :  { %v10240_v52 = vld [vmem:[%s19610_s1 + $0x1218] sm:$0xf]  ;;  %v11841_v56 = vor.u32 %v12993_v49, %v11840_v12  ;;  %6930 = vmatpush.bf16.msrb.mxu2 %v11329_v51  ;;  %v15878_v12 = vld [vmem:[%s19612_s2] sm:$0xff] }
 0x289   :  { %v12593_v54 = vld [vmem:[%s19610_s1 + $0x1254] sm:$0xf0]  ;;  %v1050_v49 = vperm.slane %v15878_v12, 4 }
 0x28a   :  { %v10752_v55 = vld [vmem:[%s19610_s1 + $0x1618] sm:$0xf]  ;;  %v10241_v33 = vor.u32 %v12593_v54, %v10240_v52  ;;  %6943 = vmatpush.bf16.msrb.mxu3 %v11841_v56 }
 0x28b   :  { %v12721_v57 = vld [vmem:[%s19610_s1 + $0x1654] sm:$0xf0] }
 0x28c   :  { %v11264_v53 = vld [vmem:[%s19610_s1 + $0x1a18] sm:$0xf]  ;;  %v10753_v62 = vor.u32 %v12721_v57, %v10752_v55  ;;  %6905 = vmatpush.bf16.msrb.mxu0 %v10241_v33 }
 0x28d   :  { %v12849_v59 = vld [vmem:[%s19610_s1 + $0x1a54] sm:$0xf0] }
 0x28e   :  { %v11776_v60 = vld [vmem:[%s19610_s1 + $0x1e18] sm:$0xf]  ;;  %v11265_v63 = vor.u32 %v12849_v59, %v11264_v53  ;;  %6918 = vmatpush.bf16.msrb.mxu1 %v10753_v62  ;;  %v6679_v53 = vpop.f32.mrf.mxu2  ;;  %v6692_v62 = vpop.f32.mrf.mxu3 }
 0x28f   :  { %v12977_v31 = vld [vmem:[%s19610_s1 + $0x1e54] sm:$0xf0]  ;;  %v9218_v53 = vld [vmem:[%s19610_s1 + $0xa58] sm:$0xf0] }
 0x290   :  { %v10176_v32 = vld [vmem:[%s19610_s1 + $0x1198] sm:$0xf]  ;;  %v11777_v39 = vor.u32 %v12977_v31, %v11776_v60  ;;  %6931 = vmatpush.bf16.msrb.mxu2 %v11265_v63  ;;  %v12121_v63 = vld [vmem:[%s19610_s1 + $0x39c] sm:$0xf] }
 0x291   :  { %v12577_v0 = vld [vmem:[%s19610_s1 + $0x11d4] sm:$0xf0] }
 0x292   :  { %v10688_v1 = vld [vmem:[%s19610_s1 + $0x1598] sm:$0xf]  ;;  %v10177_v13 = vor.u32 %v12577_v0, %v10176_v32  ;;  %6944 = vmatpush.bf16.msrb.mxu3 %v11777_v39  ;;  %v8386_v32 = vld [vmem:[%s19610_s1 + $0x3d8] sm:$0xf0] }
 0x293   :  { %v12705_v46 = vld [vmem:[%s19610_s1 + $0x15d4] sm:$0xf0]  ;;  %v12249_v0 = vld [vmem:[%s19610_s1 + $0x79c] sm:$0xf] }
 0x294   :  { %v11200_v7 = vld [vmem:[%s19610_s1 + $0x1998] sm:$0xf]  ;;  %v10689_v14 = vor.u32 %v12705_v46, %v10688_v1  ;;  %6906 = vmatpush.bf16.msrb.mxu0 %v10177_v13  ;;  %v6652_v1 = vadd.f32 %v15795_v61, %v1050_v49  ;;  %v8898_v46 = vld [vmem:[%s19610_s1 + $0x7d8] sm:$0xf0] }
 0x295   :  { %v12833_v8 = vld [vmem:[%s19610_s1 + $0x19d4] sm:$0xf0]  ;;  %v12505_v61 = vld [vmem:[%s19610_s1 + $0xf9c] sm:$0xf] }
 0x296   :  { %v11712_v58 = vld [vmem:[%s19610_s1 + $0x1d98] sm:$0xf]  ;;  %v11201_v15 = vor.u32 %v12833_v8, %v11200_v7  ;;  %6919 = vmatpush.bf16.msrb.mxu1 %v10689_v14  ;;  %v12377_v7 = vld [vmem:[%s19610_s1 + $0xb9c] sm:$0xf] }
 0x297   :  { %v12961_v10 = vld [vmem:[%s19610_s1 + $0x1dd4] sm:$0xf0]  ;;  %v9410_v8 = vld [vmem:[%s19610_s1 + $0xbd8] sm:$0xf0] }
 0x298   :  { %v10112_v16 = vld [vmem:[%s19610_s1 + $0x1118] sm:$0xf]  ;;  %v11713_v5 = vor.u32 %v12961_v10, %v11712_v58  ;;  %6932 = vmatpush.bf16.msrb.mxu2 %v11201_v15  ;;  %v9922_v13 = vld [vmem:[%s19610_s1 + $0xfd8] sm:$0xf0]  ;;  %v8389_v15 = vor.u32 %v12121_v63, %v8386_v32 }
 0x299   :  { %v12561_v3 = vld [vmem:[%s19610_s1 + $0x1154] sm:$0xf0]  ;;  %v12057_v32 = vld [vmem:[%s19610_s1 + $0x19c] sm:$0xf] }
 0x29a   :  { %v10624_v17 = vld [vmem:[%s19610_s1 + $0x1518] sm:$0xf]  ;;  %v10113_v29 = vor.u32 %v12561_v3, %v10112_v16  ;;  %6945 = vmatpush.bf16.msrb.mxu3 %v11713_v5  ;;  %v8901_v16 = vor.u32 %v12249_v0, %v8898_v46  ;;  %v9413_v3 = vor.u32 %v12377_v7, %v9410_v8  ;;  %v12105_v5 = vld [vmem:[%s19610_s1 + $0x31c] sm:$0xf]  ;;  %v6716_v46 = vpop.f32.mrf.mxu1 }
 0x29b   :  { %v12689_v22 = vld [vmem:[%s19610_s1 + $0x1554] sm:$0xf0]  ;;  %v8130_v0 = vld [vmem:[%s19610_s1 + $0x1d8] sm:$0xf0] }
 0x29c   :  { %v11136_v23 = vld [vmem:[%s19610_s1 + $0x1918] sm:$0xf]  ;;  %v10625_v9 = vor.u32 %v12689_v22, %v10624_v17  ;;  %6907 = vmatpush.bf16.msrb.mxu0 %v10113_v29  ;;  %v6665_v17 = vadd.f32 %v15806_v2, %v6652_v1  ;;  %v8322_v22 = vld [vmem:[%s19610_s1 + $0x358] sm:$0xf0] }
 0x29d   :  { %v12817_v24 = vld [vmem:[%s19610_s1 + $0x1954] sm:$0xf0]  ;;  %v12361_v2 = vld [vmem:[%s19610_s1 + $0xb1c] sm:$0xf] }
 0x29e   :  { %v11648_v26 = vld [vmem:[%s19610_s1 + $0x1d18] sm:$0xf]  ;;  %v11137_v34 = vor.u32 %v12817_v24, %v11136_v23  ;;  %6920 = vmatpush.bf16.msrb.mxu1 %v10625_v9  ;;  %v12233_v23 = vld [vmem:[%s19610_s1 + $0x71c] sm:$0xf]  ;;  %v9925_v24 = vor.u32 %v12505_v61, %v9922_v13  ;;  %v8325_v9 = vor.u32 %v12105_v5, %v8322_v22 }
 0x29f   :  { %v12945_v28 = vld [vmem:[%s19610_s1 + $0x1d54] sm:$0xf0]  ;;  %v12489_v29 = vld [vmem:[%s19610_s1 + $0xf1c] sm:$0xf] }
 0x2a0   :  { %v10048_v11 = vld [vmem:[%s19610_s1 + $0x1098] sm:$0xf]  ;;  %v11649_v18 = vor.u32 %v12945_v28, %v11648_v26  ;;  %6933 = vmatpush.bf16.msrb.mxu2 %v11137_v34  ;;  %v8834_v26 = vld [vmem:[%s19610_s1 + $0x758] sm:$0xf0] }
 0x2a1   :  { %v12545_v35 = vld [vmem:[%s19610_s1 + $0x10d4] sm:$0xf0]  ;;  %v9346_v28 = vld [vmem:[%s19610_s1 + $0xb58] sm:$0xf0]  ;;  %v8837_v34 = vor.u32 %v12233_v23, %v8834_v26  ;;  %v6729_v23 = vpop.f32.mrf.mxu2 }
 0x2a2   :  { %v10560_v36 = vld [vmem:[%s19610_s1 + $0x1498] sm:$0xf]  ;;  %v10049_v50 = vor.u32 %v12545_v35, %v10048_v11  ;;  %6946 = vmatpush.bf16.msrb.mxu3 %v11649_v18  ;;  %v9349_v11 = vor.u32 %v12361_v2, %v9346_v28  ;;  %v6678_v35 = vadd.f32 %v15832_v19, %v6665_v17  ;;  %v12217_v18 = vld [vmem:[%s19610_s1 + $0x69c] sm:$0xf] }
 0x2a3   :  { %v12673_v40 = vld [vmem:[%s19610_s1 + $0x14d4] sm:$0xf0]  ;;  %v8770_v19 = vld [vmem:[%s19610_s1 + $0x6d8] sm:$0xf0] }
 0x2a4   :  { %v11072_v43 = vld [vmem:[%s19610_s1 + $0x1898] sm:$0xf]  ;;  %v10561_v52 = vor.u32 %v12673_v40, %v10560_v36  ;;  %6908 = vmatpush.bf16.msrb.mxu0 %v10049_v50  ;;  %v12089_v36 = vld [vmem:[%s19610_s1 + $0x29c] sm:$0xf]  ;;  %v9861_v40 = vor.u32 %v12489_v29, %v9858_v30  ;;  %v6691_v50 = vadd.f32 %v15843_v25, %v6678_v35  ;;  %v6742_v30 = vpop.f32.mrf.mxu3 }
 0x2a5   :  { %v12801_v45 = vld [vmem:[%s19610_s1 + $0x18d4] sm:$0xf0]  ;;  %v8261_v49 = vor.u32 %v12089_v36, %v8258_v37  ;;  %v8706_v25 = vld [vmem:[%s19610_s1 + $0x658] sm:$0xf0] }
 0x2a6   :  { %v11584_v47 = vld [vmem:[%s19610_s1 + $0x1c98] sm:$0xf]  ;;  %v11073_v54 = vor.u32 %v12801_v45, %v11072_v43  ;;  %6921 = vmatpush.bf16.msrb.mxu1 %v10561_v52  ;;  %v12345_v43 = vld [vmem:[%s19610_s1 + $0xa9c] sm:$0xf] }
 0x2a7   :  { %v12929_v48 = vld [vmem:[%s19610_s1 + $0x1cd4] sm:$0xf0]  ;;  %v9282_v45 = vld [vmem:[%s19610_s1 + $0xad8] sm:$0xf0] }
 0x2a8   :  { %v9984_v27 = vld [vmem:[%s19610_s1 + $0x1018] sm:$0xf]  ;;  %v11585_v59 = vor.u32 %v12929_v48, %v11584_v47  ;;  %6934 = vmatpush.bf16.msrb.mxu2 %v11073_v54  ;;  %v12473_v47 = vld [vmem:[%s19610_s1 + $0xe9c] sm:$0xf] }
 0x2a9   :  { %v12529_v51 = vld [vmem:[%s19610_s1 + $0x1054] sm:$0xf0]  ;;  %v9794_v48 = vld [vmem:[%s19610_s1 + $0xed8] sm:$0xf0] }
 0x2aa   :  { %v10496_v55 = vld [vmem:[%s19610_s1 + $0x1418] sm:$0xf]  ;;  %v9985_v39 = vor.u32 %v12529_v51, %v9984_v27  ;;  %6947 = vmatpush.bf16.msrb.mxu3 %v11585_v59  ;;  %v8773_v27 = vor.u32 %v12217_v18, %v8770_v19  ;;  %v9285_v51 = vor.u32 %v12345_v43, %v9282_v45  ;;  %v12073_v52 = vld [vmem:[%s19610_s1 + $0x21c] sm:$0xf] }
 0x2ab   :  { %v12657_v56 = vld [vmem:[%s19610_s1 + $0x1454] sm:$0xf0]  ;;  %v8194_v54 = vld [vmem:[%s19610_s1 + $0x258] sm:$0xf0] }
 0x2ac   :  { %v11008_v57 = vld [vmem:[%s19610_s1 + $0x1818] sm:$0xf]  ;;  %v10497_v58 = vor.u32 %v12657_v56, %v10496_v55  ;;  %6909 = vmatpush.bf16.msrb.mxu0 %v9985_v39  ;;  %v12201_v55 = vld [vmem:[%s19610_s1 + $0x61c] sm:$0xf]  ;;  %v9797_v56 = vor.u32 %v12473_v47, %v9794_v48  ;;  %v6718_v47 = vpop.f32.mrf.mxu1 }
 0x2ad   :  { %v12785_v60 = vld [vmem:[%s19610_s1 + $0x1854] sm:$0xf0]  ;;  %v12457_v59 = vld [vmem:[%s19610_s1 + $0xe1c] sm:$0xf]  ;;  %v8709_v62 = vor.u32 %v12201_v55, %v8706_v25 }
 0x2ae   :  { %v11520_v31 = vld [vmem:[%s19610_s1 + $0x1c18] sm:$0xf]  ;;  %v11009_v10 = vor.u32 %v12785_v60, %v11008_v57  ;;  %6922 = vmatpush.bf16.msrb.mxu1 %v10497_v58  ;;  %v12329_v57 = vld [vmem:[%s19610_s1 + $0xa1c] sm:$0xf] }
 0x2af   :  { %v12913_v33 = vld [vmem:[%s19610_s1 + $0x1c54] sm:$0xf0]  ;;  %6910 = vmatmul.bf16.vlgmr.msrb.gmra.mxu0 %v13513_v41  ;;  %v9730_v60 = vld [vmem:[%s19610_s1 + $0xe58] sm:$0xf0]  ;;  %v9221_v63 = vor.u32 %v12329_v57, %v9218_v53 }
 0x2b0   :  { %v11521_v14 = vor.u32 %v12913_v33, %v11520_v31  ;;  %6935 = vmatpush.bf16.msrb.mxu2 %v11009_v10  ;;  %6954 = vmatpush.bf16.msra.mxu0 %v8389_v15  ;;  %v8197_v31 = vor.u32 %v12073_v52, %v8194_v54  ;;  %v6703_v33 = vpop.f32.mrf.mxu0  ;;  %v12185_v1 = vld [vmem:[%s19610_s1 + $0x59c] sm:$0xf]  ;;  %v9733_v7 = vor.u32 %v12457_v59, %v9730_v60  ;;  %v6731_v60 = vpop.f32.mrf.mxu2 }
 0x2b1   :  { %6923 = vmatmul.bf16.vlgmr.msrb.gmra.mxu1 %v13517_v44  ;;  %v6704_v39 = vadd.f32 %v6703_v33, %v6691_v50  ;;  %v8642_v8 = vld [vmem:[%s19610_s1 + $0x5d8] sm:$0xf0]  ;;  %v8133_v15 = vor.u32 %v12057_v32, %v8130_v0  ;;  %v6744_v32 = vpop.f32.mrf.mxu3 }
 0x2b2   :  { %6948 = vmatpush.bf16.msrb.mxu3 %v11521_v14  ;;  %6967 = vmatpush.bf16.msra.mxu1 %v8901_v16  ;;  %v12313_v58 = vld [vmem:[%s19610_s1 + $0x99c] sm:$0xf]  ;;  %v8645_v16 = vor.u32 %v12185_v1, %v8642_v8 }
 0x2b3   :  { %6936 = vmatmul.bf16.vlgmr.msrb.gmra.mxu2 %v13505_v38  ;;  %v9154_v10 = vld [vmem:[%s19610_s1 + $0x9d8] sm:$0xf0]  ;;  %v6717_v14 = vadd.f32 %v6716_v46, %v6704_v39 }
 0x2b4   :  { %6980 = vmatpush.bf16.msra.mxu2 %v9413_v3  ;;  %6955 = vmatpush.bf16.msra.mxu0 %v8325_v9  ;;  %v12441_v61 = vld [vmem:[%s19610_s1 + $0xd9c] sm:$0xf]  ;;  %v9157_v3 = vor.u32 %v12313_v58, %v9154_v10 }
 0x2b5   :  { %6949 = vmatmul.bf16.vlgmr.msrb.gmra.mxu3 %v13515_v42  ;;  %v9666_v13 = vld [vmem:[%s19610_s1 + $0xdd8] sm:$0xf0]  ;;  %v6730_v29 = vadd.f32 %v6729_v23, %v6717_v14 }
 0x2b6   :  { %6993 = vmatpush.bf16.msra.mxu3 %v9925_v24  ;;  %6968 = vmatpush.bf16.msra.mxu1 %v8837_v34  ;;  %v12041_v17 = vld [vmem:[%s19610_s1 + $0x11c] sm:$0xf]  ;;  %v9669_v24 = vor.u32 %v12441_v61, %v9666_v13 }
 0x2b7   :  { %v8066_v5 = vld [vmem:[%s19610_s1 + $0x158] sm:$0xf0]  ;;  %v6743_v35 = vadd.f32 %v6742_v30, %v6730_v29 }
 0x2b8   :  { %6981 = vmatpush.bf16.msra.mxu2 %v9349_v11  ;;  %6956 = vmatpush.bf16.msra.mxu0 %v8261_v49  ;;  %v12169_v22 = vld [vmem:[%s19610_s1 + $0x51c] sm:$0xf]  ;;  %v8069_v11 = vor.u32 %v12041_v17, %v8066_v5  ;;  %v6705_v37 = vpop.f32.mrf.mxu0 }
 0x2b9   :  { %v8578_v26 = vld [vmem:[%s19610_s1 + $0x558] sm:$0xf0]  ;;  %7894 = vst [vmem:[%s19613_s3 + $0x20] sm:$0xff] %v6743_v35 }
 0x2ba   :  { %6994 = vmatpush.bf16.msra.mxu3 %v9861_v40  ;;  %6969 = vmatpush.bf16.msra.mxu1 %v8773_v27  ;;  %v12297_v2 = vld [vmem:[%s19610_s1 + $0x91c] sm:$0xf]  ;;  %v8581_v18 = vor.u32 %v12169_v22, %v8578_v26 }
 0x2bb   :  { %v9090_v28 = vld [vmem:[%s19610_s1 + $0x958] sm:$0xf0] }
 0x2bc   :  { %6982 = vmatpush.bf16.msra.mxu2 %v9285_v51  ;;  %6957 = vmatpush.bf16.msra.mxu0 %v8197_v31  ;;  %v12425_v9 = vld [vmem:[%s19610_s1 + $0xd1c] sm:$0xf]  ;;  %v9093_v40 = vor.u32 %v12297_v2, %v9090_v28 }
 0x2bd   :  { %v9602_v34 = vld [vmem:[%s19610_s1 + $0xd58] sm:$0xf0] }
 0x2be   :  { %6995 = vmatpush.bf16.msra.mxu3 %v9797_v56  ;;  %6970 = vmatpush.bf16.msra.mxu1 %v8709_v62  ;;  %v12025_v36 = vld [vmem:[%s19610_s1 + $0x9c] sm:$0xf]  ;;  %v9605_v48 = vor.u32 %v12425_v9, %v9602_v34 }
 0x2bf   :  { %v8002_v19 = vld [vmem:[%s19610_s1 + $0xd8] sm:$0xf0] }
 0x2c0   :  { %6983 = vmatpush.bf16.msra.mxu2 %v9221_v63  ;;  %6958 = vmatpush.bf16.msra.mxu0 %v8133_v15  ;;  %v12153_v43 = vld [vmem:[%s19610_s1 + $0x49c] sm:$0xf]  ;;  %v8005_v52 = vor.u32 %v12025_v36, %v8002_v19  ;;  %v16208_v60 = vpop.f32.mrf.mxu0 }
 0x2c1   :  { %v8514_v45 = vld [vmem:[%s19610_s1 + $0x4d8] sm:$0xf0] }
 0x2c2   :  { %6996 = vmatpush.bf16.msra.mxu3 %v9733_v7  ;;  %6971 = vmatpush.bf16.msra.mxu1 %v8645_v16  ;;  %v12281_v49 = vld [vmem:[%s19610_s1 + $0x89c] sm:$0xf]  ;;  %v8517_v56 = vor.u32 %v12153_v43, %v8514_v45 }
 0x2c3   :  { %v9026_v50 = vld [vmem:[%s19610_s1 + $0x8d8] sm:$0xf0] }
 0x2c4   :  { %6984 = vmatpush.bf16.msra.mxu2 %v9157_v3  ;;  %v12409_v27 = vld [vmem:[%s19610_s1 + $0xc9c] sm:$0xf]  ;;  %6959 = vmatpush.bf16.msra.mxu0 %v8069_v11  ;;  %v9029_v25 = vor.u32 %v12281_v49, %v9026_v50 }
 0x2c5   :  { %v9538_v51 = vld [vmem:[%s19610_s1 + $0xcd8] sm:$0xf0] }
 0x2c6   :  { %6997 = vmatpush.bf16.msra.mxu3 %v9669_v24  ;;  %v12009_v54 = vld [vmem:[%s19610_s1 + $0x1c] sm:$0xf]  ;;  %6972 = vmatpush.bf16.msra.mxu1 %v8581_v18  ;;  %v9541_v31 = vor.u32 %v12409_v27, %v9538_v51 }
 0x2c7   :  { %v7938_v55 = vld [vmem:[%s19610_s1 + $0x58] sm:$0xf0] }
 0x2c8   :  { %6985 = vmatpush.bf16.msra.mxu2 %v9093_v40  ;;  %v12137_v57 = vld [vmem:[%s19610_s1 + $0x41c] sm:$0xf]  ;;  %6960 = vmatpush.bf16.msra.mxu0 %v8005_v52  ;;  %v7941_v46 = vor.u32 %v12009_v54, %v7938_v55 }
 0x2c9   :  { %v8450_v53 = vld [vmem:[%s19610_s1 + $0x458] sm:$0xf0] }
 0x2ca   :  { %v12265_v59 = vld [vmem:[%s19610_s1 + $0x81c] sm:$0xf]  ;;  %6998 = vmatpush.bf16.msra.mxu3 %v9605_v48  ;;  %6973 = vmatpush.bf16.msra.mxu1 %v8517_v56  ;;  %v8453_v10 = vor.u32 %v12137_v57, %v8450_v53 }
 0x2cb   :  { %v8962_v33 = vld [vmem:[%s19610_s1 + $0x858] sm:$0xf0] }
 0x2cc   :  { %v12393_v62 = vld [vmem:[%s19610_s1 + $0xc1c] sm:$0xf]  ;;  %6986 = vmatpush.bf16.msra.mxu2 %v9029_v25  ;;  %v8965_v61 = vor.u32 %v12265_v59, %v8962_v33  ;;  %6961 = vmatpush.bf16.msra.mxu0 %v7941_v46 }
 0x2cd   :  { %v9474_v63 = vld [vmem:[%s19610_s1 + $0xc58] sm:$0xf0] }
 0x2ce   :  { %v12633_v0 = vld [vmem:[%s19610_s1 + $0x139c] sm:$0xf]  ;;  %6999 = vmatpush.bf16.msra.mxu3 %v9541_v31  ;;  %v9477_v15 = vor.u32 %v12393_v62, %v9474_v63  ;;  %6974 = vmatpush.bf16.msra.mxu1 %v8453_v10 }
 0x2cf   :  { %v10434_v1 = vld [vmem:[%s19610_s1 + $0x13d8] sm:$0xf0]  ;;  %6962 = vmatmul.bf16.vlgmr.msra.gmra.mxu0 %v13354_v20 }
 0x2d0   :  { %v12761_v39 = vld [vmem:[%s19610_s1 + $0x179c] sm:$0xf]  ;;  %v10437_v16 = vor.u32 %v12633_v0, %v10434_v1  ;;  %6987 = vmatpush.bf16.msra.mxu2 %v8965_v61  ;;  %v16219_v0 = vpop.f32.mrf.mxu1 }
 0x2d1   :  { %v10946_v7 = vld [vmem:[%s19610_s1 + $0x17d8] sm:$0xf0]  ;;  %6975 = vmatmul.bf16.vlgmr.msra.gmra.mxu1 %v13357_v21 }
 0x2d2   :  { %v12889_v8 = vld [vmem:[%s19610_s1 + $0x1b9c] sm:$0xf]  ;;  %v10949_v3 = vor.u32 %v12761_v39, %v10946_v7  ;;  %7000 = vmatpush.bf16.msra.mxu3 %v9477_v15  ;;  %7006 = vmatpush.bf16.msrb.mxu0 %v10437_v16 }
 0x2d3   :  { %v11458_v58 = vld [vmem:[%s19610_s1 + $0x1bd8] sm:$0xf0]  ;;  %6988 = vmatmul.bf16.vlgmr.msra.gmra.mxu2 %v13322_v4 }
 0x2d4   :  { %v13017_v13 = vld [vmem:[%s19610_s1 + $0x1f9c] sm:$0xf]  ;;  %v11461_v17 = vor.u32 %v12889_v8, %v11458_v58  ;;  %7019 = vmatpush.bf16.msrb.mxu1 %v10949_v3  ;;  %v16245_v3 = vpop.f32.mrf.mxu2 }
 0x2d5   :  { %v11970_v14 = vld [vmem:[%s19610_s1 + $0x1fd8] sm:$0xf0]  ;;  %7001 = vmatmul.bf16.vlgmr.msra.gmra.mxu3 %v13327_v6 }
 0x2d6   :  { %v12617_v5 = vld [vmem:[%s19610_s1 + $0x131c] sm:$0xf]  ;;  %v11973_v24 = vor.u32 %v13017_v13, %v11970_v14  ;;  %7032 = vmatpush.bf16.msrb.mxu2 %v11461_v17 }
 0x2d7   :  { %v10370_v22 = vld [vmem:[%s19610_s1 + $0x1358] sm:$0xf0] }
 0x2d8   :  { %v12745_v23 = vld [vmem:[%s19610_s1 + $0x171c] sm:$0xf]  ;;  %v10373_v9 = vor.u32 %v12617_v5, %v10370_v22  ;;  %7045 = vmatpush.bf16.msrb.mxu3 %v11973_v24  ;;  %v16256_v24 = vpop.f32.mrf.mxu3 }
 0x2d9   :  { %v10882_v26 = vld [vmem:[%s19610_s1 + $0x1758] sm:$0xf0] }
 0x2da   :  { %v12873_v2 = vld [vmem:[%s19610_s1 + $0x1b1c] sm:$0xf]  ;;  %v10885_v34 = vor.u32 %v12745_v23, %v10882_v26  ;;  %7007 = vmatpush.bf16.msrb.mxu0 %v10373_v9 }
 0x2db   :  { %v11394_v28 = vld [vmem:[%s19610_s1 + $0x1b58] sm:$0xf0] }
 0x2dc   :  { %v13001_v29 = vld [vmem:[%s19610_s1 + $0x1f1c] sm:$0xf]  ;;  %v11397_v11 = vor.u32 %v12873_v2, %v11394_v28  ;;  %7020 = vmatpush.bf16.msrb.mxu1 %v10885_v34 }
 0x2dd   :  { %v11906_v30 = vld [vmem:[%s19610_s1 + $0x1f58] sm:$0xf0] }
 0x2de   :  { %v12601_v35 = vld [vmem:[%s19610_s1 + $0x129c] sm:$0xf]  ;;  %v11909_v18 = vor.u32 %v13001_v29, %v11906_v30  ;;  %7033 = vmatpush.bf16.msrb.mxu2 %v11397_v11  ;;  %v6757_v29 = vpop.f32.mrf.mxu0 }
 0x2df   :  { %v10306_v36 = vld [vmem:[%s19610_s1 + $0x12d8] sm:$0xf0] }
 0x2e0   :  { %v12729_v37 = vld [vmem:[%s19610_s1 + $0x169c] sm:$0xf]  ;;  %v10309_v48 = vor.u32 %v12601_v35, %v10306_v36  ;;  %7046 = vmatpush.bf16.msrb.mxu3 %v11909_v18  ;;  %v6770_v36 = vpop.f32.mrf.mxu1 }
 0x2e1   :  { %v10818_v40 = vld [vmem:[%s19610_s1 + $0x16d8] sm:$0xf0]  ;;  %v8776_v36 = vld [vmem:[%s19610_s1 + $0x6a0] sm:$0xf] }
 0x2e2   :  { %v12857_v19 = vld [vmem:[%s19610_s1 + $0x1a9c] sm:$0xf]  ;;  %v10821_v49 = vor.u32 %v12729_v37, %v10818_v40  ;;  %7008 = vmatpush.bf16.msrb.mxu0 %v10309_v48 }
 0x2e3   :  { %v11330_v43 = vld [vmem:[%s19610_s1 + $0x1ad8] sm:$0xf0] }
 0x2e4   :  { %v12985_v45 = vld [vmem:[%s19610_s1 + $0x1e9c] sm:$0xf]  ;;  %v11333_v50 = vor.u32 %v12857_v19, %v11330_v43  ;;  %7021 = vmatpush.bf16.msrb.mxu1 %v10821_v49 }
 0x2e5   :  { %v11842_v47 = vld [vmem:[%s19610_s1 + $0x1ed8] sm:$0xf0] }
 0x2e6   :  { %v12585_v27 = vld [vmem:[%s19610_s1 + $0x121c] sm:$0xf]  ;;  %v11845_v54 = vor.u32 %v12985_v45, %v11842_v47  ;;  %7034 = vmatpush.bf16.msrb.mxu2 %v11333_v50  ;;  %v1051_v47 = vperm.slane %v15878_v12, 5 }
 0x2e7   :  { %v10242_v51 = vld [vmem:[%s19610_s1 + $0x1258] sm:$0xf0] }
 0x2e8   :  { %v12713_v52 = vld [vmem:[%s19610_s1 + $0x161c] sm:$0xf]  ;;  %v10245_v59 = vor.u32 %v12585_v27, %v10242_v51  ;;  %7047 = vmatpush.bf16.msrb.mxu3 %v11845_v54 }
 0x2e9   :  { %v10754_v55 = vld [vmem:[%s19610_s1 + $0x1658] sm:$0xf0] }
 0x2ea   :  { %v12841_v56 = vld [vmem:[%s19610_s1 + $0x1a1c] sm:$0xf]  ;;  %v10757_v31 = vor.u32 %v12713_v52, %v10754_v55  ;;  %7009 = vmatpush.bf16.msrb.mxu0 %v10245_v59  ;;  %v6783_v55 = vpop.f32.mrf.mxu2  ;;  %v6796_v59 = vpop.f32.mrf.mxu3 }
 0x2eb   :  { %v11266_v25 = vld [vmem:[%s19610_s1 + $0x1a58] sm:$0xf0]  ;;  %v9736_v55 = vld [vmem:[%s19610_s1 + $0xe20] sm:$0xf] }
 0x2ec   :  { %v12969_v57 = vld [vmem:[%s19610_s1 + $0x1e1c] sm:$0xf]  ;;  %v11269_v33 = vor.u32 %v12841_v56, %v11266_v25  ;;  %7022 = vmatpush.bf16.msrb.mxu1 %v10757_v31  ;;  %v8392_v31 = vld [vmem:[%s19610_s1 + $0x3a0] sm:$0xf] }
 0x2ed   :  { %v11778_v53 = vld [vmem:[%s19610_s1 + $0x1e58] sm:$0xf0] }
 0x2ee   :  { %v12569_v62 = vld [vmem:[%s19610_s1 + $0x119c] sm:$0xf]  ;;  %v11781_v1 = vor.u32 %v12969_v57, %v11778_v53  ;;  %7035 = vmatpush.bf16.msrb.mxu2 %v11269_v33  ;;  %v12130_v33 = vld [vmem:[%s19610_s1 + $0x3dc] sm:$0xf0] }
 0x2ef   :  { %v10178_v63 = vld [vmem:[%s19610_s1 + $0x11d8] sm:$0xf0] }
 0x2f0   :  { %v12697_v32 = vld [vmem:[%s19610_s1 + $0x159c] sm:$0xf]  ;;  %v10181_v10 = vor.u32 %v12569_v62, %v10178_v63  ;;  %7048 = vmatpush.bf16.msrb.mxu3 %v11781_v1  ;;  %v8904_v62 = vld [vmem:[%s19610_s1 + $0x7a0] sm:$0xf]  ;;  %v6756_v63 = vadd.f32 %v16208_v60, %v1051_v47 }
 0x2f1   :  { %v10690_v39 = vld [vmem:[%s19610_s1 + $0x15d8] sm:$0xf0]  ;;  %v12258_v1 = vld [vmem:[%s19610_s1 + $0x7dc] sm:$0xf0] }
 0x2f2   :  { %v12825_v46 = vld [vmem:[%s19610_s1 + $0x199c] sm:$0xf]  ;;  %v10693_v61 = vor.u32 %v12697_v32, %v10690_v39  ;;  %7010 = vmatpush.bf16.msrb.mxu0 %v10181_v10  ;;  %v9416_v39 = vld [vmem:[%s19610_s1 + $0xba0] sm:$0xf] }
 0x2f3   :  { %v11202_v7 = vld [vmem:[%s19610_s1 + $0x19d8] sm:$0xf0]  ;;  %v9928_v60 = vld [vmem:[%s19610_s1 + $0xfa0] sm:$0xf] }
 0x2f4   :  { %v12953_v8 = vld [vmem:[%s19610_s1 + $0x1d9c] sm:$0xf]  ;;  %v11205_v13 = vor.u32 %v12825_v46, %v11202_v7  ;;  %7023 = vmatpush.bf16.msrb.mxu1 %v10693_v61  ;;  %v12386_v46 = vld [vmem:[%s19610_s1 + $0xbdc] sm:$0xf0]  ;;  %v8393_v61 = vor.u32 %v12130_v33, %v8392_v31 }
 0x2f5   :  { %v11714_v58 = vld [vmem:[%s19610_s1 + $0x1dd8] sm:$0xf0]  ;;  %v8136_v31 = vld [vmem:[%s19610_s1 + $0x1a0] sm:$0xf] }
 0x2f6   :  { %v12553_v14 = vld [vmem:[%s19610_s1 + $0x111c] sm:$0xf]  ;;  %v11717_v17 = vor.u32 %v12953_v8, %v11714_v58  ;;  %7036 = vmatpush.bf16.msrb.mxu2 %v11205_v13  ;;  %v12514_v58 = vld [vmem:[%s19610_s1 + $0xfdc] sm:$0xf0]  ;;  %v8905_v13 = vor.u32 %v12258_v1, %v8904_v62 }
 0x2f7   :  { %v10114_v15 = vld [vmem:[%s19610_s1 + $0x1158] sm:$0xf0]  ;;  %v12066_v33 = vld [vmem:[%s19610_s1 + $0x1dc] sm:$0xf0] }
 0x2f8   :  { %v12681_v16 = vld [vmem:[%s19610_s1 + $0x151c] sm:$0xf]  ;;  %v10117_v28 = vor.u32 %v12553_v14, %v10114_v15  ;;  %7049 = vmatpush.bf16.msrb.mxu3 %v11717_v17  ;;  %v9417_v14 = vor.u32 %v12386_v46, %v9416_v39  ;;  %v6769_v15 = vadd.f32 %v16219_v0, %v6756_v63  ;;  %v12114_v17 = vld [vmem:[%s19610_s1 + $0x35c] sm:$0xf0] }
 0x2f9   :  { %v10626_v5 = vld [vmem:[%s19610_s1 + $0x1558] sm:$0xf0]  ;;  %v9352_v0 = vld [vmem:[%s19610_s1 + $0xb20] sm:$0xf] }
 0x2fa   :  { %v12809_v22 = vld [vmem:[%s19610_s1 + $0x191c] sm:$0xf]  ;;  %v10629_v30 = vor.u32 %v12681_v16, %v10626_v5  ;;  %7011 = vmatpush.bf16.msrb.mxu0 %v10117_v28  ;;  %v8328_v16 = vld [vmem:[%s19610_s1 + $0x320] sm:$0xf] }
 0x2fb   :  { %v11138_v23 = vld [vmem:[%s19610_s1 + $0x1958] sm:$0xf0]  ;;  %v8840_v5 = vld [vmem:[%s19610_s1 + $0x720] sm:$0xf]  ;;  %v8329_v29 = vor.u32 %v12114_v17, %v8328_v16  ;;  %v6833_v17 = vpop.f32.mrf.mxu2 }
 0x2fc   :  { %v12937_v26 = vld [vmem:[%s19610_s1 + $0x1d1c] sm:$0xf]  ;;  %v11141_v9 = vor.u32 %v12809_v22, %v11138_v23  ;;  %7024 = vmatpush.bf16.msrb.mxu1 %v10629_v30  ;;  %v9929_v22 = vor.u32 %v12514_v58, %v9928_v60  ;;  %v12242_v23 = vld [vmem:[%s19610_s1 + $0x75c] sm:$0xf0] }
 0x2fd   :  { %v11650_v2 = vld [vmem:[%s19610_s1 + $0x1d58] sm:$0xf0]  ;;  %v12498_v28 = vld [vmem:[%s19610_s1 + $0xf5c] sm:$0xf0]  ;;  %v8841_v30 = vor.u32 %v12242_v23, %v8840_v5 }
 0x2fe   :  { %v12537_v34 = vld [vmem:[%s19610_s1 + $0x109c] sm:$0xf]  ;;  %v11653_v37 = vor.u32 %v12937_v26, %v11650_v2  ;;  %7037 = vmatpush.bf16.msrb.mxu2 %v11141_v9  ;;  %v12370_v26 = vld [vmem:[%s19610_s1 + $0xb5c] sm:$0xf0] }
 0x2ff   :  { %v10050_v11 = vld [vmem:[%s19610_s1 + $0x10d8] sm:$0xf0]  ;;  %v9864_v2 = vld [vmem:[%s19610_s1 + $0xf20] sm:$0xf]  ;;  %v9353_v9 = vor.u32 %v12370_v26, %v9352_v0 }
 0x300   :  { %v12665_v35 = vld [vmem:[%s19610_s1 + $0x149c] sm:$0xf]  ;;  %v10053_v48 = vor.u32 %v12537_v34, %v10050_v11  ;;  %7050 = vmatpush.bf16.msrb.mxu3 %v11653_v37  ;;  %v6782_v34 = vadd.f32 %v16245_v3, %v6769_v15  ;;  %v8264_v11 = vld [vmem:[%s19610_s1 + $0x2a0] sm:$0xf]  ;;  %v9865_v37 = vor.u32 %v12498_v28, %v9864_v2  ;;  %v6846_v2 = vpop.f32.mrf.mxu3 }
 0x301   :  { %v10562_v18 = vld [vmem:[%s19610_s1 + $0x14d8] sm:$0xf0]  ;;  %v12226_v3 = vld [vmem:[%s19610_s1 + $0x6dc] sm:$0xf0] }
 0x302   :  { %v12793_v40 = vld [vmem:[%s19610_s1 + $0x189c] sm:$0xf]  ;;  %v10565_v27 = vor.u32 %v12665_v35, %v10562_v18  ;;  %7012 = vmatpush.bf16.msrb.mxu0 %v10053_v48  ;;  %v12098_v35 = vld [vmem:[%s19610_s1 + $0x2dc] sm:$0xf0]  ;;  %v6795_v47 = vadd.f32 %v16256_v24, %v6782_v34  ;;  %v8777_v48 = vor.u32 %v12226_v3, %v8776_v36 }
 0x303   :  { %v11074_v19 = vld [vmem:[%s19610_s1 + $0x18d8] sm:$0xf0]  ;;  %v9288_v18 = vld [vmem:[%s19610_s1 + $0xaa0] sm:$0xf] }
 0x304   :  { %v12921_v43 = vld [vmem:[%s19610_s1 + $0x1c9c] sm:$0xf]  ;;  %v11077_v51 = vor.u32 %v12793_v40, %v11074_v19  ;;  %7025 = vmatpush.bf16.msrb.mxu1 %v10565_v27  ;;  %v12354_v40 = vld [vmem:[%s19610_s1 + $0xadc] sm:$0xf0] }
 0x305   :  { %v11586_v45 = vld [vmem:[%s19610_s1 + $0x1cd8] sm:$0xf0]  ;;  %v9800_v19 = vld [vmem:[%s19610_s1 + $0xea0] sm:$0xf] }
 0x306   :  { %v12521_v49 = vld [vmem:[%s19610_s1 + $0x101c] sm:$0xf]  ;;  %v11589_v56 = vor.u32 %v12921_v43, %v11586_v45  ;;  %7038 = vmatpush.bf16.msrb.mxu2 %v11077_v51  ;;  %v12482_v43 = vld [vmem:[%s19610_s1 + $0xedc] sm:$0xf0]  ;;  %v8265_v45 = vor.u32 %v12098_v35, %v8264_v11 }
 0x307   :  { %v9986_v50 = vld [vmem:[%s19610_s1 + $0x1058] sm:$0xf0]  ;;  %v12082_v27 = vld [vmem:[%s19610_s1 + $0x25c] sm:$0xf0] }
 0x308   :  { %v12649_v52 = vld [vmem:[%s19610_s1 + $0x141c] sm:$0xf]  ;;  %v9989_v32 = vor.u32 %v12521_v49, %v9986_v50  ;;  %7051 = vmatpush.bf16.msrb.mxu3 %v11589_v56  ;;  %v9289_v49 = vor.u32 %v12354_v40, %v9288_v18  ;;  %v8200_v50 = vld [vmem:[%s19610_s1 + $0x220] sm:$0xf] }
 0x309   :  { %v10498_v12 = vld [vmem:[%s19610_s1 + $0x1458] sm:$0xf0]  ;;  %v8712_v51 = vld [vmem:[%s19610_s1 + $0x620] sm:$0xf] }
 0x30a   :  { %v12777_v54 = vld [vmem:[%s19610_s1 + $0x181c] sm:$0xf]  ;;  %v10501_v7 = vor.u32 %v12649_v52, %v10498_v12  ;;  %7013 = vmatpush.bf16.msrb.mxu0 %v9989_v32  ;;  %v9801_v52 = vor.u32 %v12482_v43, %v9800_v19  ;;  %v12210_v24 = vld [vmem:[%s19610_s1 + $0x65c] sm:$0xf0]  ;;  %v6820_v32 = vpop.f32.mrf.mxu1 }
 0x30b   :  { %v11010_v25 = vld [vmem:[%s19610_s1 + $0x1858] sm:$0xf0]  ;;  %v9224_v12 = vld [vmem:[%s19610_s1 + $0xa20] sm:$0xf] }
 0x30c   :  { %v12905_v57 = vld [vmem:[%s19610_s1 + $0x1c1c] sm:$0xf]  ;;  %v11013_v8 = vor.u32 %v12777_v54, %v11010_v25  ;;  %7026 = vmatpush.bf16.msrb.mxu1 %v10501_v7  ;;  %v12338_v54 = vld [vmem:[%s19610_s1 + $0xa5c] sm:$0xf0]  ;;  %v8201_v25 = vor.u32 %v12082_v27, %v8200_v50 }
 0x30d   :  { %v11522_v53 = vld [vmem:[%s19610_s1 + $0x1c58] sm:$0xf0]  ;;  %7014 = vmatmul.bf16.vlgmr.msrb.gmra.mxu0 %v13513_v41  ;;  %v12466_v56 = vld [vmem:[%s19610_s1 + $0xe5c] sm:$0xf0]  ;;  %v9225_v59 = vor.u32 %v12338_v54, %v9224_v12 }
 0x30e   :  { %v11525_v10 = vor.u32 %v12905_v57, %v11522_v53  ;;  %7039 = vmatpush.bf16.msrb.mxu2 %v11013_v8  ;;  %7058 = vmatpush.bf16.msra.mxu0 %v8393_v61  ;;  %v6807_v57 = vpop.f32.mrf.mxu0  ;;  %v8713_v53 = vor.u32 %v12210_v24, %v8712_v51  ;;  %v8648_v62 = vld [vmem:[%s19610_s1 + $0x5a0] sm:$0xf]  ;;  %v9737_v1 = vor.u32 %v12466_v56, %v9736_v55  ;;  %v6835_v55 = vpop.f32.mrf.mxu2 }
 0x30f   :  { %7027 = vmatmul.bf16.vlgmr.msrb.gmra.mxu1 %v13517_v44  ;;  %v6808_v63 = vadd.f32 %v6807_v57, %v6795_v47  ;;  %v12194_v39 = vld [vmem:[%s19610_s1 + $0x5dc] sm:$0xf0] }
 0x310   :  { %7052 = vmatpush.bf16.msrb.mxu3 %v11525_v10  ;;  %7071 = vmatpush.bf16.msra.mxu1 %v8905_v13  ;;  %v9160_v46 = vld [vmem:[%s19610_s1 + $0x9a0] sm:$0xf]  ;;  %v8137_v10 = vor.u32 %v12066_v33, %v8136_v31  ;;  %v8649_v61 = vor.u32 %v12194_v39, %v8648_v62 }
 0x311   :  { %7040 = vmatmul.bf16.vlgmr.msrb.gmra.mxu2 %v13505_v38  ;;  %v12322_v7 = vld [vmem:[%s19610_s1 + $0x9dc] sm:$0xf0]  ;;  %v6821_v58 = vadd.f32 %v6820_v32, %v6808_v63 }
 0x312   :  { %7084 = vmatpush.bf16.msra.mxu2 %v9417_v14  ;;  %7059 = vmatpush.bf16.msra.mxu0 %v8329_v29  ;;  %v9672_v8 = vld [vmem:[%s19610_s1 + $0xda0] sm:$0xf]  ;;  %v9161_v13 = vor.u32 %v12322_v7, %v9160_v46  ;;  %v6822_v40 = vpop.f32.mrf.mxu1 }
 0x313   :  { %7053 = vmatmul.bf16.vlgmr.msrb.gmra.mxu3 %v13515_v42  ;;  %v12450_v60 = vld [vmem:[%s19610_s1 + $0xddc] sm:$0xf0]  ;;  %v6834_v26 = vadd.f32 %v6833_v17, %v6821_v58 }
 0x314   :  { %7097 = vmatpush.bf16.msra.mxu3 %v9929_v22  ;;  %7072 = vmatpush.bf16.msra.mxu1 %v8841_v30  ;;  %v8072_v14 = vld [vmem:[%s19610_s1 + $0x120] sm:$0xf]  ;;  %v9673_v5 = vor.u32 %v12450_v60, %v9672_v8 }
 0x315   :  { %v12050_v15 = vld [vmem:[%s19610_s1 + $0x15c] sm:$0xf0] }
 0x316   :  { %7085 = vmatpush.bf16.msra.mxu2 %v9353_v9  ;;  %7060 = vmatpush.bf16.msra.mxu0 %v8265_v45  ;;  %v8584_v16 = vld [vmem:[%s19610_s1 + $0x520] sm:$0xf]  ;;  %v8073_v30 = vor.u32 %v12050_v15, %v8072_v14  ;;  %v6847_v9 = vadd.f32 %v6846_v2, %v6834_v26  ;;  %v6809_v11 = vpop.f32.mrf.mxu0 }
 0x317   :  { %v12178_v22 = vld [vmem:[%s19610_s1 + $0x55c] sm:$0xf0] }
 0x318   :  { %7098 = vmatpush.bf16.msra.mxu3 %v9865_v37  ;;  %7073 = vmatpush.bf16.msra.mxu1 %v8777_v48  ;;  %v9096_v23 = vld [vmem:[%s19610_s1 + $0x920] sm:$0xf]  ;;  %v8585_v35 = vor.u32 %v12178_v22, %v8584_v16  ;;  %7895 = vst [vmem:[%s19613_s3 + $0x28] sm:$0xff] %v6847_v9 }
 0x319   :  { %v12306_v0 = vld [vmem:[%s19610_s1 + $0x95c] sm:$0xf0] }
 0x31a   :  { %7086 = vmatpush.bf16.msra.mxu2 %v9289_v49  ;;  %7061 = vmatpush.bf16.msra.mxu0 %v8201_v25  ;;  %v9608_v28 = vld [vmem:[%s19610_s1 + $0xd20] sm:$0xf]  ;;  %v9097_v36 = vor.u32 %v12306_v0, %v9096_v23 }
 0x31b   :  { %v12434_v29 = vld [vmem:[%s19610_s1 + $0xd5c] sm:$0xf0] }
 0x31c   :  { %7099 = vmatpush.bf16.msra.mxu3 %v9801_v52  ;;  %7074 = vmatpush.bf16.msra.mxu1 %v8713_v53  ;;  %v8008_v34 = vld [vmem:[%s19610_s1 + $0xa0] sm:$0xf]  ;;  %v9609_v19 = vor.u32 %v12434_v29, %v9608_v28 }
 0x31d   :  { %v12034_v37 = vld [vmem:[%s19610_s1 + $0xdc] sm:$0xf0] }
 0x31e   :  { %7087 = vmatpush.bf16.msra.mxu2 %v9225_v59  ;;  %7062 = vmatpush.bf16.msra.mxu0 %v8137_v10  ;;  %v8520_v3 = vld [vmem:[%s19610_s1 + $0x4a0] sm:$0xf]  ;;  %v8009_v49 = vor.u32 %v12034_v37, %v8008_v34  ;;  %v6848_v59 = vpop.f32.mrf.mxu3 }
 0x31f   :  { %v12162_v18 = vld [vmem:[%s19610_s1 + $0x4dc] sm:$0xf0]  ;;  %v16627_v59 = vpop.f32.mrf.mxu1 }
 0x320   :  { %7100 = vmatpush.bf16.msra.mxu3 %v9737_v1  ;;  %7075 = vmatpush.bf16.msra.mxu1 %v8649_v61  ;;  %v9032_v43 = vld [vmem:[%s19610_s1 + $0x8a0] sm:$0xf]  ;;  %v8521_v51 = vor.u32 %v12162_v18, %v8520_v3 }
 0x321   :  { %v12290_v45 = vld [vmem:[%s19610_s1 + $0x8dc] sm:$0xf0] }
 0x322   :  { %7088 = vmatpush.bf16.msra.mxu2 %v9161_v13  ;;  %v9544_v47 = vld [vmem:[%s19610_s1 + $0xca0] sm:$0xf]  ;;  %7063 = vmatpush.bf16.msra.mxu0 %v8073_v30  ;;  %v9033_v52 = vor.u32 %v12290_v45, %v9032_v43 }
 0x323   :  { %v12418_v48 = vld [vmem:[%s19610_s1 + $0xcdc] sm:$0xf0] }
 0x324   :  { %7101 = vmatpush.bf16.msra.mxu3 %v9673_v5  ;;  %v7944_v50 = vld [vmem:[%s19610_s1 + $0x20] sm:$0xf]  ;;  %7076 = vmatpush.bf16.msra.mxu1 %v8585_v35  ;;  %v9545_v56 = vor.u32 %v12418_v48, %v9544_v47 }
 0x325   :  { %v12018_v27 = vld [vmem:[%s19610_s1 + $0x5c] sm:$0xf0] }
 0x326   :  { %7089 = vmatpush.bf16.msra.mxu2 %v9097_v36  ;;  %v8456_v24 = vld [vmem:[%s19610_s1 + $0x420] sm:$0xf]  ;;  %7064 = vmatpush.bf16.msra.mxu0 %v8009_v49  ;;  %v7945_v63 = vor.u32 %v12018_v27, %v7944_v50 }
 0x327   :  { %v12146_v12 = vld [vmem:[%s19610_s1 + $0x45c] sm:$0xf0] }
 0x328   :  { %v8968_v54 = vld [vmem:[%s19610_s1 + $0x820] sm:$0xf]  ;;  %7102 = vmatpush.bf16.msra.mxu3 %v9609_v19  ;;  %7077 = vmatpush.bf16.msra.mxu1 %v8521_v51  ;;  %v8457_v46 = vor.u32 %v12146_v12, %v8456_v24 }
 0x329   :  { %v12274_v25 = vld [vmem:[%s19610_s1 + $0x85c] sm:$0xf0] }
 0x32a   :  { %v9480_v57 = vld [vmem:[%s19610_s1 + $0xc20] sm:$0xf]  ;;  %7090 = vmatpush.bf16.msra.mxu2 %v9033_v52  ;;  %v8969_v7 = vor.u32 %v12274_v25, %v8968_v54  ;;  %7065 = vmatpush.bf16.msra.mxu0 %v7945_v63  ;;  %v16616_v54 = vpop.f32.mrf.mxu0 }
 0x32b   :  { %v12402_v53 = vld [vmem:[%s19610_s1 + $0xc5c] sm:$0xf0] }
 0x32c   :  { %v10440_v31 = vld [vmem:[%s19610_s1 + $0x13a0] sm:$0xf]  ;;  %7103 = vmatpush.bf16.msra.mxu3 %v9545_v56  ;;  %v9481_v58 = vor.u32 %v12402_v53, %v9480_v57  ;;  %7078 = vmatpush.bf16.msra.mxu1 %v8457_v46 }
 0x32d   :  { %v12642_v33 = vld [vmem:[%s19610_s1 + $0x13dc] sm:$0xf0]  ;;  %7066 = vmatmul.bf16.vlgmr.msra.gmra.mxu0 %v13354_v20 }
 0x32e   :  { %v10952_v62 = vld [vmem:[%s19610_s1 + $0x17a0] sm:$0xf]  ;;  %v10441_v10 = vor.u32 %v12642_v33, %v10440_v31  ;;  %7091 = vmatpush.bf16.msra.mxu2 %v8969_v7 }
 0x32f   :  { %v12770_v32 = vld [vmem:[%s19610_s1 + $0x17dc] sm:$0xf0]  ;;  %7079 = vmatmul.bf16.vlgmr.msra.gmra.mxu1 %v13357_v21 }
 0x330   :  { %v11464_v1 = vld [vmem:[%s19610_s1 + $0x1ba0] sm:$0xf]  ;;  %v10953_v61 = vor.u32 %v12770_v32, %v10952_v62  ;;  %7104 = vmatpush.bf16.msra.mxu3 %v9481_v58  ;;  %7110 = vmatpush.bf16.msrb.mxu0 %v10441_v10  ;;  %v16653_v10 = vpop.f32.mrf.mxu2 }
 0x331   :  { %v12898_v39 = vld [vmem:[%s19610_s1 + $0x1bdc] sm:$0xf0]  ;;  %7092 = vmatmul.bf16.vlgmr.msra.gmra.mxu2 %v13322_v4 }
 0x332   :  { %v11976_v8 = vld [vmem:[%s19610_s1 + $0x1fa0] sm:$0xf]  ;;  %v11465_v13 = vor.u32 %v12898_v39, %v11464_v1  ;;  %7123 = vmatpush.bf16.msrb.mxu1 %v10953_v61 }
 0x333   :  { %v13026_v60 = vld [vmem:[%s19610_s1 + $0x1fdc] sm:$0xf0]  ;;  %7105 = vmatmul.bf16.vlgmr.msra.gmra.mxu3 %v13327_v6 }
 0x334   :  { %v10376_v14 = vld [vmem:[%s19610_s1 + $0x1320] sm:$0xf]  ;;  %v11977_v17 = vor.u32 %v13026_v60, %v11976_v8  ;;  %7136 = vmatpush.bf16.msrb.mxu2 %v11465_v13 }
 0x335   :  { %v12626_v15 = vld [vmem:[%s19610_s1 + $0x135c] sm:$0xf0] }
 0x336   :  { %v10888_v16 = vld [vmem:[%s19610_s1 + $0x1720] sm:$0xf]  ;;  %v10377_v2 = vor.u32 %v12626_v15, %v10376_v14  ;;  %7149 = vmatpush.bf16.msrb.mxu3 %v11977_v17 }
 0x337   :  { %v12754_v5 = vld [vmem:[%s19610_s1 + $0x175c] sm:$0xf0] }
 0x338   :  { %v11400_v22 = vld [vmem:[%s19610_s1 + $0x1b20] sm:$0xf]  ;;  %v10889_v28 = vor.u32 %v12754_v5, %v10888_v16  ;;  %7111 = vmatpush.bf16.msrb.mxu0 %v10377_v2  ;;  %v16664_v16 = vpop.f32.mrf.mxu3 }
 0x339   :  { %v12882_v23 = vld [vmem:[%s19610_s1 + $0x1b5c] sm:$0xf0] }
 0x33a   :  { %v11912_v0 = vld [vmem:[%s19610_s1 + $0x1f20] sm:$0xf]  ;;  %v11401_v29 = vor.u32 %v12882_v23, %v11400_v22  ;;  %7124 = vmatpush.bf16.msrb.mxu1 %v10889_v28  ;;  %v6861_v23 = vpop.f32.mrf.mxu0 }
 0x33b   :  { %v13010_v26 = vld [vmem:[%s19610_s1 + $0x1f5c] sm:$0xf0]  ;;  %v9866_v23 = vld [vmem:[%s19610_s1 + $0xf60] sm:$0xf0] }
 0x33c   :  { %v10312_v30 = vld [vmem:[%s19610_s1 + $0x12a0] sm:$0xf]  ;;  %v11913_v11 = vor.u32 %v13010_v26, %v11912_v0  ;;  %7137 = vmatpush.bf16.msrb.mxu2 %v11401_v29 }
 0x33d   :  { %v12610_v9 = vld [vmem:[%s19610_s1 + $0x12dc] sm:$0xf0] }
 0x33e   :  { %v10824_v34 = vld [vmem:[%s19610_s1 + $0x16a0] sm:$0xf]  ;;  %v10313_v40 = vor.u32 %v12610_v9, %v10312_v30  ;;  %7150 = vmatpush.bf16.msrb.mxu3 %v11913_v11  ;;  %v6874_v30 = vpop.f32.mrf.mxu1 }
 0x33f   :  { %v12738_v35 = vld [vmem:[%s19610_s1 + $0x16dc] sm:$0xf0]  ;;  %v8266_v30 = vld [vmem:[%s19610_s1 + $0x2e0] sm:$0xf0] }
 0x340   :  { %v11336_v36 = vld [vmem:[%s19610_s1 + $0x1aa0] sm:$0xf]  ;;  %v10825_v19 = vor.u32 %v12738_v35, %v10824_v34  ;;  %7112 = vmatpush.bf16.msrb.mxu0 %v10313_v40 }
 0x341   :  { %v12866_v37 = vld [vmem:[%s19610_s1 + $0x1adc] sm:$0xf0] }
 0x342   :  { %v11848_v3 = vld [vmem:[%s19610_s1 + $0x1ea0] sm:$0xf]  ;;  %v11337_v43 = vor.u32 %v12866_v37, %v11336_v36  ;;  %7125 = vmatpush.bf16.msrb.mxu1 %v10825_v19 }
 0x343   :  { %v12994_v18 = vld [vmem:[%s19610_s1 + $0x1edc] sm:$0xf0] }
 0x344   :  { %v10248_v45 = vld [vmem:[%s19610_s1 + $0x1220] sm:$0xf]  ;;  %v11849_v49 = vor.u32 %v12994_v18, %v11848_v3  ;;  %7138 = vmatpush.bf16.msrb.mxu2 %v11337_v43 }
 0x345   :  { %v12594_v47 = vld [vmem:[%s19610_s1 + $0x125c] sm:$0xf0] }
 0x346   :  { %v10760_v48 = vld [vmem:[%s19610_s1 + $0x1620] sm:$0xf]  ;;  %v10249_v12 = vor.u32 %v12594_v47, %v10248_v45  ;;  %7151 = vmatpush.bf16.msrb.mxu3 %v11849_v49 }
 0x347   :  { %v12722_v50 = vld [vmem:[%s19610_s1 + $0x165c] sm:$0xf0] }
 0x348   :  { %v11272_v27 = vld [vmem:[%s19610_s1 + $0x1a20] sm:$0xf]  ;;  %v10761_v55 = vor.u32 %v12722_v50, %v10760_v48  ;;  %7113 = vmatpush.bf16.msrb.mxu0 %v10249_v12 }
 0x349   :  { %v12850_v51 = vld [vmem:[%s19610_s1 + $0x1a5c] sm:$0xf0] }
 0x34a   :  { %v11784_v52 = vld [vmem:[%s19610_s1 + $0x1e20] sm:$0xf]  ;;  %v11273_v56 = vor.u32 %v12850_v51, %v11272_v27  ;;  %7126 = vmatpush.bf16.msrb.mxu1 %v10761_v55  ;;  %v6887_v27 = vpop.f32.mrf.mxu2  ;;  %v6900_v55 = vpop.f32.mrf.mxu3 }
 0x34b   :  { %v12978_v24 = vld [vmem:[%s19610_s1 + $0x1e5c] sm:$0xf0]  ;;  %v9226_v27 = vld [vmem:[%s19610_s1 + $0xa60] sm:$0xf0] }
 0x34c   :  { %v10184_v25 = vld [vmem:[%s19610_s1 + $0x11a0] sm:$0xf]  ;;  %v11785_v31 = vor.u32 %v12978_v24, %v11784_v52  ;;  %7139 = vmatpush.bf16.msrb.mxu2 %v11273_v56  ;;  %v12122_v56 = vld [vmem:[%s19610_s1 + $0x3a4] sm:$0xf] }
 0x34d   :  { %v12578_v57 = vld [vmem:[%s19610_s1 + $0x11dc] sm:$0xf0] }
 0x34e   :  { %v10696_v53 = vld [vmem:[%s19610_s1 + $0x15a0] sm:$0xf]  ;;  %v10185_v39 = vor.u32 %v12578_v57, %v10184_v25  ;;  %7152 = vmatpush.bf16.msrb.mxu3 %v11785_v31  ;;  %v8394_v25 = vld [vmem:[%s19610_s1 + $0x3e0] sm:$0xf0] }
 0x34f   :  { %v12706_v33 = vld [vmem:[%s19610_s1 + $0x15dc] sm:$0xf0]  ;;  %v12250_v57 = vld [vmem:[%s19610_s1 + $0x7a4] sm:$0xf] }
 0x350   :  { %v11208_v62 = vld [vmem:[%s19610_s1 + $0x19a0] sm:$0xf]  ;;  %v10697_v46 = vor.u32 %v12706_v33, %v10696_v53  ;;  %7114 = vmatpush.bf16.msrb.mxu0 %v10185_v39  ;;  %v8906_v33 = vld [vmem:[%s19610_s1 + $0x7e0] sm:$0xf0] }
 0x351   :  { %v12834_v63 = vld [vmem:[%s19610_s1 + $0x19dc] sm:$0xf0]  ;;  %v9930_v39 = vld [vmem:[%s19610_s1 + $0xfe0] sm:$0xf0] }
 0x352   :  { %v11720_v32 = vld [vmem:[%s19610_s1 + $0x1da0] sm:$0xf]  ;;  %v11209_v7 = vor.u32 %v12834_v63, %v11208_v62  ;;  %7127 = vmatpush.bf16.msrb.mxu1 %v10697_v46  ;;  %v12378_v62 = vld [vmem:[%s19610_s1 + $0xba4] sm:$0xf] }
 0x353   :  { %v12962_v1 = vld [vmem:[%s19610_s1 + $0x1ddc] sm:$0xf0]  ;;  %v9418_v63 = vld [vmem:[%s19610_s1 + $0xbe0] sm:$0xf0] }
 0x354   :  { %v10120_v8 = vld [vmem:[%s19610_s1 + $0x1120] sm:$0xf]  ;;  %v11721_v61 = vor.u32 %v12962_v1, %v11720_v32  ;;  %7140 = vmatpush.bf16.msrb.mxu2 %v11209_v7  ;;  %v8397_v7 = vor.u32 %v12122_v56, %v8394_v25  ;;  %v12058_v25 = vld [vmem:[%s19610_s1 + $0x1a4] sm:$0xf] }
 0x355   :  { %v12562_v60 = vld [vmem:[%s19610_s1 + $0x115c] sm:$0xf0] }
 0x356   :  { %v10632_v58 = vld [vmem:[%s19610_s1 + $0x1520] sm:$0xf]  ;;  %v10121_v22 = vor.u32 %v12562_v60, %v10120_v8  ;;  %7153 = vmatpush.bf16.msrb.mxu3 %v11721_v61  ;;  %v8909_v8 = vor.u32 %v12250_v57, %v8906_v33  ;;  %v9421_v60 = vor.u32 %v12378_v62, %v9418_v63  ;;  %v12106_v61 = vld [vmem:[%s19610_s1 + $0x324] sm:$0xf]  ;;  %v6924_v33 = vpop.f32.mrf.mxu1 }
 0x357   :  { %v12690_v13 = vld [vmem:[%s19610_s1 + $0x155c] sm:$0xf0]  ;;  %v8138_v57 = vld [vmem:[%s19610_s1 + $0x1e0] sm:$0xf0] }
 0x358   :  { %v11144_v14 = vld [vmem:[%s19610_s1 + $0x1920] sm:$0xf]  ;;  %v10633_v0 = vor.u32 %v12690_v13, %v10632_v58  ;;  %7115 = vmatpush.bf16.msrb.mxu0 %v10121_v22  ;;  %v8330_v13 = vld [vmem:[%s19610_s1 + $0x360] sm:$0xf0] }
 0x359   :  { %v12818_v15 = vld [vmem:[%s19610_s1 + $0x195c] sm:$0xf0]  ;;  %v12490_v22 = vld [vmem:[%s19610_s1 + $0xf24] sm:$0xf] }
 0x35a   :  { %v11656_v17 = vld [vmem:[%s19610_s1 + $0x1d20] sm:$0xf]  ;;  %v11145_v26 = vor.u32 %v12818_v15, %v11144_v14  ;;  %7128 = vmatpush.bf16.msrb.mxu1 %v10633_v0  ;;  %v12234_v14 = vld [vmem:[%s19610_s1 + $0x724] sm:$0xf]  ;;  %v8333_v0 = vor.u32 %v12106_v61, %v8330_v13 }
 0x35b   :  { %v12946_v5 = vld [vmem:[%s19610_s1 + $0x1d5c] sm:$0xf0]  ;;  %v8650_v63 = vld [vmem:[%s19610_s1 + $0x5e0] sm:$0xf0] }
 0x35c   :  { %v10056_v2 = vld [vmem:[%s19610_s1 + $0x10a0] sm:$0xf]  ;;  %v11657_v9 = vor.u32 %v12946_v5, %v11656_v17  ;;  %7141 = vmatpush.bf16.msrb.mxu2 %v11145_v26  ;;  %v8842_v17 = vld [vmem:[%s19610_s1 + $0x760] sm:$0xf0] }
 0x35d   :  { %v12546_v28 = vld [vmem:[%s19610_s1 + $0x10dc] sm:$0xf0]  ;;  %v9354_v5 = vld [vmem:[%s19610_s1 + $0xb60] sm:$0xf0]  ;;  %v8845_v26 = vor.u32 %v12234_v14, %v8842_v17  ;;  %v6937_v14 = vpop.f32.mrf.mxu2 }
 0x35e   :  { %v10568_v29 = vld [vmem:[%s19610_s1 + $0x14a0] sm:$0xf]  ;;  %v10057_v40 = vor.u32 %v12546_v28, %v10056_v2  ;;  %7154 = vmatpush.bf16.msrb.mxu3 %v11657_v9  ;;  %v12218_v9 = vld [vmem:[%s19610_s1 + $0x6a4] sm:$0xf] }
 0x35f   :  { %v12674_v34 = vld [vmem:[%s19610_s1 + $0x14dc] sm:$0xf0]  ;;  %v8074_v61 = vld [vmem:[%s19610_s1 + $0x160] sm:$0xf0] }
 0x360   :  { %v11080_v11 = vld [vmem:[%s19610_s1 + $0x18a0] sm:$0xf]  ;;  %v10569_v45 = vor.u32 %v12674_v34, %v10568_v29  ;;  %7116 = vmatpush.bf16.msrb.mxu0 %v10057_v40  ;;  %v12090_v29 = vld [vmem:[%s19610_s1 + $0x2a4] sm:$0xf]  ;;  %v9869_v34 = vor.u32 %v12490_v22, %v9866_v23  ;;  %v6950_v23 = vpop.f32.mrf.mxu3 }
 0x361   :  { %v12802_v35 = vld [vmem:[%s19610_s1 + $0x18dc] sm:$0xf0]  ;;  %v12170_v13 = vld [vmem:[%s19610_s1 + $0x524] sm:$0xf] }
 0x362   :  { %v11592_v36 = vld [vmem:[%s19610_s1 + $0x1ca0] sm:$0xf]  ;;  %v11081_v47 = vor.u32 %v12802_v35, %v11080_v11  ;;  %7129 = vmatpush.bf16.msrb.mxu1 %v10569_v45  ;;  %v12346_v11 = vld [vmem:[%s19610_s1 + $0xaa4] sm:$0xf] }
 0x363   :  { %v12930_v37 = vld [vmem:[%s19610_s1 + $0x1cdc] sm:$0xf0]  ;;  %v9290_v35 = vld [vmem:[%s19610_s1 + $0xae0] sm:$0xf0] }
 0x364   :  { %v16699_v3 = vld [vmem:[%s19612_s2] sm:$0xff]  ;;  %v11593_v51 = vor.u32 %v12930_v37, %v11592_v36  ;;  %7142 = vmatpush.bf16.msrb.mxu2 %v11081_v47 }
 0x365   :  { %v1052_v18 = vperm.slane %v16699_v3, 6  ;;  %v9992_v19 = vld [vmem:[%s19610_s1 + $0x1020] sm:$0xf]  ;;  %v12474_v36 = vld [vmem:[%s19610_s1 + $0xea4] sm:$0xf] }
 0x366   :  { %v12530_v43 = vld [vmem:[%s19610_s1 + $0x105c] sm:$0xf0]  ;;  %7155 = vmatpush.bf16.msrb.mxu3 %v11593_v51  ;;  %v9802_v37 = vld [vmem:[%s19610_s1 + $0xee0] sm:$0xf0] }
 0x367   :  { %v10504_v48 = vld [vmem:[%s19610_s1 + $0x1420] sm:$0xf]  ;;  %v6860_v53 = vadd.f32 %v16616_v54, %v1052_v18  ;;  %v9993_v31 = vor.u32 %v12530_v43, %v9992_v19  ;;  %v12506_v54 = vld [vmem:[%s19610_s1 + $0xfa4] sm:$0xf]  ;;  %v8269_v18 = vor.u32 %v12090_v29, %v8266_v30  ;;  %v9293_v43 = vor.u32 %v12346_v11, %v9290_v35 }
 0x368   :  { %v12658_v49 = vld [vmem:[%s19610_s1 + $0x145c] sm:$0xf0]  ;;  %v9933_v15 = vor.u32 %v12506_v54, %v9930_v39  ;;  %v12074_v45 = vld [vmem:[%s19610_s1 + $0x224] sm:$0xf] }
 0x369   :  { %v11016_v50 = vld [vmem:[%s19610_s1 + $0x1820] sm:$0xf]  ;;  %v10505_v32 = vor.u32 %v12658_v49, %v10504_v48  ;;  %v6873_v58 = vadd.f32 %v16627_v59, %v6860_v53  ;;  %7117 = vmatpush.bf16.msrb.mxu0 %v9993_v31  ;;  %v12362_v59 = vld [vmem:[%s19610_s1 + $0xb24] sm:$0xf]  ;;  %v9805_v49 = vor.u32 %v12474_v36, %v9802_v37  ;;  %v6926_v36 = vpop.f32.mrf.mxu1 }
 0x36a   :  { %v12786_v52 = vld [vmem:[%s19610_s1 + $0x185c] sm:$0xf0]  ;;  %v9357_v2 = vor.u32 %v12362_v59, %v9354_v5  ;;  %v8202_v47 = vld [vmem:[%s19610_s1 + $0x260] sm:$0xf0] }
 0x36b   :  { %v11528_v24 = vld [vmem:[%s19610_s1 + $0x1c20] sm:$0xf]  ;;  %v11017_v1 = vor.u32 %v12786_v52, %v11016_v50  ;;  %7130 = vmatpush.bf16.msrb.mxu1 %v10505_v32  ;;  %v6886_v28 = vadd.f32 %v16653_v10, %v6873_v58  ;;  %v8778_v10 = vld [vmem:[%s19610_s1 + $0x6e0] sm:$0xf0] }
 0x36c   :  { %v12914_v12 = vld [vmem:[%s19610_s1 + $0x1c5c] sm:$0xf0]  ;;  %7118 = vmatmul.bf16.vlgmr.msrb.gmra.mxu0 %v13513_v41  ;;  %v8781_v19 = vor.u32 %v12218_v9, %v8778_v10  ;;  %v12202_v48 = vld [vmem:[%s19610_s1 + $0x624] sm:$0xf] }
 0x36d   :  { %v11529_v46 = vor.u32 %v12914_v12, %v11528_v24  ;;  %7143 = vmatpush.bf16.msrb.mxu2 %v11017_v1  ;;  %7162 = vmatpush.bf16.msra.mxu0 %v8397_v7  ;;  %v6899_v40 = vadd.f32 %v16664_v16, %v6886_v28  ;;  %v8714_v16 = vld [vmem:[%s19610_s1 + $0x660] sm:$0xf0]  ;;  %v8205_v24 = vor.u32 %v12074_v45, %v8202_v47  ;;  %v6911_v12 = vpop.f32.mrf.mxu0 }
 0x36e   :  { %7131 = vmatmul.bf16.vlgmr.msrb.gmra.mxu1 %v13517_v44  ;;  %v12330_v50 = vld [vmem:[%s19610_s1 + $0xa24] sm:$0xf]  ;;  %v8717_v55 = vor.u32 %v12202_v48, %v8714_v16  ;;  %v8141_v7 = vor.u32 %v12058_v25, %v8138_v57  ;;  %v6952_v25 = vpop.f32.mrf.mxu3 }
 0x36f   :  { %7156 = vmatpush.bf16.msrb.mxu3 %v11529_v46  ;;  %7175 = vmatpush.bf16.msra.mxu1 %v8909_v8  ;;  %v12458_v51 = vld [vmem:[%s19610_s1 + $0xe24] sm:$0xf]  ;;  %v9229_v56 = vor.u32 %v12330_v50, %v9226_v27  ;;  %v6912_v31 = vadd.f32 %v6911_v12, %v6899_v40 }
 0x370   :  { %7144 = vmatmul.bf16.vlgmr.msrb.gmra.mxu2 %v13505_v38  ;;  %v9738_v52 = vld [vmem:[%s19610_s1 + $0xe60] sm:$0xf0] }
 0x371   :  { %7188 = vmatpush.bf16.msra.mxu2 %v9421_v60  ;;  %7163 = vmatpush.bf16.msra.mxu0 %v8333_v0  ;;  %v12186_v53 = vld [vmem:[%s19610_s1 + $0x5a4] sm:$0xf]  ;;  %v9741_v62 = vor.u32 %v12458_v51, %v9738_v52  ;;  %v6925_v46 = vadd.f32 %v6924_v33, %v6912_v31  ;;  %v6939_v52 = vpop.f32.mrf.mxu2 }
 0x372   :  { %7157 = vmatmul.bf16.vlgmr.msrb.gmra.mxu3 %v13515_v42  ;;  %v12314_v32 = vld [vmem:[%s19610_s1 + $0x9a4] sm:$0xf]  ;;  %v8653_v8 = vor.u32 %v12186_v53, %v8650_v63 }
 0x373   :  { %7201 = vmatpush.bf16.msra.mxu3 %v9933_v15  ;;  %7176 = vmatpush.bf16.msra.mxu1 %v8845_v26  ;;  %v9162_v1 = vld [vmem:[%s19610_s1 + $0x9e0] sm:$0xf0]  ;;  %v6938_v22 = vadd.f32 %v6937_v14, %v6925_v46 }
 0x374   :  { %v12442_v54 = vld [vmem:[%s19610_s1 + $0xda4] sm:$0xf]  ;;  %v9165_v60 = vor.u32 %v12314_v32, %v9162_v1 }
 0x375   :  { %7189 = vmatpush.bf16.msra.mxu2 %v9357_v2  ;;  %7164 = vmatpush.bf16.msra.mxu0 %v8269_v18  ;;  %v9674_v39 = vld [vmem:[%s19610_s1 + $0xde0] sm:$0xf0]  ;;  %v6951_v28 = vadd.f32 %v6950_v23, %v6938_v22  ;;  %v6913_v30 = vpop.f32.mrf.mxu0 }
 0x376   :  { %v12042_v58 = vld [vmem:[%s19610_s1 + $0x124] sm:$0xf]  ;;  %v9677_v15 = vor.u32 %v12442_v54, %v9674_v39 }
 0x377   :  { %7202 = vmatpush.bf16.msra.mxu3 %v9869_v34  ;;  %7177 = vmatpush.bf16.msra.mxu1 %v8781_v19  ;;  %v8586_v17 = vld [vmem:[%s19610_s1 + $0x560] sm:$0xf0]  ;;  %v8077_v2 = vor.u32 %v12042_v58, %v8074_v61  ;;  %7896 = vst [vmem:[%s19613_s3 + $0x30] sm:$0xff] %v6951_v28 }
 0x378   :  { %v12298_v59 = vld [vmem:[%s19610_s1 + $0x924] sm:$0xf]  ;;  %v8589_v9 = vor.u32 %v12170_v13, %v8586_v17 }
 0x379   :  { %7190 = vmatpush.bf16.msra.mxu2 %v9293_v43  ;;  %7165 = vmatpush.bf16.msra.mxu0 %v8205_v24  ;;  %v9098_v5 = vld [vmem:[%s19610_s1 + $0x960] sm:$0xf0] }
 0x37a   :  { %v12426_v0 = vld [vmem:[%s19610_s1 + $0xd24] sm:$0xf]  ;;  %v9101_v34 = vor.u32 %v12298_v59, %v9098_v5 }
 0x37b   :  { %7203 = vmatpush.bf16.msra.mxu3 %v9805_v49  ;;  %7178 = vmatpush.bf16.msra.mxu1 %v8717_v55  ;;  %v9610_v26 = vld [vmem:[%s19610_s1 + $0xd60] sm:$0xf0] }
 0x37c   :  { %v12026_v29 = vld [vmem:[%s19610_s1 + $0xa4] sm:$0xf]  ;;  %v9613_v37 = vor.u32 %v12426_v0, %v9610_v26 }
 0x37d   :  { %7191 = vmatpush.bf16.msra.mxu2 %v9229_v56  ;;  %7166 = vmatpush.bf16.msra.mxu0 %v8141_v7  ;;  %v8010_v10 = vld [vmem:[%s19610_s1 + $0xe0] sm:$0xf0]  ;;  %v17029_v52 = vpop.f32.mrf.mxu0 }
 0x37e   :  { %v12154_v11 = vld [vmem:[%s19610_s1 + $0x4a4] sm:$0xf]  ;;  %v8013_v45 = vor.u32 %v12026_v29, %v8010_v10 }
 0x37f   :  { %7204 = vmatpush.bf16.msra.mxu3 %v9741_v62  ;;  %7179 = vmatpush.bf16.msra.mxu1 %v8653_v8  ;;  %v8522_v35 = vld [vmem:[%s19610_s1 + $0x4e0] sm:$0xf0] }
 0x380   :  { %v12282_v18 = vld [vmem:[%s19610_s1 + $0x8a4] sm:$0xf]  ;;  %v8525_v49 = vor.u32 %v12154_v11, %v8522_v35 }
 0x381   :  { %7192 = vmatpush.bf16.msra.mxu2 %v9165_v60  ;;  %v9034_v40 = vld [vmem:[%s19610_s1 + $0x8e0] sm:$0xf0]  ;;  %7167 = vmatpush.bf16.msra.mxu0 %v8077_v2 }
 0x382   :  { %v12410_v19 = vld [vmem:[%s19610_s1 + $0xca4] sm:$0xf]  ;;  %v9037_v16 = vor.u32 %v12282_v18, %v9034_v40 }
 0x383   :  { %7205 = vmatpush.bf16.msra.mxu3 %v9677_v15  ;;  %v9546_v43 = vld [vmem:[%s19610_s1 + $0xce0] sm:$0xf0]  ;;  %7180 = vmatpush.bf16.msra.mxu1 %v8589_v9 }
 0x384   :  { %v12010_v47 = vld [vmem:[%s19610_s1 + $0x24] sm:$0xf]  ;;  %v9549_v24 = vor.u32 %v12410_v19, %v9546_v43 }
 0x385   :  { %v7946_v48 = vld [vmem:[%s19610_s1 + $0x60] sm:$0xf0]  ;;  %7193 = vmatpush.bf16.msra.mxu2 %v9101_v34  ;;  %7168 = vmatpush.bf16.msra.mxu0 %v8013_v45 }
 0x386   :  { %v12138_v50 = vld [vmem:[%s19610_s1 + $0x424] sm:$0xf]  ;;  %v7949_v33 = vor.u32 %v12010_v47, %v7946_v48 }
 0x387   :  { %v8458_v27 = vld [vmem:[%s19610_s1 + $0x460] sm:$0xf0]  ;;  %7206 = vmatpush.bf16.msra.mxu3 %v9613_v37  ;;  %7181 = vmatpush.bf16.msra.mxu1 %v8525_v49 }
 0x388   :  { %v12266_v51 = vld [vmem:[%s19610_s1 + $0x824] sm:$0xf]  ;;  %v8461_v1 = vor.u32 %v12138_v50, %v8458_v27 }
 0x389   :  { %v8970_v12 = vld [vmem:[%s19610_s1 + $0x860] sm:$0xf0]  ;;  %7194 = vmatpush.bf16.msra.mxu2 %v9037_v16  ;;  %7169 = vmatpush.bf16.msra.mxu0 %v7949_v33 }
 0x38a   :  { %v12394_v55 = vld [vmem:[%s19610_s1 + $0xc24] sm:$0xf]  ;;  %v8973_v54 = vor.u32 %v12266_v51, %v8970_v12 }
 0x38b   :  { %v9482_v56 = vld [vmem:[%s19610_s1 + $0xc60] sm:$0xf0]  ;;  %7207 = vmatpush.bf16.msra.mxu3 %v9549_v24  ;;  %7182 = vmatpush.bf16.msra.mxu1 %v8461_v1 }
 0x38c   :  { %v12634_v57 = vld [vmem:[%s19610_s1 + $0x13a4] sm:$0xf]  ;;  %v9485_v7 = vor.u32 %v12394_v55, %v9482_v56  ;;  %7170 = vmatmul.bf16.vlgmr.msra.gmra.mxu0 %v13354_v20 }
 0x38d   :  { %v10442_v53 = vld [vmem:[%s19610_s1 + $0x13e0] sm:$0xf0]  ;;  %7195 = vmatpush.bf16.msra.mxu2 %v8973_v54 }
 0x38e   :  { %v12762_v31 = vld [vmem:[%s19610_s1 + $0x17a4] sm:$0xf]  ;;  %v10445_v8 = vor.u32 %v12634_v57, %v10442_v53  ;;  %7183 = vmatmul.bf16.vlgmr.msra.gmra.mxu1 %v13357_v21  ;;  %v17040_v57 = vpop.f32.mrf.mxu1 }
 0x38f   :  { %v10954_v62 = vld [vmem:[%s19610_s1 + $0x17e0] sm:$0xf0]  ;;  %7208 = vmatpush.bf16.msra.mxu3 %v9485_v7 }
 0x390   :  { %v12890_v63 = vld [vmem:[%s19610_s1 + $0x1ba4] sm:$0xf]  ;;  %v10957_v60 = vor.u32 %v12762_v31, %v10954_v62  ;;  %7214 = vmatpush.bf16.msrb.mxu0 %v10445_v8  ;;  %7196 = vmatmul.bf16.vlgmr.msra.gmra.mxu2 %v13322_v4 }
 0x391   :  { %v11466_v32 = vld [vmem:[%s19610_s1 + $0x1be0] sm:$0xf0] }
 0x392   :  { %v13018_v39 = vld [vmem:[%s19610_s1 + $0x1fa4] sm:$0xf]  ;;  %v11469_v58 = vor.u32 %v12890_v63, %v11466_v32  ;;  %7227 = vmatpush.bf16.msrb.mxu1 %v10957_v60  ;;  %7209 = vmatmul.bf16.vlgmr.msra.gmra.mxu3 %v13327_v6  ;;  %v17066_v60 = vpop.f32.mrf.mxu2 }
 0x393   :  { %v11978_v46 = vld [vmem:[%s19610_s1 + $0x1fe0] sm:$0xf0] }
 0x394   :  { %v12618_v61 = vld [vmem:[%s19610_s1 + $0x1324] sm:$0xf]  ;;  %v11981_v15 = vor.u32 %v13018_v39, %v11978_v46  ;;  %7240 = vmatpush.bf16.msrb.mxu2 %v11469_v58 }
 0x395   :  { %v10378_v13 = vld [vmem:[%s19610_s1 + $0x1360] sm:$0xf0] }
 0x396   :  { %v12746_v14 = vld [vmem:[%s19610_s1 + $0x1724] sm:$0xf]  ;;  %v10381_v0 = vor.u32 %v12618_v61, %v10378_v13  ;;  %7253 = vmatpush.bf16.msrb.mxu3 %v11981_v15  ;;  %v17077_v15 = vpop.f32.mrf.mxu3 }
 0x397   :  { %v10890_v17 = vld [vmem:[%s19610_s1 + $0x1760] sm:$0xf0] }
 0x398   :  { %v12874_v59 = vld [vmem:[%s19610_s1 + $0x1b24] sm:$0xf]  ;;  %v10893_v26 = vor.u32 %v12746_v14, %v10890_v17  ;;  %7215 = vmatpush.bf16.msrb.mxu0 %v10381_v0 }
 0x399   :  { %v11402_v5 = vld [vmem:[%s19610_s1 + $0x1b60] sm:$0xf0] }
 0x39a   :  { %v13002_v22 = vld [vmem:[%s19610_s1 + $0x1f24] sm:$0xf]  ;;  %v11405_v2 = vor.u32 %v12874_v59, %v11402_v5  ;;  %7228 = vmatpush.bf16.msrb.mxu1 %v10893_v26 }
 0x39b   :  { %v11914_v23 = vld [vmem:[%s19610_s1 + $0x1f60] sm:$0xf0] }
 0x39c   :  { %v12602_v28 = vld [vmem:[%s19610_s1 + $0x12a4] sm:$0xf]  ;;  %v11917_v9 = vor.u32 %v13002_v22, %v11914_v23  ;;  %7241 = vmatpush.bf16.msrb.mxu2 %v11405_v2  ;;  %v6965_v22 = vpop.f32.mrf.mxu0 }
 0x39d   :  { %v10314_v29 = vld [vmem:[%s19610_s1 + $0x12e0] sm:$0xf0] }
 0x39e   :  { %v12730_v30 = vld [vmem:[%s19610_s1 + $0x16a4] sm:$0xf]  ;;  %v10317_v37 = vor.u32 %v12602_v28, %v10314_v29  ;;  %7254 = vmatpush.bf16.msrb.mxu3 %v11917_v9  ;;  %v6978_v29 = vpop.f32.mrf.mxu1 }
 0x39f   :  { %v10826_v34 = vld [vmem:[%s19610_s1 + $0x16e0] sm:$0xf0]  ;;  %v8784_v29 = vld [vmem:[%s19610_s1 + $0x6a8] sm:$0xf] }
 0x3a0   :  { %v12858_v10 = vld [vmem:[%s19610_s1 + $0x1aa4] sm:$0xf]  ;;  %v10829_v18 = vor.u32 %v12730_v30, %v10826_v34  ;;  %7216 = vmatpush.bf16.msrb.mxu0 %v10317_v37 }
 0x3a1   :  { %v11338_v11 = vld [vmem:[%s19610_s1 + $0x1ae0] sm:$0xf0] }
 0x3a2   :  { %v12986_v35 = vld [vmem:[%s19610_s1 + $0x1ea4] sm:$0xf]  ;;  %v11341_v40 = vor.u32 %v12858_v10, %v11338_v11  ;;  %7229 = vmatpush.bf16.msrb.mxu1 %v10829_v18 }
 0x3a3   :  { %v11850_v36 = vld [vmem:[%s19610_s1 + $0x1ee0] sm:$0xf0] }
 0x3a4   :  { %v12586_v19 = vld [vmem:[%s19610_s1 + $0x1224] sm:$0xf]  ;;  %v11853_v47 = vor.u32 %v12986_v35, %v11850_v36  ;;  %7242 = vmatpush.bf16.msrb.mxu2 %v11341_v40  ;;  %v1053_v36 = vperm.slane %v16699_v3, 7 }
 0x3a5   :  { %v10250_v43 = vld [vmem:[%s19610_s1 + $0x1260] sm:$0xf0] }
 0x3a6   :  { %v12714_v45 = vld [vmem:[%s19610_s1 + $0x1624] sm:$0xf]  ;;  %v10253_v51 = vor.u32 %v12586_v19, %v10250_v43  ;;  %7255 = vmatpush.bf16.msrb.mxu3 %v11853_v47 }
 0x3a7   :  { %v10762_v48 = vld [vmem:[%s19610_s1 + $0x1660] sm:$0xf0] }
 0x3a8   :  { %v12842_v49 = vld [vmem:[%s19610_s1 + $0x1a24] sm:$0xf]  ;;  %v10765_v24 = vor.u32 %v12714_v45, %v10762_v48  ;;  %7217 = vmatpush.bf16.msrb.mxu0 %v10253_v51  ;;  %v6991_v48 = vpop.f32.mrf.mxu2  ;;  %v7004_v51 = vpop.f32.mrf.mxu3 }
 0x3a9   :  { %v11274_v16 = vld [vmem:[%s19610_s1 + $0x1a60] sm:$0xf0]  ;;  %v9744_v48 = vld [vmem:[%s19610_s1 + $0xe28] sm:$0xf] }
 0x3aa   :  { %v12970_v50 = vld [vmem:[%s19610_s1 + $0x1e24] sm:$0xf]  ;;  %v11277_v12 = vor.u32 %v12842_v49, %v11274_v16  ;;  %7230 = vmatpush.bf16.msrb.mxu1 %v10765_v24  ;;  %v8400_v24 = vld [vmem:[%s19610_s1 + $0x3a8] sm:$0xf] }
 0x3ab   :  { %v11786_v27 = vld [vmem:[%s19610_s1 + $0x1e60] sm:$0xf0] }
 0x3ac   :  { %v12570_v55 = vld [vmem:[%s19610_s1 + $0x11a4] sm:$0xf]  ;;  %v11789_v53 = vor.u32 %v12970_v50, %v11786_v27  ;;  %7243 = vmatpush.bf16.msrb.mxu2 %v11277_v12  ;;  %v12131_v12 = vld [vmem:[%s19610_s1 + $0x3e4] sm:$0xf0] }
 0x3ad   :  { %v10186_v56 = vld [vmem:[%s19610_s1 + $0x11e0] sm:$0xf0] }
 0x3ae   :  { %v12698_v25 = vld [vmem:[%s19610_s1 + $0x15a4] sm:$0xf]  ;;  %v10189_v1 = vor.u32 %v12570_v55, %v10186_v56  ;;  %7256 = vmatpush.bf16.msrb.mxu3 %v11789_v53  ;;  %v8912_v55 = vld [vmem:[%s19610_s1 + $0x7a8] sm:$0xf]  ;;  %v6964_v56 = vadd.f32 %v17029_v52, %v1053_v36 }
 0x3af   :  { %v10698_v31 = vld [vmem:[%s19610_s1 + $0x15e0] sm:$0xf0]  ;;  %v12259_v53 = vld [vmem:[%s19610_s1 + $0x7e4] sm:$0xf0] }
 0x3b0   :  { %v12826_v33 = vld [vmem:[%s19610_s1 + $0x19a4] sm:$0xf]  ;;  %v10701_v54 = vor.u32 %v12698_v25, %v10698_v31  ;;  %7218 = vmatpush.bf16.msrb.mxu0 %v10189_v1  ;;  %v9424_v31 = vld [vmem:[%s19610_s1 + $0xba8] sm:$0xf] }
 0x3b1   :  { %v11210_v62 = vld [vmem:[%s19610_s1 + $0x19e0] sm:$0xf0]  ;;  %v9936_v52 = vld [vmem:[%s19610_s1 + $0xfa8] sm:$0xf] }
 0x3b2   :  { %v12954_v63 = vld [vmem:[%s19610_s1 + $0x1da4] sm:$0xf]  ;;  %v11213_v39 = vor.u32 %v12826_v33, %v11210_v62  ;;  %7231 = vmatpush.bf16.msrb.mxu1 %v10701_v54  ;;  %v12387_v33 = vld [vmem:[%s19610_s1 + $0xbe4] sm:$0xf0]  ;;  %v8401_v54 = vor.u32 %v12131_v12, %v8400_v24 }
 0x3b3   :  { %v11722_v32 = vld [vmem:[%s19610_s1 + $0x1de0] sm:$0xf0]  ;;  %v8144_v24 = vld [vmem:[%s19610_s1 + $0x1a8] sm:$0xf] }
 0x3b4   :  { %v12554_v46 = vld [vmem:[%s19610_s1 + $0x1124] sm:$0xf]  ;;  %v11725_v58 = vor.u32 %v12954_v63, %v11722_v32  ;;  %7244 = vmatpush.bf16.msrb.mxu2 %v11213_v39  ;;  %v12515_v32 = vld [vmem:[%s19610_s1 + $0xfe4] sm:$0xf0]  ;;  %v8913_v39 = vor.u32 %v12259_v53, %v8912_v55 }
 0x3b5   :  { %v10122_v7 = vld [vmem:[%s19610_s1 + $0x1160] sm:$0xf0]  ;;  %v12067_v12 = vld [vmem:[%s19610_s1 + $0x1e4] sm:$0xf0] }
 0x3b6   :  { %v12682_v8 = vld [vmem:[%s19610_s1 + $0x1524] sm:$0xf]  ;;  %v10125_v5 = vor.u32 %v12554_v46, %v10122_v7  ;;  %7257 = vmatpush.bf16.msrb.mxu3 %v11725_v58  ;;  %v9425_v46 = vor.u32 %v12387_v33, %v9424_v31  ;;  %v6977_v7 = vadd.f32 %v17040_v57, %v6964_v56  ;;  %v12115_v58 = vld [vmem:[%s19610_s1 + $0x364] sm:$0xf0] }
 0x3b7   :  { %v10634_v61 = vld [vmem:[%s19610_s1 + $0x1560] sm:$0xf0]  ;;  %v9360_v57 = vld [vmem:[%s19610_s1 + $0xb28] sm:$0xf] }
 0x3b8   :  { %v12810_v13 = vld [vmem:[%s19610_s1 + $0x1924] sm:$0xf]  ;;  %v10637_v23 = vor.u32 %v12682_v8, %v10634_v61  ;;  %7219 = vmatpush.bf16.msrb.mxu0 %v10125_v5  ;;  %v8336_v8 = vld [vmem:[%s19610_s1 + $0x328] sm:$0xf] }
 0x3b9   :  { %v11146_v14 = vld [vmem:[%s19610_s1 + $0x1960] sm:$0xf0]  ;;  %v8848_v61 = vld [vmem:[%s19610_s1 + $0x728] sm:$0xf]  ;;  %v8337_v22 = vor.u32 %v12115_v58, %v8336_v8  ;;  %v7041_v58 = vpop.f32.mrf.mxu2 }
 0x3ba   :  { %v12938_v17 = vld [vmem:[%s19610_s1 + $0x1d24] sm:$0xf]  ;;  %v11149_v0 = vor.u32 %v12810_v13, %v11146_v14  ;;  %7232 = vmatpush.bf16.msrb.mxu1 %v10637_v23  ;;  %v9937_v13 = vor.u32 %v12515_v32, %v9936_v52  ;;  %v12243_v14 = vld [vmem:[%s19610_s1 + $0x764] sm:$0xf0] }
 0x3bb   :  { %v11658_v59 = vld [vmem:[%s19610_s1 + $0x1d60] sm:$0xf0]  ;;  %v12499_v5 = vld [vmem:[%s19610_s1 + $0xf64] sm:$0xf0]  ;;  %v8849_v23 = vor.u32 %v12243_v14, %v8848_v61 }
 0x3bc   :  { %v12538_v26 = vld [vmem:[%s19610_s1 + $0x10a4] sm:$0xf]  ;;  %v11661_v30 = vor.u32 %v12938_v17, %v11658_v59  ;;  %7245 = vmatpush.bf16.msrb.mxu2 %v11149_v0  ;;  %v12371_v17 = vld [vmem:[%s19610_s1 + $0xb64] sm:$0xf0] }
 0x3bd   :  { %v10058_v2 = vld [vmem:[%s19610_s1 + $0x10e0] sm:$0xf0]  ;;  %v9872_v59 = vld [vmem:[%s19610_s1 + $0xf28] sm:$0xf]  ;;  %v9361_v0 = vor.u32 %v12371_v17, %v9360_v57 }
 0x3be   :  { %v12666_v28 = vld [vmem:[%s19610_s1 + $0x14a4] sm:$0xf]  ;;  %v10061_v37 = vor.u32 %v12538_v26, %v10058_v2  ;;  %7258 = vmatpush.bf16.msrb.mxu3 %v11661_v30  ;;  %v6990_v26 = vadd.f32 %v17066_v60, %v6977_v7  ;;  %v8272_v2 = vld [vmem:[%s19610_s1 + $0x2a8] sm:$0xf]  ;;  %v9873_v30 = vor.u32 %v12499_v5, %v9872_v59  ;;  %v7054_v59 = vpop.f32.mrf.mxu3 }
 0x3bf   :  { %v10570_v9 = vld [vmem:[%s19610_s1 + $0x14e0] sm:$0xf0]  ;;  %v12227_v60 = vld [vmem:[%s19610_s1 + $0x6e4] sm:$0xf0] }
 0x3c0   :  { %v12794_v34 = vld [vmem:[%s19610_s1 + $0x18a4] sm:$0xf]  ;;  %v10573_v19 = vor.u32 %v12666_v28, %v10570_v9  ;;  %7220 = vmatpush.bf16.msrb.mxu0 %v10061_v37  ;;  %v12099_v28 = vld [vmem:[%s19610_s1 + $0x2e4] sm:$0xf0]  ;;  %v7003_v36 = vadd.f32 %v17077_v15, %v6990_v26  ;;  %v8785_v37 = vor.u32 %v12227_v60, %v8784_v29 }
 0x3c1   :  { %v11082_v10 = vld [vmem:[%s19610_s1 + $0x18e0] sm:$0xf0]  ;;  %v9296_v9 = vld [vmem:[%s19610_s1 + $0xaa8] sm:$0xf] }
 0x3c2   :  { %v12922_v11 = vld [vmem:[%s19610_s1 + $0x1ca4] sm:$0xf]  ;;  %v11085_v43 = vor.u32 %v12794_v34, %v11082_v10  ;;  %7233 = vmatpush.bf16.msrb.mxu1 %v10573_v19  ;;  %v12355_v34 = vld [vmem:[%s19610_s1 + $0xae4] sm:$0xf0] }
 0x3c3   :  { %v11594_v35 = vld [vmem:[%s19610_s1 + $0x1ce0] sm:$0xf0]  ;;  %v9808_v10 = vld [vmem:[%s19610_s1 + $0xea8] sm:$0xf] }
 0x3c4   :  { %v12522_v18 = vld [vmem:[%s19610_s1 + $0x1024] sm:$0xf]  ;;  %v11597_v49 = vor.u32 %v12922_v11, %v11594_v35  ;;  %7246 = vmatpush.bf16.msrb.mxu2 %v11085_v43  ;;  %v12483_v11 = vld [vmem:[%s19610_s1 + $0xee4] sm:$0xf0]  ;;  %v8273_v35 = vor.u32 %v12099_v28, %v8272_v2 }
 0x3c5   :  { %v9994_v40 = vld [vmem:[%s19610_s1 + $0x1060] sm:$0xf0]  ;;  %v12083_v19 = vld [vmem:[%s19610_s1 + $0x264] sm:$0xf0] }
 0x3c6   :  { %v12650_v45 = vld [vmem:[%s19610_s1 + $0x1424] sm:$0xf]  ;;  %v9997_v25 = vor.u32 %v12522_v18, %v9994_v40  ;;  %7259 = vmatpush.bf16.msrb.mxu3 %v11597_v49  ;;  %v9297_v18 = vor.u32 %v12355_v34, %v9296_v9  ;;  %v8208_v40 = vld [vmem:[%s19610_s1 + $0x228] sm:$0xf] }
 0x3c7   :  { %v10506_v3 = vld [vmem:[%s19610_s1 + $0x1460] sm:$0xf0]  ;;  %v8720_v43 = vld [vmem:[%s19610_s1 + $0x628] sm:$0xf] }
 0x3c8   :  { %v12778_v47 = vld [vmem:[%s19610_s1 + $0x1824] sm:$0xf]  ;;  %v10509_v62 = vor.u32 %v12650_v45, %v10506_v3  ;;  %7221 = vmatpush.bf16.msrb.mxu0 %v9997_v25  ;;  %v9809_v45 = vor.u32 %v12483_v11, %v9808_v10  ;;  %v12211_v15 = vld [vmem:[%s19610_s1 + $0x664] sm:$0xf0]  ;;  %v7028_v25 = vpop.f32.mrf.mxu1 }
 0x3c9   :  { %v11018_v16 = vld [vmem:[%s19610_s1 + $0x1860] sm:$0xf0]  ;;  %v9232_v3 = vld [vmem:[%s19610_s1 + $0xa28] sm:$0xf] }
 0x3ca   :  { %v12906_v50 = vld [vmem:[%s19610_s1 + $0x1c24] sm:$0xf]  ;;  %v11021_v63 = vor.u32 %v12778_v47, %v11018_v16  ;;  %7234 = vmatpush.bf16.msrb.mxu1 %v10509_v62  ;;  %v12339_v47 = vld [vmem:[%s19610_s1 + $0xa64] sm:$0xf0]  ;;  %v8209_v16 = vor.u32 %v12083_v19, %v8208_v40 }
 0x3cb   :  { %v11530_v27 = vld [vmem:[%s19610_s1 + $0x1c60] sm:$0xf0]  ;;  %7222 = vmatmul.bf16.vlgmr.msrb.gmra.mxu0 %v13513_v41  ;;  %v12467_v49 = vld [vmem:[%s19610_s1 + $0xe64] sm:$0xf0]  ;;  %v9233_v51 = vor.u32 %v12339_v47, %v9232_v3 }
 0x3cc   :  { %v11533_v1 = vor.u32 %v12906_v50, %v11530_v27  ;;  %7247 = vmatpush.bf16.msrb.mxu2 %v11021_v63  ;;  %7266 = vmatpush.bf16.msra.mxu0 %v8401_v54  ;;  %v7015_v50 = vpop.f32.mrf.mxu0  ;;  %v8721_v27 = vor.u32 %v12211_v15, %v8720_v43  ;;  %v8656_v55 = vld [vmem:[%s19610_s1 + $0x5a8] sm:$0xf]  ;;  %v9745_v53 = vor.u32 %v12467_v49, %v9744_v48  ;;  %v7043_v48 = vpop.f32.mrf.mxu2 }
 0x3cd   :  { %7235 = vmatmul.bf16.vlgmr.msrb.gmra.mxu1 %v13517_v44  ;;  %v7016_v56 = vadd.f32 %v7015_v50, %v7003_v36  ;;  %v12195_v31 = vld [vmem:[%s19610_s1 + $0x5e4] sm:$0xf0] }
 0x3ce   :  { %7260 = vmatpush.bf16.msrb.mxu3 %v11533_v1  ;;  %7279 = vmatpush.bf16.msra.mxu1 %v8913_v39  ;;  %v9168_v33 = vld [vmem:[%s19610_s1 + $0x9a8] sm:$0xf]  ;;  %v8145_v1 = vor.u32 %v12067_v12, %v8144_v24  ;;  %v8657_v54 = vor.u32 %v12195_v31, %v8656_v55 }
 0x3cf   :  { %7248 = vmatmul.bf16.vlgmr.msrb.gmra.mxu2 %v13505_v38  ;;  %v12323_v62 = vld [vmem:[%s19610_s1 + $0x9e4] sm:$0xf0]  ;;  %v7029_v32 = vadd.f32 %v7028_v25, %v7016_v56 }
 0x3d0   :  { %7292 = vmatpush.bf16.msra.mxu2 %v9425_v46  ;;  %7267 = vmatpush.bf16.msra.mxu0 %v8337_v22  ;;  %v9680_v63 = vld [vmem:[%s19610_s1 + $0xda8] sm:$0xf]  ;;  %v9169_v39 = vor.u32 %v12323_v62, %v9168_v33  ;;  %v7030_v34 = vpop.f32.mrf.mxu1 }
 0x3d1   :  { %7261 = vmatmul.bf16.vlgmr.msrb.gmra.mxu3 %v13515_v42  ;;  %v12451_v52 = vld [vmem:[%s19610_s1 + $0xde4] sm:$0xf0]  ;;  %v7042_v17 = vadd.f32 %v7041_v58, %v7029_v32 }
 0x3d2   :  { %7305 = vmatpush.bf16.msra.mxu3 %v9937_v13  ;;  %7280 = vmatpush.bf16.msra.mxu1 %v8849_v23  ;;  %v8080_v46 = vld [vmem:[%s19610_s1 + $0x128] sm:$0xf]  ;;  %v9681_v61 = vor.u32 %v12451_v52, %v9680_v63 }
 0x3d3   :  { %v12051_v7 = vld [vmem:[%s19610_s1 + $0x164] sm:$0xf0] }
 0x3d4   :  { %7293 = vmatpush.bf16.msra.mxu2 %v9361_v0  ;;  %7268 = vmatpush.bf16.msra.mxu0 %v8273_v35  ;;  %v8592_v8 = vld [vmem:[%s19610_s1 + $0x528] sm:$0xf]  ;;  %v8081_v23 = vor.u32 %v12051_v7, %v8080_v46  ;;  %v7055_v0 = vadd.f32 %v7054_v59, %v7042_v17  ;;  %v7017_v2 = vpop.f32.mrf.mxu0 }
 0x3d5   :  { %v12179_v13 = vld [vmem:[%s19610_s1 + $0x564] sm:$0xf0] }
 0x3d6   :  { %7306 = vmatpush.bf16.msra.mxu3 %v9873_v30  ;;  %7281 = vmatpush.bf16.msra.mxu1 %v8785_v37  ;;  %v9104_v14 = vld [vmem:[%s19610_s1 + $0x928] sm:$0xf]  ;;  %v8593_v28 = vor.u32 %v12179_v13, %v8592_v8  ;;  %7897 = vst [vmem:[%s19613_s3 + $0x38] sm:$0xff] %v7055_v0 }
 0x3d7   :  { %v12307_v57 = vld [vmem:[%s19610_s1 + $0x964] sm:$0xf0] }
 0x3d8   :  { %7294 = vmatpush.bf16.msra.mxu2 %v9297_v18  ;;  %7269 = vmatpush.bf16.msra.mxu0 %v8209_v16  ;;  %v9616_v5 = vld [vmem:[%s19610_s1 + $0xd28] sm:$0xf]  ;;  %v9105_v29 = vor.u32 %v12307_v57, %v9104_v14 }
 0x3d9   :  { %v12435_v22 = vld [vmem:[%s19610_s1 + $0xd64] sm:$0xf0] }
 0x3da   :  { %7307 = vmatpush.bf16.msra.mxu3 %v9809_v45  ;;  %7282 = vmatpush.bf16.msra.mxu1 %v8721_v27  ;;  %v8016_v26 = vld [vmem:[%s19610_s1 + $0xa8] sm:$0xf]  ;;  %v9617_v10 = vor.u32 %v12435_v22, %v9616_v5 }
 0x3db   :  { %v12035_v30 = vld [vmem:[%s19610_s1 + $0xe4] sm:$0xf0] }
 0x3dc   :  { %7295 = vmatpush.bf16.msra.mxu2 %v9233_v51  ;;  %7270 = vmatpush.bf16.msra.mxu0 %v8145_v1  ;;  %v8528_v60 = vld [vmem:[%s19610_s1 + $0x4a8] sm:$0xf]  ;;  %v8017_v18 = vor.u32 %v12035_v30, %v8016_v26  ;;  %v7056_v51 = vpop.f32.mrf.mxu3 }
 0x3dd   :  { %v12163_v9 = vld [vmem:[%s19610_s1 + $0x4e4] sm:$0xf0]  ;;  %v17448_v51 = vpop.f32.mrf.mxu1 }
 0x3de   :  { %7308 = vmatpush.bf16.msra.mxu3 %v9745_v53  ;;  %7283 = vmatpush.bf16.msra.mxu1 %v8657_v54  ;;  %v9040_v11 = vld [vmem:[%s19610_s1 + $0x8a8] sm:$0xf]  ;;  %v8529_v43 = vor.u32 %v12163_v9, %v8528_v60 }
 0x3df   :  { %v12291_v35 = vld [vmem:[%s19610_s1 + $0x8e4] sm:$0xf0] }
 0x3e0   :  { %7296 = vmatpush.bf16.msra.mxu2 %v9169_v39  ;;  %v9552_v36 = vld [vmem:[%s19610_s1 + $0xca8] sm:$0xf]  ;;  %7271 = vmatpush.bf16.msra.mxu0 %v8081_v23  ;;  %v9041_v45 = vor.u32 %v12291_v35, %v9040_v11 }
 0x3e1   :  { %v12419_v37 = vld [vmem:[%s19610_s1 + $0xce4] sm:$0xf0] }
 0x3e2   :  { %7309 = vmatpush.bf16.msra.mxu3 %v9681_v61  ;;  %v7952_v40 = vld [vmem:[%s19610_s1 + $0x28] sm:$0xf]  ;;  %7284 = vmatpush.bf16.msra.mxu1 %v8593_v28  ;;  %v9553_v49 = vor.u32 %v12419_v37, %v9552_v36 }
 0x3e3   :  { %v12019_v19 = vld [vmem:[%s19610_s1 + $0x64] sm:$0xf0] }
 0x3e4   :  { %7297 = vmatpush.bf16.msra.mxu2 %v9105_v29  ;;  %v8464_v15 = vld [vmem:[%s19610_s1 + $0x428] sm:$0xf]  ;;  %7272 = vmatpush.bf16.msra.mxu0 %v8017_v18  ;;  %v7953_v56 = vor.u32 %v12019_v19, %v7952_v40 }
 0x3e5   :  { %v12147_v3 = vld [vmem:[%s19610_s1 + $0x464] sm:$0xf0] }
 0x3e6   :  { %v8976_v47 = vld [vmem:[%s19610_s1 + $0x828] sm:$0xf]  ;;  %7310 = vmatpush.bf16.msra.mxu3 %v9617_v10  ;;  %7285 = vmatpush.bf16.msra.mxu1 %v8529_v43  ;;  %v8465_v33 = vor.u32 %v12147_v3, %v8464_v15 }
 0x3e7   :  { %v12275_v16 = vld [vmem:[%s19610_s1 + $0x864] sm:$0xf0] }
 0x3e8   :  { %v9488_v50 = vld [vmem:[%s19610_s1 + $0xc28] sm:$0xf]  ;;  %7298 = vmatpush.bf16.msra.mxu2 %v9041_v45  ;;  %v8977_v62 = vor.u32 %v12275_v16, %v8976_v47  ;;  %7273 = vmatpush.bf16.msra.mxu0 %v7953_v56  ;;  %v17437_v47 = vpop.f32.mrf.mxu0 }
 0x3e9   :  { %v12403_v27 = vld [vmem:[%s19610_s1 + $0xc64] sm:$0xf0] }
 0x3ea   :  { %v10448_v24 = vld [vmem:[%s19610_s1 + $0x13a8] sm:$0xf]  ;;  %7311 = vmatpush.bf16.msra.mxu3 %v9553_v49  ;;  %v9489_v32 = vor.u32 %v12403_v27, %v9488_v50  ;;  %7286 = vmatpush.bf16.msra.mxu1 %v8465_v33 }
 0x3eb   :  { %v12643_v12 = vld [vmem:[%s19610_s1 + $0x13e4] sm:$0xf0]  ;;  %7274 = vmatmul.bf16.vlgmr.msra.gmra.mxu0 %v13354_v20 }
 0x3ec   :  { %v10960_v55 = vld [vmem:[%s19610_s1 + $0x17a8] sm:$0xf]  ;;  %v10449_v1 = vor.u32 %v12643_v12, %v10448_v24  ;;  %7299 = vmatpush.bf16.msra.mxu2 %v8977_v62 }
 0x3ed   :  { %v12771_v25 = vld [vmem:[%s19610_s1 + $0x17e4] sm:$0xf0]  ;;  %7287 = vmatmul.bf16.vlgmr.msra.gmra.mxu1 %v13357_v21 }
 0x3ee   :  { %v11472_v53 = vld [vmem:[%s19610_s1 + $0x1ba8] sm:$0xf]  ;;  %v10961_v54 = vor.u32 %v12771_v25, %v10960_v55  ;;  %7312 = vmatpush.bf16.msra.mxu3 %v9489_v32  ;;  %7318 = vmatpush.bf16.msrb.mxu0 %v10449_v1  ;;  %v17474_v1 = vpop.f32.mrf.mxu2 }
 0x3ef   :  { %v12899_v31 = vld [vmem:[%s19610_s1 + $0x1be4] sm:$0xf0]  ;;  %7300 = vmatmul.bf16.vlgmr.msra.gmra.mxu2 %v13322_v4 }
 0x3f0   :  { %v11984_v63 = vld [vmem:[%s19610_s1 + $0x1fa8] sm:$0xf]  ;;  %v11473_v39 = vor.u32 %v12899_v31, %v11472_v53  ;;  %7331 = vmatpush.bf16.msrb.mxu1 %v10961_v54 }
 0x3f1   :  { %v13027_v52 = vld [vmem:[%s19610_s1 + $0x1fe4] sm:$0xf0]  ;;  %7313 = vmatmul.bf16.vlgmr.msra.gmra.mxu3 %v13327_v6 }
 0x3f2   :  { %v10384_v46 = vld [vmem:[%s19610_s1 + $0x1328] sm:$0xf]  ;;  %v11985_v58 = vor.u32 %v13027_v52, %v11984_v63  ;;  %7344 = vmatpush.bf16.msrb.mxu2 %v11473_v39 }
 0x3f3   :  { %v12627_v7 = vld [vmem:[%s19610_s1 + $0x1364] sm:$0xf0] }
 0x3f4   :  { %v10896_v8 = vld [vmem:[%s19610_s1 + $0x1728] sm:$0xf]  ;;  %v10385_v59 = vor.u32 %v12627_v7, %v10384_v46  ;;  %7357 = vmatpush.bf16.msrb.mxu3 %v11985_v58 }
 0x3f5   :  { %v12755_v61 = vld [vmem:[%s19610_s1 + $0x1764] sm:$0xf0] }
 0x3f6   :  { %v11408_v13 = vld [vmem:[%s19610_s1 + $0x1b28] sm:$0xf]  ;;  %v10897_v5 = vor.u32 %v12755_v61, %v10896_v8  ;;  %7319 = vmatpush.bf16.msrb.mxu0 %v10385_v59  ;;  %v17485_v8 = vpop.f32.mrf.mxu3 }
 0x3f7   :  { %v12883_v14 = vld [vmem:[%s19610_s1 + $0x1b64] sm:$0xf0] }
 0x3f8   :  { %v11920_v57 = vld [vmem:[%s19610_s1 + $0x1f28] sm:$0xf]  ;;  %v11409_v22 = vor.u32 %v12883_v14, %v11408_v13  ;;  %7332 = vmatpush.bf16.msrb.mxu1 %v10897_v5 }
 0x3f9   :  { %v13011_v17 = vld [vmem:[%s19610_s1 + $0x1f64] sm:$0xf0] }
 0x3fa   :  { %v10320_v23 = vld [vmem:[%s19610_s1 + $0x12a8] sm:$0xf]  ;;  %v11921_v2 = vor.u32 %v13011_v17, %v11920_v57  ;;  %7345 = vmatpush.bf16.msrb.mxu2 %v11409_v22  ;;  %v7069_v57 = vpop.f32.mrf.mxu0 }
 0x3fb   :  { %v12611_v0 = vld [vmem:[%s19610_s1 + $0x12e4] sm:$0xf0]  ;;  %v9874_v57 = vld [vmem:[%s19610_s1 + $0xf68] sm:$0xf0] }
 0x3fc   :  { %v10832_v26 = vld [vmem:[%s19610_s1 + $0x16a8] sm:$0xf]  ;;  %v10321_v34 = vor.u32 %v12611_v0, %v10320_v23  ;;  %7358 = vmatpush.bf16.msrb.mxu3 %v11921_v2  ;;  %v7082_v0 = vpop.f32.mrf.mxu1 }
 0x3fd   :  { %v12739_v28 = vld [vmem:[%s19610_s1 + $0x16e4] sm:$0xf0]  ;;  %v8274_v0 = vld [vmem:[%s19610_s1 + $0x2e8] sm:$0xf0] }
 0x3fe   :  { %v11344_v29 = vld [vmem:[%s19610_s1 + $0x1aa8] sm:$0xf]  ;;  %v10833_v10 = vor.u32 %v12739_v28, %v10832_v26  ;;  %7320 = vmatpush.bf16.msrb.mxu0 %v10321_v34 }
 0x3ff   :  { %v12867_v30 = vld [vmem:[%s19610_s1 + $0x1ae4] sm:$0xf0] }
 0x400   :  { %v11856_v60 = vld [vmem:[%s19610_s1 + $0x1ea8] sm:$0xf]  ;;  %v11345_v11 = vor.u32 %v12867_v30, %v11344_v29  ;;  %7333 = vmatpush.bf16.msrb.mxu1 %v10833_v10 }
 0x401   :  { %v12995_v9 = vld [vmem:[%s19610_s1 + $0x1ee4] sm:$0xf0] }
 0x402   :  { %v10256_v35 = vld [vmem:[%s19610_s1 + $0x1228] sm:$0xf]  ;;  %v11857_v18 = vor.u32 %v12995_v9, %v11856_v60  ;;  %7346 = vmatpush.bf16.msrb.mxu2 %v11345_v11 }
 0x403   :  { %v12595_v36 = vld [vmem:[%s19610_s1 + $0x1264] sm:$0xf0] }
 0x404   :  { %v10768_v37 = vld [vmem:[%s19610_s1 + $0x1628] sm:$0xf]  ;;  %v10257_v3 = vor.u32 %v12595_v36, %v10256_v35  ;;  %7359 = vmatpush.bf16.msrb.mxu3 %v11857_v18 }
 0x405   :  { %v12723_v40 = vld [vmem:[%s19610_s1 + $0x1664] sm:$0xf0] }
 0x406   :  { %v11280_v19 = vld [vmem:[%s19610_s1 + $0x1a28] sm:$0xf]  ;;  %v10769_v48 = vor.u32 %v12723_v40, %v10768_v37  ;;  %7321 = vmatpush.bf16.msrb.mxu0 %v10257_v3 }
 0x407   :  { %v12851_v43 = vld [vmem:[%s19610_s1 + $0x1a64] sm:$0xf0] }
 0x408   :  { %v11792_v45 = vld [vmem:[%s19610_s1 + $0x1e28] sm:$0xf]  ;;  %v11281_v49 = vor.u32 %v12851_v43, %v11280_v19  ;;  %7334 = vmatpush.bf16.msrb.mxu1 %v10769_v48  ;;  %v7095_v19 = vpop.f32.mrf.mxu2  ;;  %v7108_v48 = vpop.f32.mrf.mxu3 }
 0x409   :  { %v12979_v15 = vld [vmem:[%s19610_s1 + $0x1e64] sm:$0xf0]  ;;  %v9234_v19 = vld [vmem:[%s19610_s1 + $0xa68] sm:$0xf0] }
 0x40a   :  { %v10192_v16 = vld [vmem:[%s19610_s1 + $0x11a8] sm:$0xf]  ;;  %v11793_v24 = vor.u32 %v12979_v15, %v11792_v45  ;;  %7347 = vmatpush.bf16.msrb.mxu2 %v11281_v49  ;;  %v12123_v49 = vld [vmem:[%s19610_s1 + $0x3ac] sm:$0xf] }
 0x40b   :  { %v12579_v50 = vld [vmem:[%s19610_s1 + $0x11e4] sm:$0xf0] }
 0x40c   :  { %v10704_v27 = vld [vmem:[%s19610_s1 + $0x15a8] sm:$0xf]  ;;  %v10193_v31 = vor.u32 %v12579_v50, %v10192_v16  ;;  %7360 = vmatpush.bf16.msrb.mxu3 %v11793_v24  ;;  %v8402_v16 = vld [vmem:[%s19610_s1 + $0x3e8] sm:$0xf0] }
 0x40d   :  { %v12707_v12 = vld [vmem:[%s19610_s1 + $0x15e4] sm:$0xf0]  ;;  %v12251_v50 = vld [vmem:[%s19610_s1 + $0x7ac] sm:$0xf] }
 0x40e   :  { %v11216_v55 = vld [vmem:[%s19610_s1 + $0x19a8] sm:$0xf]  ;;  %v10705_v33 = vor.u32 %v12707_v12, %v10704_v27  ;;  %7322 = vmatpush.bf16.msrb.mxu0 %v10193_v31  ;;  %v8914_v12 = vld [vmem:[%s19610_s1 + $0x7e8] sm:$0xf0] }
 0x40f   :  { %v12835_v56 = vld [vmem:[%s19610_s1 + $0x19e4] sm:$0xf0]  ;;  %v9938_v31 = vld [vmem:[%s19610_s1 + $0xfe8] sm:$0xf0] }
 0x410   :  { %v11728_v25 = vld [vmem:[%s19610_s1 + $0x1da8] sm:$0xf]  ;;  %v11217_v62 = vor.u32 %v12835_v56, %v11216_v55  ;;  %7335 = vmatpush.bf16.msrb.mxu1 %v10705_v33  ;;  %v12379_v55 = vld [vmem:[%s19610_s1 + $0xbac] sm:$0xf] }
 0x411   :  { %v12963_v53 = vld [vmem:[%s19610_s1 + $0x1de4] sm:$0xf0]  ;;  %v9426_v56 = vld [vmem:[%s19610_s1 + $0xbe8] sm:$0xf0] }
 0x412   :  { %v10128_v63 = vld [vmem:[%s19610_s1 + $0x1128] sm:$0xf]  ;;  %v11729_v54 = vor.u32 %v12963_v53, %v11728_v25  ;;  %7348 = vmatpush.bf16.msrb.mxu2 %v11217_v62  ;;  %v8405_v62 = vor.u32 %v12123_v49, %v8402_v16  ;;  %v12059_v16 = vld [vmem:[%s19610_s1 + $0x1ac] sm:$0xf] }
 0x413   :  { %v12563_v52 = vld [vmem:[%s19610_s1 + $0x1164] sm:$0xf0] }
 0x414   :  { %v10640_v32 = vld [vmem:[%s19610_s1 + $0x1528] sm:$0xf]  ;;  %v10129_v13 = vor.u32 %v12563_v52, %v10128_v63  ;;  %7361 = vmatpush.bf16.msrb.mxu3 %v11729_v54  ;;  %v8917_v63 = vor.u32 %v12251_v50, %v8914_v12  ;;  %v9429_v52 = vor.u32 %v12379_v55, %v9426_v56  ;;  %v12107_v54 = vld [vmem:[%s19610_s1 + $0x32c] sm:$0xf]  ;;  %v7132_v12 = vpop.f32.mrf.mxu1 }
 0x415   :  { %v12691_v39 = vld [vmem:[%s19610_s1 + $0x1564] sm:$0xf0]  ;;  %v8146_v50 = vld [vmem:[%s19610_s1 + $0x1e8] sm:$0xf0] }
 0x416   :  { %v11152_v46 = vld [vmem:[%s19610_s1 + $0x1928] sm:$0xf]  ;;  %v10641_v17 = vor.u32 %v12691_v39, %v10640_v32  ;;  %7323 = vmatpush.bf16.msrb.mxu0 %v10129_v13  ;;  %v8338_v39 = vld [vmem:[%s19610_s1 + $0x368] sm:$0xf0] }
 0x417   :  { %v12819_v7 = vld [vmem:[%s19610_s1 + $0x1964] sm:$0xf0]  ;;  %v12491_v13 = vld [vmem:[%s19610_s1 + $0xf2c] sm:$0xf] }
 0x418   :  { %v11664_v58 = vld [vmem:[%s19610_s1 + $0x1d28] sm:$0xf]  ;;  %v11153_v59 = vor.u32 %v12819_v7, %v11152_v46  ;;  %7336 = vmatpush.bf16.msrb.mxu1 %v10641_v17  ;;  %v12235_v46 = vld [vmem:[%s19610_s1 + $0x72c] sm:$0xf]  ;;  %v8341_v17 = vor.u32 %v12107_v54, %v8338_v39 }
 0x419   :  { %v12947_v61 = vld [vmem:[%s19610_s1 + $0x1d64] sm:$0xf0]  ;;  %v8658_v56 = vld [vmem:[%s19610_s1 + $0x5e8] sm:$0xf0] }
 0x41a   :  { %v17496_v14 = vld [vmem:[%s19612_s2 + $0x8] sm:$0xff]  ;;  %v11665_v26 = vor.u32 %v12947_v61, %v11664_v58  ;;  %7349 = vmatpush.bf16.msrb.mxu2 %v11153_v59 }
 0x41b   :  { %v10064_v5 = vld [vmem:[%s19610_s1 + $0x10a8] sm:$0xf]  ;;  %v1054_v9 = vperm.slane %v17496_v14, 0  ;;  %v8850_v58 = vld [vmem:[%s19610_s1 + $0x768] sm:$0xf0] }
 0x41c   :  { %v12547_v22 = vld [vmem:[%s19610_s1 + $0x10e4] sm:$0xf0]  ;;  %7362 = vmatpush.bf16.msrb.mxu3 %v11665_v26  ;;  %v9362_v61 = vld [vmem:[%s19610_s1 + $0xb68] sm:$0xf0]  ;;  %v8853_v59 = vor.u32 %v12235_v46, %v8850_v58  ;;  %v7145_v46 = vpop.f32.mrf.mxu2 }
 0x41d   :  { %v10576_v23 = vld [vmem:[%s19610_s1 + $0x14a8] sm:$0xf]  ;;  %v10065_v34 = vor.u32 %v12547_v22, %v10064_v5  ;;  %v7068_v27 = vadd.f32 %v17437_v47, %v1054_v9  ;;  %v12507_v47 = vld [vmem:[%s19610_s1 + $0xfac] sm:$0xf] }
 0x41e   :  { %v12675_v2 = vld [vmem:[%s19610_s1 + $0x14e4] sm:$0xf0]  ;;  %v9941_v7 = vor.u32 %v12507_v47, %v9938_v31  ;;  %v12219_v26 = vld [vmem:[%s19610_s1 + $0x6ac] sm:$0xf] }
 0x41f   :  { %v11088_v28 = vld [vmem:[%s19610_s1 + $0x18a8] sm:$0xf]  ;;  %v10577_v35 = vor.u32 %v12675_v2, %v10576_v23  ;;  %7324 = vmatpush.bf16.msrb.mxu0 %v10065_v34  ;;  %v7081_v32 = vadd.f32 %v17448_v51, %v7068_v27  ;;  %v12363_v51 = vld [vmem:[%s19610_s1 + $0xb2c] sm:$0xf]  ;;  %v9877_v2 = vor.u32 %v12491_v13, %v9874_v57  ;;  %v7158_v57 = vpop.f32.mrf.mxu3 }
 0x420   :  { %v12803_v29 = vld [vmem:[%s19610_s1 + $0x18e4] sm:$0xf0]  ;;  %v9365_v5 = vor.u32 %v12363_v51, %v9362_v61  ;;  %v12091_v23 = vld [vmem:[%s19610_s1 + $0x2ac] sm:$0xf] }
 0x421   :  { %v11600_v30 = vld [vmem:[%s19610_s1 + $0x1ca8] sm:$0xf]  ;;  %v11089_v36 = vor.u32 %v12803_v29, %v11088_v28  ;;  %7337 = vmatpush.bf16.msrb.mxu1 %v10577_v35  ;;  %v7094_v22 = vadd.f32 %v17474_v1, %v7081_v32  ;;  %v8786_v1 = vld [vmem:[%s19610_s1 + $0x6e8] sm:$0xf0]  ;;  %v8277_v9 = vor.u32 %v12091_v23, %v8274_v0 }
 0x422   :  { %v12931_v60 = vld [vmem:[%s19610_s1 + $0x1ce4] sm:$0xf0]  ;;  %v12347_v28 = vld [vmem:[%s19610_s1 + $0xaac] sm:$0xf] }
 0x423   :  { %v10000_v10 = vld [vmem:[%s19610_s1 + $0x1028] sm:$0xf]  ;;  %v11601_v43 = vor.u32 %v12931_v60, %v11600_v30  ;;  %7350 = vmatpush.bf16.msrb.mxu2 %v11089_v36  ;;  %v9298_v29 = vld [vmem:[%s19610_s1 + $0xae8] sm:$0xf0]  ;;  %v7107_v34 = vadd.f32 %v17485_v8, %v7094_v22 }
 0x424   :  { %v12531_v11 = vld [vmem:[%s19610_s1 + $0x1064] sm:$0xf0]  ;;  %v12475_v30 = vld [vmem:[%s19610_s1 + $0xeac] sm:$0xf] }
 0x425   :  { %v10512_v37 = vld [vmem:[%s19610_s1 + $0x1428] sm:$0xf]  ;;  %v10001_v24 = vor.u32 %v12531_v11, %v10000_v10  ;;  %7363 = vmatpush.bf16.msrb.mxu3 %v11601_v43  ;;  %v9810_v60 = vld [vmem:[%s19610_s1 + $0xee8] sm:$0xf0]  ;;  %v8789_v10 = vor.u32 %v12219_v26, %v8786_v1  ;;  %v9301_v11 = vor.u32 %v12347_v28, %v9298_v29 }
 0x426   :  { %v12659_v18 = vld [vmem:[%s19610_s1 + $0x1464] sm:$0xf0]  ;;  %v12075_v35 = vld [vmem:[%s19610_s1 + $0x22c] sm:$0xf] }
 0x427   :  { %v11024_v40 = vld [vmem:[%s19610_s1 + $0x1828] sm:$0xf]  ;;  %v10513_v25 = vor.u32 %v12659_v18, %v10512_v37  ;;  %7325 = vmatpush.bf16.msrb.mxu0 %v10001_v24  ;;  %v8210_v36 = vld [vmem:[%s19610_s1 + $0x268] sm:$0xf0]  ;;  %v9813_v18 = vor.u32 %v12475_v30, %v9810_v60  ;;  %v7134_v30 = vpop.f32.mrf.mxu1 }
 0x428   :  { %v12787_v45 = vld [vmem:[%s19610_s1 + $0x1864] sm:$0xf0]  ;;  %v12203_v37 = vld [vmem:[%s19610_s1 + $0x62c] sm:$0xf] }
 0x429   :  { %v11536_v15 = vld [vmem:[%s19610_s1 + $0x1c28] sm:$0xf]  ;;  %v11025_v53 = vor.u32 %v12787_v45, %v11024_v40  ;;  %7338 = vmatpush.bf16.msrb.mxu1 %v10513_v25  ;;  %v8722_v8 = vld [vmem:[%s19610_s1 + $0x668] sm:$0xf0] }
 0x42a   :  { %v12915_v3 = vld [vmem:[%s19610_s1 + $0x1c64] sm:$0xf0]  ;;  %7326 = vmatmul.bf16.vlgmr.msrb.gmra.mxu0 %v13513_v41  ;;  %v12331_v40 = vld [vmem:[%s19610_s1 + $0xa2c] sm:$0xf]  ;;  %v8725_v48 = vor.u32 %v12203_v37, %v8722_v8 }
 0x42b   :  { %v11537_v33 = vor.u32 %v12915_v3, %v11536_v15  ;;  %7351 = vmatpush.bf16.msrb.mxu2 %v11025_v53  ;;  %7370 = vmatpush.bf16.msra.mxu0 %v8405_v62  ;;  %v12459_v43 = vld [vmem:[%s19610_s1 + $0xe2c] sm:$0xf]  ;;  %v8213_v15 = vor.u32 %v12075_v35, %v8210_v36  ;;  %v7119_v3 = vpop.f32.mrf.mxu0  ;;  %v9237_v49 = vor.u32 %v12331_v40, %v9234_v19 }
 0x42c   :  { %7339 = vmatmul.bf16.vlgmr.msrb.gmra.mxu1 %v13517_v44  ;;  %v9746_v45 = vld [vmem:[%s19610_s1 + $0xe68] sm:$0xf0]  ;;  %v7120_v24 = vadd.f32 %v7119_v3, %v7107_v34  ;;  %v8149_v62 = vor.u32 %v12059_v16, %v8146_v50  ;;  %v7160_v16 = vpop.f32.mrf.mxu3 }
 0x42d   :  { %7364 = vmatpush.bf16.msrb.mxu3 %v11537_v33  ;;  %7383 = vmatpush.bf16.msra.mxu1 %v8917_v63  ;;  %v12187_v27 = vld [vmem:[%s19610_s1 + $0x5ac] sm:$0xf]  ;;  %v9749_v55 = vor.u32 %v12459_v43, %v9746_v45  ;;  %v7147_v45 = vpop.f32.mrf.mxu2 }
 0x42e   :  { %7352 = vmatmul.bf16.vlgmr.msrb.gmra.mxu2 %v13505_v38  ;;  %v12315_v25 = vld [vmem:[%s19610_s1 + $0x9ac] sm:$0xf]  ;;  %v7133_v33 = vadd.f32 %v7132_v12, %v7120_v24  ;;  %v8661_v63 = vor.u32 %v12187_v27, %v8658_v56 }
 0x42f   :  { %7396 = vmatpush.bf16.msra.mxu2 %v9429_v52  ;;  %7371 = vmatpush.bf16.msra.mxu0 %v8341_v17  ;;  %v9170_v53 = vld [vmem:[%s19610_s1 + $0x9e8] sm:$0xf0] }
 0x430   :  { %7365 = vmatmul.bf16.vlgmr.msrb.gmra.mxu3 %v13515_v42  ;;  %v12443_v47 = vld [vmem:[%s19610_s1 + $0xdac] sm:$0xf]  ;;  %v9173_v52 = vor.u32 %v12315_v25, %v9170_v53  ;;  %v7146_v13 = vadd.f32 %v7145_v46, %v7133_v33 }
 0x431   :  { %7409 = vmatpush.bf16.msra.mxu3 %v9941_v7  ;;  %7384 = vmatpush.bf16.msra.mxu1 %v8853_v59  ;;  %v9682_v31 = vld [vmem:[%s19610_s1 + $0xde8] sm:$0xf0] }
 0x432   :  { %v12043_v32 = vld [vmem:[%s19610_s1 + $0x12c] sm:$0xf]  ;;  %v9685_v7 = vor.u32 %v12443_v47, %v9682_v31  ;;  %v7159_v22 = vadd.f32 %v7158_v57, %v7146_v13 }
 0x433   :  { %7397 = vmatpush.bf16.msra.mxu2 %v9365_v5  ;;  %7372 = vmatpush.bf16.msra.mxu0 %v8277_v9  ;;  %v8082_v54 = vld [vmem:[%s19610_s1 + $0x168] sm:$0xf0]  ;;  %v7121_v0 = vpop.f32.mrf.mxu0 }
 0x434   :  { %v12171_v39 = vld [vmem:[%s19610_s1 + $0x52c] sm:$0xf]  ;;  %v8085_v5 = vor.u32 %v12043_v32, %v8082_v54  ;;  %7898 = vst [vmem:[%s19613_s3 + $0x40] sm:$0xff] %v7159_v22 }
 0x435   :  { %7410 = vmatpush.bf16.msra.mxu3 %v9877_v2  ;;  %7385 = vmatpush.bf16.msra.mxu1 %v8789_v10  ;;  %v8594_v58 = vld [vmem:[%s19610_s1 + $0x568] sm:$0xf0] }
 0x436   :  { %v12299_v51 = vld [vmem:[%s19610_s1 + $0x92c] sm:$0xf]  ;;  %v8597_v26 = vor.u32 %v12171_v39, %v8594_v58 }
 0x437   :  { %7398 = vmatpush.bf16.msra.mxu2 %v9301_v11  ;;  %7373 = vmatpush.bf16.msra.mxu0 %v8213_v15  ;;  %v9106_v61 = vld [vmem:[%s19610_s1 + $0x968] sm:$0xf0] }
 0x438   :  { %v12427_v17 = vld [vmem:[%s19610_s1 + $0xd2c] sm:$0xf]  ;;  %v9109_v2 = vor.u32 %v12299_v51, %v9106_v61 }
 0x439   :  { %7411 = vmatpush.bf16.msra.mxu3 %v9813_v18  ;;  %7386 = vmatpush.bf16.msra.mxu1 %v8725_v48  ;;  %v9618_v59 = vld [vmem:[%s19610_s1 + $0xd68] sm:$0xf0] }
 0x43a   :  { %v12027_v23 = vld [vmem:[%s19610_s1 + $0xac] sm:$0xf]  ;;  %v9621_v60 = vor.u32 %v12427_v17, %v9618_v59 }
 0x43b   :  { %7399 = vmatpush.bf16.msra.mxu2 %v9237_v49  ;;  %7374 = vmatpush.bf16.msra.mxu0 %v8149_v62  ;;  %v8018_v1 = vld [vmem:[%s19610_s1 + $0xe8] sm:$0xf0]  ;;  %v17850_v45 = vpop.f32.mrf.mxu0 }
 0x43c   :  { %v12155_v28 = vld [vmem:[%s19610_s1 + $0x4ac] sm:$0xf]  ;;  %v8021_v35 = vor.u32 %v12027_v23, %v8018_v1 }
 0x43d   :  { %7412 = vmatpush.bf16.msra.mxu3 %v9749_v55  ;;  %7387 = vmatpush.bf16.msra.mxu1 %v8661_v63  ;;  %v8530_v29 = vld [vmem:[%s19610_s1 + $0x4e8] sm:$0xf0] }
 0x43e   :  { %v12283_v9 = vld [vmem:[%s19610_s1 + $0x8ac] sm:$0xf]  ;;  %v8533_v18 = vor.u32 %v12155_v28, %v8530_v29 }
 0x43f   :  { %7400 = vmatpush.bf16.msra.mxu2 %v9173_v52  ;;  %v9042_v34 = vld [vmem:[%s19610_s1 + $0x8e8] sm:$0xf0]  ;;  %7375 = vmatpush.bf16.msra.mxu0 %v8085_v5 }
 0x440   :  { %v12411_v10 = vld [vmem:[%s19610_s1 + $0xcac] sm:$0xf]  ;;  %v9045_v8 = vor.u32 %v12283_v9, %v9042_v34 }
 0x441   :  { %7413 = vmatpush.bf16.msra.mxu3 %v9685_v7  ;;  %v9554_v11 = vld [vmem:[%s19610_s1 + $0xce8] sm:$0xf0]  ;;  %7388 = vmatpush.bf16.msra.mxu1 %v8597_v26 }
 0x442   :  { %v12011_v36 = vld [vmem:[%s19610_s1 + $0x2c] sm:$0xf]  ;;  %v9557_v15 = vor.u32 %v12411_v10, %v9554_v11 }
 0x443   :  { %v7954_v37 = vld [vmem:[%s19610_s1 + $0x68] sm:$0xf0]  ;;  %7401 = vmatpush.bf16.msra.mxu2 %v9109_v2  ;;  %7376 = vmatpush.bf16.msra.mxu0 %v8021_v35 }
 0x444   :  { %v12139_v40 = vld [vmem:[%s19610_s1 + $0x42c] sm:$0xf]  ;;  %v7957_v12 = vor.u32 %v12011_v36, %v7954_v37 }
 0x445   :  { %v8466_v19 = vld [vmem:[%s19610_s1 + $0x468] sm:$0xf0]  ;;  %7414 = vmatpush.bf16.msra.mxu3 %v9621_v60  ;;  %7389 = vmatpush.bf16.msra.mxu1 %v8533_v18 }
 0x446   :  { %v12267_v43 = vld [vmem:[%s19610_s1 + $0x82c] sm:$0xf]  ;;  %v8469_v53 = vor.u32 %v12139_v40, %v8466_v19 }
 0x447   :  { %v8978_v3 = vld [vmem:[%s19610_s1 + $0x868] sm:$0xf0]  ;;  %7402 = vmatpush.bf16.msra.mxu2 %v9045_v8  ;;  %7377 = vmatpush.bf16.msra.mxu0 %v7957_v12 }
 0x448   :  { %v12395_v48 = vld [vmem:[%s19610_s1 + $0xc2c] sm:$0xf]  ;;  %v8981_v47 = vor.u32 %v12267_v43, %v8978_v3 }
 0x449   :  { %v9490_v49 = vld [vmem:[%s19610_s1 + $0xc68] sm:$0xf0]  ;;  %7415 = vmatpush.bf16.msra.mxu3 %v9557_v15  ;;  %7390 = vmatpush.bf16.msra.mxu1 %v8469_v53 }
 0x44a   :  { %v12635_v50 = vld [vmem:[%s19610_s1 + $0x13ac] sm:$0xf]  ;;  %v9493_v62 = vor.u32 %v12395_v48, %v9490_v49  ;;  %7378 = vmatmul.bf16.vlgmr.msra.gmra.mxu0 %v13354_v20 }
 0x44b   :  { %v10450_v27 = vld [vmem:[%s19610_s1 + $0x13e8] sm:$0xf0]  ;;  %7403 = vmatpush.bf16.msra.mxu2 %v8981_v47 }
 0x44c   :  { %v12763_v24 = vld [vmem:[%s19610_s1 + $0x17ac] sm:$0xf]  ;;  %v10453_v63 = vor.u32 %v12635_v50, %v10450_v27  ;;  %7391 = vmatmul.bf16.vlgmr.msra.gmra.mxu1 %v13357_v21  ;;  %v17861_v50 = vpop.f32.mrf.mxu1 }
 0x44d   :  { %v10962_v55 = vld [vmem:[%s19610_s1 + $0x17e8] sm:$0xf0]  ;;  %7416 = vmatpush.bf16.msra.mxu3 %v9493_v62 }
 0x44e   :  { %v12891_v56 = vld [vmem:[%s19610_s1 + $0x1bac] sm:$0xf]  ;;  %v10965_v52 = vor.u32 %v12763_v24, %v10962_v55  ;;  %7422 = vmatpush.bf16.msrb.mxu0 %v10453_v63  ;;  %7404 = vmatmul.bf16.vlgmr.msra.gmra.mxu2 %v13322_v4 }
 0x44f   :  { %v11474_v25 = vld [vmem:[%s19610_s1 + $0x1be8] sm:$0xf0] }
 0x450   :  { %v13019_v31 = vld [vmem:[%s19610_s1 + $0x1fac] sm:$0xf]  ;;  %v11477_v32 = vor.u32 %v12891_v56, %v11474_v25  ;;  %7435 = vmatpush.bf16.msrb.mxu1 %v10965_v52  ;;  %7417 = vmatmul.bf16.vlgmr.msra.gmra.mxu3 %v13327_v6  ;;  %v17887_v52 = vpop.f32.mrf.mxu2 }
 0x451   :  { %v11986_v33 = vld [vmem:[%s19610_s1 + $0x1fe8] sm:$0xf0] }
 0x452   :  { %v12619_v54 = vld [vmem:[%s19610_s1 + $0x132c] sm:$0xf]  ;;  %v11989_v7 = vor.u32 %v13019_v31, %v11986_v33  ;;  %7448 = vmatpush.bf16.msrb.mxu2 %v11477_v32 }
 0x453   :  { %v10386_v39 = vld [vmem:[%s19610_s1 + $0x1368] sm:$0xf0] }
 0x454   :  { %v12747_v46 = vld [vmem:[%s19610_s1 + $0x172c] sm:$0xf]  ;;  %v10389_v17 = vor.u32 %v12619_v54, %v10386_v39  ;;  %7461 = vmatpush.bf16.msrb.mxu3 %v11989_v7  ;;  %v17898_v7 = vpop.f32.mrf.mxu3 }
 0x455   :  { %v10898_v58 = vld [vmem:[%s19610_s1 + $0x1768] sm:$0xf0] }
 0x456   :  { %v12875_v51 = vld [vmem:[%s19610_s1 + $0x1b2c] sm:$0xf]  ;;  %v10901_v59 = vor.u32 %v12747_v46, %v10898_v58  ;;  %7423 = vmatpush.bf16.msrb.mxu0 %v10389_v17 }
 0x457   :  { %v11410_v61 = vld [vmem:[%s19610_s1 + $0x1b68] sm:$0xf0] }
 0x458   :  { %v13003_v13 = vld [vmem:[%s19610_s1 + $0x1f2c] sm:$0xf]  ;;  %v11413_v5 = vor.u32 %v12875_v51, %v11410_v61  ;;  %7436 = vmatpush.bf16.msrb.mxu1 %v10901_v59 }
 0x459   :  { %v11922_v57 = vld [vmem:[%s19610_s1 + $0x1f68] sm:$0xf0] }
 0x45a   :  { %v12603_v22 = vld [vmem:[%s19610_s1 + $0x12ac] sm:$0xf]  ;;  %v11925_v26 = vor.u32 %v13003_v13, %v11922_v57  ;;  %7449 = vmatpush.bf16.msrb.mxu2 %v11413_v5  ;;  %v7173_v13 = vpop.f32.mrf.mxu0 }
 0x45b   :  { %v10322_v23 = vld [vmem:[%s19610_s1 + $0x12e8] sm:$0xf0] }
 0x45c   :  { %v12731_v0 = vld [vmem:[%s19610_s1 + $0x16ac] sm:$0xf]  ;;  %v10325_v60 = vor.u32 %v12603_v22, %v10322_v23  ;;  %7462 = vmatpush.bf16.msrb.mxu3 %v11925_v26  ;;  %v7186_v23 = vpop.f32.mrf.mxu1 }
 0x45d   :  { %v10834_v2 = vld [vmem:[%s19610_s1 + $0x16e8] sm:$0xf0]  ;;  %v8792_v23 = vld [vmem:[%s19610_s1 + $0x6b0] sm:$0xf] }
 0x45e   :  { %v12859_v1 = vld [vmem:[%s19610_s1 + $0x1aac] sm:$0xf]  ;;  %v10837_v9 = vor.u32 %v12731_v0, %v10834_v2  ;;  %7424 = vmatpush.bf16.msrb.mxu0 %v10325_v60 }
 0x45f   :  { %v11346_v28 = vld [vmem:[%s19610_s1 + $0x1ae8] sm:$0xf0] }
 0x460   :  { %v12987_v29 = vld [vmem:[%s19610_s1 + $0x1eac] sm:$0xf]  ;;  %v11349_v34 = vor.u32 %v12859_v1, %v11346_v28  ;;  %7437 = vmatpush.bf16.msrb.mxu1 %v10837_v9 }
 0x461   :  { %v11858_v30 = vld [vmem:[%s19610_s1 + $0x1ee8] sm:$0xf0] }
 0x462   :  { %v12587_v10 = vld [vmem:[%s19610_s1 + $0x122c] sm:$0xf]  ;;  %v11861_v36 = vor.u32 %v12987_v29, %v11858_v30  ;;  %7450 = vmatpush.bf16.msrb.mxu2 %v11349_v34  ;;  %v1055_v30 = vperm.slane %v17496_v14, 1 }
 0x463   :  { %v10258_v11 = vld [vmem:[%s19610_s1 + $0x1268] sm:$0xf0] }
 0x464   :  { %v12715_v35 = vld [vmem:[%s19610_s1 + $0x162c] sm:$0xf]  ;;  %v10261_v43 = vor.u32 %v12587_v10, %v10258_v11  ;;  %7463 = vmatpush.bf16.msrb.mxu3 %v11861_v36 }
 0x465   :  { %v10770_v37 = vld [vmem:[%s19610_s1 + $0x1668] sm:$0xf0] }
 0x466   :  { %v12843_v18 = vld [vmem:[%s19610_s1 + $0x1a2c] sm:$0xf]  ;;  %v10773_v15 = vor.u32 %v12715_v35, %v10770_v37  ;;  %7425 = vmatpush.bf16.msrb.mxu0 %v10261_v43  ;;  %v7199_v37 = vpop.f32.mrf.mxu2  ;;  %v7212_v43 = vpop.f32.mrf.mxu3 }
 0x467   :  { %v11282_v8 = vld [vmem:[%s19610_s1 + $0x1a68] sm:$0xf0]  ;;  %v9752_v37 = vld [vmem:[%s19610_s1 + $0xe30] sm:$0xf] }
 0x468   :  { %v12971_v40 = vld [vmem:[%s19610_s1 + $0x1e2c] sm:$0xf]  ;;  %v11285_v3 = vor.u32 %v12843_v18, %v11282_v8  ;;  %7438 = vmatpush.bf16.msrb.mxu1 %v10773_v15  ;;  %v8408_v15 = vld [vmem:[%s19610_s1 + $0x3b0] sm:$0xf] }
 0x469   :  { %v11794_v19 = vld [vmem:[%s19610_s1 + $0x1e68] sm:$0xf0] }
 0x46a   :  { %v12571_v48 = vld [vmem:[%s19610_s1 + $0x11ac] sm:$0xf]  ;;  %v11797_v27 = vor.u32 %v12971_v40, %v11794_v19  ;;  %7451 = vmatpush.bf16.msrb.mxu2 %v11285_v3  ;;  %v12132_v3 = vld [vmem:[%s19610_s1 + $0x3ec] sm:$0xf0] }
 0x46b   :  { %v10194_v49 = vld [vmem:[%s19610_s1 + $0x11e8] sm:$0xf0] }
 0x46c   :  { %v12699_v16 = vld [vmem:[%s19610_s1 + $0x15ac] sm:$0xf]  ;;  %v10197_v53 = vor.u32 %v12571_v48, %v10194_v49  ;;  %7464 = vmatpush.bf16.msrb.mxu3 %v11797_v27  ;;  %v8920_v48 = vld [vmem:[%s19610_s1 + $0x7b0] sm:$0xf]  ;;  %v7172_v49 = vadd.f32 %v17850_v45, %v1055_v30 }
 0x46d   :  { %v10706_v24 = vld [vmem:[%s19610_s1 + $0x15e8] sm:$0xf0]  ;;  %v12260_v27 = vld [vmem:[%s19610_s1 + $0x7ec] sm:$0xf0] }
 0x46e   :  { %v12827_v12 = vld [vmem:[%s19610_s1 + $0x19ac] sm:$0xf]  ;;  %v10709_v47 = vor.u32 %v12699_v16, %v10706_v24  ;;  %7426 = vmatpush.bf16.msrb.mxu0 %v10197_v53  ;;  %v9432_v24 = vld [vmem:[%s19610_s1 + $0xbb0] sm:$0xf] }
 0x46f   :  { %v11218_v55 = vld [vmem:[%s19610_s1 + $0x19e8] sm:$0xf0]  ;;  %v9944_v45 = vld [vmem:[%s19610_s1 + $0xfb0] sm:$0xf] }
 0x470   :  { %v12955_v56 = vld [vmem:[%s19610_s1 + $0x1dac] sm:$0xf]  ;;  %v11221_v31 = vor.u32 %v12827_v12, %v11218_v55  ;;  %7439 = vmatpush.bf16.msrb.mxu1 %v10709_v47  ;;  %v12388_v12 = vld [vmem:[%s19610_s1 + $0xbec] sm:$0xf0]  ;;  %v8409_v47 = vor.u32 %v12132_v3, %v8408_v15 }
 0x471   :  { %v11730_v25 = vld [vmem:[%s19610_s1 + $0x1de8] sm:$0xf0]  ;;  %v8152_v15 = vld [vmem:[%s19610_s1 + $0x1b0] sm:$0xf] }
 0x472   :  { %v12555_v33 = vld [vmem:[%s19610_s1 + $0x112c] sm:$0xf]  ;;  %v11733_v32 = vor.u32 %v12955_v56, %v11730_v25  ;;  %7452 = vmatpush.bf16.msrb.mxu2 %v11221_v31  ;;  %v12516_v25 = vld [vmem:[%s19610_s1 + $0xfec] sm:$0xf0]  ;;  %v8921_v31 = vor.u32 %v12260_v27, %v8920_v48 }
 0x473   :  { %v10130_v62 = vld [vmem:[%s19610_s1 + $0x1168] sm:$0xf0]  ;;  %v12068_v3 = vld [vmem:[%s19610_s1 + $0x1ec] sm:$0xf0] }
 0x474   :  { %v12683_v63 = vld [vmem:[%s19610_s1 + $0x152c] sm:$0xf]  ;;  %v10133_v61 = vor.u32 %v12555_v33, %v10130_v62  ;;  %7465 = vmatpush.bf16.msrb.mxu3 %v11733_v32  ;;  %v9433_v33 = vor.u32 %v12388_v12, %v9432_v24  ;;  %v7185_v62 = vadd.f32 %v17861_v50, %v7172_v49  ;;  %v12116_v32 = vld [vmem:[%s19610_s1 + $0x36c] sm:$0xf0] }
 0x475   :  { %v10642_v54 = vld [vmem:[%s19610_s1 + $0x1568] sm:$0xf0]  ;;  %v9368_v50 = vld [vmem:[%s19610_s1 + $0xb30] sm:$0xf] }
 0x476   :  { %v12811_v39 = vld [vmem:[%s19610_s1 + $0x192c] sm:$0xf]  ;;  %v10645_v57 = vor.u32 %v12683_v63, %v10642_v54  ;;  %7427 = vmatpush.bf16.msrb.mxu0 %v10133_v61  ;;  %v8344_v63 = vld [vmem:[%s19610_s1 + $0x330] sm:$0xf] }
 0x477   :  { %v11154_v46 = vld [vmem:[%s19610_s1 + $0x1968] sm:$0xf0]  ;;  %v8856_v54 = vld [vmem:[%s19610_s1 + $0x730] sm:$0xf]  ;;  %v8345_v13 = vor.u32 %v12116_v32, %v8344_v63  ;;  %v7249_v32 = vpop.f32.mrf.mxu2 }
 0x478   :  { %v12939_v58 = vld [vmem:[%s19610_s1 + $0x1d2c] sm:$0xf]  ;;  %v11157_v17 = vor.u32 %v12811_v39, %v11154_v46  ;;  %7440 = vmatpush.bf16.msrb.mxu1 %v10645_v57  ;;  %v9945_v39 = vor.u32 %v12516_v25, %v9944_v45  ;;  %v12244_v46 = vld [vmem:[%s19610_s1 + $0x76c] sm:$0xf0] }
 0x479   :  { %v11666_v51 = vld [vmem:[%s19610_s1 + $0x1d68] sm:$0xf0]  ;;  %v12500_v61 = vld [vmem:[%s19610_s1 + $0xf6c] sm:$0xf0]  ;;  %v8857_v57 = vor.u32 %v12244_v46, %v8856_v54 }
 0x47a   :  { %v12539_v59 = vld [vmem:[%s19610_s1 + $0x10ac] sm:$0xf]  ;;  %v11669_v0 = vor.u32 %v12939_v58, %v11666_v51  ;;  %7453 = vmatpush.bf16.msrb.mxu2 %v11157_v17  ;;  %v12372_v58 = vld [vmem:[%s19610_s1 + $0xb6c] sm:$0xf0] }
 0x47b   :  { %v10066_v5 = vld [vmem:[%s19610_s1 + $0x10e8] sm:$0xf0]  ;;  %v9880_v51 = vld [vmem:[%s19610_s1 + $0xf30] sm:$0xf]  ;;  %v9369_v17 = vor.u32 %v12372_v58, %v9368_v50 }
 0x47c   :  { %v12667_v22 = vld [vmem:[%s19610_s1 + $0x14ac] sm:$0xf]  ;;  %v10069_v60 = vor.u32 %v12539_v59, %v10066_v5  ;;  %7466 = vmatpush.bf16.msrb.mxu3 %v11669_v0  ;;  %v7198_v59 = vadd.f32 %v17887_v52, %v7185_v62  ;;  %v8280_v5 = vld [vmem:[%s19610_s1 + $0x2b0] sm:$0xf]  ;;  %v9881_v0 = vor.u32 %v12500_v61, %v9880_v51  ;;  %v7262_v51 = vpop.f32.mrf.mxu3 }
 0x47d   :  { %v10578_v26 = vld [vmem:[%s19610_s1 + $0x14e8] sm:$0xf0]  ;;  %v12228_v52 = vld [vmem:[%s19610_s1 + $0x6ec] sm:$0xf0] }
 0x47e   :  { %v12795_v2 = vld [vmem:[%s19610_s1 + $0x18ac] sm:$0xf]  ;;  %v10581_v10 = vor.u32 %v12667_v22, %v10578_v26  ;;  %7428 = vmatpush.bf16.msrb.mxu0 %v10069_v60  ;;  %v12100_v22 = vld [vmem:[%s19610_s1 + $0x2ec] sm:$0xf0]  ;;  %v7211_v30 = vadd.f32 %v17898_v7, %v7198_v59  ;;  %v8793_v60 = vor.u32 %v12228_v52, %v8792_v23 }
 0x47f   :  { %v11090_v1 = vld [vmem:[%s19610_s1 + $0x18e8] sm:$0xf0]  ;;  %v9304_v26 = vld [vmem:[%s19610_s1 + $0xab0] sm:$0xf] }
 0x480   :  { %v12923_v28 = vld [vmem:[%s19610_s1 + $0x1cac] sm:$0xf]  ;;  %v11093_v11 = vor.u32 %v12795_v2, %v11090_v1  ;;  %7441 = vmatpush.bf16.msrb.mxu1 %v10581_v10  ;;  %v12356_v2 = vld [vmem:[%s19610_s1 + $0xaec] sm:$0xf0] }
 0x481   :  { %v11602_v29 = vld [vmem:[%s19610_s1 + $0x1ce8] sm:$0xf0]  ;;  %v9816_v1 = vld [vmem:[%s19610_s1 + $0xeb0] sm:$0xf] }
 0x482   :  { %v12523_v9 = vld [vmem:[%s19610_s1 + $0x102c] sm:$0xf]  ;;  %v11605_v18 = vor.u32 %v12923_v28, %v11602_v29  ;;  %7454 = vmatpush.bf16.msrb.mxu2 %v11093_v11  ;;  %v12484_v28 = vld [vmem:[%s19610_s1 + $0xeec] sm:$0xf0]  ;;  %v8281_v29 = vor.u32 %v12100_v22, %v8280_v5 }
 0x483   :  { %v10002_v34 = vld [vmem:[%s19610_s1 + $0x1068] sm:$0xf0]  ;;  %v12084_v10 = vld [vmem:[%s19610_s1 + $0x26c] sm:$0xf0] }
 0x484   :  { %v12651_v35 = vld [vmem:[%s19610_s1 + $0x142c] sm:$0xf]  ;;  %v10005_v16 = vor.u32 %v12523_v9, %v10002_v34  ;;  %7467 = vmatpush.bf16.msrb.mxu3 %v11605_v18  ;;  %v9305_v9 = vor.u32 %v12356_v2, %v9304_v26  ;;  %v8216_v34 = vld [vmem:[%s19610_s1 + $0x230] sm:$0xf] }
 0x485   :  { %v10514_v14 = vld [vmem:[%s19610_s1 + $0x1468] sm:$0xf0]  ;;  %v8728_v11 = vld [vmem:[%s19610_s1 + $0x630] sm:$0xf] }
 0x486   :  { %v12779_v36 = vld [vmem:[%s19610_s1 + $0x182c] sm:$0xf]  ;;  %v10517_v55 = vor.u32 %v12651_v35, %v10514_v14  ;;  %7429 = vmatpush.bf16.msrb.mxu0 %v10005_v16  ;;  %v9817_v35 = vor.u32 %v12484_v28, %v9816_v1  ;;  %v12212_v7 = vld [vmem:[%s19610_s1 + $0x66c] sm:$0xf0]  ;;  %v7236_v16 = vpop.f32.mrf.mxu1 }
 0x487   :  { %v11026_v8 = vld [vmem:[%s19610_s1 + $0x1868] sm:$0xf0]  ;;  %v9240_v14 = vld [vmem:[%s19610_s1 + $0xa30] sm:$0xf] }
 0x488   :  { %v12907_v40 = vld [vmem:[%s19610_s1 + $0x1c2c] sm:$0xf]  ;;  %v11029_v56 = vor.u32 %v12779_v36, %v11026_v8  ;;  %7442 = vmatpush.bf16.msrb.mxu1 %v10517_v55  ;;  %v12340_v36 = vld [vmem:[%s19610_s1 + $0xa6c] sm:$0xf0]  ;;  %v8217_v8 = vor.u32 %v12084_v10, %v8216_v34 }
 0x489   :  { %v11538_v19 = vld [vmem:[%s19610_s1 + $0x1c68] sm:$0xf0]  ;;  %7430 = vmatmul.bf16.vlgmr.msrb.gmra.mxu0 %v13513_v41  ;;  %v12468_v18 = vld [vmem:[%s19610_s1 + $0xe6c] sm:$0xf0]  ;;  %v9241_v43 = vor.u32 %v12340_v36, %v9240_v14 }
 0x48a   :  { %v11541_v53 = vor.u32 %v12907_v40, %v11538_v19  ;;  %7455 = vmatpush.bf16.msrb.mxu2 %v11029_v56  ;;  %7474 = vmatpush.bf16.msra.mxu0 %v8409_v47  ;;  %v7223_v40 = vpop.f32.mrf.mxu0  ;;  %v8729_v19 = vor.u32 %v12212_v7, %v8728_v11  ;;  %v8664_v48 = vld [vmem:[%s19610_s1 + $0x5b0] sm:$0xf]  ;;  %v9753_v27 = vor.u32 %v12468_v18, %v9752_v37  ;;  %v7251_v37 = vpop.f32.mrf.mxu2 }
 0x48b   :  { %7443 = vmatmul.bf16.vlgmr.msrb.gmra.mxu1 %v13517_v44  ;;  %v7224_v49 = vadd.f32 %v7223_v40, %v7211_v30  ;;  %v12196_v24 = vld [vmem:[%s19610_s1 + $0x5ec] sm:$0xf0] }
 0x48c   :  { %7468 = vmatpush.bf16.msrb.mxu3 %v11541_v53  ;;  %7487 = vmatpush.bf16.msra.mxu1 %v8921_v31  ;;  %v9176_v12 = vld [vmem:[%s19610_s1 + $0x9b0] sm:$0xf]  ;;  %v8153_v53 = vor.u32 %v12068_v3, %v8152_v15  ;;  %v8665_v47 = vor.u32 %v12196_v24, %v8664_v48 }
 0x48d   :  { %7456 = vmatmul.bf16.vlgmr.msrb.gmra.mxu2 %v13505_v38  ;;  %v12324_v55 = vld [vmem:[%s19610_s1 + $0x9ec] sm:$0xf0]  ;;  %v7237_v25 = vadd.f32 %v7236_v16, %v7224_v49 }
 0x48e   :  { %7500 = vmatpush.bf16.msra.mxu2 %v9433_v33  ;;  %7475 = vmatpush.bf16.msra.mxu0 %v8345_v13  ;;  %v9688_v56 = vld [vmem:[%s19610_s1 + $0xdb0] sm:$0xf]  ;;  %v9177_v31 = vor.u32 %v12324_v55, %v9176_v12  ;;  %v7238_v2 = vpop.f32.mrf.mxu1 }
 0x48f   :  { %7469 = vmatmul.bf16.vlgmr.msrb.gmra.mxu3 %v13515_v42  ;;  %v12452_v45 = vld [vmem:[%s19610_s1 + $0xdec] sm:$0xf0]  ;;  %v7250_v58 = vadd.f32 %v7249_v32, %v7237_v25 }
 0x490   :  { %7513 = vmatpush.bf16.msra.mxu3 %v9945_v39  ;;  %7488 = vmatpush.bf16.msra.mxu1 %v8857_v57  ;;  %v8088_v33 = vld [vmem:[%s19610_s1 + $0x130] sm:$0xf]  ;;  %v9689_v54 = vor.u32 %v12452_v45, %v9688_v56 }
 0x491   :  { %v12052_v62 = vld [vmem:[%s19610_s1 + $0x16c] sm:$0xf0] }
 0x492   :  { %7501 = vmatpush.bf16.msra.mxu2 %v9369_v17  ;;  %7476 = vmatpush.bf16.msra.mxu0 %v8281_v29  ;;  %v8600_v63 = vld [vmem:[%s19610_s1 + $0x530] sm:$0xf]  ;;  %v8089_v57 = vor.u32 %v12052_v62, %v8088_v33  ;;  %v7263_v17 = vadd.f32 %v7262_v51, %v7250_v58  ;;  %v7225_v5 = vpop.f32.mrf.mxu0 }
 0x493   :  { %v12180_v39 = vld [vmem:[%s19610_s1 + $0x56c] sm:$0xf0] }
 0x494   :  { %7514 = vmatpush.bf16.msra.mxu3 %v9881_v0  ;;  %7489 = vmatpush.bf16.msra.mxu1 %v8793_v60  ;;  %v9112_v46 = vld [vmem:[%s19610_s1 + $0x930] sm:$0xf]  ;;  %v8601_v22 = vor.u32 %v12180_v39, %v8600_v63  ;;  %7899 = vst [vmem:[%s19613_s3 + $0x48] sm:$0xff] %v7263_v17 }
 0x495   :  { %v12308_v50 = vld [vmem:[%s19610_s1 + $0x96c] sm:$0xf0] }
 0x496   :  { %7502 = vmatpush.bf16.msra.mxu2 %v9305_v9  ;;  %7477 = vmatpush.bf16.msra.mxu0 %v8217_v8  ;;  %v9624_v61 = vld [vmem:[%s19610_s1 + $0xd30] sm:$0xf]  ;;  %v9113_v23 = vor.u32 %v12308_v50, %v9112_v46 }
 0x497   :  { %v12436_v13 = vld [vmem:[%s19610_s1 + $0xd6c] sm:$0xf0] }
 0x498   :  { %7515 = vmatpush.bf16.msra.mxu3 %v9817_v35  ;;  %7490 = vmatpush.bf16.msra.mxu1 %v8729_v19  ;;  %v8024_v59 = vld [vmem:[%s19610_s1 + $0xb0] sm:$0xf]  ;;  %v9625_v1 = vor.u32 %v12436_v13, %v9624_v61 }
 0x499   :  { %v12036_v0 = vld [vmem:[%s19610_s1 + $0xec] sm:$0xf0] }
 0x49a   :  { %7503 = vmatpush.bf16.msra.mxu2 %v9241_v43  ;;  %7478 = vmatpush.bf16.msra.mxu0 %v8153_v53  ;;  %v8536_v52 = vld [vmem:[%s19610_s1 + $0x4b0] sm:$0xf]  ;;  %v8025_v9 = vor.u32 %v12036_v0, %v8024_v59  ;;  %v7264_v43 = vpop.f32.mrf.mxu3 }
 0x49b   :  { %v12164_v26 = vld [vmem:[%s19610_s1 + $0x4ec] sm:$0xf0]  ;;  %v18269_v43 = vpop.f32.mrf.mxu1 }
 0x49c   :  { %7516 = vmatpush.bf16.msra.mxu3 %v9753_v27  ;;  %7491 = vmatpush.bf16.msra.mxu1 %v8665_v47  ;;  %v9048_v28 = vld [vmem:[%s19610_s1 + $0x8b0] sm:$0xf]  ;;  %v8537_v11 = vor.u32 %v12164_v26, %v8536_v52 }
 0x49d   :  { %v12292_v29 = vld [vmem:[%s19610_s1 + $0x8ec] sm:$0xf0] }
 0x49e   :  { %7504 = vmatpush.bf16.msra.mxu2 %v9177_v31  ;;  %v9560_v30 = vld [vmem:[%s19610_s1 + $0xcb0] sm:$0xf]  ;;  %7479 = vmatpush.bf16.msra.mxu0 %v8089_v57  ;;  %v9049_v35 = vor.u32 %v12292_v29, %v9048_v28 }
 0x49f   :  { %v12420_v60 = vld [vmem:[%s19610_s1 + $0xcec] sm:$0xf0] }
 0x4a0   :  { %7517 = vmatpush.bf16.msra.mxu3 %v9689_v54  ;;  %v7960_v34 = vld [vmem:[%s19610_s1 + $0x30] sm:$0xf]  ;;  %7492 = vmatpush.bf16.msra.mxu1 %v8601_v22  ;;  %v9561_v18 = vor.u32 %v12420_v60, %v9560_v30 }
 0x4a1   :  { %v12020_v10 = vld [vmem:[%s19610_s1 + $0x6c] sm:$0xf0] }
 0x4a2   :  { %7505 = vmatpush.bf16.msra.mxu2 %v9113_v23  ;;  %v8472_v7 = vld [vmem:[%s19610_s1 + $0x430] sm:$0xf]  ;;  %7480 = vmatpush.bf16.msra.mxu0 %v8025_v9  ;;  %v7961_v49 = vor.u32 %v12020_v10, %v7960_v34 }
 0x4a3   :  { %v12148_v14 = vld [vmem:[%s19610_s1 + $0x46c] sm:$0xf0] }
 0x4a4   :  { %v8984_v36 = vld [vmem:[%s19610_s1 + $0x830] sm:$0xf]  ;;  %7518 = vmatpush.bf16.msra.mxu3 %v9625_v1  ;;  %7493 = vmatpush.bf16.msra.mxu1 %v8537_v11  ;;  %v8473_v12 = vor.u32 %v12148_v14, %v8472_v7 }
 0x4a5   :  { %v12276_v8 = vld [vmem:[%s19610_s1 + $0x86c] sm:$0xf0] }
 0x4a6   :  { %v9496_v40 = vld [vmem:[%s19610_s1 + $0xc30] sm:$0xf]  ;;  %7506 = vmatpush.bf16.msra.mxu2 %v9049_v35  ;;  %v8985_v55 = vor.u32 %v12276_v8, %v8984_v36  ;;  %7481 = vmatpush.bf16.msra.mxu0 %v7961_v49  ;;  %v18258_v36 = vpop.f32.mrf.mxu0 }
 0x4a7   :  { %v12404_v19 = vld [vmem:[%s19610_s1 + $0xc6c] sm:$0xf0] }
 0x4a8   :  { %v10456_v15 = vld [vmem:[%s19610_s1 + $0x13b0] sm:$0xf]  ;;  %7519 = vmatpush.bf16.msra.mxu3 %v9561_v18  ;;  %v9497_v25 = vor.u32 %v12404_v19, %v9496_v40  ;;  %7494 = vmatpush.bf16.msra.mxu1 %v8473_v12 }
 0x4a9   :  { %v12644_v3 = vld [vmem:[%s19610_s1 + $0x13ec] sm:$0xf0]  ;;  %7482 = vmatmul.bf16.vlgmr.msra.gmra.mxu0 %v13354_v20 }
 0x4aa   :  { %v10968_v48 = vld [vmem:[%s19610_s1 + $0x17b0] sm:$0xf]  ;;  %v10457_v53 = vor.u32 %v12644_v3, %v10456_v15  ;;  %7507 = vmatpush.bf16.msra.mxu2 %v8985_v55 }
 0x4ab   :  { %v12772_v16 = vld [vmem:[%s19610_s1 + $0x17ec] sm:$0xf0]  ;;  %7495 = vmatmul.bf16.vlgmr.msra.gmra.mxu1 %v13357_v21 }
 0x4ac   :  { %v11480_v27 = vld [vmem:[%s19610_s1 + $0x1bb0] sm:$0xf]  ;;  %v10969_v47 = vor.u32 %v12772_v16, %v10968_v48  ;;  %7520 = vmatpush.bf16.msra.mxu3 %v9497_v25  ;;  %7526 = vmatpush.bf16.msrb.mxu0 %v10457_v53  ;;  %v18295_v53 = vpop.f32.mrf.mxu2 }
 0x4ad   :  { %v12900_v24 = vld [vmem:[%s19610_s1 + $0x1bec] sm:$0xf0]  ;;  %7508 = vmatmul.bf16.vlgmr.msra.gmra.mxu2 %v13322_v4 }
 0x4ae   :  { %v11992_v56 = vld [vmem:[%s19610_s1 + $0x1fb0] sm:$0xf]  ;;  %v11481_v31 = vor.u32 %v12900_v24, %v11480_v27  ;;  %7539 = vmatpush.bf16.msrb.mxu1 %v10969_v47 }
 0x4af   :  { %v13028_v45 = vld [vmem:[%s19610_s1 + $0x1fec] sm:$0xf0]  ;;  %7521 = vmatmul.bf16.vlgmr.msra.gmra.mxu3 %v13327_v6 }
 0x4b0   :  { %v10392_v33 = vld [vmem:[%s19610_s1 + $0x1330] sm:$0xf]  ;;  %v11993_v32 = vor.u32 %v13028_v45, %v11992_v56  ;;  %7552 = vmatpush.bf16.msrb.mxu2 %v11481_v31 }
 0x4b1   :  { %v12628_v62 = vld [vmem:[%s19610_s1 + $0x136c] sm:$0xf0] }
 0x4b2   :  { %v10904_v63 = vld [vmem:[%s19610_s1 + $0x1730] sm:$0xf]  ;;  %v10393_v51 = vor.u32 %v12628_v62, %v10392_v33  ;;  %7565 = vmatpush.bf16.msrb.mxu3 %v11993_v32 }
 0x4b3   :  { %v12756_v54 = vld [vmem:[%s19610_s1 + $0x176c] sm:$0xf0] }
 0x4b4   :  { %v11416_v39 = vld [vmem:[%s19610_s1 + $0x1b30] sm:$0xf]  ;;  %v10905_v61 = vor.u32 %v12756_v54, %v10904_v63  ;;  %7527 = vmatpush.bf16.msrb.mxu0 %v10393_v51  ;;  %v18306_v63 = vpop.f32.mrf.mxu3 }
 0x4b5   :  { %v12884_v46 = vld [vmem:[%s19610_s1 + $0x1b6c] sm:$0xf0] }
 0x4b6   :  { %v11928_v50 = vld [vmem:[%s19610_s1 + $0x1f30] sm:$0xf]  ;;  %v11417_v13 = vor.u32 %v12884_v46, %v11416_v39  ;;  %7540 = vmatpush.bf16.msrb.mxu1 %v10905_v61  ;;  %v7277_v46 = vpop.f32.mrf.mxu0 }
 0x4b7   :  { %v13012_v58 = vld [vmem:[%s19610_s1 + $0x1f6c] sm:$0xf0]  ;;  %v9882_v46 = vld [vmem:[%s19610_s1 + $0xf70] sm:$0xf0] }
 0x4b8   :  { %v10328_v57 = vld [vmem:[%s19610_s1 + $0x12b0] sm:$0xf]  ;;  %v11929_v5 = vor.u32 %v13012_v58, %v11928_v50  ;;  %7553 = vmatpush.bf16.msrb.mxu2 %v11417_v13 }
 0x4b9   :  { %v12612_v17 = vld [vmem:[%s19610_s1 + $0x12ec] sm:$0xf0] }
 0x4ba   :  { %v10840_v59 = vld [vmem:[%s19610_s1 + $0x16b0] sm:$0xf]  ;;  %v10329_v2 = vor.u32 %v12612_v17, %v10328_v57  ;;  %7566 = vmatpush.bf16.msrb.mxu3 %v11929_v5  ;;  %v7290_v57 = vpop.f32.mrf.mxu1 }
 0x4bb   :  { %v12740_v22 = vld [vmem:[%s19610_s1 + $0x16ec] sm:$0xf0]  ;;  %v8282_v57 = vld [vmem:[%s19610_s1 + $0x2f0] sm:$0xf0] }
 0x4bc   :  { %v11352_v23 = vld [vmem:[%s19610_s1 + $0x1ab0] sm:$0xf]  ;;  %v10841_v1 = vor.u32 %v12740_v22, %v10840_v59  ;;  %7528 = vmatpush.bf16.msrb.mxu0 %v10329_v2 }
 0x4bd   :  { %v12868_v0 = vld [vmem:[%s19610_s1 + $0x1aec] sm:$0xf0] }
 0x4be   :  { %v11864_v52 = vld [vmem:[%s19610_s1 + $0x1eb0] sm:$0xf]  ;;  %v11353_v28 = vor.u32 %v12868_v0, %v11352_v23  ;;  %7541 = vmatpush.bf16.msrb.mxu1 %v10841_v1 }
 0x4bf   :  { %v12996_v26 = vld [vmem:[%s19610_s1 + $0x1eec] sm:$0xf0] }
 0x4c0   :  { %v10264_v29 = vld [vmem:[%s19610_s1 + $0x1230] sm:$0xf]  ;;  %v11865_v9 = vor.u32 %v12996_v26, %v11864_v52  ;;  %7554 = vmatpush.bf16.msrb.mxu2 %v11353_v28  ;;  %v18341_v52 = vld [vmem:[%s19612_s2 + $0x8] sm:$0xff] }
 0x4c1   :  { %v12596_v30 = vld [vmem:[%s19610_s1 + $0x126c] sm:$0xf0]  ;;  %v1056_v26 = vperm.slane %v18341_v52, 2 }
 0x4c2   :  { %v10776_v60 = vld [vmem:[%s19610_s1 + $0x1630] sm:$0xf]  ;;  %v10265_v14 = vor.u32 %v12596_v30, %v10264_v29  ;;  %7567 = vmatpush.bf16.msrb.mxu3 %v11865_v9 }
 0x4c3   :  { %v12724_v34 = vld [vmem:[%s19610_s1 + $0x166c] sm:$0xf0] }
 0x4c4   :  { %v11288_v10 = vld [vmem:[%s19610_s1 + $0x1a30] sm:$0xf]  ;;  %v10777_v37 = vor.u32 %v12724_v34, %v10776_v60  ;;  %7529 = vmatpush.bf16.msrb.mxu0 %v10265_v14 }
 0x4c5   :  { %v12852_v11 = vld [vmem:[%s19610_s1 + $0x1a6c] sm:$0xf0] }
 0x4c6   :  { %v11800_v35 = vld [vmem:[%s19610_s1 + $0x1e30] sm:$0xf]  ;;  %v11289_v18 = vor.u32 %v12852_v11, %v11288_v10  ;;  %7542 = vmatpush.bf16.msrb.mxu1 %v10777_v37  ;;  %v7303_v10 = vpop.f32.mrf.mxu2  ;;  %v7316_v37 = vpop.f32.mrf.mxu3 }
 0x4c7   :  { %v12980_v7 = vld [vmem:[%s19610_s1 + $0x1e6c] sm:$0xf0]  ;;  %v9242_v10 = vld [vmem:[%s19610_s1 + $0xa70] sm:$0xf0] }
 0x4c8   :  { %v10200_v8 = vld [vmem:[%s19610_s1 + $0x11b0] sm:$0xf]  ;;  %v11801_v15 = vor.u32 %v12980_v7, %v11800_v35  ;;  %7555 = vmatpush.bf16.msrb.mxu2 %v11289_v18  ;;  %v12124_v18 = vld [vmem:[%s19610_s1 + $0x3b4] sm:$0xf] }
 0x4c9   :  { %v12580_v40 = vld [vmem:[%s19610_s1 + $0x11ec] sm:$0xf0] }
 0x4ca   :  { %v10712_v19 = vld [vmem:[%s19610_s1 + $0x15b0] sm:$0xf]  ;;  %v10201_v24 = vor.u32 %v12580_v40, %v10200_v8  ;;  %7568 = vmatpush.bf16.msrb.mxu3 %v11801_v15  ;;  %v8410_v8 = vld [vmem:[%s19610_s1 + $0x3f0] sm:$0xf0] }
 0x4cb   :  { %v12708_v3 = vld [vmem:[%s19610_s1 + $0x15ec] sm:$0xf0]  ;;  %v12252_v40 = vld [vmem:[%s19610_s1 + $0x7b4] sm:$0xf] }
 0x4cc   :  { %v11224_v48 = vld [vmem:[%s19610_s1 + $0x19b0] sm:$0xf]  ;;  %v10713_v12 = vor.u32 %v12708_v3, %v10712_v19  ;;  %7530 = vmatpush.bf16.msrb.mxu0 %v10201_v24  ;;  %v7276_v19 = vadd.f32 %v18258_v36, %v1056_v26  ;;  %v8922_v3 = vld [vmem:[%s19610_s1 + $0x7f0] sm:$0xf0] }
 0x4cd   :  { %v12836_v49 = vld [vmem:[%s19610_s1 + $0x19ec] sm:$0xf0]  ;;  %v12508_v36 = vld [vmem:[%s19610_s1 + $0xfb4] sm:$0xf] }
 0x4ce   :  { %v11736_v16 = vld [vmem:[%s19610_s1 + $0x1db0] sm:$0xf]  ;;  %v11225_v55 = vor.u32 %v12836_v49, %v11224_v48  ;;  %7543 = vmatpush.bf16.msrb.mxu1 %v10713_v12  ;;  %v12380_v48 = vld [vmem:[%s19610_s1 + $0xbb4] sm:$0xf] }
 0x4cf   :  { %v12964_v27 = vld [vmem:[%s19610_s1 + $0x1dec] sm:$0xf0]  ;;  %v9434_v49 = vld [vmem:[%s19610_s1 + $0xbf0] sm:$0xf0] }
 0x4d0   :  { %v10136_v56 = vld [vmem:[%s19610_s1 + $0x1130] sm:$0xf]  ;;  %v11737_v47 = vor.u32 %v12964_v27, %v11736_v16  ;;  %7556 = vmatpush.bf16.msrb.mxu2 %v11225_v55  ;;  %v9946_v24 = vld [vmem:[%s19610_s1 + $0xff0] sm:$0xf0]  ;;  %v8413_v55 = vor.u32 %v12124_v18, %v8410_v8 }
 0x4d1   :  { %v12564_v45 = vld [vmem:[%s19610_s1 + $0x116c] sm:$0xf0]  ;;  %v12060_v8 = vld [vmem:[%s19610_s1 + $0x1b4] sm:$0xf] }
 0x4d2   :  { %v10648_v25 = vld [vmem:[%s19610_s1 + $0x1530] sm:$0xf]  ;;  %v10137_v39 = vor.u32 %v12564_v45, %v10136_v56  ;;  %7569 = vmatpush.bf16.msrb.mxu3 %v11737_v47  ;;  %v8925_v56 = vor.u32 %v12252_v40, %v8922_v3  ;;  %v9437_v45 = vor.u32 %v12380_v48, %v9434_v49  ;;  %v12108_v47 = vld [vmem:[%s19610_s1 + $0x334] sm:$0xf]  ;;  %v7340_v3 = vpop.f32.mrf.mxu1 }
 0x4d3   :  { %v12692_v31 = vld [vmem:[%s19610_s1 + $0x156c] sm:$0xf0]  ;;  %v8154_v40 = vld [vmem:[%s19610_s1 + $0x1f0] sm:$0xf0] }
 0x4d4   :  { %v11160_v33 = vld [vmem:[%s19610_s1 + $0x1930] sm:$0xf]  ;;  %v10649_v50 = vor.u32 %v12692_v31, %v10648_v25  ;;  %7531 = vmatpush.bf16.msrb.mxu0 %v10137_v39  ;;  %v7289_v25 = vadd.f32 %v18269_v43, %v7276_v19  ;;  %v8346_v31 = vld [vmem:[%s19610_s1 + $0x370] sm:$0xf0] }
 0x4d5   :  { %v12820_v62 = vld [vmem:[%s19610_s1 + $0x196c] sm:$0xf0]  ;;  %v12364_v43 = vld [vmem:[%s19610_s1 + $0xb34] sm:$0xf] }
 0x4d6   :  { %v11672_v32 = vld [vmem:[%s19610_s1 + $0x1d30] sm:$0xf]  ;;  %v11161_v58 = vor.u32 %v12820_v62, %v11160_v33  ;;  %7544 = vmatpush.bf16.msrb.mxu1 %v10649_v50  ;;  %v12236_v33 = vld [vmem:[%s19610_s1 + $0x734] sm:$0xf]  ;;  %v9949_v62 = vor.u32 %v12508_v36, %v9946_v24  ;;  %v8349_v50 = vor.u32 %v12108_v47, %v8346_v31 }
 0x4d7   :  { %v12948_v54 = vld [vmem:[%s19610_s1 + $0x1d6c] sm:$0xf0]  ;;  %v12492_v39 = vld [vmem:[%s19610_s1 + $0xf34] sm:$0xf] }
 0x4d8   :  { %v10072_v51 = vld [vmem:[%s19610_s1 + $0x10b0] sm:$0xf]  ;;  %v11673_v17 = vor.u32 %v12948_v54, %v11672_v32  ;;  %7557 = vmatpush.bf16.msrb.mxu2 %v11161_v58  ;;  %v8858_v32 = vld [vmem:[%s19610_s1 + $0x770] sm:$0xf0] }
 0x4d9   :  { %v12548_v61 = vld [vmem:[%s19610_s1 + $0x10ec] sm:$0xf0]  ;;  %v9370_v54 = vld [vmem:[%s19610_s1 + $0xb70] sm:$0xf0]  ;;  %v8861_v58 = vor.u32 %v12236_v33, %v8858_v32  ;;  %v7353_v33 = vpop.f32.mrf.mxu2 }
 0x4da   :  { %v10584_v13 = vld [vmem:[%s19610_s1 + $0x14b0] sm:$0xf]  ;;  %v10073_v2 = vor.u32 %v12548_v61, %v10072_v51  ;;  %7570 = vmatpush.bf16.msrb.mxu3 %v11673_v17  ;;  %v9373_v51 = vor.u32 %v12364_v43, %v9370_v54  ;;  %v7302_v61 = vadd.f32 %v18295_v53, %v7289_v25  ;;  %v12220_v17 = vld [vmem:[%s19610_s1 + $0x6b4] sm:$0xf] }
 0x4db   :  { %v12676_v59 = vld [vmem:[%s19610_s1 + $0x14ec] sm:$0xf0]  ;;  %v8794_v53 = vld [vmem:[%s19610_s1 + $0x6f0] sm:$0xf0] }
 0x4dc   :  { %v11096_v5 = vld [vmem:[%s19610_s1 + $0x18b0] sm:$0xf]  ;;  %v10585_v29 = vor.u32 %v12676_v59, %v10584_v13  ;;  %7532 = vmatpush.bf16.msrb.mxu0 %v10073_v2  ;;  %v12092_v13 = vld [vmem:[%s19610_s1 + $0x2b4] sm:$0xf]  ;;  %v9885_v59 = vor.u32 %v12492_v39, %v9882_v46  ;;  %v7315_v2 = vadd.f32 %v18306_v63, %v7302_v61  ;;  %v7366_v46 = vpop.f32.mrf.mxu3 }
 0x4dd   :  { %v12804_v22 = vld [vmem:[%s19610_s1 + $0x18ec] sm:$0xf0]  ;;  %v8285_v26 = vor.u32 %v12092_v13, %v8282_v57  ;;  %v8730_v63 = vld [vmem:[%s19610_s1 + $0x670] sm:$0xf0] }
 0x4de   :  { %v11608_v23 = vld [vmem:[%s19610_s1 + $0x1cb0] sm:$0xf]  ;;  %v11097_v30 = vor.u32 %v12804_v22, %v11096_v5  ;;  %7545 = vmatpush.bf16.msrb.mxu1 %v10585_v29  ;;  %v12348_v5 = vld [vmem:[%s19610_s1 + $0xab4] sm:$0xf] }
 0x4df   :  { %v12932_v0 = vld [vmem:[%s19610_s1 + $0x1cec] sm:$0xf0]  ;;  %v9306_v22 = vld [vmem:[%s19610_s1 + $0xaf0] sm:$0xf0] }
 0x4e0   :  { %v10008_v1 = vld [vmem:[%s19610_s1 + $0x1030] sm:$0xf]  ;;  %v11609_v11 = vor.u32 %v12932_v0, %v11608_v23  ;;  %7558 = vmatpush.bf16.msrb.mxu2 %v11097_v30  ;;  %v12476_v23 = vld [vmem:[%s19610_s1 + $0xeb4] sm:$0xf] }
 0x4e1   :  { %v12532_v28 = vld [vmem:[%s19610_s1 + $0x106c] sm:$0xf0]  ;;  %v9818_v0 = vld [vmem:[%s19610_s1 + $0xef0] sm:$0xf0] }
 0x4e2   :  { %v10520_v60 = vld [vmem:[%s19610_s1 + $0x1430] sm:$0xf]  ;;  %v10009_v15 = vor.u32 %v12532_v28, %v10008_v1  ;;  %7571 = vmatpush.bf16.msrb.mxu3 %v11609_v11  ;;  %v8797_v1 = vor.u32 %v12220_v17, %v8794_v53  ;;  %v9309_v28 = vor.u32 %v12348_v5, %v9306_v22  ;;  %v12076_v29 = vld [vmem:[%s19610_s1 + $0x234] sm:$0xf] }
 0x4e3   :  { %v12660_v9 = vld [vmem:[%s19610_s1 + $0x146c] sm:$0xf0]  ;;  %v8218_v30 = vld [vmem:[%s19610_s1 + $0x270] sm:$0xf0] }
 0x4e4   :  { %v11032_v34 = vld [vmem:[%s19610_s1 + $0x1830] sm:$0xf]  ;;  %v10521_v16 = vor.u32 %v12660_v9, %v10520_v60  ;;  %7533 = vmatpush.bf16.msrb.mxu0 %v10009_v15  ;;  %v12204_v60 = vld [vmem:[%s19610_s1 + $0x634] sm:$0xf]  ;;  %v9821_v9 = vor.u32 %v12476_v23, %v9818_v0  ;;  %v7342_v23 = vpop.f32.mrf.mxu1 }
 0x4e5   :  { %v12788_v35 = vld [vmem:[%s19610_s1 + $0x186c] sm:$0xf0]  ;;  %v12460_v11 = vld [vmem:[%s19610_s1 + $0xe34] sm:$0xf]  ;;  %v8733_v37 = vor.u32 %v12204_v60, %v8730_v63 }
 0x4e6   :  { %v11544_v7 = vld [vmem:[%s19610_s1 + $0x1c30] sm:$0xf]  ;;  %v11033_v27 = vor.u32 %v12788_v35, %v11032_v34  ;;  %7546 = vmatpush.bf16.msrb.mxu1 %v10521_v16  ;;  %v12332_v34 = vld [vmem:[%s19610_s1 + $0xa34] sm:$0xf] }
 0x4e7   :  { %v12916_v14 = vld [vmem:[%s19610_s1 + $0x1c6c] sm:$0xf0]  ;;  %7534 = vmatmul.bf16.vlgmr.msrb.gmra.mxu0 %v13513_v41  ;;  %v9754_v35 = vld [vmem:[%s19610_s1 + $0xe70] sm:$0xf0]  ;;  %v9245_v18 = vor.u32 %v12332_v34, %v9242_v10 }
 0x4e8   :  { %v11545_v12 = vor.u32 %v12916_v14, %v11544_v7  ;;  %7559 = vmatpush.bf16.msrb.mxu2 %v11033_v27  ;;  %7578 = vmatpush.bf16.msra.mxu0 %v8413_v55  ;;  %v8221_v7 = vor.u32 %v12076_v29, %v8218_v30  ;;  %v7327_v14 = vpop.f32.mrf.mxu0  ;;  %v12188_v19 = vld [vmem:[%s19610_s1 + $0x5b4] sm:$0xf]  ;;  %v9757_v48 = vor.u32 %v12460_v11, %v9754_v35  ;;  %v7355_v35 = vpop.f32.mrf.mxu2 }
 0x4e9   :  { %7547 = vmatmul.bf16.vlgmr.msrb.gmra.mxu1 %v13517_v44  ;;  %v7328_v15 = vadd.f32 %v7327_v14, %v7315_v2  ;;  %v8666_v49 = vld [vmem:[%s19610_s1 + $0x5f0] sm:$0xf0]  ;;  %v8157_v55 = vor.u32 %v12060_v8, %v8154_v40  ;;  %v7368_v8 = vpop.f32.mrf.mxu3 }
 0x4ea   :  { %7572 = vmatpush.bf16.msrb.mxu3 %v11545_v12  ;;  %7591 = vmatpush.bf16.msra.mxu1 %v8925_v56  ;;  %v12316_v16 = vld [vmem:[%s19610_s1 + $0x9b4] sm:$0xf]  ;;  %v8669_v56 = vor.u32 %v12188_v19, %v8666_v49 }
 0x4eb   :  { %7560 = vmatmul.bf16.vlgmr.msrb.gmra.mxu2 %v13505_v38  ;;  %v9178_v27 = vld [vmem:[%s19610_s1 + $0x9f0] sm:$0xf0]  ;;  %v7341_v12 = vadd.f32 %v7340_v3, %v7328_v15 }
 0x4ec   :  { %7604 = vmatpush.bf16.msra.mxu2 %v9437_v45  ;;  %7579 = vmatpush.bf16.msra.mxu0 %v8349_v50  ;;  %v12444_v36 = vld [vmem:[%s19610_s1 + $0xdb4] sm:$0xf]  ;;  %v9181_v45 = vor.u32 %v12316_v16, %v9178_v27 }
 0x4ed   :  { %7573 = vmatmul.bf16.vlgmr.msrb.gmra.mxu3 %v13515_v42  ;;  %v9690_v24 = vld [vmem:[%s19610_s1 + $0xdf0] sm:$0xf0]  ;;  %v7354_v39 = vadd.f32 %v7353_v33, %v7341_v12 }
 0x4ee   :  { %7617 = vmatpush.bf16.msra.mxu3 %v9949_v62  ;;  %7592 = vmatpush.bf16.msra.mxu1 %v8861_v58  ;;  %v12044_v25 = vld [vmem:[%s19610_s1 + $0x134] sm:$0xf]  ;;  %v9693_v62 = vor.u32 %v12444_v36, %v9690_v24 }
 0x4ef   :  { %v8090_v47 = vld [vmem:[%s19610_s1 + $0x170] sm:$0xf0]  ;;  %v7367_v61 = vadd.f32 %v7366_v46, %v7354_v39 }
 0x4f0   :  { %7605 = vmatpush.bf16.msra.mxu2 %v9373_v51  ;;  %7580 = vmatpush.bf16.msra.mxu0 %v8285_v26  ;;  %v12172_v31 = vld [vmem:[%s19610_s1 + $0x534] sm:$0xf]  ;;  %v8093_v51 = vor.u32 %v12044_v25, %v8090_v47  ;;  %v7329_v57 = vpop.f32.mrf.mxu0 }
 0x4f1   :  { %v8602_v32 = vld [vmem:[%s19610_s1 + $0x570] sm:$0xf0]  ;;  %7900 = vst [vmem:[%s19613_s3 + $0x50] sm:$0xff] %v7367_v61 }
 0x4f2   :  { %7618 = vmatpush.bf16.msra.mxu3 %v9885_v59  ;;  %7593 = vmatpush.bf16.msra.mxu1 %v8797_v1  ;;  %v12300_v43 = vld [vmem:[%s19610_s1 + $0x934] sm:$0xf]  ;;  %v8605_v17 = vor.u32 %v12172_v31, %v8602_v32 }
 0x4f3   :  { %v9114_v54 = vld [vmem:[%s19610_s1 + $0x970] sm:$0xf0] }
 0x4f4   :  { %7606 = vmatpush.bf16.msra.mxu2 %v9309_v28  ;;  %7581 = vmatpush.bf16.msra.mxu0 %v8221_v7  ;;  %v12428_v50 = vld [vmem:[%s19610_s1 + $0xd34] sm:$0xf]  ;;  %v9117_v59 = vor.u32 %v12300_v43, %v9114_v54 }
 0x4f5   :  { %v9626_v58 = vld [vmem:[%s19610_s1 + $0xd70] sm:$0xf0] }
 0x4f6   :  { %7619 = vmatpush.bf16.msra.mxu3 %v9821_v9  ;;  %7594 = vmatpush.bf16.msra.mxu1 %v8733_v37  ;;  %v12028_v13 = vld [vmem:[%s19610_s1 + $0xb4] sm:$0xf]  ;;  %v9629_v0 = vor.u32 %v12428_v50, %v9626_v58 }
 0x4f7   :  { %v8026_v53 = vld [vmem:[%s19610_s1 + $0xf0] sm:$0xf0] }
 0x4f8   :  { %7607 = vmatpush.bf16.msra.mxu2 %v9245_v18  ;;  %7582 = vmatpush.bf16.msra.mxu0 %v8157_v55  ;;  %v12156_v5 = vld [vmem:[%s19610_s1 + $0x4b4] sm:$0xf]  ;;  %v8029_v29 = vor.u32 %v12028_v13, %v8026_v53  ;;  %v18671_v35 = vpop.f32.mrf.mxu0 }
 0x4f9   :  { %v8538_v22 = vld [vmem:[%s19610_s1 + $0x4f0] sm:$0xf0] }
 0x4fa   :  { %7620 = vmatpush.bf16.msra.mxu3 %v9757_v48  ;;  %7595 = vmatpush.bf16.msra.mxu1 %v8669_v56  ;;  %v12284_v26 = vld [vmem:[%s19610_s1 + $0x8b4] sm:$0xf]  ;;  %v8541_v9 = vor.u32 %v12156_v5, %v8538_v22 }
 0x4fb   :  { %v9050_v2 = vld [vmem:[%s19610_s1 + $0x8f0] sm:$0xf0] }
 0x4fc   :  { %7608 = vmatpush.bf16.msra.mxu2 %v9181_v45  ;;  %v12412_v1 = vld [vmem:[%s19610_s1 + $0xcb4] sm:$0xf]  ;;  %7583 = vmatpush.bf16.msra.mxu0 %v8093_v51  ;;  %v9053_v63 = vor.u32 %v12284_v26, %v9050_v2 }
 0x4fd   :  { %v9562_v28 = vld [vmem:[%s19610_s1 + $0xcf0] sm:$0xf0] }
 0x4fe   :  { %7621 = vmatpush.bf16.msra.mxu3 %v9693_v62  ;;  %v12012_v30 = vld [vmem:[%s19610_s1 + $0x34] sm:$0xf]  ;;  %7596 = vmatpush.bf16.msra.mxu1 %v8605_v17  ;;  %v9565_v7 = vor.u32 %v12412_v1, %v9562_v28 }
 0x4ff   :  { %v7962_v60 = vld [vmem:[%s19610_s1 + $0x70] sm:$0xf0] }
 0x500   :  { %7609 = vmatpush.bf16.msra.mxu2 %v9117_v59  ;;  %v12140_v34 = vld [vmem:[%s19610_s1 + $0x434] sm:$0xf]  ;;  %7584 = vmatpush.bf16.msra.mxu0 %v8029_v29  ;;  %v7965_v3 = vor.u32 %v12012_v30, %v7962_v60 }
 0x501   :  { %v8474_v10 = vld [vmem:[%s19610_s1 + $0x470] sm:$0xf0] }
 0x502   :  { %v12268_v11 = vld [vmem:[%s19610_s1 + $0x834] sm:$0xf]  ;;  %7622 = vmatpush.bf16.msra.mxu3 %v9629_v0  ;;  %7597 = vmatpush.bf16.msra.mxu1 %v8541_v9  ;;  %v8477_v27 = vor.u32 %v12140_v34, %v8474_v10 }
 0x503   :  { %v8986_v14 = vld [vmem:[%s19610_s1 + $0x870] sm:$0xf0] }
 0x504   :  { %v12396_v37 = vld [vmem:[%s19610_s1 + $0xc34] sm:$0xf]  ;;  %7610 = vmatpush.bf16.msra.mxu2 %v9053_v63  ;;  %v8989_v36 = vor.u32 %v12268_v11, %v8986_v14  ;;  %7585 = vmatpush.bf16.msra.mxu0 %v7965_v3 }
 0x505   :  { %v9498_v18 = vld [vmem:[%s19610_s1 + $0xc70] sm:$0xf0] }
 0x506   :  { %v12636_v40 = vld [vmem:[%s19610_s1 + $0x13b4] sm:$0xf]  ;;  %7623 = vmatpush.bf16.msra.mxu3 %v9565_v7  ;;  %v9501_v55 = vor.u32 %v12396_v37, %v9498_v18  ;;  %7598 = vmatpush.bf16.msra.mxu1 %v8477_v27 }
 0x507   :  { %v10458_v19 = vld [vmem:[%s19610_s1 + $0x13f0] sm:$0xf0]  ;;  %7586 = vmatmul.bf16.vlgmr.msra.gmra.mxu0 %v13354_v20 }
 0x508   :  { %v12764_v15 = vld [vmem:[%s19610_s1 + $0x17b4] sm:$0xf]  ;;  %v10461_v56 = vor.u32 %v12636_v40, %v10458_v19  ;;  %7611 = vmatpush.bf16.msra.mxu2 %v8989_v36  ;;  %v18682_v40 = vpop.f32.mrf.mxu1 }
 0x509   :  { %v10970_v48 = vld [vmem:[%s19610_s1 + $0x17f0] sm:$0xf0]  ;;  %7599 = vmatmul.bf16.vlgmr.msra.gmra.mxu1 %v13357_v21 }
 0x50a   :  { %v12892_v49 = vld [vmem:[%s19610_s1 + $0x1bb4] sm:$0xf]  ;;  %v10973_v45 = vor.u32 %v12764_v15, %v10970_v48  ;;  %7624 = vmatpush.bf16.msra.mxu3 %v9501_v55  ;;  %7630 = vmatpush.bf16.msrb.mxu0 %v10461_v56 }
 0x50b   :  { %v11482_v16 = vld [vmem:[%s19610_s1 + $0x1bf0] sm:$0xf0]  ;;  %7612 = vmatmul.bf16.vlgmr.msra.gmra.mxu2 %v13322_v4 }
 0x50c   :  { %v13020_v24 = vld [vmem:[%s19610_s1 + $0x1fb4] sm:$0xf]  ;;  %v11485_v25 = vor.u32 %v12892_v49, %v11482_v16  ;;  %7643 = vmatpush.bf16.msrb.mxu1 %v10973_v45  ;;  %v18708_v45 = vpop.f32.mrf.mxu2 }
 0x50d   :  { %v11994_v12 = vld [vmem:[%s19610_s1 + $0x1ff0] sm:$0xf0]  ;;  %7625 = vmatmul.bf16.vlgmr.msra.gmra.mxu3 %v13327_v6 }
 0x50e   :  { %v12620_v47 = vld [vmem:[%s19610_s1 + $0x1334] sm:$0xf]  ;;  %v11997_v62 = vor.u32 %v13020_v24, %v11994_v12  ;;  %7656 = vmatpush.bf16.msrb.mxu2 %v11485_v25 }
 0x50f   :  { %v10394_v31 = vld [vmem:[%s19610_s1 + $0x1370] sm:$0xf0] }
 0x510   :  { %v12748_v33 = vld [vmem:[%s19610_s1 + $0x1734] sm:$0xf]  ;;  %v10397_v50 = vor.u32 %v12620_v47, %v10394_v31  ;;  %7669 = vmatpush.bf16.msrb.mxu3 %v11997_v62  ;;  %v18719_v62 = vpop.f32.mrf.mxu3 }
 0x511   :  { %v10906_v32 = vld [vmem:[%s19610_s1 + $0x1770] sm:$0xf0] }
 0x512   :  { %v12876_v43 = vld [vmem:[%s19610_s1 + $0x1b34] sm:$0xf]  ;;  %v10909_v58 = vor.u32 %v12748_v33, %v10906_v32  ;;  %7631 = vmatpush.bf16.msrb.mxu0 %v10397_v50 }
 0x513   :  { %v11418_v54 = vld [vmem:[%s19610_s1 + $0x1b70] sm:$0xf0] }
 0x514   :  { %v13004_v39 = vld [vmem:[%s19610_s1 + $0x1f34] sm:$0xf]  ;;  %v11421_v51 = vor.u32 %v12876_v43, %v11418_v54  ;;  %7644 = vmatpush.bf16.msrb.mxu1 %v10909_v58 }
 0x515   :  { %v11930_v46 = vld [vmem:[%s19610_s1 + $0x1f70] sm:$0xf0] }
 0x516   :  { %v12604_v61 = vld [vmem:[%s19610_s1 + $0x12b4] sm:$0xf]  ;;  %v11933_v17 = vor.u32 %v13004_v39, %v11930_v46  ;;  %7657 = vmatpush.bf16.msrb.mxu2 %v11421_v51  ;;  %v7381_v39 = vpop.f32.mrf.mxu0 }
 0x517   :  { %v10330_v13 = vld [vmem:[%s19610_s1 + $0x12f0] sm:$0xf0] }
 0x518   :  { %v12732_v57 = vld [vmem:[%s19610_s1 + $0x16b4] sm:$0xf]  ;;  %v10333_v0 = vor.u32 %v12604_v61, %v10330_v13  ;;  %7670 = vmatpush.bf16.msrb.mxu3 %v11933_v17  ;;  %v7394_v13 = vpop.f32.mrf.mxu1 }
 0x519   :  { %v10842_v59 = vld [vmem:[%s19610_s1 + $0x16f0] sm:$0xf0]  ;;  %v8800_v13 = vld [vmem:[%s19610_s1 + $0x6b8] sm:$0xf] }
 0x51a   :  { %v12860_v53 = vld [vmem:[%s19610_s1 + $0x1ab4] sm:$0xf]  ;;  %v10845_v26 = vor.u32 %v12732_v57, %v10842_v59  ;;  %7632 = vmatpush.bf16.msrb.mxu0 %v10333_v0 }
 0x51b   :  { %v11354_v5 = vld [vmem:[%s19610_s1 + $0x1af0] sm:$0xf0] }
 0x51c   :  { %v12988_v22 = vld [vmem:[%s19610_s1 + $0x1eb4] sm:$0xf]  ;;  %v11357_v2 = vor.u32 %v12860_v53, %v11354_v5  ;;  %7645 = vmatpush.bf16.msrb.mxu1 %v10845_v26 }
 0x51d   :  { %v11866_v23 = vld [vmem:[%s19610_s1 + $0x1ef0] sm:$0xf0] }
 0x51e   :  { %v12588_v1 = vld [vmem:[%s19610_s1 + $0x1234] sm:$0xf]  ;;  %v11869_v30 = vor.u32 %v12988_v22, %v11866_v23  ;;  %7658 = vmatpush.bf16.msrb.mxu2 %v11357_v2  ;;  %v1057_v23 = vperm.slane %v18341_v52, 3 }
 0x51f   :  { %v10266_v28 = vld [vmem:[%s19610_s1 + $0x1270] sm:$0xf0] }
 0x520   :  { %v12716_v29 = vld [vmem:[%s19610_s1 + $0x1634] sm:$0xf]  ;;  %v10269_v11 = vor.u32 %v12588_v1, %v10266_v28  ;;  %7671 = vmatpush.bf16.msrb.mxu3 %v11869_v30 }
 0x521   :  { %v10778_v60 = vld [vmem:[%s19610_s1 + $0x1670] sm:$0xf0] }
 0x522   :  { %v12844_v9 = vld [vmem:[%s19610_s1 + $0x1a34] sm:$0xf]  ;;  %v10781_v7 = vor.u32 %v12716_v29, %v10778_v60  ;;  %7633 = vmatpush.bf16.msrb.mxu0 %v10269_v11  ;;  %v7407_v60 = vpop.f32.mrf.mxu2  ;;  %v7420_v11 = vpop.f32.mrf.mxu3 }
 0x523   :  { %v11290_v63 = vld [vmem:[%s19610_s1 + $0x1a70] sm:$0xf0]  ;;  %v9760_v60 = vld [vmem:[%s19610_s1 + $0xe38] sm:$0xf] }
 0x524   :  { %v12972_v34 = vld [vmem:[%s19610_s1 + $0x1e34] sm:$0xf]  ;;  %v11293_v14 = vor.u32 %v12844_v9, %v11290_v63  ;;  %7646 = vmatpush.bf16.msrb.mxu1 %v10781_v7  ;;  %v8416_v7 = vld [vmem:[%s19610_s1 + $0x3b8] sm:$0xf] }
 0x525   :  { %v11802_v10 = vld [vmem:[%s19610_s1 + $0x1e70] sm:$0xf0] }
 0x526   :  { %v12572_v37 = vld [vmem:[%s19610_s1 + $0x11b4] sm:$0xf]  ;;  %v11805_v19 = vor.u32 %v12972_v34, %v11802_v10  ;;  %7659 = vmatpush.bf16.msrb.mxu2 %v11293_v14  ;;  %v12133_v14 = vld [vmem:[%s19610_s1 + $0x3f4] sm:$0xf0] }
 0x527   :  { %v10202_v18 = vld [vmem:[%s19610_s1 + $0x11f0] sm:$0xf0] }
 0x528   :  { %v12700_v8 = vld [vmem:[%s19610_s1 + $0x15b4] sm:$0xf]  ;;  %v10205_v27 = vor.u32 %v12572_v37, %v10202_v18  ;;  %7672 = vmatpush.bf16.msrb.mxu3 %v11805_v19  ;;  %v8928_v37 = vld [vmem:[%s19610_s1 + $0x7b8] sm:$0xf]  ;;  %v7380_v18 = vadd.f32 %v18671_v35, %v1057_v23 }
 0x529   :  { %v10714_v15 = vld [vmem:[%s19610_s1 + $0x15f0] sm:$0xf0]  ;;  %v12261_v19 = vld [vmem:[%s19610_s1 + $0x7f4] sm:$0xf0] }
 0x52a   :  { %v12828_v3 = vld [vmem:[%s19610_s1 + $0x19b4] sm:$0xf]  ;;  %v10717_v36 = vor.u32 %v12700_v8, %v10714_v15  ;;  %7634 = vmatpush.bf16.msrb.mxu0 %v10205_v27  ;;  %v9440_v15 = vld [vmem:[%s19610_s1 + $0xbb8] sm:$0xf] }
 0x52b   :  { %v11226_v48 = vld [vmem:[%s19610_s1 + $0x19f0] sm:$0xf0]  ;;  %v9952_v35 = vld [vmem:[%s19610_s1 + $0xfb8] sm:$0xf] }
 0x52c   :  { %v12956_v49 = vld [vmem:[%s19610_s1 + $0x1db4] sm:$0xf]  ;;  %v11229_v24 = vor.u32 %v12828_v3, %v11226_v48  ;;  %7647 = vmatpush.bf16.msrb.mxu1 %v10717_v36  ;;  %v12389_v3 = vld [vmem:[%s19610_s1 + $0xbf4] sm:$0xf0]  ;;  %v8417_v36 = vor.u32 %v12133_v14, %v8416_v7 }
 0x52d   :  { %v11738_v16 = vld [vmem:[%s19610_s1 + $0x1df0] sm:$0xf0]  ;;  %v8160_v7 = vld [vmem:[%s19610_s1 + $0x1b8] sm:$0xf] }
 0x52e   :  { %v12556_v12 = vld [vmem:[%s19610_s1 + $0x1134] sm:$0xf]  ;;  %v11741_v25 = vor.u32 %v12956_v49, %v11738_v16  ;;  %7660 = vmatpush.bf16.msrb.mxu2 %v11229_v24  ;;  %v12517_v16 = vld [vmem:[%s19610_s1 + $0xff4] sm:$0xf0]  ;;  %v8929_v24 = vor.u32 %v12261_v19, %v8928_v37 }
 0x52f   :  { %v10138_v55 = vld [vmem:[%s19610_s1 + $0x1170] sm:$0xf0]  ;;  %v12069_v14 = vld [vmem:[%s19610_s1 + $0x1f4] sm:$0xf0] }
 0x530   :  { %v12684_v56 = vld [vmem:[%s19610_s1 + $0x1534] sm:$0xf]  ;;  %v10141_v54 = vor.u32 %v12556_v12, %v10138_v55  ;;  %7673 = vmatpush.bf16.msrb.mxu3 %v11741_v25  ;;  %v9441_v12 = vor.u32 %v12389_v3, %v9440_v15  ;;  %v7393_v55 = vadd.f32 %v18682_v40, %v7380_v18  ;;  %v12117_v25 = vld [vmem:[%s19610_s1 + $0x374] sm:$0xf0] }
 0x531   :  { %v10650_v47 = vld [vmem:[%s19610_s1 + $0x1570] sm:$0xf0]  ;;  %v9376_v40 = vld [vmem:[%s19610_s1 + $0xb38] sm:$0xf] }
 0x532   :  { %v12812_v31 = vld [vmem:[%s19610_s1 + $0x1934] sm:$0xf]  ;;  %v10653_v46 = vor.u32 %v12684_v56, %v10650_v47  ;;  %7635 = vmatpush.bf16.msrb.mxu0 %v10141_v54  ;;  %v8352_v56 = vld [vmem:[%s19610_s1 + $0x338] sm:$0xf] }
 0x533   :  { %v11162_v33 = vld [vmem:[%s19610_s1 + $0x1970] sm:$0xf0]  ;;  %v8864_v47 = vld [vmem:[%s19610_s1 + $0x738] sm:$0xf]  ;;  %v8353_v39 = vor.u32 %v12117_v25, %v8352_v56  ;;  %v7457_v25 = vpop.f32.mrf.mxu2 }
 0x534   :  { %v12940_v32 = vld [vmem:[%s19610_s1 + $0x1d34] sm:$0xf]  ;;  %v11165_v50 = vor.u32 %v12812_v31, %v11162_v33  ;;  %7648 = vmatpush.bf16.msrb.mxu1 %v10653_v46  ;;  %v9953_v31 = vor.u32 %v12517_v16, %v9952_v35  ;;  %v12245_v33 = vld [vmem:[%s19610_s1 + $0x774] sm:$0xf0] }
 0x535   :  { %v11674_v43 = vld [vmem:[%s19610_s1 + $0x1d70] sm:$0xf0]  ;;  %v12501_v54 = vld [vmem:[%s19610_s1 + $0xf74] sm:$0xf0]  ;;  %v8865_v46 = vor.u32 %v12245_v33, %v8864_v47 }
 0x536   :  { %v12540_v58 = vld [vmem:[%s19610_s1 + $0x10b4] sm:$0xf]  ;;  %v11677_v57 = vor.u32 %v12940_v32, %v11674_v43  ;;  %7661 = vmatpush.bf16.msrb.mxu2 %v11165_v50  ;;  %v12373_v32 = vld [vmem:[%s19610_s1 + $0xb74] sm:$0xf0] }
 0x537   :  { %v10074_v51 = vld [vmem:[%s19610_s1 + $0x10f0] sm:$0xf0]  ;;  %v9888_v43 = vld [vmem:[%s19610_s1 + $0xf38] sm:$0xf]  ;;  %v9377_v50 = vor.u32 %v12373_v32, %v9376_v40 }
 0x538   :  { %v12668_v61 = vld [vmem:[%s19610_s1 + $0x14b4] sm:$0xf]  ;;  %v10077_v0 = vor.u32 %v12540_v58, %v10074_v51  ;;  %7674 = vmatpush.bf16.msrb.mxu3 %v11677_v57  ;;  %v7406_v58 = vadd.f32 %v18708_v45, %v7393_v55  ;;  %v8288_v51 = vld [vmem:[%s19610_s1 + $0x2b8] sm:$0xf]  ;;  %v9889_v57 = vor.u32 %v12501_v54, %v9888_v43  ;;  %v7470_v43 = vpop.f32.mrf.mxu3 }
 0x539   :  { %v10586_v17 = vld [vmem:[%s19610_s1 + $0x14f0] sm:$0xf0]  ;;  %v12229_v45 = vld [vmem:[%s19610_s1 + $0x6f4] sm:$0xf0] }
 0x53a   :  { %v12796_v59 = vld [vmem:[%s19610_s1 + $0x18b4] sm:$0xf]  ;;  %v10589_v1 = vor.u32 %v12668_v61, %v10586_v17  ;;  %7636 = vmatpush.bf16.msrb.mxu0 %v10077_v0  ;;  %v12101_v61 = vld [vmem:[%s19610_s1 + $0x2f4] sm:$0xf0]  ;;  %v7419_v23 = vadd.f32 %v18719_v62, %v7406_v58  ;;  %v8801_v0 = vor.u32 %v12229_v45, %v8800_v13 }
 0x53b   :  { %v11098_v53 = vld [vmem:[%s19610_s1 + $0x18f0] sm:$0xf0]  ;;  %v9312_v17 = vld [vmem:[%s19610_s1 + $0xab8] sm:$0xf] }
 0x53c   :  { %v12924_v5 = vld [vmem:[%s19610_s1 + $0x1cb4] sm:$0xf]  ;;  %v11101_v28 = vor.u32 %v12796_v59, %v11098_v53  ;;  %7649 = vmatpush.bf16.msrb.mxu1 %v10589_v1  ;;  %v12357_v59 = vld [vmem:[%s19610_s1 + $0xaf4] sm:$0xf0] }
 0x53d   :  { %v11610_v22 = vld [vmem:[%s19610_s1 + $0x1cf0] sm:$0xf0]  ;;  %v9824_v53 = vld [vmem:[%s19610_s1 + $0xeb8] sm:$0xf] }
 0x53e   :  { %v12524_v26 = vld [vmem:[%s19610_s1 + $0x1034] sm:$0xf]  ;;  %v11613_v9 = vor.u32 %v12924_v5, %v11610_v22  ;;  %7662 = vmatpush.bf16.msrb.mxu2 %v11101_v28  ;;  %v12485_v5 = vld [vmem:[%s19610_s1 + $0xef4] sm:$0xf0]  ;;  %v8289_v22 = vor.u32 %v12101_v61, %v8288_v51 }
 0x53f   :  { %v10010_v2 = vld [vmem:[%s19610_s1 + $0x1070] sm:$0xf0]  ;;  %v12085_v1 = vld [vmem:[%s19610_s1 + $0x274] sm:$0xf0] }
 0x540   :  { %v12652_v29 = vld [vmem:[%s19610_s1 + $0x1434] sm:$0xf]  ;;  %v10013_v8 = vor.u32 %v12524_v26, %v10010_v2  ;;  %7675 = vmatpush.bf16.msrb.mxu3 %v11613_v9  ;;  %v9313_v26 = vor.u32 %v12357_v59, %v9312_v17  ;;  %v8224_v2 = vld [vmem:[%s19610_s1 + $0x238] sm:$0xf] }
 0x541   :  { %v10522_v52 = vld [vmem:[%s19610_s1 + $0x1470] sm:$0xf0]  ;;  %v8736_v28 = vld [vmem:[%s19610_s1 + $0x638] sm:$0xf] }
 0x542   :  { %v12780_v30 = vld [vmem:[%s19610_s1 + $0x1834] sm:$0xf]  ;;  %v10525_v48 = vor.u32 %v12652_v29, %v10522_v52  ;;  %7637 = vmatpush.bf16.msrb.mxu0 %v10013_v8  ;;  %v9825_v29 = vor.u32 %v12485_v5, %v9824_v53  ;;  %v12213_v62 = vld [vmem:[%s19610_s1 + $0x674] sm:$0xf0]  ;;  %v7444_v8 = vpop.f32.mrf.mxu1 }
 0x543   :  { %v11034_v63 = vld [vmem:[%s19610_s1 + $0x1870] sm:$0xf0]  ;;  %v9248_v52 = vld [vmem:[%s19610_s1 + $0xa38] sm:$0xf] }
 0x544   :  { %v12908_v34 = vld [vmem:[%s19610_s1 + $0x1c34] sm:$0xf]  ;;  %v11037_v49 = vor.u32 %v12780_v30, %v11034_v63  ;;  %7650 = vmatpush.bf16.msrb.mxu1 %v10525_v48  ;;  %v12341_v30 = vld [vmem:[%s19610_s1 + $0xa74] sm:$0xf0]  ;;  %v8225_v63 = vor.u32 %v12085_v1, %v8224_v2 }
 0x545   :  { %v11546_v10 = vld [vmem:[%s19610_s1 + $0x1c70] sm:$0xf0]  ;;  %7638 = vmatmul.bf16.vlgmr.msrb.gmra.mxu0 %v13513_v41  ;;  %v12469_v9 = vld [vmem:[%s19610_s1 + $0xe74] sm:$0xf0]  ;;  %v9249_v11 = vor.u32 %v12341_v30, %v9248_v52 }
 0x546   :  { %v11549_v27 = vor.u32 %v12908_v34, %v11546_v10  ;;  %7663 = vmatpush.bf16.msrb.mxu2 %v11037_v49  ;;  %7682 = vmatpush.bf16.msra.mxu0 %v8417_v36  ;;  %v7431_v34 = vpop.f32.mrf.mxu0  ;;  %v8737_v10 = vor.u32 %v12213_v62, %v8736_v28  ;;  %v8672_v37 = vld [vmem:[%s19610_s1 + $0x5b8] sm:$0xf]  ;;  %v9761_v19 = vor.u32 %v12469_v9, %v9760_v60  ;;  %v7459_v60 = vpop.f32.mrf.mxu2 }
 0x547   :  { %7651 = vmatmul.bf16.vlgmr.msrb.gmra.mxu1 %v13517_v44  ;;  %v7432_v18 = vadd.f32 %v7431_v34, %v7419_v23  ;;  %v12197_v15 = vld [vmem:[%s19610_s1 + $0x5f4] sm:$0xf0] }
 0x548   :  { %7676 = vmatpush.bf16.msrb.mxu3 %v11549_v27  ;;  %7695 = vmatpush.bf16.msra.mxu1 %v8929_v24  ;;  %v9184_v3 = vld [vmem:[%s19610_s1 + $0x9b8] sm:$0xf]  ;;  %v8161_v27 = vor.u32 %v12069_v14, %v8160_v7  ;;  %v8673_v36 = vor.u32 %v12197_v15, %v8672_v37 }
 0x549   :  { %7664 = vmatmul.bf16.vlgmr.msrb.gmra.mxu2 %v13505_v38  ;;  %v12325_v48 = vld [vmem:[%s19610_s1 + $0x9f4] sm:$0xf0]  ;;  %v7445_v16 = vadd.f32 %v7444_v8, %v7432_v18 }
 0x54a   :  { %7708 = vmatpush.bf16.msra.mxu2 %v9441_v12  ;;  %7683 = vmatpush.bf16.msra.mxu0 %v8353_v39  ;;  %v9696_v49 = vld [vmem:[%s19610_s1 + $0xdb8] sm:$0xf]  ;;  %v9185_v24 = vor.u32 %v12325_v48, %v9184_v3  ;;  %v7446_v59 = vpop.f32.mrf.mxu1 }
 0x54b   :  { %7677 = vmatmul.bf16.vlgmr.msrb.gmra.mxu3 %v13515_v42  ;;  %v12453_v35 = vld [vmem:[%s19610_s1 + $0xdf4] sm:$0xf0]  ;;  %v7458_v32 = vadd.f32 %v7457_v25, %v7445_v16 }
 0x54c   :  { %7721 = vmatpush.bf16.msra.mxu3 %v9953_v31  ;;  %7696 = vmatpush.bf16.msra.mxu1 %v8865_v46  ;;  %v8096_v12 = vld [vmem:[%s19610_s1 + $0x138] sm:$0xf]  ;;  %v9697_v47 = vor.u32 %v12453_v35, %v9696_v49 }
 0x54d   :  { %v12053_v55 = vld [vmem:[%s19610_s1 + $0x174] sm:$0xf0] }
 0x54e   :  { %7709 = vmatpush.bf16.msra.mxu2 %v9377_v50  ;;  %7684 = vmatpush.bf16.msra.mxu0 %v8289_v22  ;;  %v8608_v56 = vld [vmem:[%s19610_s1 + $0x538] sm:$0xf]  ;;  %v8097_v46 = vor.u32 %v12053_v55, %v8096_v12  ;;  %v7471_v50 = vadd.f32 %v7470_v43, %v7458_v32  ;;  %v7433_v51 = vpop.f32.mrf.mxu0 }
 0x54f   :  { %v12181_v31 = vld [vmem:[%s19610_s1 + $0x574] sm:$0xf0] }
 0x550   :  { %7722 = vmatpush.bf16.msra.mxu3 %v9889_v57  ;;  %7697 = vmatpush.bf16.msra.mxu1 %v8801_v0  ;;  %v9120_v33 = vld [vmem:[%s19610_s1 + $0x938] sm:$0xf]  ;;  %v8609_v61 = vor.u32 %v12181_v31, %v8608_v56  ;;  %7901 = vst [vmem:[%s19613_s3 + $0x58] sm:$0xff] %v7471_v50 }
 0x551   :  { %v12309_v40 = vld [vmem:[%s19610_s1 + $0x974] sm:$0xf0] }
 0x552   :  { %7710 = vmatpush.bf16.msra.mxu2 %v9313_v26  ;;  %7685 = vmatpush.bf16.msra.mxu0 %v8225_v63  ;;  %v9632_v54 = vld [vmem:[%s19610_s1 + $0xd38] sm:$0xf]  ;;  %v9121_v13 = vor.u32 %v12309_v40, %v9120_v33 }
 0x553   :  { %v12437_v39 = vld [vmem:[%s19610_s1 + $0xd74] sm:$0xf0] }
 0x554   :  { %7723 = vmatpush.bf16.msra.mxu3 %v9825_v29  ;;  %7698 = vmatpush.bf16.msra.mxu1 %v8737_v10  ;;  %v8032_v58 = vld [vmem:[%s19610_s1 + $0xb8] sm:$0xf]  ;;  %v9633_v53 = vor.u32 %v12437_v39, %v9632_v54 }
 0x555   :  { %v12037_v57 = vld [vmem:[%s19610_s1 + $0xf4] sm:$0xf0] }
 0x556   :  { %7711 = vmatpush.bf16.msra.mxu2 %v9249_v11  ;;  %7686 = vmatpush.bf16.msra.mxu0 %v8161_v27  ;;  %v8544_v45 = vld [vmem:[%s19610_s1 + $0x4b8] sm:$0xf]  ;;  %v8033_v26 = vor.u32 %v12037_v57, %v8032_v58  ;;  %v7472_v11 = vpop.f32.mrf.mxu3 }
 0x557   :  { %v12165_v17 = vld [vmem:[%s19610_s1 + $0x4f4] sm:$0xf0]  ;;  %v19090_v11 = vpop.f32.mrf.mxu1 }
 0x558   :  { %7724 = vmatpush.bf16.msra.mxu3 %v9761_v19  ;;  %7699 = vmatpush.bf16.msra.mxu1 %v8673_v36  ;;  %v9056_v5 = vld [vmem:[%s19610_s1 + $0x8b8] sm:$0xf]  ;;  %v8545_v28 = vor.u32 %v12165_v17, %v8544_v45 }
 0x559   :  { %v12293_v22 = vld [vmem:[%s19610_s1 + $0x8f4] sm:$0xf0] }
 0x55a   :  { %7712 = vmatpush.bf16.msra.mxu2 %v9185_v24  ;;  %v9568_v23 = vld [vmem:[%s19610_s1 + $0xcb8] sm:$0xf]  ;;  %7687 = vmatpush.bf16.msra.mxu0 %v8097_v46  ;;  %v9057_v29 = vor.u32 %v12293_v22, %v9056_v5 }
 0x55b   :  { %v12421_v0 = vld [vmem:[%s19610_s1 + $0xcf4] sm:$0xf0] }
 0x55c   :  { %7725 = vmatpush.bf16.msra.mxu3 %v9697_v47  ;;  %v7968_v2 = vld [vmem:[%s19610_s1 + $0x38] sm:$0xf]  ;;  %7700 = vmatpush.bf16.msra.mxu1 %v8609_v61  ;;  %v9569_v9 = vor.u32 %v12421_v0, %v9568_v23 }
 0x55d   :  { %v12021_v1 = vld [vmem:[%s19610_s1 + $0x74] sm:$0xf0] }
 0x55e   :  { %7713 = vmatpush.bf16.msra.mxu2 %v9121_v13  ;;  %v8480_v62 = vld [vmem:[%s19610_s1 + $0x438] sm:$0xf]  ;;  %7688 = vmatpush.bf16.msra.mxu0 %v8033_v26  ;;  %v7969_v18 = vor.u32 %v12021_v1, %v7968_v2 }
 0x55f   :  { %v12149_v52 = vld [vmem:[%s19610_s1 + $0x474] sm:$0xf0] }
 0x560   :  { %v8992_v30 = vld [vmem:[%s19610_s1 + $0x838] sm:$0xf]  ;;  %7726 = vmatpush.bf16.msra.mxu3 %v9633_v53  ;;  %7701 = vmatpush.bf16.msra.mxu1 %v8545_v28  ;;  %v8481_v3 = vor.u32 %v12149_v52, %v8480_v62 }
 0x561   :  { %v12277_v63 = vld [vmem:[%s19610_s1 + $0x874] sm:$0xf0] }
 0x562   :  { %v9504_v34 = vld [vmem:[%s19610_s1 + $0xc38] sm:$0xf]  ;;  %7714 = vmatpush.bf16.msra.mxu2 %v9057_v29  ;;  %v8993_v48 = vor.u32 %v12277_v63, %v8992_v30  ;;  %7689 = vmatpush.bf16.msra.mxu0 %v7969_v18  ;;  %v19079_v30 = vpop.f32.mrf.mxu0 }
 0x563   :  { %v12405_v10 = vld [vmem:[%s19610_s1 + $0xc74] sm:$0xf0] }
 0x564   :  { %v10464_v7 = vld [vmem:[%s19610_s1 + $0x13b8] sm:$0xf]  ;;  %7727 = vmatpush.bf16.msra.mxu3 %v9569_v9  ;;  %v9505_v16 = vor.u32 %v12405_v10, %v9504_v34  ;;  %7702 = vmatpush.bf16.msra.mxu1 %v8481_v3 }
 0x565   :  { %v12645_v14 = vld [vmem:[%s19610_s1 + $0x13f4] sm:$0xf0]  ;;  %7690 = vmatmul.bf16.vlgmr.msra.gmra.mxu0 %v13354_v20 }
 0x566   :  { %v10976_v37 = vld [vmem:[%s19610_s1 + $0x17b8] sm:$0xf]  ;;  %v10465_v27 = vor.u32 %v12645_v14, %v10464_v7  ;;  %7715 = vmatpush.bf16.msra.mxu2 %v8993_v48 }
 0x567   :  { %v12773_v8 = vld [vmem:[%s19610_s1 + $0x17f4] sm:$0xf0]  ;;  %7703 = vmatmul.bf16.vlgmr.msra.gmra.mxu1 %v13357_v21 }
 0x568   :  { %v11488_v19 = vld [vmem:[%s19610_s1 + $0x1bb8] sm:$0xf]  ;;  %v10977_v36 = vor.u32 %v12773_v8, %v10976_v37  ;;  %7728 = vmatpush.bf16.msra.mxu3 %v9505_v16  ;;  %7734 = vmatpush.bf16.msrb.mxu0 %v10465_v27  ;;  %v19116_v27 = vpop.f32.mrf.mxu2 }
 0x569   :  { %v12901_v15 = vld [vmem:[%s19610_s1 + $0x1bf4] sm:$0xf0]  ;;  %7716 = vmatmul.bf16.vlgmr.msra.gmra.mxu2 %v13322_v4 }
 0x56a   :  { %v12000_v49 = vld [vmem:[%s19610_s1 + $0x1fb8] sm:$0xf]  ;;  %v11489_v24 = vor.u32 %v12901_v15, %v11488_v19  ;;  %7747 = vmatpush.bf16.msrb.mxu1 %v10977_v36 }
 0x56b   :  { %v13029_v35 = vld [vmem:[%s19610_s1 + $0x1ff4] sm:$0xf0]  ;;  %7729 = vmatmul.bf16.vlgmr.msra.gmra.mxu3 %v13327_v6 }
 0x56c   :  { %v10400_v12 = vld [vmem:[%s19610_s1 + $0x1338] sm:$0xf]  ;;  %v12001_v25 = vor.u32 %v13029_v35, %v12000_v49  ;;  %7760 = vmatpush.bf16.msrb.mxu2 %v11489_v24 }
 0x56d   :  { %v12629_v55 = vld [vmem:[%s19610_s1 + $0x1374] sm:$0xf0] }
 0x56e   :  { %v10912_v56 = vld [vmem:[%s19610_s1 + $0x1738] sm:$0xf]  ;;  %v10401_v43 = vor.u32 %v12629_v55, %v10400_v12  ;;  %7773 = vmatpush.bf16.msrb.mxu3 %v12001_v25 }
 0x56f   :  { %v12757_v47 = vld [vmem:[%s19610_s1 + $0x1774] sm:$0xf0] }
 0x570   :  { %v11424_v31 = vld [vmem:[%s19610_s1 + $0x1b38] sm:$0xf]  ;;  %v10913_v54 = vor.u32 %v12757_v47, %v10912_v56  ;;  %7735 = vmatpush.bf16.msrb.mxu0 %v10401_v43  ;;  %v19127_v56 = vpop.f32.mrf.mxu3 }
 0x571   :  { %v12885_v33 = vld [vmem:[%s19610_s1 + $0x1b74] sm:$0xf0] }
 0x572   :  { %v11936_v40 = vld [vmem:[%s19610_s1 + $0x1f38] sm:$0xf]  ;;  %v11425_v39 = vor.u32 %v12885_v33, %v11424_v31  ;;  %7748 = vmatpush.bf16.msrb.mxu1 %v10913_v54  ;;  %v7485_v33 = vpop.f32.mrf.mxu0 }
 0x573   :  { %v13013_v32 = vld [vmem:[%s19610_s1 + $0x1f74] sm:$0xf0]  ;;  %v9890_v33 = vld [vmem:[%s19610_s1 + $0xf78] sm:$0xf0] }
 0x574   :  { %v10336_v46 = vld [vmem:[%s19610_s1 + $0x12b8] sm:$0xf]  ;;  %v11937_v51 = vor.u32 %v13013_v32, %v11936_v40  ;;  %7761 = vmatpush.bf16.msrb.mxu2 %v11425_v39 }
 0x575   :  { %v12613_v50 = vld [vmem:[%s19610_s1 + $0x12f4] sm:$0xf0] }
 0x576   :  { %v10848_v58 = vld [vmem:[%s19610_s1 + $0x16b8] sm:$0xf]  ;;  %v10337_v59 = vor.u32 %v12613_v50, %v10336_v46  ;;  %7774 = vmatpush.bf16.msrb.mxu3 %v11937_v51  ;;  %v7498_v46 = vpop.f32.mrf.mxu1 }
 0x577   :  { %v12741_v61 = vld [vmem:[%s19610_s1 + $0x16f4] sm:$0xf0]  ;;  %v8290_v46 = vld [vmem:[%s19610_s1 + $0x2f8] sm:$0xf0] }
 0x578   :  { %v11360_v13 = vld [vmem:[%s19610_s1 + $0x1ab8] sm:$0xf]  ;;  %v10849_v53 = vor.u32 %v12741_v61, %v10848_v58  ;;  %7736 = vmatpush.bf16.msrb.mxu0 %v10337_v59 }
 0x579   :  { %v12869_v57 = vld [vmem:[%s19610_s1 + $0x1af4] sm:$0xf0] }
 0x57a   :  { %v11872_v45 = vld [vmem:[%s19610_s1 + $0x1eb8] sm:$0xf]  ;;  %v11361_v5 = vor.u32 %v12869_v57, %v11360_v13  ;;  %7749 = vmatpush.bf16.msrb.mxu1 %v10849_v53 }
 0x57b   :  { %v12997_v17 = vld [vmem:[%s19610_s1 + $0x1ef4] sm:$0xf0] }
 0x57c   :  { %v10272_v22 = vld [vmem:[%s19610_s1 + $0x1238] sm:$0xf]  ;;  %v11873_v26 = vor.u32 %v12997_v17, %v11872_v45  ;;  %7762 = vmatpush.bf16.msrb.mxu2 %v11361_v5  ;;  %v19162_v45 = vld [vmem:[%s19612_s2 + $0x8] sm:$0xff] }
 0x57d   :  { %v12597_v23 = vld [vmem:[%s19610_s1 + $0x1274] sm:$0xf0]  ;;  %v1058_v17 = vperm.slane %v19162_v45, 4 }
 0x57e   :  { %v10784_v0 = vld [vmem:[%s19610_s1 + $0x1638] sm:$0xf]  ;;  %v10273_v52 = vor.u32 %v12597_v23, %v10272_v22  ;;  %7775 = vmatpush.bf16.msrb.mxu3 %v11873_v26 }
 0x57f   :  { %v12725_v2 = vld [vmem:[%s19610_s1 + $0x1674] sm:$0xf0] }
 0x580   :  { %v11296_v1 = vld [vmem:[%s19610_s1 + $0x1a38] sm:$0xf]  ;;  %v10785_v60 = vor.u32 %v12725_v2, %v10784_v0  ;;  %7737 = vmatpush.bf16.msrb.mxu0 %v10273_v52 }
 0x581   :  { %v12853_v28 = vld [vmem:[%s19610_s1 + $0x1a74] sm:$0xf0] }
 0x582   :  { %v11808_v29 = vld [vmem:[%s19610_s1 + $0x1e38] sm:$0xf]  ;;  %v11297_v9 = vor.u32 %v12853_v28, %v11296_v1  ;;  %7750 = vmatpush.bf16.msrb.mxu1 %v10785_v60  ;;  %v7511_v1 = vpop.f32.mrf.mxu2  ;;  %v7524_v60 = vpop.f32.mrf.mxu3 }
 0x583   :  { %v12981_v62 = vld [vmem:[%s19610_s1 + $0x1e74] sm:$0xf0]  ;;  %v9250_v1 = vld [vmem:[%s19610_s1 + $0xa78] sm:$0xf0] }
 0x584   :  { %v10208_v63 = vld [vmem:[%s19610_s1 + $0x11b8] sm:$0xf]  ;;  %v11809_v7 = vor.u32 %v12981_v62, %v11808_v29  ;;  %7763 = vmatpush.bf16.msrb.mxu2 %v11297_v9  ;;  %v12125_v9 = vld [vmem:[%s19610_s1 + $0x3bc] sm:$0xf] }
 0x585   :  { %v12581_v34 = vld [vmem:[%s19610_s1 + $0x11f4] sm:$0xf0] }
 0x586   :  { %v10720_v10 = vld [vmem:[%s19610_s1 + $0x15b8] sm:$0xf]  ;;  %v10209_v15 = vor.u32 %v12581_v34, %v10208_v63  ;;  %7776 = vmatpush.bf16.msrb.mxu3 %v11809_v7  ;;  %v8418_v63 = vld [vmem:[%s19610_s1 + $0x3f8] sm:$0xf0] }
 0x587   :  { %v12709_v14 = vld [vmem:[%s19610_s1 + $0x15f4] sm:$0xf0]  ;;  %v12253_v34 = vld [vmem:[%s19610_s1 + $0x7bc] sm:$0xf] }
 0x588   :  { %v11232_v37 = vld [vmem:[%s19610_s1 + $0x19b8] sm:$0xf]  ;;  %v10721_v3 = vor.u32 %v12709_v14, %v10720_v10  ;;  %7738 = vmatpush.bf16.msrb.mxu0 %v10209_v15  ;;  %v7484_v10 = vadd.f32 %v19079_v30, %v1058_v17  ;;  %v8930_v14 = vld [vmem:[%s19610_s1 + $0x7f8] sm:$0xf0] }
 0x589   :  { %v12837_v18 = vld [vmem:[%s19610_s1 + $0x19f4] sm:$0xf0]  ;;  %v12509_v30 = vld [vmem:[%s19610_s1 + $0xfbc] sm:$0xf] }
 0x58a   :  { %v11744_v8 = vld [vmem:[%s19610_s1 + $0x1db8] sm:$0xf]  ;;  %v11233_v48 = vor.u32 %v12837_v18, %v11232_v37  ;;  %7751 = vmatpush.bf16.msrb.mxu1 %v10721_v3  ;;  %v12381_v37 = vld [vmem:[%s19610_s1 + $0xbbc] sm:$0xf] }
 0x58b   :  { %v12965_v19 = vld [vmem:[%s19610_s1 + $0x1df4] sm:$0xf0]  ;;  %v9442_v18 = vld [vmem:[%s19610_s1 + $0xbf8] sm:$0xf0] }
 0x58c   :  { %v10144_v49 = vld [vmem:[%s19610_s1 + $0x1138] sm:$0xf]  ;;  %v11745_v36 = vor.u32 %v12965_v19, %v11744_v8  ;;  %7764 = vmatpush.bf16.msrb.mxu2 %v11233_v48  ;;  %v9954_v15 = vld [vmem:[%s19610_s1 + $0xff8] sm:$0xf0]  ;;  %v8421_v48 = vor.u32 %v12125_v9, %v8418_v63 }
 0x58d   :  { %v12565_v35 = vld [vmem:[%s19610_s1 + $0x1174] sm:$0xf0]  ;;  %v12061_v63 = vld [vmem:[%s19610_s1 + $0x1bc] sm:$0xf] }
 0x58e   :  { %v10656_v16 = vld [vmem:[%s19610_s1 + $0x1538] sm:$0xf]  ;;  %v10145_v31 = vor.u32 %v12565_v35, %v10144_v49  ;;  %7777 = vmatpush.bf16.msrb.mxu3 %v11745_v36  ;;  %v8933_v49 = vor.u32 %v12253_v34, %v8930_v14  ;;  %v9445_v35 = vor.u32 %v12381_v37, %v9442_v18  ;;  %v12109_v36 = vld [vmem:[%s19610_s1 + $0x33c] sm:$0xf]  ;;  %v7548_v14 = vpop.f32.mrf.mxu1 }
 0x58f   :  { %v12693_v24 = vld [vmem:[%s19610_s1 + $0x1574] sm:$0xf0]  ;;  %v8162_v34 = vld [vmem:[%s19610_s1 + $0x1f8] sm:$0xf0] }
 0x590   :  { %v11168_v12 = vld [vmem:[%s19610_s1 + $0x1938] sm:$0xf]  ;;  %v10657_v40 = vor.u32 %v12693_v24, %v10656_v16  ;;  %7739 = vmatpush.bf16.msrb.mxu0 %v10145_v31  ;;  %v7497_v16 = vadd.f32 %v19090_v11, %v7484_v10  ;;  %v8354_v24 = vld [vmem:[%s19610_s1 + $0x378] sm:$0xf0] }
 0x591   :  { %v12821_v55 = vld [vmem:[%s19610_s1 + $0x1974] sm:$0xf0]  ;;  %v12365_v11 = vld [vmem:[%s19610_s1 + $0xb3c] sm:$0xf] }
 0x592   :  { %v11680_v25 = vld [vmem:[%s19610_s1 + $0x1d38] sm:$0xf]  ;;  %v11169_v32 = vor.u32 %v12821_v55, %v11168_v12  ;;  %7752 = vmatpush.bf16.msrb.mxu1 %v10657_v40  ;;  %v12237_v12 = vld [vmem:[%s19610_s1 + $0x73c] sm:$0xf]  ;;  %v9957_v55 = vor.u32 %v12509_v30, %v9954_v15  ;;  %v8357_v40 = vor.u32 %v12109_v36, %v8354_v24 }
 0x593   :  { %v12949_v47 = vld [vmem:[%s19610_s1 + $0x1d74] sm:$0xf0]  ;;  %v12493_v31 = vld [vmem:[%s19610_s1 + $0xf3c] sm:$0xf] }
 0x594   :  { %v10080_v43 = vld [vmem:[%s19610_s1 + $0x10b8] sm:$0xf]  ;;  %v11681_v50 = vor.u32 %v12949_v47, %v11680_v25  ;;  %7765 = vmatpush.bf16.msrb.mxu2 %v11169_v32  ;;  %v8866_v25 = vld [vmem:[%s19610_s1 + $0x778] sm:$0xf0] }
 0x595   :  { %v12549_v54 = vld [vmem:[%s19610_s1 + $0x10f4] sm:$0xf0]  ;;  %v9378_v47 = vld [vmem:[%s19610_s1 + $0xb78] sm:$0xf0]  ;;  %v8869_v32 = vor.u32 %v12237_v12, %v8866_v25  ;;  %v7561_v12 = vpop.f32.mrf.mxu2 }
 0x596   :  { %v10592_v39 = vld [vmem:[%s19610_s1 + $0x14b8] sm:$0xf]  ;;  %v10081_v59 = vor.u32 %v12549_v54, %v10080_v43  ;;  %7778 = vmatpush.bf16.msrb.mxu3 %v11681_v50  ;;  %v9381_v43 = vor.u32 %v12365_v11, %v9378_v47  ;;  %v7510_v54 = vadd.f32 %v19116_v27, %v7497_v16  ;;  %v12221_v50 = vld [vmem:[%s19610_s1 + $0x6bc] sm:$0xf] }
 0x597   :  { %v12677_v58 = vld [vmem:[%s19610_s1 + $0x14f4] sm:$0xf0]  ;;  %v8802_v27 = vld [vmem:[%s19610_s1 + $0x6f8] sm:$0xf0] }
 0x598   :  { %v11104_v51 = vld [vmem:[%s19610_s1 + $0x18b8] sm:$0xf]  ;;  %v10593_v22 = vor.u32 %v12677_v58, %v10592_v39  ;;  %7740 = vmatpush.bf16.msrb.mxu0 %v10081_v59  ;;  %v12093_v39 = vld [vmem:[%s19610_s1 + $0x2bc] sm:$0xf]  ;;  %v9893_v58 = vor.u32 %v12493_v31, %v9890_v33  ;;  %v7523_v59 = vadd.f32 %v19127_v56, %v7510_v54  ;;  %v7574_v33 = vpop.f32.mrf.mxu3 }
 0x599   :  { %v12805_v61 = vld [vmem:[%s19610_s1 + $0x18f4] sm:$0xf0]  ;;  %v8293_v17 = vor.u32 %v12093_v39, %v8290_v46  ;;  %v8738_v56 = vld [vmem:[%s19610_s1 + $0x678] sm:$0xf0] }
 0x59a   :  { %v11616_v13 = vld [vmem:[%s19610_s1 + $0x1cb8] sm:$0xf]  ;;  %v11105_v23 = vor.u32 %v12805_v61, %v11104_v51  ;;  %7753 = vmatpush.bf16.msrb.mxu1 %v10593_v22  ;;  %v12349_v51 = vld [vmem:[%s19610_s1 + $0xabc] sm:$0xf] }
 0x59b   :  { %v12933_v57 = vld [vmem:[%s19610_s1 + $0x1cf4] sm:$0xf0]  ;;  %v9314_v61 = vld [vmem:[%s19610_s1 + $0xaf8] sm:$0xf0] }
 0x59c   :  { %v10016_v53 = vld [vmem:[%s19610_s1 + $0x1038] sm:$0xf]  ;;  %v11617_v28 = vor.u32 %v12933_v57, %v11616_v13  ;;  %7766 = vmatpush.bf16.msrb.mxu2 %v11105_v23  ;;  %v12477_v13 = vld [vmem:[%s19610_s1 + $0xebc] sm:$0xf] }
 0x59d   :  { %v12533_v5 = vld [vmem:[%s19610_s1 + $0x1074] sm:$0xf0]  ;;  %v9826_v57 = vld [vmem:[%s19610_s1 + $0xef8] sm:$0xf0] }
 0x59e   :  { %v10528_v0 = vld [vmem:[%s19610_s1 + $0x1438] sm:$0xf]  ;;  %v10017_v7 = vor.u32 %v12533_v5, %v10016_v53  ;;  %7779 = vmatpush.bf16.msrb.mxu3 %v11617_v28  ;;  %v8805_v53 = vor.u32 %v12221_v50, %v8802_v27  ;;  %v9317_v5 = vor.u32 %v12349_v51, %v9314_v61  ;;  %v12077_v22 = vld [vmem:[%s19610_s1 + $0x23c] sm:$0xf] }
 0x59f   :  { %v12661_v26 = vld [vmem:[%s19610_s1 + $0x1474] sm:$0xf0]  ;;  %v8226_v23 = vld [vmem:[%s19610_s1 + $0x278] sm:$0xf0] }
 0x5a0   :  { %v11040_v2 = vld [vmem:[%s19610_s1 + $0x1838] sm:$0xf]  ;;  %v10529_v8 = vor.u32 %v12661_v26, %v10528_v0  ;;  %7741 = vmatpush.bf16.msrb.mxu0 %v10017_v7  ;;  %v12205_v0 = vld [vmem:[%s19610_s1 + $0x63c] sm:$0xf]  ;;  %v9829_v26 = vor.u32 %v12477_v13, %v9826_v57  ;;  %v7550_v13 = vpop.f32.mrf.mxu1 }
 0x5a1   :  { %v12789_v29 = vld [vmem:[%s19610_s1 + $0x1874] sm:$0xf0]  ;;  %v12461_v28 = vld [vmem:[%s19610_s1 + $0xe3c] sm:$0xf]  ;;  %v8741_v60 = vor.u32 %v12205_v0, %v8738_v56 }
 0x5a2   :  { %v11552_v62 = vld [vmem:[%s19610_s1 + $0x1c38] sm:$0xf]  ;;  %v11041_v19 = vor.u32 %v12789_v29, %v11040_v2  ;;  %7754 = vmatpush.bf16.msrb.mxu1 %v10529_v8  ;;  %v12333_v2 = vld [vmem:[%s19610_s1 + $0xa3c] sm:$0xf] }
 0x5a3   :  { %v12917_v52 = vld [vmem:[%s19610_s1 + $0x1c74] sm:$0xf0]  ;;  %7742 = vmatmul.bf16.vlgmr.msrb.gmra.mxu0 %v13513_v41  ;;  %v9762_v29 = vld [vmem:[%s19610_s1 + $0xe78] sm:$0xf0]  ;;  %v9253_v9 = vor.u32 %v12333_v2, %v9250_v1 }
 0x5a4   :  { %v11553_v3 = vor.u32 %v12917_v52, %v11552_v62  ;;  %7767 = vmatpush.bf16.msrb.mxu2 %v11041_v19  ;;  %7786 = vmatpush.bf16.msra.mxu0 %v8421_v48  ;;  %v8229_v62 = vor.u32 %v12077_v22, %v8226_v23  ;;  %v7535_v52 = vpop.f32.mrf.mxu0  ;;  %v12189_v10 = vld [vmem:[%s19610_s1 + $0x5bc] sm:$0xf]  ;;  %v9765_v37 = vor.u32 %v12461_v28, %v9762_v29  ;;  %v7563_v29 = vpop.f32.mrf.mxu2 }
 0x5a5   :  { %7755 = vmatmul.bf16.vlgmr.msrb.gmra.mxu1 %v13517_v44  ;;  %v7536_v7 = vadd.f32 %v7535_v52, %v7523_v59  ;;  %v8674_v18 = vld [vmem:[%s19610_s1 + $0x5f8] sm:$0xf0]  ;;  %v8165_v48 = vor.u32 %v12061_v63, %v8162_v34  ;;  %v7576_v63 = vpop.f32.mrf.mxu3 }
 0x5a6   :  { %7780 = vmatpush.bf16.msrb.mxu3 %v11553_v3  ;;  %7799 = vmatpush.bf16.msra.mxu1 %v8933_v49  ;;  %v12317_v8 = vld [vmem:[%s19610_s1 + $0x9bc] sm:$0xf]  ;;  %v8677_v49 = vor.u32 %v12189_v10, %v8674_v18 }
 0x5a7   :  { %7768 = vmatmul.bf16.vlgmr.msrb.gmra.mxu2 %v13505_v38  ;;  %v9186_v19 = vld [vmem:[%s19610_s1 + $0x9f8] sm:$0xf0]  ;;  %v7549_v3 = vadd.f32 %v7548_v14, %v7536_v7 }
 0x5a8   :  { %7812 = vmatpush.bf16.msra.mxu2 %v9445_v35  ;;  %7787 = vmatpush.bf16.msra.mxu0 %v8357_v40  ;;  %v12445_v30 = vld [vmem:[%s19610_s1 + $0xdbc] sm:$0xf]  ;;  %v9189_v35 = vor.u32 %v12317_v8, %v9186_v19 }
 0x5a9   :  { %7781 = vmatmul.bf16.vlgmr.msrb.gmra.mxu3 %v13515_v42  ;;  %v9698_v15 = vld [vmem:[%s19610_s1 + $0xdf8] sm:$0xf0]  ;;  %v7562_v31 = vadd.f32 %v7561_v12, %v7549_v3 }
 0x5aa   :  { %7825 = vmatpush.bf16.msra.mxu3 %v9957_v55  ;;  %7800 = vmatpush.bf16.msra.mxu1 %v8869_v32  ;;  %v12045_v16 = vld [vmem:[%s19610_s1 + $0x13c] sm:$0xf]  ;;  %v9701_v55 = vor.u32 %v12445_v30, %v9698_v15 }
 0x5ab   :  { %v8098_v36 = vld [vmem:[%s19610_s1 + $0x178] sm:$0xf0]  ;;  %v7575_v54 = vadd.f32 %v7574_v33, %v7562_v31 }
 0x5ac   :  { %7813 = vmatpush.bf16.msra.mxu2 %v9381_v43  ;;  %7788 = vmatpush.bf16.msra.mxu0 %v8293_v17  ;;  %v12173_v24 = vld [vmem:[%s19610_s1 + $0x53c] sm:$0xf]  ;;  %v8101_v43 = vor.u32 %v12045_v16, %v8098_v36  ;;  %v7537_v46 = vpop.f32.mrf.mxu0 }
 0x5ad   :  { %v8610_v25 = vld [vmem:[%s19610_s1 + $0x578] sm:$0xf0]  ;;  %7902 = vst [vmem:[%s19613_s3 + $0x60] sm:$0xff] %v7575_v54 }
 0x5ae   :  { %7826 = vmatpush.bf16.msra.mxu3 %v9893_v58  ;;  %7801 = vmatpush.bf16.msra.mxu1 %v8805_v53  ;;  %v12301_v11 = vld [vmem:[%s19610_s1 + $0x93c] sm:$0xf]  ;;  %v8613_v50 = vor.u32 %v12173_v24, %v8610_v25 }
 0x5af   :  { %v9122_v47 = vld [vmem:[%s19610_s1 + $0x978] sm:$0xf0] }
 0x5b0   :  { %7814 = vmatpush.bf16.msra.mxu2 %v9317_v5  ;;  %7789 = vmatpush.bf16.msra.mxu0 %v8229_v62  ;;  %v12429_v40 = vld [vmem:[%s19610_s1 + $0xd3c] sm:$0xf]  ;;  %v9125_v58 = vor.u32 %v12301_v11, %v9122_v47 }
 0x5b1   :  { %v9634_v32 = vld [vmem:[%s19610_s1 + $0xd78] sm:$0xf0] }
 0x5b2   :  { %7827 = vmatpush.bf16.msra.mxu3 %v9829_v26  ;;  %7802 = vmatpush.bf16.msra.mxu1 %v8741_v60  ;;  %v12029_v39 = vld [vmem:[%s19610_s1 + $0xbc] sm:$0xf]  ;;  %v9637_v57 = vor.u32 %v12429_v40, %v9634_v32 }
 0x5b3   :  { %v8034_v27 = vld [vmem:[%s19610_s1 + $0xf8] sm:$0xf0] }
 0x5b4   :  { %7815 = vmatpush.bf16.msra.mxu2 %v9253_v9  ;;  %7790 = vmatpush.bf16.msra.mxu0 %v8165_v48  ;;  %v12157_v51 = vld [vmem:[%s19610_s1 + $0x4bc] sm:$0xf]  ;;  %v8037_v22 = vor.u32 %v12029_v39, %v8034_v27 }
 0x5b5   :  { %v8546_v61 = vld [vmem:[%s19610_s1 + $0x4f8] sm:$0xf0] }
 0x5b6   :  { %7828 = vmatpush.bf16.msra.mxu3 %v9765_v37  ;;  %7803 = vmatpush.bf16.msra.mxu1 %v8677_v49  ;;  %v12285_v17 = vld [vmem:[%s19610_s1 + $0x8bc] sm:$0xf]  ;;  %v8549_v26 = vor.u32 %v12157_v51, %v8546_v61 }
 0x5b7   :  { %v9058_v59 = vld [vmem:[%s19610_s1 + $0x8f8] sm:$0xf0] }
 0x5b8   :  { %7816 = vmatpush.bf16.msra.mxu2 %v9189_v35  ;;  %v12413_v53 = vld [vmem:[%s19610_s1 + $0xcbc] sm:$0xf]  ;;  %7791 = vmatpush.bf16.msra.mxu0 %v8101_v43  ;;  %v9061_v56 = vor.u32 %v12285_v17, %v9058_v59 }
 0x5b9   :  { %v9570_v5 = vld [vmem:[%s19610_s1 + $0xcf8] sm:$0xf0] }
 0x5ba   :  { %7829 = vmatpush.bf16.msra.mxu3 %v9701_v55  ;;  %v12013_v23 = vld [vmem:[%s19610_s1 + $0x3c] sm:$0xf]  ;;  %7804 = vmatpush.bf16.msra.mxu1 %v8613_v50  ;;  %v9573_v62 = vor.u32 %v12413_v53, %v9570_v5 }
 0x5bb   :  { %v7970_v0 = vld [vmem:[%s19610_s1 + $0x78] sm:$0xf0] }
 0x5bc   :  { %7817 = vmatpush.bf16.msra.mxu2 %v9125_v58  ;;  %v12141_v2 = vld [vmem:[%s19610_s1 + $0x43c] sm:$0xf]  ;;  %7792 = vmatpush.bf16.msra.mxu0 %v8037_v22  ;;  %v7973_v14 = vor.u32 %v12013_v23, %v7970_v0 }
 0x5bd   :  { %v8482_v1 = vld [vmem:[%s19610_s1 + $0x478] sm:$0xf0] }
 0x5be   :  { %v12269_v28 = vld [vmem:[%s19610_s1 + $0x83c] sm:$0xf]  ;;  %7830 = vmatpush.bf16.msra.mxu3 %v9637_v57  ;;  %7805 = vmatpush.bf16.msra.mxu1 %v8549_v26  ;;  %v8485_v19 = vor.u32 %v12141_v2, %v8482_v1 }
 0x5bf   :  { %v8994_v52 = vld [vmem:[%s19610_s1 + $0x878] sm:$0xf0] }
 0x5c0   :  { %v12397_v60 = vld [vmem:[%s19610_s1 + $0xc3c] sm:$0xf]  ;;  %7818 = vmatpush.bf16.msra.mxu2 %v9061_v56  ;;  %v8997_v30 = vor.u32 %v12269_v28, %v8994_v52  ;;  %7793 = vmatpush.bf16.msra.mxu0 %v7973_v14  ;;  %v19492_v56 = vpop.f32.mrf.mxu0  ;;  %v19503_v52 = vpop.f32.mrf.mxu1 }
 0x5c1   :  { %v9506_v9 = vld [vmem:[%s19610_s1 + $0xc78] sm:$0xf0] }
 0x5c2   :  { %v12637_v34 = vld [vmem:[%s19610_s1 + $0x13bc] sm:$0xf]  ;;  %7831 = vmatpush.bf16.msra.mxu3 %v9573_v62  ;;  %v9509_v48 = vor.u32 %v12397_v60, %v9506_v9  ;;  %7806 = vmatpush.bf16.msra.mxu1 %v8485_v19 }
 0x5c3   :  { %v10466_v10 = vld [vmem:[%s19610_s1 + $0x13f8] sm:$0xf0]  ;;  %7794 = vmatmul.bf16.vlgmr.msra.gmra.mxu0 %v13354_v20 }
 0x5c4   :  { %v12765_v7 = vld [vmem:[%s19610_s1 + $0x17bc] sm:$0xf]  ;;  %v10469_v49 = vor.u32 %v12637_v34, %v10466_v10  ;;  %7819 = vmatpush.bf16.msra.mxu2 %v8997_v30 }
 0x5c5   :  { %v10978_v37 = vld [vmem:[%s19610_s1 + $0x17f8] sm:$0xf0]  ;;  %7807 = vmatmul.bf16.vlgmr.msra.gmra.mxu1 %v13357_v21 }
 0x5c6   :  { %v12893_v18 = vld [vmem:[%s19610_s1 + $0x1bbc] sm:$0xf]  ;;  %v10981_v35 = vor.u32 %v12765_v7, %v10978_v37  ;;  %7832 = vmatpush.bf16.msra.mxu3 %v9509_v48  ;;  %7838 = vmatpush.bf16.msrb.mxu0 %v10469_v49 }
 0x5c7   :  { %v11490_v8 = vld [vmem:[%s19610_s1 + $0x1bf8] sm:$0xf0]  ;;  %7820 = vmatmul.bf16.vlgmr.msra.gmra.mxu2 %v13322_v4 }
 0x5c8   :  { %v13021_v15 = vld [vmem:[%s19610_s1 + $0x1fbc] sm:$0xf]  ;;  %v11493_v16 = vor.u32 %v12893_v18, %v11490_v8  ;;  %7851 = vmatpush.bf16.msrb.mxu1 %v10981_v35 }
 0x5c9   :  { %v12002_v3 = vld [vmem:[%s19610_s1 + $0x1ff8] sm:$0xf0]  ;;  %7833 = vmatmul.bf16.vlgmr.msra.gmra.mxu3 %v13327_v6 }
 0x5ca   :  { %v12621_v36 = vld [vmem:[%s19610_s1 + $0x133c] sm:$0xf]  ;;  %v12005_v55 = vor.u32 %v13021_v15, %v12002_v3  ;;  %7864 = vmatpush.bf16.msrb.mxu2 %v11493_v16  ;;  %v7613_v15 = vpop.f32.mrf.mxu2  ;;  %v7626_v16 = vpop.f32.mrf.mxu3 }
 0x5cb   :  { %v10402_v24 = vld [vmem:[%s19610_s1 + $0x1378] sm:$0xf0] }
 0x5cc   :  { %v12749_v12 = vld [vmem:[%s19610_s1 + $0x173c] sm:$0xf]  ;;  %v10405_v40 = vor.u32 %v12621_v36, %v10402_v24  ;;  %7877 = vmatpush.bf16.msrb.mxu3 %v12005_v55  ;;  %v7589_v55 = vpop.f32.mrf.mxu0 }
 0x5cd   :  { %v10914_v25 = vld [vmem:[%s19610_s1 + $0x1778] sm:$0xf0] }
 0x5ce   :  { %v12877_v11 = vld [vmem:[%s19610_s1 + $0x1b3c] sm:$0xf]  ;;  %v10917_v32 = vor.u32 %v12749_v12, %v10914_v25  ;;  %7839 = vmatpush.bf16.msrb.mxu0 %v10405_v40  ;;  %v7602_v40 = vpop.f32.mrf.mxu1 }
 0x5cf   :  { %v11426_v47 = vld [vmem:[%s19610_s1 + $0x1b78] sm:$0xf0] }
 0x5d0   :  { %v13005_v31 = vld [vmem:[%s19610_s1 + $0x1f3c] sm:$0xf]  ;;  %v11429_v43 = vor.u32 %v12877_v11, %v11426_v47  ;;  %7852 = vmatpush.bf16.msrb.mxu1 %v10917_v32 }
 0x5d1   :  { %v11938_v33 = vld [vmem:[%s19610_s1 + $0x1f78] sm:$0xf0] }
 0x5d2   :  { %v12605_v54 = vld [vmem:[%s19610_s1 + $0x12bc] sm:$0xf]  ;;  %v11941_v50 = vor.u32 %v13005_v31, %v11938_v33  ;;  %7865 = vmatpush.bf16.msrb.mxu2 %v11429_v43 }
 0x5d3   :  { %v10338_v39 = vld [vmem:[%s19610_s1 + $0x12f8] sm:$0xf0] }
 0x5d4   :  { %v12733_v46 = vld [vmem:[%s19610_s1 + $0x16bc] sm:$0xf]  ;;  %v10341_v13 = vor.u32 %v12605_v54, %v10338_v39  ;;  %7878 = vmatpush.bf16.msrb.mxu3 %v11941_v50 }
 0x5d5   :  { %v10850_v58 = vld [vmem:[%s19610_s1 + $0x16f8] sm:$0xf0] }
 0x5d6   :  { %v12861_v27 = vld [vmem:[%s19610_s1 + $0x1abc] sm:$0xf]  ;;  %v10853_v57 = vor.u32 %v12733_v46, %v10850_v58  ;;  %7840 = vmatpush.bf16.msrb.mxu0 %v10341_v13  ;;  %v1059_v58 = vperm.slane %v19162_v45, 5 }
 0x5d7   :  { %v11362_v51 = vld [vmem:[%s19610_s1 + $0x1af8] sm:$0xf0] }
 0x5d8   :  { %v12989_v61 = vld [vmem:[%s19610_s1 + $0x1ebc] sm:$0xf]  ;;  %v11365_v17 = vor.u32 %v12861_v27, %v11362_v51  ;;  %7853 = vmatpush.bf16.msrb.mxu1 %v10853_v57 }
 0x5d9   :  { %v11874_v4 = vld [vmem:[%s19610_s1 + $0x1ef8] sm:$0xf0] }
 0x5da   :  { %v12589_v6 = vld [vmem:[%s19610_s1 + $0x123c] sm:$0xf]  ;;  %v11877_v53 = vor.u32 %v12989_v61, %v11874_v4  ;;  %7866 = vmatpush.bf16.msrb.mxu2 %v11365_v17  ;;  %v7615_v17 = vpop.f32.mrf.mxu2 }
 0x5db   :  { %v10274_v59 = vld [vmem:[%s19610_s1 + $0x1278] sm:$0xf0] }
 0x5dc   :  { %v12717_v20 = vld [vmem:[%s19610_s1 + $0x163c] sm:$0xf]  ;;  %v10277_v26 = vor.u32 %v12589_v6, %v10274_v59  ;;  %7879 = vmatpush.bf16.msrb.mxu3 %v11877_v53 }
 0x5dd   :  { %v10786_v21 = vld [vmem:[%s19610_s1 + $0x1678] sm:$0xf0] }
 0x5de   :  { %v12845_v5 = vld [vmem:[%s19610_s1 + $0x1a3c] sm:$0xf]  ;;  %v10789_v2 = vor.u32 %v12717_v20, %v10786_v21  ;;  %7841 = vmatpush.bf16.msrb.mxu0 %v10277_v26  ;;  %v7628_v21 = vpop.f32.mrf.mxu3 }
 0x5df   :  { %v11298_v22 = vld [vmem:[%s19610_s1 + $0x1a78] sm:$0xf0] }
 0x5e0   :  { %v12973_v23 = vld [vmem:[%s19610_s1 + $0x1e3c] sm:$0xf]  ;;  %v11301_v1 = vor.u32 %v12845_v5, %v11298_v22  ;;  %7854 = vmatpush.bf16.msrb.mxu1 %v10789_v2 }
 0x5e1   :  { %v11810_v0 = vld [vmem:[%s19610_s1 + $0x1e78] sm:$0xf0] }
 0x5e2   :  { %v12573_v28 = vld [vmem:[%s19610_s1 + $0x11bc] sm:$0xf]  ;;  %v11813_v60 = vor.u32 %v12973_v23, %v11810_v0  ;;  %7867 = vmatpush.bf16.msrb.mxu2 %v11301_v1  ;;  %v7588_v23 = vadd.f32 %v19492_v56, %v1059_v58 }
 0x5e3   :  { %v10210_v29 = vld [vmem:[%s19610_s1 + $0x11f8] sm:$0xf0] }
 0x5e4   :  { %v12701_v62 = vld [vmem:[%s19610_s1 + $0x15bc] sm:$0xf]  ;;  %v10213_v14 = vor.u32 %v12573_v28, %v10210_v29  ;;  %7880 = vmatpush.bf16.msrb.mxu3 %v11813_v60  ;;  %v7601_v28 = vadd.f32 %v19503_v52, %v7588_v23 }
 0x5e5   :  { %v10722_v9 = vld [vmem:[%s19610_s1 + $0x15f8] sm:$0xf0] }
 0x5e6   :  { %v12829_v63 = vld [vmem:[%s19610_s1 + $0x19bc] sm:$0xf]  ;;  %v10725_v37 = vor.u32 %v12701_v62, %v10722_v9  ;;  %7842 = vmatpush.bf16.msrb.mxu0 %v10213_v14  ;;  %v7614_v29 = vadd.f32 %v7613_v15, %v7601_v28  ;;  %v7639_v62 = vpop.f32.mrf.mxu0  ;;  %v7652_v9 = vpop.f32.mrf.mxu1  ;;  %v1060_v15 = vperm.slane %v19162_v45, 6 }
 0x5e7   :  { %v11234_v34 = vld [vmem:[%s19610_s1 + $0x19f8] sm:$0xf0] }
 0x5e8   :  { %v12957_v10 = vld [vmem:[%s19610_s1 + $0x1dbc] sm:$0xf]  ;;  %v11237_v18 = vor.u32 %v12829_v63, %v11234_v34  ;;  %7855 = vmatpush.bf16.msrb.mxu1 %v10725_v37  ;;  %v7627_v56 = vadd.f32 %v7626_v16, %v7614_v29  ;;  %v7665_v34 = vpop.f32.mrf.mxu2 }
 0x5e9   :  { %v11746_v7 = vld [vmem:[%s19610_s1 + $0x1df8] sm:$0xf0] }
 0x5ea   :  { %v12557_v8 = vld [vmem:[%s19610_s1 + $0x113c] sm:$0xf]  ;;  %v11749_v3 = vor.u32 %v12957_v10, %v11746_v7  ;;  %7868 = vmatpush.bf16.msrb.mxu2 %v11237_v18  ;;  %v7640_v60 = vadd.f32 %v7639_v62, %v7627_v56  ;;  %v7678_v10 = vpop.f32.mrf.mxu3 }
 0x5eb   :  { %v10146_v19 = vld [vmem:[%s19610_s1 + $0x1178] sm:$0xf0] }
 0x5ec   :  { %v12685_v30 = vld [vmem:[%s19610_s1 + $0x153c] sm:$0xf]  ;;  %v10149_v12 = vor.u32 %v12557_v8, %v10146_v19  ;;  %7881 = vmatpush.bf16.msrb.mxu3 %v11749_v3  ;;  %v7653_v63 = vadd.f32 %v7652_v9, %v7640_v60 }
 0x5ed   :  { %v10658_v48 = vld [vmem:[%s19610_s1 + $0x1578] sm:$0xf0] }
 0x5ee   :  { %v12813_v49 = vld [vmem:[%s19610_s1 + $0x193c] sm:$0xf]  ;;  %v10661_v25 = vor.u32 %v12685_v30, %v10658_v48  ;;  %7843 = vmatpush.bf16.msrb.mxu0 %v10149_v12  ;;  %v7666_v52 = vadd.f32 %v7665_v34, %v7653_v63  ;;  %v7641_v14 = vpop.f32.mrf.mxu0  ;;  %v7654_v37 = vpop.f32.mrf.mxu1 }
 0x5ef   :  { %v11170_v35 = vld [vmem:[%s19610_s1 + $0x1978] sm:$0xf0] }
 0x5f0   :  { %v12941_v36 = vld [vmem:[%s19610_s1 + $0x1d3c] sm:$0xf]  ;;  %v11173_v11 = vor.u32 %v12813_v49, %v11170_v35  ;;  %7856 = vmatpush.bf16.msrb.mxu1 %v10661_v25  ;;  %v7679_v7 = vadd.f32 %v7678_v10, %v7666_v52 }
 0x5f1   :  { %v11682_v24 = vld [vmem:[%s19610_s1 + $0x1d78] sm:$0xf0] }
 0x5f2   :  { %v12541_v47 = vld [vmem:[%s19610_s1 + $0x10bc] sm:$0xf]  ;;  %v11685_v32 = vor.u32 %v12941_v36, %v11682_v24  ;;  %7869 = vmatpush.bf16.msrb.mxu2 %v11173_v11  ;;  %7903 = vst [vmem:[%s19613_s3 + $0x68] sm:$0xff] %v7679_v7 }
 0x5f3   :  { %v10082_v31 = vld [vmem:[%s19610_s1 + $0x10f8] sm:$0xf0] }
 0x5f4   :  { %v12669_v33 = vld [vmem:[%s19610_s1 + $0x14bc] sm:$0xf]  ;;  %v10085_v27 = vor.u32 %v12541_v47, %v10082_v31  ;;  %7882 = vmatpush.bf16.msrb.mxu3 %v11685_v32 }
 0x5f5   :  { %v10594_v43 = vld [vmem:[%s19610_s1 + $0x14f8] sm:$0xf0] }
 0x5f6   :  { %v12797_v54 = vld [vmem:[%s19610_s1 + $0x18bc] sm:$0xf]  ;;  %v10597_v51 = vor.u32 %v12669_v33, %v10594_v43  ;;  %7844 = vmatpush.bf16.msrb.mxu0 %v10085_v27  ;;  %v7704_v18 = vpop.f32.mrf.mxu1 }
 0x5f7   :  { %v11106_v39 = vld [vmem:[%s19610_s1 + $0x18f8] sm:$0xf0] }
 0x5f8   :  { %v12925_v46 = vld [vmem:[%s19610_s1 + $0x1cbc] sm:$0xf]  ;;  %v11109_v61 = vor.u32 %v12797_v54, %v11106_v39  ;;  %7857 = vmatpush.bf16.msrb.mxu1 %v10597_v51 }
 0x5f9   :  { %v11618_v50 = vld [vmem:[%s19610_s1 + $0x1cf8] sm:$0xf0] }
 0x5fa   :  { %v12525_v4 = vld [vmem:[%s19610_s1 + $0x103c] sm:$0xf]  ;;  %v11621_v6 = vor.u32 %v12925_v46, %v11618_v50  ;;  %7870 = vmatpush.bf16.msrb.mxu2 %v11109_v61  ;;  %v1061_v61 = vperm.slane %v19162_v45, 7 }
 0x5fb   :  { %v10018_v13 = vld [vmem:[%s19610_s1 + $0x1078] sm:$0xf0] }
 0x5fc   :  { %v12653_v57 = vld [vmem:[%s19610_s1 + $0x143c] sm:$0xf]  ;;  %v10021_v0 = vor.u32 %v12525_v4, %v10018_v13  ;;  %7883 = vmatpush.bf16.msrb.mxu3 %v11621_v6 }
 0x5fd   :  { %v10530_v59 = vld [vmem:[%s19610_s1 + $0x1478] sm:$0xf0] }
 0x5fe   :  { %v12781_v20 = vld [vmem:[%s19610_s1 + $0x183c] sm:$0xf]  ;;  %v10533_v26 = vor.u32 %v12653_v57, %v10530_v59  ;;  %7845 = vmatpush.bf16.msrb.mxu0 %v10021_v0  ;;  %v7706_v30 = vpop.f32.mrf.mxu1 }
 0x5ff   :  { %v11042_v53 = vld [vmem:[%s19610_s1 + $0x1878] sm:$0xf0] }
 0x600   :  { %v12909_v5 = vld [vmem:[%s19610_s1 + $0x1c3c] sm:$0xf]  ;;  %v11045_v2 = vor.u32 %v12781_v20, %v11042_v53  ;;  %7858 = vmatpush.bf16.msrb.mxu1 %v10533_v26 }
 0x601   :  { %v11554_v22 = vld [vmem:[%s19610_s1 + $0x1c78] sm:$0xf0]  ;;  %7846 = vmatmul.bf16.vlgmr.msrb.gmra.mxu0 %v13513_v41  ;;  %v7667_v41 = vpop.f32.mrf.mxu2 }
 0x602   :  { %v11557_v1 = vor.u32 %v12909_v5, %v11554_v22  ;;  %7871 = vmatpush.bf16.msrb.mxu2 %v11045_v2 }
 0x603   :  { %7859 = vmatmul.bf16.vlgmr.msrb.gmra.mxu1 %v13517_v44  ;;  %v7680_v44 = vpop.f32.mrf.mxu3 }
 0x604   :  { %7884 = vmatpush.bf16.msrb.mxu3 %v11557_v1 }
 0x605   :  { %7872 = vmatmul.bf16.vlgmr.msrb.gmra.mxu2 %v13505_v38  ;;  %v7691_v38 = vpop.f32.mrf.mxu0 }
 0x606   :  { %v7692_v49 = vadd.f32 %v7691_v38, %v1060_v15 }
 0x607   :  { %7885 = vmatmul.bf16.vlgmr.msrb.gmra.mxu3 %v13515_v42 }
 0x608   :  { %v7705_v35 = vadd.f32 %v7704_v18, %v7692_v49 }
 0x609   :  { %v7717_v42 = vpop.f32.mrf.mxu2 }
 0x60a   :  { %v7718_v16 = vadd.f32 %v7717_v42, %v7705_v35 }
 0x60b   :  { %v7730_v8 = vpop.f32.mrf.mxu3 }
 0x60c   :  { %v7731_v36 = vadd.f32 %v7730_v8, %v7718_v16 }
 0x60d   :  { %v7693_v19 = vpop.f32.mrf.mxu0 }
 0x611   :  { %v7719_v3 = vpop.f32.mrf.mxu2 }
 0x613   :  { %v7732_v48 = vpop.f32.mrf.mxu3 }
 0x620   :  { %v7743_v24 = vpop.f32.mrf.mxu0 }
 0x621   :  { %v7744_v12 = vadd.f32 %v7743_v24, %v7731_v36 }
 0x622   :  { %v7756_v55 = vpop.f32.mrf.mxu1 }
 0x623   :  { %v7757_v25 = vadd.f32 %v7756_v55, %v7744_v12 }
 0x628   :  { %v7745_v40 = vpop.f32.mrf.mxu0 }
 0x62a   :  { %v7769_v11 = vpop.f32.mrf.mxu2  ;;  %v7758_v32 = vpop.f32.mrf.mxu1 }
 0x62b   :  { %v7770_v47 = vadd.f32 %v7769_v11, %v7757_v25 }
 0x62c   :  { %v7782_v31 = vpop.f32.mrf.mxu3 }
 0x62d   :  { %v7783_v33 = vadd.f32 %v7782_v31, %v7770_v47 }
 0x62f   :  { %7904 = vst [vmem:[%s19613_s3 + $0x70] sm:$0xff] %v7783_v33 }
 0x632   :  { %v7771_v43 = vpop.f32.mrf.mxu2 }
 0x634   :  { %v7784_v54 = vpop.f32.mrf.mxu3 }
 0x640   :  { %v7795_v39 = vpop.f32.mrf.mxu0 }
 0x641   :  { %v7796_v57 = vadd.f32 %v7795_v39, %v1061_v61 }
 0x642   :  { %v7808_v46 = vpop.f32.mrf.mxu1 }
 0x643   :  { %v7809_v17 = vadd.f32 %v7808_v46, %v7796_v57 }
 0x648   :  { %v7797_v27 = vpop.f32.mrf.mxu0 }
 0x64a   :  { %v7821_v50 = vpop.f32.mrf.mxu2  ;;  %v7810_v51 = vpop.f32.mrf.mxu1 }
 0x64b   :  { %v7822_v6 = vadd.f32 %v7821_v50, %v7809_v17 }
 0x64c   :  { %v7834_v58 = vpop.f32.mrf.mxu3 }
 0x64d   :  { %v7835_v59 = vadd.f32 %v7834_v58, %v7822_v6 }
 0x652   :  { %v7823_v4 = vpop.f32.mrf.mxu2 }
 0x654   :  { %v7836_v13 = vpop.f32.mrf.mxu3 }
 0x67e   :  { %v7847_v20 = vpop.f32.mrf.mxu0 }
 0x67f   :  { %v7848_v21 = vadd.f32 %v7847_v20, %v7835_v59 }
 0x680   :  { %v7860_v53 = vpop.f32.mrf.mxu1 }
 0x681   :  { %v7861_v5 = vadd.f32 %v7860_v53, %v7848_v21 }
 0x686   :  { %v7849_v26 = vpop.f32.mrf.mxu0 }
 0x688   :  { %v7873_v22 = vpop.f32.mrf.mxu2  ;;  %v7862_v2 = vpop.f32.mrf.mxu1 }
 0x689   :  { %v7874_v23 = vadd.f32 %v7873_v22, %v7861_v5 }
 0x68a   :  { %v7886_v0 = vpop.f32.mrf.mxu3 }
 0x68b   :  { %v7887_v1 = vadd.f32 %v7886_v0, %v7874_v23 }
 0x68d   :  { %7905 = vst [vmem:[%s19613_s3 + $0x78] sm:$0xff] %v7887_v1 }
 0x690   :  { %v7875_v45 = vpop.f32.mrf.mxu2 }
 0x692   :  { %v7888_v28 = vpop.f32.mrf.mxu3 }

</bundles_post_ra>
